<compile_context>
chip_gen: v5e
topology: v5e:2x2
jax: 0.10.0
libtpu: 0.0.40
codegen_flags: <defaults>
</compile_context>

<pallas_src>
import functools

import numpy as np

import jax
import jax.numpy as jnp
from jax import lax
from jax.experimental import pallas as pl
from jax.experimental.pallas import tpu as pltpu


def _round_up(x, m):
    return ((x + m - 1) // m) * m


# ----------------------------- kernel ----------------------------------------


def _lstm_cell_step(xh_scr, w_ref, b_ref, h_scr, c_scr, emb_pad, hid_pad):
    """One LSTM step driven off the persistent [x, h] scratch.
    xh: (B, E+H) bf16, w: (E+H, 4H) bf16 stacked [Wih; Whh], b: (1, 4H) f32.
    Gate order i, f, g, o (PyTorch); each gate slice is 128-lane aligned.
    Updates h_scr / c_scr (f32) and the h half of xh_scr (bf16)."""
    gates = jnp.dot(xh_scr[...], w_ref[...],
                    preferred_element_type=jnp.float32) + b_ref[...]
    c = c_scr[...]
    i = jax.nn.sigmoid(gates[:, 0 * hid_pad:1 * hid_pad])
    f = jax.nn.sigmoid(gates[:, 1 * hid_pad:2 * hid_pad])
    g = jnp.tanh(gates[:, 2 * hid_pad:3 * hid_pad])
    o = jax.nn.sigmoid(gates[:, 3 * hid_pad:4 * hid_pad])
    c_new = f * c + i * g
    h_new = o * jnp.tanh(c_new)
    h_scr[...] = h_new
    c_scr[...] = c_new
    xh_scr[:, emb_pad:] = h_new.astype(jnp.bfloat16)
    return h_new


def seq2seq_kernel(eng_vocab, src_len, steps,
                   tf_ref,                                   # scalar prefetch (SMEM)
                   src_emb_ref, tgt_emb_ref,                 # (L,B,E) bf16 slabs
                   enc_w_ref, enc_b_ref, dec_w_ref, dec_b_ref,
                   embtab_ref, fcw_ref, fcb_ref,             # resident tables
                   logits_ref,                               # (steps,B,V) f32 out
                   h_scr, c_scr, xh_scr):                    # VMEM carries
    emb_pad = src_emb_ref.shape[-1]
    hid_pad = h_scr.shape[-1]
    vocab_pad = fcw_ref.shape[-1]

    h_scr[...] = jnp.zeros_like(h_scr)
    c_scr[...] = jnp.zeros_like(c_scr)
    xh_scr[...] = jnp.zeros_like(xh_scr)

    # ---------------- encoder: fully unrolled time recurrence ----------------
    for t in range(src_len):
        xh_scr[:, :emb_pad] = src_emb_ref[t]
        _lstm_cell_step(xh_scr, enc_w_ref, enc_b_ref, h_scr, c_scr,
                        emb_pad, hid_pad)

    # ---------------- decoder: fully unrolled, greedy feedback gated ----------
    for s in range(steps):
        # input select: target[s] on step 0 / teacher-forced steps, otherwise the
        # greedy embedding written into xh_scr at the end of the previous step.
        if s == 0:
            xh_scr[:, :emb_pad] = tgt_emb_ref[0]
        else:
            @pl.when(tf_ref[s] != 0)
            def _(s=s):
                xh_scr[:, :emb_pad] = tgt_emb_ref[s]

        h_new = _lstm_cell_step(xh_scr, dec_w_ref, dec_b_ref, h_scr, c_scr,
                                emb_pad, hid_pad)

        # vocab projection (lane-dense padded vocab)
        logits = (jnp.dot(h_new.astype(jnp.bfloat16), fcw_ref[...],
                          preferred_element_type=jnp.float32) + fcb_ref[...])
        logits_ref[s] = logits

        # greedy argmax + embedding gather only when the NEXT step actually
        # consumes it (not teacher-forced, and not past the last step).
        if s + 1 < steps:
            @pl.when(tf_ref[s + 1] == 0)
            def _(logits=logits):
                col = lax.broadcasted_iota(jnp.int32, logits.shape, 1)
                masked = jnp.where(col < eng_vocab, logits, -1e30)
                row_max = jnp.max(masked, axis=-1, keepdims=True)
                best = jnp.min(jnp.where(masked >= row_max, col, vocab_pad),
                               axis=-1, keepdims=True)          # (B, 1) int32
                onehot = (col == best).astype(jnp.bfloat16)     # (B, vocab_pad)
                greedy = jnp.dot(onehot, embtab_ref[...],       # exact row select
                                 preferred_element_type=jnp.float32)
                xh_scr[:, :emb_pad] = greedy.astype(jnp.bfloat16)


# ----------------------------- pallas_call wrapper -----------------------------


def run_seq2seq(tf_flags, src_emb, tgt_emb, enc_w, enc_b, dec_w, dec_b,
                dec_emb_tab, fc_w, fc_b, eng_vocab):
    src_len, batch_pad, emb_pad = src_emb.shape
    tgt_len = tgt_emb.shape[0]
    steps = tgt_len - 1
    hid_pad = enc_w.shape[1] // 4
    vocab_pad = fc_w.shape[-1]

    kernel = functools.partial(seq2seq_kernel, eng_vocab, src_len, steps)

    # grid=(1,): single invocation, everything resident in VMEM, teacher-force
    # flags scalar-prefetched into SMEM.  All index maps are constant.
    grid_spec = pltpu.PrefetchScalarGridSpec(
        num_scalar_prefetch=1,
        grid=(1,),
        in_specs=[
            pl.BlockSpec(src_emb.shape, lambda i, tf: (0, 0, 0)),
            pl.BlockSpec(tgt_emb.shape, lambda i, tf: (0, 0, 0)),
            pl.BlockSpec(enc_w.shape, lambda i, tf: (0, 0)),
            pl.BlockSpec(enc_b.shape, lambda i, tf: (0, 0)),
            pl.BlockSpec(dec_w.shape, lambda i, tf: (0, 0)),
            pl.BlockSpec(dec_b.shape, lambda i, tf: (0, 0)),
            pl.BlockSpec(dec_emb_tab.shape, lambda i, tf: (0, 0)),
            pl.BlockSpec(fc_w.shape, lambda i, tf: (0, 0)),
            pl.BlockSpec(fc_b.shape, lambda i, tf: (0, 0)),
        ],
        out_specs=pl.BlockSpec((steps, batch_pad, vocab_pad),
                               lambda i, tf: (0, 0, 0)),
        scratch_shapes=[
            pltpu.VMEM((batch_pad, hid_pad), jnp.float32),              # h carry
            pltpu.VMEM((batch_pad, hid_pad), jnp.float32),              # c carry
            pltpu.VMEM((batch_pad, emb_pad + hid_pad), jnp.bfloat16),   # [x, h]
        ],
    )
    # TODO(synk): if hid/vocab grow (e.g. v7x 64 MiB VMEM with fc_w ~64 MiB),
    # add a vocab grid axis tiling fc_w/fc_b/logits; at these shapes everything
    # fits with huge margin so the fully-resident layout is optimal.
    return pl.pallas_call(
        kernel,
        grid_spec=grid_spec,
        out_shape=jax.ShapeDtypeStruct((steps, batch_pad, vocab_pad), jnp.float32),
        compiler_params=pltpu.CompilerParams(
            dimension_semantics=("arbitrary",)),   # time axis is a true recurrence
    )(tf_flags, src_emb, tgt_emb, enc_w, enc_b, dec_w, dec_b,
      dec_emb_tab, fc_w, fc_b)


# ----------------------------- params ----------------------------------------


def init_params(key, ger_vocab, eng_vocab, emb_dim, hid_dim):
    ks = jax.random.split(key, 10)
    u = lambda k, shape: jax.random.uniform(k, shape, jnp.float32, -0.1, 0.1)
    return dict(
        enc_emb=u(ks[0], (ger_vocab, emb_dim)),
        enc_wih=u(ks[1], (emb_dim, 4 * hid_dim)),
        enc_whh=u(ks[2], (hid_dim, 4 * hid_dim)),
        enc_b=u(ks[3], (1, 4 * hid_dim)),      # b_ih + b_hh folded together
        dec_emb=u(ks[4], (eng_vocab, emb_dim)),
        dec_wih=u(ks[5], (emb_dim, 4 * hid_dim)),
        dec_whh=u(ks[6], (hid_dim, 4 * hid_dim)),
        dec_b=u(ks[7], (1, 4 * hid_dim)),
        fc_w=u(ks[8], (hid_dim, eng_vocab)),
        fc_b=u(ks[9], (1, eng_vocab)),
    )


def pack_params(params, *, emb_dim, hid_dim, eng_vocab):
    """Pad/stack weights into the lane-aligned, bf16 layouts the kernel expects."""
    emb_pad = _round_up(emb_dim, 128)
    hid_pad = _round_up(hid_dim, 128)
    vocab_pad = _round_up(eng_vocab, 128)

    def to_np(x):
        return np.asarray(x, dtype=np.float32)

    def stack_lstm(wih, whh, b):
        wih4 = to_np(wih).reshape(emb_dim, 4, hid_dim)
        whh4 = to_np(whh).reshape(hid_dim, 4, hid_dim)
        w = np.zeros((emb_pad + hid_pad, 4, hid_pad), np.float32)
        w[:emb_dim, :, :hid_dim] = wih4                     # rows for x (padded emb)
        w[emb_pad:emb_pad + hid_dim, :, :hid_dim] = whh4    # rows for h (padded hid)
        bb = np.zeros((1, 4, hid_pad), np.float32)
        bb[0, :, :hid_dim] = to_np(b).reshape(4, hid_dim)
        return (jnp.asarray(w.reshape(emb_pad + hid_pad, 4 * hid_pad), jnp.bfloat16),
                jnp.asarray(bb.reshape(1, 4 * hid_pad), jnp.float32))

    enc_w, enc_b = stack_lstm(params["enc_wih"], params["enc_whh"], params["enc_b"])
    dec_w, dec_b = stack_lstm(params["dec_wih"], params["dec_whh"], params["dec_b"])

    def pad_2d(x, rows, cols):
        x = to_np(x)
        out = np.zeros((rows, cols), np.float32)
        out[:x.shape[0], :x.shape[1]] = x
        return out

    ger_vocab = params["enc_emb"].shape[0]
    enc_emb = jnp.asarray(pad_2d(params["enc_emb"], ger_vocab, emb_pad), jnp.bfloat16)
    # decoder embedding table is row-padded to vocab_pad so the in-kernel
    # one-hot gather is a lane-dense (B, vocab_pad) x (vocab_pad, emb_pad) matmul
    dec_emb = jnp.asarray(pad_2d(params["dec_emb"], vocab_pad, emb_pad), jnp.bfloat16)

    fc_w = jnp.asarray(pad_2d(params["fc_w"], hid_pad, vocab_pad), jnp.bfloat16)
    fc_b = jnp.asarray(pad_2d(params["fc_b"], 1, vocab_pad), jnp.float32)

    return dict(enc_w=enc_w, enc_b=enc_b, dec_w=dec_w, dec_b=dec_b,
                enc_emb=enc_emb, dec_emb=dec_emb, fc_w=fc_w, fc_b=fc_b)


# ----------------------------- model glue -------------------------------------


@functools.partial(jax.jit, static_argnames=("eng_vocab",))
def seq2seq_forward(packed, source, target, tf_flags, *, eng_vocab):
    """source: (src_len, batch) int32; target: (tgt_len, batch) int32;
    tf_flags: (tgt_len,) int32 teacher-force decisions (whole batch per step).
    Returns (tgt_len, batch, eng_vocab) f32 with row 0 zeroed, like the module."""
    src_len, batch = source.shape
    tgt_len = target.shape[0]
    batch_pad = max(8, _round_up(batch, 8))

    # pad the batch dimension (token 0 for padding rows; sliced off at the end)
    src_p = jnp.zeros((src_len, batch_pad), source.dtype).at[:, :batch].set(source)
    tgt_p = jnp.zeros((tgt_len, batch_pad), target.dtype).at[:, :batch].set(target)

    # embedding gathers stay in plain JAX, kept bf16 end-to-end
    src_emb = jnp.take(packed["enc_emb"], src_p, axis=0)
    tgt_emb = jnp.take(packed["dec_emb"], tgt_p, axis=0)

    # single fused encoder+decoder kernel
    logits = run_seq2seq(tf_flags.astype(jnp.int32), src_emb, tgt_emb,
                         packed["enc_w"], packed["enc_b"],
                         packed["dec_w"], packed["dec_b"],
                         packed["dec_emb"], packed["fc_w"], packed["fc_b"],
                         eng_vocab)

    outputs = jnp.concatenate(
        [jnp.zeros((1, batch, eng_vocab), jnp.float32),
         logits[:, :batch, :eng_vocab]], axis=0)
    return outputs


# TODO(synk): the module's `predict` method (variable-length greedy decode with
# early stop on token 2) is host-loop driven and is not implemented here.


# ----------------------------- main -------------------------------------------

if __name__ == "__main__":
    GER_VOCAB = 20
    ENG_VOCAB = 16
    EMB_DIM = 16
    HID_DIM = 32
    SRC_LEN = 6
    TGT_LEN = 8
    BATCH = 2
    TEACHER_FORCE_RATIO = 0.5

    root = jax.random.PRNGKey(0)
    k_params, k_src, k_tgt, k_tf = jax.random.split(root, 4)

    params = init_params(k_params, GER_VOCAB, ENG_VOCAB, EMB_DIM, HID_DIM)
    packed = pack_params(params, emb_dim=EMB_DIM, hid_dim=HID_DIM,
                         eng_vocab=ENG_VOCAB)

    source = jax.random.randint(k_src, (SRC_LEN, BATCH), 0, GER_VOCAB,
                                dtype=jnp.int32)
    target = jax.random.randint(k_tgt, (TGT_LEN, BATCH), 0, ENG_VOCAB,
                                dtype=jnp.int32)

    # Deterministic stand-in for python's random.random() per decoder step;
    # flag at index t decides the input of step t (whole batch), as in the module.
    tf_flags = (jax.random.uniform(k_tf, (TGT_LEN,)) < TEACHER_FORCE_RATIO
                ).astype(jnp.int32)

    outputs = seq2seq_forward(packed, source, target, tf_flags,
                              eng_vocab=ENG_VOCAB)
    outputs = jax.block_until_ready(outputs)

    assert outputs.shape == (TGT_LEN, BATCH, ENG_VOCAB)
    assert bool(jnp.all(outputs[0] == 0.0))
    assert bool(jnp.all(jnp.isfinite(outputs)))
    print("KERNEL_OK")
</pallas_src>

<mosaic_0001>
module attributes {stable_mosaic.version = 11 : i64} {
  func.func @seq2seq_kernel(%arg0: i32, %arg1: memref<8xi32, #tpu.memory_space<smem>>, %arg2: memref<6x8x128xbf16, #tpu.memory_space<vmem>>, %arg3: memref<8x8x128xbf16, #tpu.memory_space<vmem>>, %arg4: memref<256x512xbf16, #tpu.memory_space<vmem>>, %arg5: memref<1x512xf32, #tpu.memory_space<vmem>>, %arg6: memref<256x512xbf16, #tpu.memory_space<vmem>>, %arg7: memref<1x512xf32, #tpu.memory_space<vmem>>, %arg8: memref<128x128xbf16, #tpu.memory_space<vmem>>, %arg9: memref<128x128xbf16, #tpu.memory_space<vmem>>, %arg10: memref<1x128xf32, #tpu.memory_space<vmem>>, %arg11: memref<7x8x128xf32, #tpu.memory_space<vmem>>, %arg12: memref<8x128xf32, #tpu.memory_space<vmem>>, %arg13: memref<8x128xf32, #tpu.memory_space<vmem>>, %arg14: memref<8x256xbf16, #tpu.memory_space<vmem>>) attributes {dimension_semantics = [#tpu.dimension_semantics<arbitrary>], iteration_bounds = array<i64: 1>, scalar_prefetch = 1 : i64, scratch_operands = 3 : i64, tpu.core_type = #tpu.core_type<tc>, window_params = [{pipeline_mode = #tpu.pipeline_mode<synchronous>, transform_indices = @transform_0, window_bounds = array<i64: 6, 8, 128>}, {pipeline_mode = #tpu.pipeline_mode<synchronous>, transform_indices = @transform_1, window_bounds = array<i64: 8, 8, 128>}, {pipeline_mode = #tpu.pipeline_mode<synchronous>, transform_indices = @transform_2, window_bounds = array<i64: 256, 512>}, {pipeline_mode = #tpu.pipeline_mode<synchronous>, transform_indices = @transform_3, window_bounds = array<i64: 1, 512>}, {pipeline_mode = #tpu.pipeline_mode<synchronous>, transform_indices = @transform_4, window_bounds = array<i64: 256, 512>}, {pipeline_mode = #tpu.pipeline_mode<synchronous>, transform_indices = @transform_5, window_bounds = array<i64: 1, 512>}, {pipeline_mode = #tpu.pipeline_mode<synchronous>, transform_indices = @transform_6, window_bounds = array<i64: 128, 128>}, {pipeline_mode = #tpu.pipeline_mode<synchronous>, transform_indices = @transform_7, window_bounds = array<i64: 128, 128>}, {pipeline_mode = #tpu.pipeline_mode<synchronous>, transform_indices = @transform_8, window_bounds = array<i64: 1, 128>}, {pipeline_mode = #tpu.pipeline_mode<synchronous>, transform_indices = @transform_9, window_bounds = array<i64: 7, 8, 128>}]} {
    %cst = arith.constant 0.000000e+00 : f32
    %0 = vector.broadcast %cst : f32 to vector<8x128xf32>
    %c0 = arith.constant 0 : index
    %c0_0 = arith.constant 0 : index
    %1 = vector.load %arg12[%c0, %c0_0] : memref<8x128xf32, #tpu.memory_space<vmem>>, vector<8x128xf32>
    tpu.vector_store %arg12[%c0, %c0_0], %0 {strides = array<i32>} : memref<8x128xf32, #tpu.memory_space<vmem>>, vector<8x128xf32>,
    %cst_1 = arith.constant 0.000000e+00 : f32
    %2 = vector.broadcast %cst_1 : f32 to vector<8x128xf32>
    %c0_2 = arith.constant 0 : index
    %c0_3 = arith.constant 0 : index
    %3 = vector.load %arg13[%c0_2, %c0_3] : memref<8x128xf32, #tpu.memory_space<vmem>>, vector<8x128xf32>
    tpu.vector_store %arg13[%c0_2, %c0_3], %2 {strides = array<i32>} : memref<8x128xf32, #tpu.memory_space<vmem>>, vector<8x128xf32>,
    %cst_4 = arith.constant 0.000000e+00 : bf16
    %4 = vector.broadcast %cst_4 : bf16 to vector<8x256xbf16>
    %c0_5 = arith.constant 0 : index
    %c0_6 = arith.constant 0 : index
    %5 = vector.load %arg14[%c0_5, %c0_6] : memref<8x256xbf16, #tpu.memory_space<vmem>>, vector<8x256xbf16>
    tpu.vector_store %arg14[%c0_5, %c0_6], %4 {strides = array<i32>} : memref<8x256xbf16, #tpu.memory_space<vmem>>, vector<8x256xbf16>,
    %c0_7 = arith.constant 0 : index
    %c0_8 = arith.constant 0 : index
    %c0_9 = arith.constant 0 : index
    %6 = vector.load %arg2[%c0_7, %c0_8, %c0_9] : memref<6x8x128xbf16, #tpu.memory_space<vmem>>, vector<1x8x128xbf16>
    %7 = vector.shape_cast %6 : vector<1x8x128xbf16> to vector<8x128xbf16>
    %c0_10 = arith.constant 0 : index
    %c0_11 = arith.constant 0 : index
    %8 = vector.load %arg14[%c0_10, %c0_11] : memref<8x256xbf16, #tpu.memory_space<vmem>>, vector<8x128xbf16>
    tpu.vector_store %arg14[%c0_10, %c0_11], %7 {strides = array<i32>} : memref<8x256xbf16, #tpu.memory_space<vmem>>, vector<8x128xbf16>,
    %c0_12 = arith.constant 0 : index
    %c0_13 = arith.constant 0 : index
    %9 = vector.load %arg14[%c0_12, %c0_13] : memref<8x256xbf16, #tpu.memory_space<vmem>>, vector<8x256xbf16>
    %c0_14 = arith.constant 0 : index
    %c0_15 = arith.constant 0 : index
    %10 = vector.load %arg4[%c0_14, %c0_15] : memref<256x512xbf16, #tpu.memory_space<vmem>>, vector<256x512xbf16>
    %cst_16 = arith.constant dense<0.000000e+00> : vector<8x512xf32>
    %11 = tpu.matmul %9, %10, %cst_16 {dimension_numbers = #tpu.dot_dimension_numbers<[1], [0], [0], [1], [0, 0, 1, 1], [], []>} : vector<8x256xbf16>, vector<256x512xbf16>, vector<8x512xf32> -> vector<8x512xf32>
    %c0_17 = arith.constant 0 : index
    %c0_18 = arith.constant 0 : index
    %12 = vector.load %arg5[%c0_17, %c0_18] : memref<1x512xf32, #tpu.memory_space<vmem>>, vector<1x512xf32>
    %13 = vector.broadcast %12 : vector<1x512xf32> to vector<8x512xf32>
    %14 = arith.addf %11, %13 : vector<8x512xf32>
    %c0_19 = arith.constant 0 : index
    %c0_20 = arith.constant 0 : index
    %15 = vector.load %arg13[%c0_19, %c0_20] : memref<8x128xf32, #tpu.memory_space<vmem>>, vector<8x128xf32>
    %16 = vector.extract_strided_slice %14 {offsets = [0, 0], sizes = [8, 128], strides = [1, 1]} : vector<8x512xf32> to vector<8x128xf32>
    %17 = arith.negf %16 : vector<8x128xf32>
    %18 = math.exp %17 : vector<8x128xf32>
    %cst_21 = arith.constant 1.000000e+00 : f32
    %19 = vector.broadcast %cst_21 : f32 to vector<8x128xf32>
    %20 = arith.addf %19, %18 : vector<8x128xf32>
    %21 = arith.divf %19, %20 : vector<8x128xf32>
    %22 = vector.extract_strided_slice %14 {offsets = [0, 128], sizes = [8, 128], strides = [1, 1]} : vector<8x512xf32> to vector<8x128xf32>
    %23 = arith.negf %22 : vector<8x128xf32>
    %24 = math.exp %23 : vector<8x128xf32>
    %cst_22 = arith.constant 1.000000e+00 : f32
    %25 = vector.broadcast %cst_22 : f32 to vector<8x128xf32>
    %26 = arith.addf %25, %24 : vector<8x128xf32>
    %27 = arith.divf %25, %26 : vector<8x128xf32>
    %28 = vector.extract_strided_slice %14 {offsets = [0, 256], sizes = [8, 128], strides = [1, 1]} : vector<8x512xf32> to vector<8x128xf32>
    %29 = math.tanh %28 : vector<8x128xf32>
    %30 = vector.extract_strided_slice %14 {offsets = [0, 384], sizes = [8, 128], strides = [1, 1]} : vector<8x512xf32> to vector<8x128xf32>
    %31 = arith.negf %30 : vector<8x128xf32>
    %32 = math.exp %31 : vector<8x128xf32>
    %cst_23 = arith.constant 1.000000e+00 : f32
    %33 = vector.broadcast %cst_23 : f32 to vector<8x128xf32>
    %34 = arith.addf %33, %32 : vector<8x128xf32>
    %35 = arith.divf %33, %34 : vector<8x128xf32>
    %36 = arith.mulf %27, %15 : vector<8x128xf32>
    %37 = arith.mulf %21, %29 : vector<8x128xf32>
    %38 = arith.addf %36, %37 : vector<8x128xf32>
    %39 = math.tanh %38 : vector<8x128xf32>
    %40 = arith.mulf %35, %39 : vector<8x128xf32>
    %c0_24 = arith.constant 0 : index
    %c0_25 = arith.constant 0 : index
    %41 = vector.load %arg12[%c0_24, %c0_25] : memref<8x128xf32, #tpu.memory_space<vmem>>, vector<8x128xf32>
    tpu.vector_store %arg12[%c0_24, %c0_25], %40 {strides = array<i32>} : memref<8x128xf32, #tpu.memory_space<vmem>>, vector<8x128xf32>,
    %c0_26 = arith.constant 0 : index
    %c0_27 = arith.constant 0 : index
    %42 = vector.load %arg13[%c0_26, %c0_27] : memref<8x128xf32, #tpu.memory_space<vmem>>, vector<8x128xf32>
    tpu.vector_store %arg13[%c0_26, %c0_27], %38 {strides = array<i32>} : memref<8x128xf32, #tpu.memory_space<vmem>>, vector<8x128xf32>,
    %43 = arith.truncf %40 : vector<8x128xf32> to vector<8x128xbf16>
    %c0_28 = arith.constant 0 : index
    %c128 = arith.constant 128 : index
    %44 = vector.load %arg14[%c0_28, %c128] : memref<8x256xbf16, #tpu.memory_space<vmem>>, vector<8x128xbf16>
    tpu.vector_store %arg14[%c0_28, %c128], %43 {strides = array<i32>} : memref<8x256xbf16, #tpu.memory_space<vmem>>, vector<8x128xbf16>,
    %c1 = arith.constant 1 : index
    %c0_29 = arith.constant 0 : index
    %c0_30 = arith.constant 0 : index
    %45 = vector.load %arg2[%c1, %c0_29, %c0_30] : memref<6x8x128xbf16, #tpu.memory_space<vmem>>, vector<1x8x128xbf16>
    %46 = vector.shape_cast %45 : vector<1x8x128xbf16> to vector<8x128xbf16>
    %c0_31 = arith.constant 0 : index
    %c0_32 = arith.constant 0 : index
    %47 = vector.load %arg14[%c0_31, %c0_32] : memref<8x256xbf16, #tpu.memory_space<vmem>>, vector<8x128xbf16>
    tpu.vector_store %arg14[%c0_31, %c0_32], %46 {strides = array<i32>} : memref<8x256xbf16, #tpu.memory_space<vmem>>, vector<8x128xbf16>,
    %c0_33 = arith.constant 0 : index
    %c0_34 = arith.constant 0 : index
    %48 = vector.load %arg14[%c0_33, %c0_34] : memref<8x256xbf16, #tpu.memory_space<vmem>>, vector<8x256xbf16>
    %c0_35 = arith.constant 0 : index
    %c0_36 = arith.constant 0 : index
    %49 = vector.load %arg4[%c0_35, %c0_36] : memref<256x512xbf16, #tpu.memory_space<vmem>>, vector<256x512xbf16>
    %cst_37 = arith.constant dense<0.000000e+00> : vector<8x512xf32>
    %50 = tpu.matmul %48, %49, %cst_37 {dimension_numbers = #tpu.dot_dimension_numbers<[1], [0], [0], [1], [0, 0, 1, 1], [], []>} : vector<8x256xbf16>, vector<256x512xbf16>, vector<8x512xf32> -> vector<8x512xf32>
    %c0_38 = arith.constant 0 : index
    %c0_39 = arith.constant 0 : index
    %51 = vector.load %arg5[%c0_38, %c0_39] : memref<1x512xf32, #tpu.memory_space<vmem>>, vector<1x512xf32>
    %52 = vector.broadcast %51 : vector<1x512xf32> to vector<8x512xf32>
    %53 = arith.addf %50, %52 : vector<8x512xf32>
    %c0_40 = arith.constant 0 : index
    %c0_41 = arith.constant 0 : index
    %54 = vector.load %arg13[%c0_40, %c0_41] : memref<8x128xf32, #tpu.memory_space<vmem>>, vector<8x128xf32>
    %55 = vector.extract_strided_slice %53 {offsets = [0, 0], sizes = [8, 128], strides = [1, 1]} : vector<8x512xf32> to vector<8x128xf32>
    %56 = arith.negf %55 : vector<8x128xf32>
    %57 = math.exp %56 : vector<8x128xf32>
    %cst_42 = arith.constant 1.000000e+00 : f32
    %58 = vector.broadcast %cst_42 : f32 to vector<8x128xf32>
    %59 = arith.addf %58, %57 : vector<8x128xf32>
    %60 = arith.divf %58, %59 : vector<8x128xf32>
    %61 = vector.extract_strided_slice %53 {offsets = [0, 128], sizes = [8, 128], strides = [1, 1]} : vector<8x512xf32> to vector<8x128xf32>
    %62 = arith.negf %61 : vector<8x128xf32>
    %63 = math.exp %62 : vector<8x128xf32>
    %cst_43 = arith.constant 1.000000e+00 : f32
    %64 = vector.broadcast %cst_43 : f32 to vector<8x128xf32>
    %65 = arith.addf %64, %63 : vector<8x128xf32>
    %66 = arith.divf %64, %65 : vector<8x128xf32>
    %67 = vector.extract_strided_slice %53 {offsets = [0, 256], sizes = [8, 128], strides = [1, 1]} : vector<8x512xf32> to vector<8x128xf32>
    %68 = math.tanh %67 : vector<8x128xf32>
    %69 = vector.extract_strided_slice %53 {offsets = [0, 384], sizes = [8, 128], strides = [1, 1]} : vector<8x512xf32> to vector<8x128xf32>
    %70 = arith.negf %69 : vector<8x128xf32>
    %71 = math.exp %70 : vector<8x128xf32>
    %cst_44 = arith.constant 1.000000e+00 : f32
    %72 = vector.broadcast %cst_44 : f32 to vector<8x128xf32>
    %73 = arith.addf %72, %71 : vector<8x128xf32>
    %74 = arith.divf %72, %73 : vector<8x128xf32>
    %75 = arith.mulf %66, %54 : vector<8x128xf32>
    %76 = arith.mulf %60, %68 : vector<8x128xf32>
    %77 = arith.addf %75, %76 : vector<8x128xf32>
    %78 = math.tanh %77 : vector<8x128xf32>
    %79 = arith.mulf %74, %78 : vector<8x128xf32>
    %c0_45 = arith.constant 0 : index
    %c0_46 = arith.constant 0 : index
    %80 = vector.load %arg12[%c0_45, %c0_46] : memref<8x128xf32, #tpu.memory_space<vmem>>, vector<8x128xf32>
    tpu.vector_store %arg12[%c0_45, %c0_46], %79 {strides = array<i32>} : memref<8x128xf32, #tpu.memory_space<vmem>>, vector<8x128xf32>,
    %c0_47 = arith.constant 0 : index
    %c0_48 = arith.constant 0 : index
    %81 = vector.load %arg13[%c0_47, %c0_48] : memref<8x128xf32, #tpu.memory_space<vmem>>, vector<8x128xf32>
    tpu.vector_store %arg13[%c0_47, %c0_48], %77 {strides = array<i32>} : memref<8x128xf32, #tpu.memory_space<vmem>>, vector<8x128xf32>,
    %82 = arith.truncf %79 : vector<8x128xf32> to vector<8x128xbf16>
    %c0_49 = arith.constant 0 : index
    %c128_50 = arith.constant 128 : index
    %83 = vector.load %arg14[%c0_49, %c128_50] : memref<8x256xbf16, #tpu.memory_space<vmem>>, vector<8x128xbf16>
    tpu.vector_store %arg14[%c0_49, %c128_50], %82 {strides = array<i32>} : memref<8x256xbf16, #tpu.memory_space<vmem>>, vector<8x128xbf16>,
    %c2 = arith.constant 2 : index
    %c0_51 = arith.constant 0 : index
    %c0_52 = arith.constant 0 : index
    %84 = vector.load %arg2[%c2, %c0_51, %c0_52] : memref<6x8x128xbf16, #tpu.memory_space<vmem>>, vector<1x8x128xbf16>
    %85 = vector.shape_cast %84 : vector<1x8x128xbf16> to vector<8x128xbf16>
    %c0_53 = arith.constant 0 : index
    %c0_54 = arith.constant 0 : index
    %86 = vector.load %arg14[%c0_53, %c0_54] : memref<8x256xbf16, #tpu.memory_space<vmem>>, vector<8x128xbf16>
    tpu.vector_store %arg14[%c0_53, %c0_54], %85 {strides = array<i32>} : memref<8x256xbf16, #tpu.memory_space<vmem>>, vector<8x128xbf16>,
    %c0_55 = arith.constant 0 : index
    %c0_56 = arith.constant 0 : index
    %87 = vector.load %arg14[%c0_55, %c0_56] : memref<8x256xbf16, #tpu.memory_space<vmem>>, vector<8x256xbf16>
    %c0_57 = arith.constant 0 : index
    %c0_58 = arith.constant 0 : index
    %88 = vector.load %arg4[%c0_57, %c0_58] : memref<256x512xbf16, #tpu.memory_space<vmem>>, vector<256x512xbf16>
    %cst_59 = arith.constant dense<0.000000e+00> : vector<8x512xf32>
    %89 = tpu.matmul %87, %88, %cst_59 {dimension_numbers = #tpu.dot_dimension_numbers<[1], [0], [0], [1], [0, 0, 1, 1], [], []>} : vector<8x256xbf16>, vector<256x512xbf16>, vector<8x512xf32> -> vector<8x512xf32>
    %c0_60 = arith.constant 0 : index
    %c0_61 = arith.constant 0 : index
    %90 = vector.load %arg5[%c0_60, %c0_61] : memref<1x512xf32, #tpu.memory_space<vmem>>, vector<1x512xf32>
    %91 = vector.broadcast %90 : vector<1x512xf32> to vector<8x512xf32>
    %92 = arith.addf %89, %91 : vector<8x512xf32>
    %c0_62 = arith.constant 0 : index
    %c0_63 = arith.constant 0 : index
    %93 = vector.load %arg13[%c0_62, %c0_63] : memref<8x128xf32, #tpu.memory_space<vmem>>, vector<8x128xf32>
    %94 = vector.extract_strided_slice %92 {offsets = [0, 0], sizes = [8, 128], strides = [1, 1]} : vector<8x512xf32> to vector<8x128xf32>
    %95 = arith.negf %94 : vector<8x128xf32>
    %96 = math.exp %95 : vector<8x128xf32>
    %cst_64 = arith.constant 1.000000e+00 : f32
    %97 = vector.broadcast %cst_64 : f32 to vector<8x128xf32>
    %98 = arith.addf %97, %96 : vector<8x128xf32>
    %99 = arith.divf %97, %98 : vector<8x128xf32>
    %100 = vector.extract_strided_slice %92 {offsets = [0, 128], sizes = [8, 128], strides = [1, 1]} : vector<8x512xf32> to vector<8x128xf32>
    %101 = arith.negf %100 : vector<8x128xf32>
    %102 = math.exp %101 : vector<8x128xf32>
    %cst_65 = arith.constant 1.000000e+00 : f32
    %103 = vector.broadcast %cst_65 : f32 to vector<8x128xf32>
    %104 = arith.addf %103, %102 : vector<8x128xf32>
    %105 = arith.divf %103, %104 : vector<8x128xf32>
    %106 = vector.extract_strided_slice %92 {offsets = [0, 256], sizes = [8, 128], strides = [1, 1]} : vector<8x512xf32> to vector<8x128xf32>
    %107 = math.tanh %106 : vector<8x128xf32>
    %108 = vector.extract_strided_slice %92 {offsets = [0, 384], sizes = [8, 128], strides = [1, 1]} : vector<8x512xf32> to vector<8x128xf32>
    %109 = arith.negf %108 : vector<8x128xf32>
    %110 = math.exp %109 : vector<8x128xf32>
    %cst_66 = arith.constant 1.000000e+00 : f32
    %111 = vector.broadcast %cst_66 : f32 to vector<8x128xf32>
    %112 = arith.addf %111, %110 : vector<8x128xf32>
    %113 = arith.divf %111, %112 : vector<8x128xf32>
    %114 = arith.mulf %105, %93 : vector<8x128xf32>
    %115 = arith.mulf %99, %107 : vector<8x128xf32>
    %116 = arith.addf %114, %115 : vector<8x128xf32>
    %117 = math.tanh %116 : vector<8x128xf32>
    %118 = arith.mulf %113, %117 : vector<8x128xf32>
    %c0_67 = arith.constant 0 : index
    %c0_68 = arith.constant 0 : index
    %119 = vector.load %arg12[%c0_67, %c0_68] : memref<8x128xf32, #tpu.memory_space<vmem>>, vector<8x128xf32>
    tpu.vector_store %arg12[%c0_67, %c0_68], %118 {strides = array<i32>} : memref<8x128xf32, #tpu.memory_space<vmem>>, vector<8x128xf32>,
    %c0_69 = arith.constant 0 : index
    %c0_70 = arith.constant 0 : index
    %120 = vector.load %arg13[%c0_69, %c0_70] : memref<8x128xf32, #tpu.memory_space<vmem>>, vector<8x128xf32>
    tpu.vector_store %arg13[%c0_69, %c0_70], %116 {strides = array<i32>} : memref<8x128xf32, #tpu.memory_space<vmem>>, vector<8x128xf32>,
    %121 = arith.truncf %118 : vector<8x128xf32> to vector<8x128xbf16>
    %c0_71 = arith.constant 0 : index
    %c128_72 = arith.constant 128 : index
    %122 = vector.load %arg14[%c0_71, %c128_72] : memref<8x256xbf16, #tpu.memory_space<vmem>>, vector<8x128xbf16>
    tpu.vector_store %arg14[%c0_71, %c128_72], %121 {strides = array<i32>} : memref<8x256xbf16, #tpu.memory_space<vmem>>, vector<8x128xbf16>,
    %c3 = arith.constant 3 : index
    %c0_73 = arith.constant 0 : index
    %c0_74 = arith.constant 0 : index
    %123 = vector.load %arg2[%c3, %c0_73, %c0_74] : memref<6x8x128xbf16, #tpu.memory_space<vmem>>, vector<1x8x128xbf16>
    %124 = vector.shape_cast %123 : vector<1x8x128xbf16> to vector<8x128xbf16>
    %c0_75 = arith.constant 0 : index
    %c0_76 = arith.constant 0 : index
    %125 = vector.load %arg14[%c0_75, %c0_76] : memref<8x256xbf16, #tpu.memory_space<vmem>>, vector<8x128xbf16>
    tpu.vector_store %arg14[%c0_75, %c0_76], %124 {strides = array<i32>} : memref<8x256xbf16, #tpu.memory_space<vmem>>, vector<8x128xbf16>,
    %c0_77 = arith.constant 0 : index
    %c0_78 = arith.constant 0 : index
    %126 = vector.load %arg14[%c0_77, %c0_78] : memref<8x256xbf16, #tpu.memory_space<vmem>>, vector<8x256xbf16>
    %c0_79 = arith.constant 0 : index
    %c0_80 = arith.constant 0 : index
    %127 = vector.load %arg4[%c0_79, %c0_80] : memref<256x512xbf16, #tpu.memory_space<vmem>>, vector<256x512xbf16>
    %cst_81 = arith.constant dense<0.000000e+00> : vector<8x512xf32>
    %128 = tpu.matmul %126, %127, %cst_81 {dimension_numbers = #tpu.dot_dimension_numbers<[1], [0], [0], [1], [0, 0, 1, 1], [], []>} : vector<8x256xbf16>, vector<256x512xbf16>, vector<8x512xf32> -> vector<8x512xf32>
    %c0_82 = arith.constant 0 : index
    %c0_83 = arith.constant 0 : index
    %129 = vector.load %arg5[%c0_82, %c0_83] : memref<1x512xf32, #tpu.memory_space<vmem>>, vector<1x512xf32>
    %130 = vector.broadcast %129 : vector<1x512xf32> to vector<8x512xf32>
    %131 = arith.addf %128, %130 : vector<8x512xf32>
    %c0_84 = arith.constant 0 : index
    %c0_85 = arith.constant 0 : index
    %132 = vector.load %arg13[%c0_84, %c0_85] : memref<8x128xf32, #tpu.memory_space<vmem>>, vector<8x128xf32>
    %133 = vector.extract_strided_slice %131 {offsets = [0, 0], sizes = [8, 128], strides = [1, 1]} : vector<8x512xf32> to vector<8x128xf32>
    %134 = arith.negf %133 : vector<8x128xf32>
    %135 = math.exp %134 : vector<8x128xf32>
    %cst_86 = arith.constant 1.000000e+00 : f32
    %136 = vector.broadcast %cst_86 : f32 to vector<8x128xf32>
    %137 = arith.addf %136, %135 : vector<8x128xf32>
    %138 = arith.divf %136, %137 : vector<8x128xf32>
    %139 = vector.extract_strided_slice %131 {offsets = [0, 128], sizes = [8, 128], strides = [1, 1]} : vector<8x512xf32> to vector<8x128xf32>
    %140 = arith.negf %139 : vector<8x128xf32>
    %141 = math.exp %140 : vector<8x128xf32>
    %cst_87 = arith.constant 1.000000e+00 : f32
    %142 = vector.broadcast %cst_87 : f32 to vector<8x128xf32>
    %143 = arith.addf %142, %141 : vector<8x128xf32>
    %144 = arith.divf %142, %143 : vector<8x128xf32>
    %145 = vector.extract_strided_slice %131 {offsets = [0, 256], sizes = [8, 128], strides = [1, 1]} : vector<8x512xf32> to vector<8x128xf32>
    %146 = math.tanh %145 : vector<8x128xf32>
    %147 = vector.extract_strided_slice %131 {offsets = [0, 384], sizes = [8, 128], strides = [1, 1]} : vector<8x512xf32> to vector<8x128xf32>
    %148 = arith.negf %147 : vector<8x128xf32>
    %149 = math.exp %148 : vector<8x128xf32>
    %cst_88 = arith.constant 1.000000e+00 : f32
    %150 = vector.broadcast %cst_88 : f32 to vector<8x128xf32>
    %151 = arith.addf %150, %149 : vector<8x128xf32>
    %152 = arith.divf %150, %151 : vector<8x128xf32>
    %153 = arith.mulf %144, %132 : vector<8x128xf32>
    %154 = arith.mulf %138, %146 : vector<8x128xf32>
    %155 = arith.addf %153, %154 : vector<8x128xf32>
    %156 = math.tanh %155 : vector<8x128xf32>
    %157 = arith.mulf %152, %156 : vector<8x128xf32>
    %c0_89 = arith.constant 0 : index
    %c0_90 = arith.constant 0 : index
    %158 = vector.load %arg12[%c0_89, %c0_90] : memref<8x128xf32, #tpu.memory_space<vmem>>, vector<8x128xf32>
    tpu.vector_store %arg12[%c0_89, %c0_90], %157 {strides = array<i32>} : memref<8x128xf32, #tpu.memory_space<vmem>>, vector<8x128xf32>,
    %c0_91 = arith.constant 0 : index
    %c0_92 = arith.constant 0 : index
    %159 = vector.load %arg13[%c0_91, %c0_92] : memref<8x128xf32, #tpu.memory_space<vmem>>, vector<8x128xf32>
    tpu.vector_store %arg13[%c0_91, %c0_92], %155 {strides = array<i32>} : memref<8x128xf32, #tpu.memory_space<vmem>>, vector<8x128xf32>,
    %160 = arith.truncf %157 : vector<8x128xf32> to vector<8x128xbf16>
    %c0_93 = arith.constant 0 : index
    %c128_94 = arith.constant 128 : index
    %161 = vector.load %arg14[%c0_93, %c128_94] : memref<8x256xbf16, #tpu.memory_space<vmem>>, vector<8x128xbf16>
    tpu.vector_store %arg14[%c0_93, %c128_94], %160 {strides = array<i32>} : memref<8x256xbf16, #tpu.memory_space<vmem>>, vector<8x128xbf16>,
    %c4 = arith.constant 4 : index
    %c0_95 = arith.constant 0 : index
    %c0_96 = arith.constant 0 : index
    %162 = vector.load %arg2[%c4, %c0_95, %c0_96] : memref<6x8x128xbf16, #tpu.memory_space<vmem>>, vector<1x8x128xbf16>
    %163 = vector.shape_cast %162 : vector<1x8x128xbf16> to vector<8x128xbf16>
    %c0_97 = arith.constant 0 : index
    %c0_98 = arith.constant 0 : index
    %164 = vector.load %arg14[%c0_97, %c0_98] : memref<8x256xbf16, #tpu.memory_space<vmem>>, vector<8x128xbf16>
    tpu.vector_store %arg14[%c0_97, %c0_98], %163 {strides = array<i32>} : memref<8x256xbf16, #tpu.memory_space<vmem>>, vector<8x128xbf16>,
    %c0_99 = arith.constant 0 : index
    %c0_100 = arith.constant 0 : index
    %165 = vector.load %arg14[%c0_99, %c0_100] : memref<8x256xbf16, #tpu.memory_space<vmem>>, vector<8x256xbf16>
    %c0_101 = arith.constant 0 : index
    %c0_102 = arith.constant 0 : index
    %166 = vector.load %arg4[%c0_101, %c0_102] : memref<256x512xbf16, #tpu.memory_space<vmem>>, vector<256x512xbf16>
    %cst_103 = arith.constant dense<0.000000e+00> : vector<8x512xf32>
    %167 = tpu.matmul %165, %166, %cst_103 {dimension_numbers = #tpu.dot_dimension_numbers<[1], [0], [0], [1], [0, 0, 1, 1], [], []>} : vector<8x256xbf16>, vector<256x512xbf16>, vector<8x512xf32> -> vector<8x512xf32>
    %c0_104 = arith.constant 0 : index
    %c0_105 = arith.constant 0 : index
    %168 = vector.load %arg5[%c0_104, %c0_105] : memref<1x512xf32, #tpu.memory_space<vmem>>, vector<1x512xf32>
    %169 = vector.broadcast %168 : vector<1x512xf32> to vector<8x512xf32>
    %170 = arith.addf %167, %169 : vector<8x512xf32>
    %c0_106 = arith.constant 0 : index
    %c0_107 = arith.constant 0 : index
    %171 = vector.load %arg13[%c0_106, %c0_107] : memref<8x128xf32, #tpu.memory_space<vmem>>, vector<8x128xf32>
    %172 = vector.extract_strided_slice %170 {offsets = [0, 0], sizes = [8, 128], strides = [1, 1]} : vector<8x512xf32> to vector<8x128xf32>
    %173 = arith.negf %172 : vector<8x128xf32>
    %174 = math.exp %173 : vector<8x128xf32>
    %cst_108 = arith.constant 1.000000e+00 : f32
    %175 = vector.broadcast %cst_108 : f32 to vector<8x128xf32>
    %176 = arith.addf %175, %174 : vector<8x128xf32>
    %177 = arith.divf %175, %176 : vector<8x128xf32>
    %178 = vector.extract_strided_slice %170 {offsets = [0, 128], sizes = [8, 128], strides = [1, 1]} : vector<8x512xf32> to vector<8x128xf32>
    %179 = arith.negf %178 : vector<8x128xf32>
    %180 = math.exp %179 : vector<8x128xf32>
    %cst_109 = arith.constant 1.000000e+00 : f32
    %181 = vector.broadcast %cst_109 : f32 to vector<8x128xf32>
    %182 = arith.addf %181, %180 : vector<8x128xf32>
    %183 = arith.divf %181, %182 : vector<8x128xf32>
    %184 = vector.extract_strided_slice %170 {offsets = [0, 256], sizes = [8, 128], strides = [1, 1]} : vector<8x512xf32> to vector<8x128xf32>
    %185 = math.tanh %184 : vector<8x128xf32>
    %186 = vector.extract_strided_slice %170 {offsets = [0, 384], sizes = [8, 128], strides = [1, 1]} : vector<8x512xf32> to vector<8x128xf32>
    %187 = arith.negf %186 : vector<8x128xf32>
    %188 = math.exp %187 : vector<8x128xf32>
    %cst_110 = arith.constant 1.000000e+00 : f32
    %189 = vector.broadcast %cst_110 : f32 to vector<8x128xf32>
    %190 = arith.addf %189, %188 : vector<8x128xf32>
    %191 = arith.divf %189, %190 : vector<8x128xf32>
    %192 = arith.mulf %183, %171 : vector<8x128xf32>
    %193 = arith.mulf %177, %185 : vector<8x128xf32>
    %194 = arith.addf %192, %193 : vector<8x128xf32>
    %195 = math.tanh %194 : vector<8x128xf32>
    %196 = arith.mulf %191, %195 : vector<8x128xf32>
    %c0_111 = arith.constant 0 : index
    %c0_112 = arith.constant 0 : index
    %197 = vector.load %arg12[%c0_111, %c0_112] : memref<8x128xf32, #tpu.memory_space<vmem>>, vector<8x128xf32>
    tpu.vector_store %arg12[%c0_111, %c0_112], %196 {strides = array<i32>} : memref<8x128xf32, #tpu.memory_space<vmem>>, vector<8x128xf32>,
    %c0_113 = arith.constant 0 : index
    %c0_114 = arith.constant 0 : index
    %198 = vector.load %arg13[%c0_113, %c0_114] : memref<8x128xf32, #tpu.memory_space<vmem>>, vector<8x128xf32>
    tpu.vector_store %arg13[%c0_113, %c0_114], %194 {strides = array<i32>} : memref<8x128xf32, #tpu.memory_space<vmem>>, vector<8x128xf32>,
    %199 = arith.truncf %196 : vector<8x128xf32> to vector<8x128xbf16>
    %c0_115 = arith.constant 0 : index
    %c128_116 = arith.constant 128 : index
    %200 = vector.load %arg14[%c0_115, %c128_116] : memref<8x256xbf16, #tpu.memory_space<vmem>>, vector<8x128xbf16>
    tpu.vector_store %arg14[%c0_115, %c128_116], %199 {strides = array<i32>} : memref<8x256xbf16, #tpu.memory_space<vmem>>, vector<8x128xbf16>,
    %c5 = arith.constant 5 : index
    %c0_117 = arith.constant 0 : index
    %c0_118 = arith.constant 0 : index
    %201 = vector.load %arg2[%c5, %c0_117, %c0_118] : memref<6x8x128xbf16, #tpu.memory_space<vmem>>, vector<1x8x128xbf16>
    %202 = vector.shape_cast %201 : vector<1x8x128xbf16> to vector<8x128xbf16>
    %c0_119 = arith.constant 0 : index
    %c0_120 = arith.constant 0 : index
    %203 = vector.load %arg14[%c0_119, %c0_120] : memref<8x256xbf16, #tpu.memory_space<vmem>>, vector<8x128xbf16>
    tpu.vector_store %arg14[%c0_119, %c0_120], %202 {strides = array<i32>} : memref<8x256xbf16, #tpu.memory_space<vmem>>, vector<8x128xbf16>,
    %c0_121 = arith.constant 0 : index
    %c0_122 = arith.constant 0 : index
    %204 = vector.load %arg14[%c0_121, %c0_122] : memref<8x256xbf16, #tpu.memory_space<vmem>>, vector<8x256xbf16>
    %c0_123 = arith.constant 0 : index
    %c0_124 = arith.constant 0 : index
    %205 = vector.load %arg4[%c0_123, %c0_124] : memref<256x512xbf16, #tpu.memory_space<vmem>>, vector<256x512xbf16>
    %cst_125 = arith.constant dense<0.000000e+00> : vector<8x512xf32>
    %206 = tpu.matmul %204, %205, %cst_125 {dimension_numbers = #tpu.dot_dimension_numbers<[1], [0], [0], [1], [0, 0, 1, 1], [], []>} : vector<8x256xbf16>, vector<256x512xbf16>, vector<8x512xf32> -> vector<8x512xf32>
    %c0_126 = arith.constant 0 : index
    %c0_127 = arith.constant 0 : index
    %207 = vector.load %arg5[%c0_126, %c0_127] : memref<1x512xf32, #tpu.memory_space<vmem>>, vector<1x512xf32>
    %208 = vector.broadcast %207 : vector<1x512xf32> to vector<8x512xf32>
    %209 = arith.addf %206, %208 : vector<8x512xf32>
    %c0_128 = arith.constant 0 : index
    %c0_129 = arith.constant 0 : index
    %210 = vector.load %arg13[%c0_128, %c0_129] : memref<8x128xf32, #tpu.memory_space<vmem>>, vector<8x128xf32>
    %211 = vector.extract_strided_slice %209 {offsets = [0, 0], sizes = [8, 128], strides = [1, 1]} : vector<8x512xf32> to vector<8x128xf32>
    %212 = arith.negf %211 : vector<8x128xf32>
    %213 = math.exp %212 : vector<8x128xf32>
    %cst_130 = arith.constant 1.000000e+00 : f32
    %214 = vector.broadcast %cst_130 : f32 to vector<8x128xf32>
    %215 = arith.addf %214, %213 : vector<8x128xf32>
    %216 = arith.divf %214, %215 : vector<8x128xf32>
    %217 = vector.extract_strided_slice %209 {offsets = [0, 128], sizes = [8, 128], strides = [1, 1]} : vector<8x512xf32> to vector<8x128xf32>
    %218 = arith.negf %217 : vector<8x128xf32>
    %219 = math.exp %218 : vector<8x128xf32>
    %cst_131 = arith.constant 1.000000e+00 : f32
    %220 = vector.broadcast %cst_131 : f32 to vector<8x128xf32>
    %221 = arith.addf %220, %219 : vector<8x128xf32>
    %222 = arith.divf %220, %221 : vector<8x128xf32>
    %223 = vector.extract_strided_slice %209 {offsets = [0, 256], sizes = [8, 128], strides = [1, 1]} : vector<8x512xf32> to vector<8x128xf32>
    %224 = math.tanh %223 : vector<8x128xf32>
    %225 = vector.extract_strided_slice %209 {offsets = [0, 384], sizes = [8, 128], strides = [1, 1]} : vector<8x512xf32> to vector<8x128xf32>
    %226 = arith.negf %225 : vector<8x128xf32>
    %227 = math.exp %226 : vector<8x128xf32>
    %cst_132 = arith.constant 1.000000e+00 : f32
    %228 = vector.broadcast %cst_132 : f32 to vector<8x128xf32>
    %229 = arith.addf %228, %227 : vector<8x128xf32>
    %230 = arith.divf %228, %229 : vector<8x128xf32>
    %231 = arith.mulf %222, %210 : vector<8x128xf32>
    %232 = arith.mulf %216, %224 : vector<8x128xf32>
    %233 = arith.addf %231, %232 : vector<8x128xf32>
    %234 = math.tanh %233 : vector<8x128xf32>
    %235 = arith.mulf %230, %234 : vector<8x128xf32>
    %c0_133 = arith.constant 0 : index
    %c0_134 = arith.constant 0 : index
    %236 = vector.load %arg12[%c0_133, %c0_134] : memref<8x128xf32, #tpu.memory_space<vmem>>, vector<8x128xf32>
    tpu.vector_store %arg12[%c0_133, %c0_134], %235 {strides = array<i32>} : memref<8x128xf32, #tpu.memory_space<vmem>>, vector<8x128xf32>,
    %c0_135 = arith.constant 0 : index
    %c0_136 = arith.constant 0 : index
    %237 = vector.load %arg13[%c0_135, %c0_136] : memref<8x128xf32, #tpu.memory_space<vmem>>, vector<8x128xf32>
    tpu.vector_store %arg13[%c0_135, %c0_136], %233 {strides = array<i32>} : memref<8x128xf32, #tpu.memory_space<vmem>>, vector<8x128xf32>,
    %238 = arith.truncf %235 : vector<8x128xf32> to vector<8x128xbf16>
    %c0_137 = arith.constant 0 : index
    %c128_138 = arith.constant 128 : index
    %239 = vector.load %arg14[%c0_137, %c128_138] : memref<8x256xbf16, #tpu.memory_space<vmem>>, vector<8x128xbf16>
    tpu.vector_store %arg14[%c0_137, %c128_138], %238 {strides = array<i32>} : memref<8x256xbf16, #tpu.memory_space<vmem>>, vector<8x128xbf16>,
    %c0_139 = arith.constant 0 : index
    %c0_140 = arith.constant 0 : index
    %c0_141 = arith.constant 0 : index
    %240 = vector.load %arg3[%c0_139, %c0_140, %c0_141] : memref<8x8x128xbf16, #tpu.memory_space<vmem>>, vector<1x8x128xbf16>
    %241 = vector.shape_cast %240 : vector<1x8x128xbf16> to vector<8x128xbf16>
    %c0_142 = arith.constant 0 : index
    %c0_143 = arith.constant 0 : index
    %242 = vector.load %arg14[%c0_142, %c0_143] : memref<8x256xbf16, #tpu.memory_space<vmem>>, vector<8x128xbf16>
    tpu.vector_store %arg14[%c0_142, %c0_143], %241 {strides = array<i32>} : memref<8x256xbf16, #tpu.memory_space<vmem>>, vector<8x128xbf16>,
    %c0_144 = arith.constant 0 : index
    %c0_145 = arith.constant 0 : index
    %243 = vector.load %arg14[%c0_144, %c0_145] : memref<8x256xbf16, #tpu.memory_space<vmem>>, vector<8x256xbf16>
    %c0_146 = arith.constant 0 : index
    %c0_147 = arith.constant 0 : index
    %244 = vector.load %arg6[%c0_146, %c0_147] : memref<256x512xbf16, #tpu.memory_space<vmem>>, vector<256x512xbf16>
    %cst_148 = arith.constant dense<0.000000e+00> : vector<8x512xf32>
    %245 = tpu.matmul %243, %244, %cst_148 {dimension_numbers = #tpu.dot_dimension_numbers<[1], [0], [0], [1], [0, 0, 1, 1], [], []>} : vector<8x256xbf16>, vector<256x512xbf16>, vector<8x512xf32> -> vector<8x512xf32>
    %c0_149 = arith.constant 0 : index
    %c0_150 = arith.constant 0 : index
    %246 = vector.load %arg7[%c0_149, %c0_150] : memref<1x512xf32, #tpu.memory_space<vmem>>, vector<1x512xf32>
    %247 = vector.broadcast %246 : vector<1x512xf32> to vector<8x512xf32>
    %248 = arith.addf %245, %247 : vector<8x512xf32>
    %c0_151 = arith.constant 0 : index
    %c0_152 = arith.constant 0 : index
    %249 = vector.load %arg13[%c0_151, %c0_152] : memref<8x128xf32, #tpu.memory_space<vmem>>, vector<8x128xf32>
    %250 = vector.extract_strided_slice %248 {offsets = [0, 0], sizes = [8, 128], strides = [1, 1]} : vector<8x512xf32> to vector<8x128xf32>
    %251 = arith.negf %250 : vector<8x128xf32>
    %252 = math.exp %251 : vector<8x128xf32>
    %cst_153 = arith.constant 1.000000e+00 : f32
    %253 = vector.broadcast %cst_153 : f32 to vector<8x128xf32>
    %254 = arith.addf %253, %252 : vector<8x128xf32>
    %255 = arith.divf %253, %254 : vector<8x128xf32>
    %256 = vector.extract_strided_slice %248 {offsets = [0, 128], sizes = [8, 128], strides = [1, 1]} : vector<8x512xf32> to vector<8x128xf32>
    %257 = arith.negf %256 : vector<8x128xf32>
    %258 = math.exp %257 : vector<8x128xf32>
    %cst_154 = arith.constant 1.000000e+00 : f32
    %259 = vector.broadcast %cst_154 : f32 to vector<8x128xf32>
    %260 = arith.addf %259, %258 : vector<8x128xf32>
    %261 = arith.divf %259, %260 : vector<8x128xf32>
    %262 = vector.extract_strided_slice %248 {offsets = [0, 256], sizes = [8, 128], strides = [1, 1]} : vector<8x512xf32> to vector<8x128xf32>
    %263 = math.tanh %262 : vector<8x128xf32>
    %264 = vector.extract_strided_slice %248 {offsets = [0, 384], sizes = [8, 128], strides = [1, 1]} : vector<8x512xf32> to vector<8x128xf32>
    %265 = arith.negf %264 : vector<8x128xf32>
    %266 = math.exp %265 : vector<8x128xf32>
    %cst_155 = arith.constant 1.000000e+00 : f32
    %267 = vector.broadcast %cst_155 : f32 to vector<8x128xf32>
    %268 = arith.addf %267, %266 : vector<8x128xf32>
    %269 = arith.divf %267, %268 : vector<8x128xf32>
    %270 = arith.mulf %261, %249 : vector<8x128xf32>
    %271 = arith.mulf %255, %263 : vector<8x128xf32>
    %272 = arith.addf %270, %271 : vector<8x128xf32>
    %273 = math.tanh %272 : vector<8x128xf32>
    %274 = arith.mulf %269, %273 : vector<8x128xf32>
    %c0_156 = arith.constant 0 : index
    %c0_157 = arith.constant 0 : index
    %275 = vector.load %arg12[%c0_156, %c0_157] : memref<8x128xf32, #tpu.memory_space<vmem>>, vector<8x128xf32>
    tpu.vector_store %arg12[%c0_156, %c0_157], %274 {strides = array<i32>} : memref<8x128xf32, #tpu.memory_space<vmem>>, vector<8x128xf32>,
    %c0_158 = arith.constant 0 : index
    %c0_159 = arith.constant 0 : index
    %276 = vector.load %arg13[%c0_158, %c0_159] : memref<8x128xf32, #tpu.memory_space<vmem>>, vector<8x128xf32>
    tpu.vector_store %arg13[%c0_158, %c0_159], %272 {strides = array<i32>} : memref<8x128xf32, #tpu.memory_space<vmem>>, vector<8x128xf32>,
    %277 = arith.truncf %274 : vector<8x128xf32> to vector<8x128xbf16>
    %c0_160 = arith.constant 0 : index
    %c128_161 = arith.constant 128 : index
    %278 = vector.load %arg14[%c0_160, %c128_161] : memref<8x256xbf16, #tpu.memory_space<vmem>>, vector<8x128xbf16>
    tpu.vector_store %arg14[%c0_160, %c128_161], %277 {strides = array<i32>} : memref<8x256xbf16, #tpu.memory_space<vmem>>, vector<8x128xbf16>,
    %279 = arith.truncf %274 : vector<8x128xf32> to vector<8x128xbf16>
    %c0_162 = arith.constant 0 : index
    %c0_163 = arith.constant 0 : index
    %280 = vector.load %arg9[%c0_162, %c0_163] : memref<128x128xbf16, #tpu.memory_space<vmem>>, vector<128x128xbf16>
    %cst_164 = arith.constant dense<0.000000e+00> : vector<8x128xf32>
    %281 = tpu.matmul %279, %280, %cst_164 {dimension_numbers = #tpu.dot_dimension_numbers<[1], [0], [0], [1], [0, 0, 1, 1], [], []>} : vector<8x128xbf16>, vector<128x128xbf16>, vector<8x128xf32> -> vector<8x128xf32>
    %c0_165 = arith.constant 0 : index
    %c0_166 = arith.constant 0 : index
    %282 = vector.load %arg10[%c0_165, %c0_166] : memref<1x128xf32, #tpu.memory_space<vmem>>, vector<1x128xf32>
    %283 = vector.broadcast %282 : vector<1x128xf32> to vector<8x128xf32>
    %284 = arith.addf %281, %283 : vector<8x128xf32>
    %c0_167 = arith.constant 0 : index
    %c0_168 = arith.constant 0 : index
    %c0_169 = arith.constant 0 : index
    %285 = vector.load %arg11[%c0_167, %c0_168, %c0_169] : memref<7x8x128xf32, #tpu.memory_space<vmem>>, vector<1x8x128xf32>
    %286 = vector.shape_cast %285 : vector<1x8x128xf32> to vector<8x128xf32>
    %287 = vector.shape_cast %284 : vector<8x128xf32> to vector<1x8x128xf32>
    tpu.vector_store %arg11[%c0_167, %c0_168, %c0_169], %287 {strides = array<i32>} : memref<7x8x128xf32, #tpu.memory_space<vmem>>, vector<1x8x128xf32>,
    %c1_170 = arith.constant 1 : index
    %288 = memref.load %arg1[%c1_170] : memref<8xi32, #tpu.memory_space<smem>>
    %c0_i32 = arith.constant 0 : i32
    %289 = arith.cmpi eq, %288, %c0_i32 : i32
    %290 = arith.extui %289 : i1 to i32
    %c0_i32_171 = arith.constant 0 : i32
    %291 = arith.cmpi ne, %290, %c0_i32_171 : i32
    scf.if %291 {
      %606 = tpu.iota {dimensions = array<i32: 1>} : vector<8x128xi32>
      %c16_i32 = arith.constant 16 : i32
      %607 = vector.broadcast %c16_i32 : i32 to vector<8x128xi32>
      %608 = arith.cmpi slt, %606, %607 : vector<8x128xi32>
      %cst_360 = arith.constant -1.000000e+30 : f32
      %609 = vector.broadcast %cst_360 : f32 to vector<8x128xf32>
      %610 = arith.select %608, %284, %609 : vector<8x128xi1>, vector<8x128xf32>
      %cst_361 = arith.constant dense<0xFF800000> : vector<8xf32>
      %611 = vector.multi_reduction <maximumf>, %610, %cst_361 [1] : vector<8x128xf32> to vector<8xf32>
      %612 = vector.shape_cast %611 : vector<8xf32> to vector<8x1xf32>
      %613 = vector.broadcast %612 : vector<8x1xf32> to vector<8x128xf32>
      %614 = arith.cmpf oge, %610, %613 : vector<8x128xf32>
      %c128_i32 = arith.constant 128 : i32
      %615 = vector.broadcast %c128_i32 : i32 to vector<8x128xi32>
      %616 = arith.select %614, %606, %615 : vector<8x128xi1>, vector<8x128xi32>
      %cst_362 = arith.constant dense<2147483647> : vector<8xi32>
      %617 = vector.multi_reduction <minsi>, %616, %cst_362 [1] : vector<8x128xi32> to vector<8xi32>
      %618 = vector.shape_cast %617 : vector<8xi32> to vector<8x1xi32>
      %619 = vector.broadcast %618 : vector<8x1xi32> to vector<8x128xi32>
      %620 = arith.cmpi eq, %606, %619 : vector<8x128xi32>
      %621 = arith.extui %620 : vector<8x128xi1> to vector<8x128xi32>
      %622 = arith.sitofp %621 : vector<8x128xi32> to vector<8x128xf32>
      %623 = arith.truncf %622 : vector<8x128xf32> to vector<8x128xbf16>
      %c0_363 = arith.constant 0 : index
      %c0_364 = arith.constant 0 : index
      %624 = vector.load %arg8[%c0_363, %c0_364] : memref<128x128xbf16, #tpu.memory_space<vmem>>, vector<128x128xbf16>
      %cst_365 = arith.constant dense<0.000000e+00> : vector<8x128xf32>
      %625 = tpu.matmul %623, %624, %cst_365 {dimension_numbers = #tpu.dot_dimension_numbers<[1], [0], [0], [1], [0, 0, 1, 1], [], []>} : vector<8x128xbf16>, vector<128x128xbf16>, vector<8x128xf32> -> vector<8x128xf32>
      %626 = arith.truncf %625 : vector<8x128xf32> to vector<8x128xbf16>
      %c0_366 = arith.constant 0 : index
      %c0_367 = arith.constant 0 : index
      %627 = vector.load %arg14[%c0_366, %c0_367] : memref<8x256xbf16, #tpu.memory_space<vmem>>, vector<8x128xbf16>
      tpu.vector_store %arg14[%c0_366, %c0_367], %626 {strides = array<i32>} : memref<8x256xbf16, #tpu.memory_space<vmem>>, vector<8x128xbf16>,
    } else {
    }
    %c1_172 = arith.constant 1 : index
    %292 = memref.load %arg1[%c1_172] : memref<8xi32, #tpu.memory_space<smem>>
    %c0_i32_173 = arith.constant 0 : i32
    %293 = arith.cmpi ne, %292, %c0_i32_173 : i32
    %294 = arith.extui %293 : i1 to i32
    %c0_i32_174 = arith.constant 0 : i32
    %295 = arith.cmpi ne, %294, %c0_i32_174 : i32
    scf.if %295 {
      %c1_360 = arith.constant 1 : index
      %c0_361 = arith.constant 0 : index
      %c0_362 = arith.constant 0 : index
      %606 = vector.load %arg3[%c1_360, %c0_361, %c0_362] : memref<8x8x128xbf16, #tpu.memory_space<vmem>>, vector<1x8x128xbf16>
      %607 = vector.shape_cast %606 : vector<1x8x128xbf16> to vector<8x128xbf16>
      %c0_363 = arith.constant 0 : index
      %c0_364 = arith.constant 0 : index
      %608 = vector.load %arg14[%c0_363, %c0_364] : memref<8x256xbf16, #tpu.memory_space<vmem>>, vector<8x128xbf16>
      tpu.vector_store %arg14[%c0_363, %c0_364], %607 {strides = array<i32>} : memref<8x256xbf16, #tpu.memory_space<vmem>>, vector<8x128xbf16>,
    } else {
    }
    %c0_175 = arith.constant 0 : index
    %c0_176 = arith.constant 0 : index
    %296 = vector.load %arg14[%c0_175, %c0_176] : memref<8x256xbf16, #tpu.memory_space<vmem>>, vector<8x256xbf16>
    %c0_177 = arith.constant 0 : index
    %c0_178 = arith.constant 0 : index
    %297 = vector.load %arg6[%c0_177, %c0_178] : memref<256x512xbf16, #tpu.memory_space<vmem>>, vector<256x512xbf16>
    %cst_179 = arith.constant dense<0.000000e+00> : vector<8x512xf32>
    %298 = tpu.matmul %296, %297, %cst_179 {dimension_numbers = #tpu.dot_dimension_numbers<[1], [0], [0], [1], [0, 0, 1, 1], [], []>} : vector<8x256xbf16>, vector<256x512xbf16>, vector<8x512xf32> -> vector<8x512xf32>
    %c0_180 = arith.constant 0 : index
    %c0_181 = arith.constant 0 : index
    %299 = vector.load %arg7[%c0_180, %c0_181] : memref<1x512xf32, #tpu.memory_space<vmem>>, vector<1x512xf32>
    %300 = vector.broadcast %299 : vector<1x512xf32> to vector<8x512xf32>
    %301 = arith.addf %298, %300 : vector<8x512xf32>
    %c0_182 = arith.constant 0 : index
    %c0_183 = arith.constant 0 : index
    %302 = vector.load %arg13[%c0_182, %c0_183] : memref<8x128xf32, #tpu.memory_space<vmem>>, vector<8x128xf32>
    %303 = vector.extract_strided_slice %301 {offsets = [0, 0], sizes = [8, 128], strides = [1, 1]} : vector<8x512xf32> to vector<8x128xf32>
    %304 = arith.negf %303 : vector<8x128xf32>
    %305 = math.exp %304 : vector<8x128xf32>
    %cst_184 = arith.constant 1.000000e+00 : f32
    %306 = vector.broadcast %cst_184 : f32 to vector<8x128xf32>
    %307 = arith.addf %306, %305 : vector<8x128xf32>
    %308 = arith.divf %306, %307 : vector<8x128xf32>
    %309 = vector.extract_strided_slice %301 {offsets = [0, 128], sizes = [8, 128], strides = [1, 1]} : vector<8x512xf32> to vector<8x128xf32>
    %310 = arith.negf %309 : vector<8x128xf32>
    %311 = math.exp %310 : vector<8x128xf32>
    %cst_185 = arith.constant 1.000000e+00 : f32
    %312 = vector.broadcast %cst_185 : f32 to vector<8x128xf32>
    %313 = arith.addf %312, %311 : vector<8x128xf32>
    %314 = arith.divf %312, %313 : vector<8x128xf32>
    %315 = vector.extract_strided_slice %301 {offsets = [0, 256], sizes = [8, 128], strides = [1, 1]} : vector<8x512xf32> to vector<8x128xf32>
    %316 = math.tanh %315 : vector<8x128xf32>
    %317 = vector.extract_strided_slice %301 {offsets = [0, 384], sizes = [8, 128], strides = [1, 1]} : vector<8x512xf32> to vector<8x128xf32>
    %318 = arith.negf %317 : vector<8x128xf32>
    %319 = math.exp %318 : vector<8x128xf32>
    %cst_186 = arith.constant 1.000000e+00 : f32
    %320 = vector.broadcast %cst_186 : f32 to vector<8x128xf32>
    %321 = arith.addf %320, %319 : vector<8x128xf32>
    %322 = arith.divf %320, %321 : vector<8x128xf32>
    %323 = arith.mulf %314, %302 : vector<8x128xf32>
    %324 = arith.mulf %308, %316 : vector<8x128xf32>
    %325 = arith.addf %323, %324 : vector<8x128xf32>
    %326 = math.tanh %325 : vector<8x128xf32>
    %327 = arith.mulf %322, %326 : vector<8x128xf32>
    %c0_187 = arith.constant 0 : index
    %c0_188 = arith.constant 0 : index
    %328 = vector.load %arg12[%c0_187, %c0_188] : memref<8x128xf32, #tpu.memory_space<vmem>>, vector<8x128xf32>
    tpu.vector_store %arg12[%c0_187, %c0_188], %327 {strides = array<i32>} : memref<8x128xf32, #tpu.memory_space<vmem>>, vector<8x128xf32>,
    %c0_189 = arith.constant 0 : index
    %c0_190 = arith.constant 0 : index
    %329 = vector.load %arg13[%c0_189, %c0_190] : memref<8x128xf32, #tpu.memory_space<vmem>>, vector<8x128xf32>
    tpu.vector_store %arg13[%c0_189, %c0_190], %325 {strides = array<i32>} : memref<8x128xf32, #tpu.memory_space<vmem>>, vector<8x128xf32>,
    %330 = arith.truncf %327 : vector<8x128xf32> to vector<8x128xbf16>
    %c0_191 = arith.constant 0 : index
    %c128_192 = arith.constant 128 : index
    %331 = vector.load %arg14[%c0_191, %c128_192] : memref<8x256xbf16, #tpu.memory_space<vmem>>, vector<8x128xbf16>
    tpu.vector_store %arg14[%c0_191, %c128_192], %330 {strides = array<i32>} : memref<8x256xbf16, #tpu.memory_space<vmem>>, vector<8x128xbf16>,
    %332 = arith.truncf %327 : vector<8x128xf32> to vector<8x128xbf16>
    %c0_193 = arith.constant 0 : index
    %c0_194 = arith.constant 0 : index
    %333 = vector.load %arg9[%c0_193, %c0_194] : memref<128x128xbf16, #tpu.memory_space<vmem>>, vector<128x128xbf16>
    %cst_195 = arith.constant dense<0.000000e+00> : vector<8x128xf32>
    %334 = tpu.matmul %332, %333, %cst_195 {dimension_numbers = #tpu.dot_dimension_numbers<[1], [0], [0], [1], [0, 0, 1, 1], [], []>} : vector<8x128xbf16>, vector<128x128xbf16>, vector<8x128xf32> -> vector<8x128xf32>
    %c0_196 = arith.constant 0 : index
    %c0_197 = arith.constant 0 : index
    %335 = vector.load %arg10[%c0_196, %c0_197] : memref<1x128xf32, #tpu.memory_space<vmem>>, vector<1x128xf32>
    %336 = vector.broadcast %335 : vector<1x128xf32> to vector<8x128xf32>
    %337 = arith.addf %334, %336 : vector<8x128xf32>
    %c1_198 = arith.constant 1 : index
    %c0_199 = arith.constant 0 : index
    %c0_200 = arith.constant 0 : index
    %338 = vector.load %arg11[%c1_198, %c0_199, %c0_200] : memref<7x8x128xf32, #tpu.memory_space<vmem>>, vector<1x8x128xf32>
    %339 = vector.shape_cast %338 : vector<1x8x128xf32> to vector<8x128xf32>
    %340 = vector.shape_cast %337 : vector<8x128xf32> to vector<1x8x128xf32>
    tpu.vector_store %arg11[%c1_198, %c0_199, %c0_200], %340 {strides = array<i32>} : memref<7x8x128xf32, #tpu.memory_space<vmem>>, vector<1x8x128xf32>,
    %c2_201 = arith.constant 2 : index
    %341 = memref.load %arg1[%c2_201] : memref<8xi32, #tpu.memory_space<smem>>
    %c0_i32_202 = arith.constant 0 : i32
    %342 = arith.cmpi eq, %341, %c0_i32_202 : i32
    %343 = arith.extui %342 : i1 to i32
    %c0_i32_203 = arith.constant 0 : i32
    %344 = arith.cmpi ne, %343, %c0_i32_203 : i32
    scf.if %344 {
      %606 = tpu.iota {dimensions = array<i32: 1>} : vector<8x128xi32>
      %c16_i32 = arith.constant 16 : i32
      %607 = vector.broadcast %c16_i32 : i32 to vector<8x128xi32>
      %608 = arith.cmpi slt, %606, %607 : vector<8x128xi32>
      %cst_360 = arith.constant -1.000000e+30 : f32
      %609 = vector.broadcast %cst_360 : f32 to vector<8x128xf32>
      %610 = arith.select %608, %337, %609 : vector<8x128xi1>, vector<8x128xf32>
      %cst_361 = arith.constant dense<0xFF800000> : vector<8xf32>
      %611 = vector.multi_reduction <maximumf>, %610, %cst_361 [1] : vector<8x128xf32> to vector<8xf32>
      %612 = vector.shape_cast %611 : vector<8xf32> to vector<8x1xf32>
      %613 = vector.broadcast %612 : vector<8x1xf32> to vector<8x128xf32>
      %614 = arith.cmpf oge, %610, %613 : vector<8x128xf32>
      %c128_i32 = arith.constant 128 : i32
      %615 = vector.broadcast %c128_i32 : i32 to vector<8x128xi32>
      %616 = arith.select %614, %606, %615 : vector<8x128xi1>, vector<8x128xi32>
      %cst_362 = arith.constant dense<2147483647> : vector<8xi32>
      %617 = vector.multi_reduction <minsi>, %616, %cst_362 [1] : vector<8x128xi32> to vector<8xi32>
      %618 = vector.shape_cast %617 : vector<8xi32> to vector<8x1xi32>
      %619 = vector.broadcast %618 : vector<8x1xi32> to vector<8x128xi32>
      %620 = arith.cmpi eq, %606, %619 : vector<8x128xi32>
      %621 = arith.extui %620 : vector<8x128xi1> to vector<8x128xi32>
      %622 = arith.sitofp %621 : vector<8x128xi32> to vector<8x128xf32>
      %623 = arith.truncf %622 : vector<8x128xf32> to vector<8x128xbf16>
      %c0_363 = arith.constant 0 : index
      %c0_364 = arith.constant 0 : index
      %624 = vector.load %arg8[%c0_363, %c0_364] : memref<128x128xbf16, #tpu.memory_space<vmem>>, vector<128x128xbf16>
      %cst_365 = arith.constant dense<0.000000e+00> : vector<8x128xf32>
      %625 = tpu.matmul %623, %624, %cst_365 {dimension_numbers = #tpu.dot_dimension_numbers<[1], [0], [0], [1], [0, 0, 1, 1], [], []>} : vector<8x128xbf16>, vector<128x128xbf16>, vector<8x128xf32> -> vector<8x128xf32>
      %626 = arith.truncf %625 : vector<8x128xf32> to vector<8x128xbf16>
      %c0_366 = arith.constant 0 : index
      %c0_367 = arith.constant 0 : index
      %627 = vector.load %arg14[%c0_366, %c0_367] : memref<8x256xbf16, #tpu.memory_space<vmem>>, vector<8x128xbf16>
      tpu.vector_store %arg14[%c0_366, %c0_367], %626 {strides = array<i32>} : memref<8x256xbf16, #tpu.memory_space<vmem>>, vector<8x128xbf16>,
    } else {
    }
    %c2_204 = arith.constant 2 : index
    %345 = memref.load %arg1[%c2_204] : memref<8xi32, #tpu.memory_space<smem>>
    %c0_i32_205 = arith.constant 0 : i32
    %346 = arith.cmpi ne, %345, %c0_i32_205 : i32
    %347 = arith.extui %346 : i1 to i32
    %c0_i32_206 = arith.constant 0 : i32
    %348 = arith.cmpi ne, %347, %c0_i32_206 : i32
    scf.if %348 {
      %c2_360 = arith.constant 2 : index
      %c0_361 = arith.constant 0 : index
      %c0_362 = arith.constant 0 : index
      %606 = vector.load %arg3[%c2_360, %c0_361, %c0_362] : memref<8x8x128xbf16, #tpu.memory_space<vmem>>, vector<1x8x128xbf16>
      %607 = vector.shape_cast %606 : vector<1x8x128xbf16> to vector<8x128xbf16>
      %c0_363 = arith.constant 0 : index
      %c0_364 = arith.constant 0 : index
      %608 = vector.load %arg14[%c0_363, %c0_364] : memref<8x256xbf16, #tpu.memory_space<vmem>>, vector<8x128xbf16>
      tpu.vector_store %arg14[%c0_363, %c0_364], %607 {strides = array<i32>} : memref<8x256xbf16, #tpu.memory_space<vmem>>, vector<8x128xbf16>,
    } else {
    }
    %c0_207 = arith.constant 0 : index
    %c0_208 = arith.constant 0 : index
    %349 = vector.load %arg14[%c0_207, %c0_208] : memref<8x256xbf16, #tpu.memory_space<vmem>>, vector<8x256xbf16>
    %c0_209 = arith.constant 0 : index
    %c0_210 = arith.constant 0 : index
    %350 = vector.load %arg6[%c0_209, %c0_210] : memref<256x512xbf16, #tpu.memory_space<vmem>>, vector<256x512xbf16>
    %cst_211 = arith.constant dense<0.000000e+00> : vector<8x512xf32>
    %351 = tpu.matmul %349, %350, %cst_211 {dimension_numbers = #tpu.dot_dimension_numbers<[1], [0], [0], [1], [0, 0, 1, 1], [], []>} : vector<8x256xbf16>, vector<256x512xbf16>, vector<8x512xf32> -> vector<8x512xf32>
    %c0_212 = arith.constant 0 : index
    %c0_213 = arith.constant 0 : index
    %352 = vector.load %arg7[%c0_212, %c0_213] : memref<1x512xf32, #tpu.memory_space<vmem>>, vector<1x512xf32>
    %353 = vector.broadcast %352 : vector<1x512xf32> to vector<8x512xf32>
    %354 = arith.addf %351, %353 : vector<8x512xf32>
    %c0_214 = arith.constant 0 : index
    %c0_215 = arith.constant 0 : index
    %355 = vector.load %arg13[%c0_214, %c0_215] : memref<8x128xf32, #tpu.memory_space<vmem>>, vector<8x128xf32>
    %356 = vector.extract_strided_slice %354 {offsets = [0, 0], sizes = [8, 128], strides = [1, 1]} : vector<8x512xf32> to vector<8x128xf32>
    %357 = arith.negf %356 : vector<8x128xf32>
    %358 = math.exp %357 : vector<8x128xf32>
    %cst_216 = arith.constant 1.000000e+00 : f32
    %359 = vector.broadcast %cst_216 : f32 to vector<8x128xf32>
    %360 = arith.addf %359, %358 : vector<8x128xf32>
    %361 = arith.divf %359, %360 : vector<8x128xf32>
    %362 = vector.extract_strided_slice %354 {offsets = [0, 128], sizes = [8, 128], strides = [1, 1]} : vector<8x512xf32> to vector<8x128xf32>
    %363 = arith.negf %362 : vector<8x128xf32>
    %364 = math.exp %363 : vector<8x128xf32>
    %cst_217 = arith.constant 1.000000e+00 : f32
    %365 = vector.broadcast %cst_217 : f32 to vector<8x128xf32>
    %366 = arith.addf %365, %364 : vector<8x128xf32>
    %367 = arith.divf %365, %366 : vector<8x128xf32>
    %368 = vector.extract_strided_slice %354 {offsets = [0, 256], sizes = [8, 128], strides = [1, 1]} : vector<8x512xf32> to vector<8x128xf32>
    %369 = math.tanh %368 : vector<8x128xf32>
    %370 = vector.extract_strided_slice %354 {offsets = [0, 384], sizes = [8, 128], strides = [1, 1]} : vector<8x512xf32> to vector<8x128xf32>
    %371 = arith.negf %370 : vector<8x128xf32>
    %372 = math.exp %371 : vector<8x128xf32>
    %cst_218 = arith.constant 1.000000e+00 : f32
    %373 = vector.broadcast %cst_218 : f32 to vector<8x128xf32>
    %374 = arith.addf %373, %372 : vector<8x128xf32>
    %375 = arith.divf %373, %374 : vector<8x128xf32>
    %376 = arith.mulf %367, %355 : vector<8x128xf32>
    %377 = arith.mulf %361, %369 : vector<8x128xf32>
    %378 = arith.addf %376, %377 : vector<8x128xf32>
    %379 = math.tanh %378 : vector<8x128xf32>
    %380 = arith.mulf %375, %379 : vector<8x128xf32>
    %c0_219 = arith.constant 0 : index
    %c0_220 = arith.constant 0 : index
    %381 = vector.load %arg12[%c0_219, %c0_220] : memref<8x128xf32, #tpu.memory_space<vmem>>, vector<8x128xf32>
    tpu.vector_store %arg12[%c0_219, %c0_220], %380 {strides = array<i32>} : memref<8x128xf32, #tpu.memory_space<vmem>>, vector<8x128xf32>,
    %c0_221 = arith.constant 0 : index
    %c0_222 = arith.constant 0 : index
    %382 = vector.load %arg13[%c0_221, %c0_222] : memref<8x128xf32, #tpu.memory_space<vmem>>, vector<8x128xf32>
    tpu.vector_store %arg13[%c0_221, %c0_222], %378 {strides = array<i32>} : memref<8x128xf32, #tpu.memory_space<vmem>>, vector<8x128xf32>,
    %383 = arith.truncf %380 : vector<8x128xf32> to vector<8x128xbf16>
    %c0_223 = arith.constant 0 : index
    %c128_224 = arith.constant 128 : index
    %384 = vector.load %arg14[%c0_223, %c128_224] : memref<8x256xbf16, #tpu.memory_space<vmem>>, vector<8x128xbf16>
    tpu.vector_store %arg14[%c0_223, %c128_224], %383 {strides = array<i32>} : memref<8x256xbf16, #tpu.memory_space<vmem>>, vector<8x128xbf16>,
    %385 = arith.truncf %380 : vector<8x128xf32> to vector<8x128xbf16>
    %c0_225 = arith.constant 0 : index
    %c0_226 = arith.constant 0 : index
    %386 = vector.load %arg9[%c0_225, %c0_226] : memref<128x128xbf16, #tpu.memory_space<vmem>>, vector<128x128xbf16>
    %cst_227 = arith.constant dense<0.000000e+00> : vector<8x128xf32>
    %387 = tpu.matmul %385, %386, %cst_227 {dimension_numbers = #tpu.dot_dimension_numbers<[1], [0], [0], [1], [0, 0, 1, 1], [], []>} : vector<8x128xbf16>, vector<128x128xbf16>, vector<8x128xf32> -> vector<8x128xf32>
    %c0_228 = arith.constant 0 : index
    %c0_229 = arith.constant 0 : index
    %388 = vector.load %arg10[%c0_228, %c0_229] : memref<1x128xf32, #tpu.memory_space<vmem>>, vector<1x128xf32>
    %389 = vector.broadcast %388 : vector<1x128xf32> to vector<8x128xf32>
    %390 = arith.addf %387, %389 : vector<8x128xf32>
    %c2_230 = arith.constant 2 : index
    %c0_231 = arith.constant 0 : index
    %c0_232 = arith.constant 0 : index
    %391 = vector.load %arg11[%c2_230, %c0_231, %c0_232] : memref<7x8x128xf32, #tpu.memory_space<vmem>>, vector<1x8x128xf32>
    %392 = vector.shape_cast %391 : vector<1x8x128xf32> to vector<8x128xf32>
    %393 = vector.shape_cast %390 : vector<8x128xf32> to vector<1x8x128xf32>
    tpu.vector_store %arg11[%c2_230, %c0_231, %c0_232], %393 {strides = array<i32>} : memref<7x8x128xf32, #tpu.memory_space<vmem>>, vector<1x8x128xf32>,
    %c3_233 = arith.constant 3 : index
    %394 = memref.load %arg1[%c3_233] : memref<8xi32, #tpu.memory_space<smem>>
    %c0_i32_234 = arith.constant 0 : i32
    %395 = arith.cmpi eq, %394, %c0_i32_234 : i32
    %396 = arith.extui %395 : i1 to i32
    %c0_i32_235 = arith.constant 0 : i32
    %397 = arith.cmpi ne, %396, %c0_i32_235 : i32
    scf.if %397 {
      %606 = tpu.iota {dimensions = array<i32: 1>} : vector<8x128xi32>
      %c16_i32 = arith.constant 16 : i32
      %607 = vector.broadcast %c16_i32 : i32 to vector<8x128xi32>
      %608 = arith.cmpi slt, %606, %607 : vector<8x128xi32>
      %cst_360 = arith.constant -1.000000e+30 : f32
      %609 = vector.broadcast %cst_360 : f32 to vector<8x128xf32>
      %610 = arith.select %608, %390, %609 : vector<8x128xi1>, vector<8x128xf32>
      %cst_361 = arith.constant dense<0xFF800000> : vector<8xf32>
      %611 = vector.multi_reduction <maximumf>, %610, %cst_361 [1] : vector<8x128xf32> to vector<8xf32>
      %612 = vector.shape_cast %611 : vector<8xf32> to vector<8x1xf32>
      %613 = vector.broadcast %612 : vector<8x1xf32> to vector<8x128xf32>
      %614 = arith.cmpf oge, %610, %613 : vector<8x128xf32>
      %c128_i32 = arith.constant 128 : i32
      %615 = vector.broadcast %c128_i32 : i32 to vector<8x128xi32>
      %616 = arith.select %614, %606, %615 : vector<8x128xi1>, vector<8x128xi32>
      %cst_362 = arith.constant dense<2147483647> : vector<8xi32>
      %617 = vector.multi_reduction <minsi>, %616, %cst_362 [1] : vector<8x128xi32> to vector<8xi32>
      %618 = vector.shape_cast %617 : vector<8xi32> to vector<8x1xi32>
      %619 = vector.broadcast %618 : vector<8x1xi32> to vector<8x128xi32>
      %620 = arith.cmpi eq, %606, %619 : vector<8x128xi32>
      %621 = arith.extui %620 : vector<8x128xi1> to vector<8x128xi32>
      %622 = arith.sitofp %621 : vector<8x128xi32> to vector<8x128xf32>
      %623 = arith.truncf %622 : vector<8x128xf32> to vector<8x128xbf16>
      %c0_363 = arith.constant 0 : index
      %c0_364 = arith.constant 0 : index
      %624 = vector.load %arg8[%c0_363, %c0_364] : memref<128x128xbf16, #tpu.memory_space<vmem>>, vector<128x128xbf16>
      %cst_365 = arith.constant dense<0.000000e+00> : vector<8x128xf32>
      %625 = tpu.matmul %623, %624, %cst_365 {dimension_numbers = #tpu.dot_dimension_numbers<[1], [0], [0], [1], [0, 0, 1, 1], [], []>} : vector<8x128xbf16>, vector<128x128xbf16>, vector<8x128xf32> -> vector<8x128xf32>
      %626 = arith.truncf %625 : vector<8x128xf32> to vector<8x128xbf16>
      %c0_366 = arith.constant 0 : index
      %c0_367 = arith.constant 0 : index
      %627 = vector.load %arg14[%c0_366, %c0_367] : memref<8x256xbf16, #tpu.memory_space<vmem>>, vector<8x128xbf16>
      tpu.vector_store %arg14[%c0_366, %c0_367], %626 {strides = array<i32>} : memref<8x256xbf16, #tpu.memory_space<vmem>>, vector<8x128xbf16>,
    } else {
    }
    %c3_236 = arith.constant 3 : index
    %398 = memref.load %arg1[%c3_236] : memref<8xi32, #tpu.memory_space<smem>>
    %c0_i32_237 = arith.constant 0 : i32
    %399 = arith.cmpi ne, %398, %c0_i32_237 : i32
    %400 = arith.extui %399 : i1 to i32
    %c0_i32_238 = arith.constant 0 : i32
    %401 = arith.cmpi ne, %400, %c0_i32_238 : i32
    scf.if %401 {
      %c3_360 = arith.constant 3 : index
      %c0_361 = arith.constant 0 : index
      %c0_362 = arith.constant 0 : index
      %606 = vector.load %arg3[%c3_360, %c0_361, %c0_362] : memref<8x8x128xbf16, #tpu.memory_space<vmem>>, vector<1x8x128xbf16>
      %607 = vector.shape_cast %606 : vector<1x8x128xbf16> to vector<8x128xbf16>
      %c0_363 = arith.constant 0 : index
      %c0_364 = arith.constant 0 : index
      %608 = vector.load %arg14[%c0_363, %c0_364] : memref<8x256xbf16, #tpu.memory_space<vmem>>, vector<8x128xbf16>
      tpu.vector_store %arg14[%c0_363, %c0_364], %607 {strides = array<i32>} : memref<8x256xbf16, #tpu.memory_space<vmem>>, vector<8x128xbf16>,
    } else {
    }
    %c0_239 = arith.constant 0 : index
    %c0_240 = arith.constant 0 : index
    %402 = vector.load %arg14[%c0_239, %c0_240] : memref<8x256xbf16, #tpu.memory_space<vmem>>, vector<8x256xbf16>
    %c0_241 = arith.constant 0 : index
    %c0_242 = arith.constant 0 : index
    %403 = vector.load %arg6[%c0_241, %c0_242] : memref<256x512xbf16, #tpu.memory_space<vmem>>, vector<256x512xbf16>
    %cst_243 = arith.constant dense<0.000000e+00> : vector<8x512xf32>
    %404 = tpu.matmul %402, %403, %cst_243 {dimension_numbers = #tpu.dot_dimension_numbers<[1], [0], [0], [1], [0, 0, 1, 1], [], []>} : vector<8x256xbf16>, vector<256x512xbf16>, vector<8x512xf32> -> vector<8x512xf32>
    %c0_244 = arith.constant 0 : index
    %c0_245 = arith.constant 0 : index
    %405 = vector.load %arg7[%c0_244, %c0_245] : memref<1x512xf32, #tpu.memory_space<vmem>>, vector<1x512xf32>
    %406 = vector.broadcast %405 : vector<1x512xf32> to vector<8x512xf32>
    %407 = arith.addf %404, %406 : vector<8x512xf32>
    %c0_246 = arith.constant 0 : index
    %c0_247 = arith.constant 0 : index
    %408 = vector.load %arg13[%c0_246, %c0_247] : memref<8x128xf32, #tpu.memory_space<vmem>>, vector<8x128xf32>
    %409 = vector.extract_strided_slice %407 {offsets = [0, 0], sizes = [8, 128], strides = [1, 1]} : vector<8x512xf32> to vector<8x128xf32>
    %410 = arith.negf %409 : vector<8x128xf32>
    %411 = math.exp %410 : vector<8x128xf32>
    %cst_248 = arith.constant 1.000000e+00 : f32
    %412 = vector.broadcast %cst_248 : f32 to vector<8x128xf32>
    %413 = arith.addf %412, %411 : vector<8x128xf32>
    %414 = arith.divf %412, %413 : vector<8x128xf32>
    %415 = vector.extract_strided_slice %407 {offsets = [0, 128], sizes = [8, 128], strides = [1, 1]} : vector<8x512xf32> to vector<8x128xf32>
    %416 = arith.negf %415 : vector<8x128xf32>
    %417 = math.exp %416 : vector<8x128xf32>
    %cst_249 = arith.constant 1.000000e+00 : f32
    %418 = vector.broadcast %cst_249 : f32 to vector<8x128xf32>
    %419 = arith.addf %418, %417 : vector<8x128xf32>
    %420 = arith.divf %418, %419 : vector<8x128xf32>
    %421 = vector.extract_strided_slice %407 {offsets = [0, 256], sizes = [8, 128], strides = [1, 1]} : vector<8x512xf32> to vector<8x128xf32>
    %422 = math.tanh %421 : vector<8x128xf32>
    %423 = vector.extract_strided_slice %407 {offsets = [0, 384], sizes = [8, 128], strides = [1, 1]} : vector<8x512xf32> to vector<8x128xf32>
    %424 = arith.negf %423 : vector<8x128xf32>
    %425 = math.exp %424 : vector<8x128xf32>
    %cst_250 = arith.constant 1.000000e+00 : f32
    %426 = vector.broadcast %cst_250 : f32 to vector<8x128xf32>
    %427 = arith.addf %426, %425 : vector<8x128xf32>
    %428 = arith.divf %426, %427 : vector<8x128xf32>
    %429 = arith.mulf %420, %408 : vector<8x128xf32>
    %430 = arith.mulf %414, %422 : vector<8x128xf32>
    %431 = arith.addf %429, %430 : vector<8x128xf32>
    %432 = math.tanh %431 : vector<8x128xf32>
    %433 = arith.mulf %428, %432 : vector<8x128xf32>
    %c0_251 = arith.constant 0 : index
    %c0_252 = arith.constant 0 : index
    %434 = vector.load %arg12[%c0_251, %c0_252] : memref<8x128xf32, #tpu.memory_space<vmem>>, vector<8x128xf32>
    tpu.vector_store %arg12[%c0_251, %c0_252], %433 {strides = array<i32>} : memref<8x128xf32, #tpu.memory_space<vmem>>, vector<8x128xf32>,
    %c0_253 = arith.constant 0 : index
    %c0_254 = arith.constant 0 : index
    %435 = vector.load %arg13[%c0_253, %c0_254] : memref<8x128xf32, #tpu.memory_space<vmem>>, vector<8x128xf32>
    tpu.vector_store %arg13[%c0_253, %c0_254], %431 {strides = array<i32>} : memref<8x128xf32, #tpu.memory_space<vmem>>, vector<8x128xf32>,
    %436 = arith.truncf %433 : vector<8x128xf32> to vector<8x128xbf16>
    %c0_255 = arith.constant 0 : index
    %c128_256 = arith.constant 128 : index
    %437 = vector.load %arg14[%c0_255, %c128_256] : memref<8x256xbf16, #tpu.memory_space<vmem>>, vector<8x128xbf16>
    tpu.vector_store %arg14[%c0_255, %c128_256], %436 {strides = array<i32>} : memref<8x256xbf16, #tpu.memory_space<vmem>>, vector<8x128xbf16>,
    %438 = arith.truncf %433 : vector<8x128xf32> to vector<8x128xbf16>
    %c0_257 = arith.constant 0 : index
    %c0_258 = arith.constant 0 : index
    %439 = vector.load %arg9[%c0_257, %c0_258] : memref<128x128xbf16, #tpu.memory_space<vmem>>, vector<128x128xbf16>
    %cst_259 = arith.constant dense<0.000000e+00> : vector<8x128xf32>
    %440 = tpu.matmul %438, %439, %cst_259 {dimension_numbers = #tpu.dot_dimension_numbers<[1], [0], [0], [1], [0, 0, 1, 1], [], []>} : vector<8x128xbf16>, vector<128x128xbf16>, vector<8x128xf32> -> vector<8x128xf32>
    %c0_260 = arith.constant 0 : index
    %c0_261 = arith.constant 0 : index
    %441 = vector.load %arg10[%c0_260, %c0_261] : memref<1x128xf32, #tpu.memory_space<vmem>>, vector<1x128xf32>
    %442 = vector.broadcast %441 : vector<1x128xf32> to vector<8x128xf32>
    %443 = arith.addf %440, %442 : vector<8x128xf32>
    %c3_262 = arith.constant 3 : index
    %c0_263 = arith.constant 0 : index
    %c0_264 = arith.constant 0 : index
    %444 = vector.load %arg11[%c3_262, %c0_263, %c0_264] : memref<7x8x128xf32, #tpu.memory_space<vmem>>, vector<1x8x128xf32>
    %445 = vector.shape_cast %444 : vector<1x8x128xf32> to vector<8x128xf32>
    %446 = vector.shape_cast %443 : vector<8x128xf32> to vector<1x8x128xf32>
    tpu.vector_store %arg11[%c3_262, %c0_263, %c0_264], %446 {strides = array<i32>} : memref<7x8x128xf32, #tpu.memory_space<vmem>>, vector<1x8x128xf32>,
    %c4_265 = arith.constant 4 : index
    %447 = memref.load %arg1[%c4_265] : memref<8xi32, #tpu.memory_space<smem>>
    %c0_i32_266 = arith.constant 0 : i32
    %448 = arith.cmpi eq, %447, %c0_i32_266 : i32
    %449 = arith.extui %448 : i1 to i32
    %c0_i32_267 = arith.constant 0 : i32
    %450 = arith.cmpi ne, %449, %c0_i32_267 : i32
    scf.if %450 {
      %606 = tpu.iota {dimensions = array<i32: 1>} : vector<8x128xi32>
      %c16_i32 = arith.constant 16 : i32
      %607 = vector.broadcast %c16_i32 : i32 to vector<8x128xi32>
      %608 = arith.cmpi slt, %606, %607 : vector<8x128xi32>
      %cst_360 = arith.constant -1.000000e+30 : f32
      %609 = vector.broadcast %cst_360 : f32 to vector<8x128xf32>
      %610 = arith.select %608, %443, %609 : vector<8x128xi1>, vector<8x128xf32>
      %cst_361 = arith.constant dense<0xFF800000> : vector<8xf32>
      %611 = vector.multi_reduction <maximumf>, %610, %cst_361 [1] : vector<8x128xf32> to vector<8xf32>
      %612 = vector.shape_cast %611 : vector<8xf32> to vector<8x1xf32>
      %613 = vector.broadcast %612 : vector<8x1xf32> to vector<8x128xf32>
      %614 = arith.cmpf oge, %610, %613 : vector<8x128xf32>
      %c128_i32 = arith.constant 128 : i32
      %615 = vector.broadcast %c128_i32 : i32 to vector<8x128xi32>
      %616 = arith.select %614, %606, %615 : vector<8x128xi1>, vector<8x128xi32>
      %cst_362 = arith.constant dense<2147483647> : vector<8xi32>
      %617 = vector.multi_reduction <minsi>, %616, %cst_362 [1] : vector<8x128xi32> to vector<8xi32>
      %618 = vector.shape_cast %617 : vector<8xi32> to vector<8x1xi32>
      %619 = vector.broadcast %618 : vector<8x1xi32> to vector<8x128xi32>
      %620 = arith.cmpi eq, %606, %619 : vector<8x128xi32>
      %621 = arith.extui %620 : vector<8x128xi1> to vector<8x128xi32>
      %622 = arith.sitofp %621 : vector<8x128xi32> to vector<8x128xf32>
      %623 = arith.truncf %622 : vector<8x128xf32> to vector<8x128xbf16>
      %c0_363 = arith.constant 0 : index
      %c0_364 = arith.constant 0 : index
      %624 = vector.load %arg8[%c0_363, %c0_364] : memref<128x128xbf16, #tpu.memory_space<vmem>>, vector<128x128xbf16>
      %cst_365 = arith.constant dense<0.000000e+00> : vector<8x128xf32>
      %625 = tpu.matmul %623, %624, %cst_365 {dimension_numbers = #tpu.dot_dimension_numbers<[1], [0], [0], [1], [0, 0, 1, 1], [], []>} : vector<8x128xbf16>, vector<128x128xbf16>, vector<8x128xf32> -> vector<8x128xf32>
      %626 = arith.truncf %625 : vector<8x128xf32> to vector<8x128xbf16>
      %c0_366 = arith.constant 0 : index
      %c0_367 = arith.constant 0 : index
      %627 = vector.load %arg14[%c0_366, %c0_367] : memref<8x256xbf16, #tpu.memory_space<vmem>>, vector<8x128xbf16>
      tpu.vector_store %arg14[%c0_366, %c0_367], %626 {strides = array<i32>} : memref<8x256xbf16, #tpu.memory_space<vmem>>, vector<8x128xbf16>,
    } else {
    }
    %c4_268 = arith.constant 4 : index
    %451 = memref.load %arg1[%c4_268] : memref<8xi32, #tpu.memory_space<smem>>
    %c0_i32_269 = arith.constant 0 : i32
    %452 = arith.cmpi ne, %451, %c0_i32_269 : i32
    %453 = arith.extui %452 : i1 to i32
    %c0_i32_270 = arith.constant 0 : i32
    %454 = arith.cmpi ne, %453, %c0_i32_270 : i32
    scf.if %454 {
      %c4_360 = arith.constant 4 : index
      %c0_361 = arith.constant 0 : index
      %c0_362 = arith.constant 0 : index
      %606 = vector.load %arg3[%c4_360, %c0_361, %c0_362] : memref<8x8x128xbf16, #tpu.memory_space<vmem>>, vector<1x8x128xbf16>
      %607 = vector.shape_cast %606 : vector<1x8x128xbf16> to vector<8x128xbf16>
      %c0_363 = arith.constant 0 : index
      %c0_364 = arith.constant 0 : index
      %608 = vector.load %arg14[%c0_363, %c0_364] : memref<8x256xbf16, #tpu.memory_space<vmem>>, vector<8x128xbf16>
      tpu.vector_store %arg14[%c0_363, %c0_364], %607 {strides = array<i32>} : memref<8x256xbf16, #tpu.memory_space<vmem>>, vector<8x128xbf16>,
    } else {
    }
    %c0_271 = arith.constant 0 : index
    %c0_272 = arith.constant 0 : index
    %455 = vector.load %arg14[%c0_271, %c0_272] : memref<8x256xbf16, #tpu.memory_space<vmem>>, vector<8x256xbf16>
    %c0_273 = arith.constant 0 : index
    %c0_274 = arith.constant 0 : index
    %456 = vector.load %arg6[%c0_273, %c0_274] : memref<256x512xbf16, #tpu.memory_space<vmem>>, vector<256x512xbf16>
    %cst_275 = arith.constant dense<0.000000e+00> : vector<8x512xf32>
    %457 = tpu.matmul %455, %456, %cst_275 {dimension_numbers = #tpu.dot_dimension_numbers<[1], [0], [0], [1], [0, 0, 1, 1], [], []>} : vector<8x256xbf16>, vector<256x512xbf16>, vector<8x512xf32> -> vector<8x512xf32>
    %c0_276 = arith.constant 0 : index
    %c0_277 = arith.constant 0 : index
    %458 = vector.load %arg7[%c0_276, %c0_277] : memref<1x512xf32, #tpu.memory_space<vmem>>, vector<1x512xf32>
    %459 = vector.broadcast %458 : vector<1x512xf32> to vector<8x512xf32>
    %460 = arith.addf %457, %459 : vector<8x512xf32>
    %c0_278 = arith.constant 0 : index
    %c0_279 = arith.constant 0 : index
    %461 = vector.load %arg13[%c0_278, %c0_279] : memref<8x128xf32, #tpu.memory_space<vmem>>, vector<8x128xf32>
    %462 = vector.extract_strided_slice %460 {offsets = [0, 0], sizes = [8, 128], strides = [1, 1]} : vector<8x512xf32> to vector<8x128xf32>
    %463 = arith.negf %462 : vector<8x128xf32>
    %464 = math.exp %463 : vector<8x128xf32>
    %cst_280 = arith.constant 1.000000e+00 : f32
    %465 = vector.broadcast %cst_280 : f32 to vector<8x128xf32>
    %466 = arith.addf %465, %464 : vector<8x128xf32>
    %467 = arith.divf %465, %466 : vector<8x128xf32>
    %468 = vector.extract_strided_slice %460 {offsets = [0, 128], sizes = [8, 128], strides = [1, 1]} : vector<8x512xf32> to vector<8x128xf32>
    %469 = arith.negf %468 : vector<8x128xf32>
    %470 = math.exp %469 : vector<8x128xf32>
    %cst_281 = arith.constant 1.000000e+00 : f32
    %471 = vector.broadcast %cst_281 : f32 to vector<8x128xf32>
    %472 = arith.addf %471, %470 : vector<8x128xf32>
    %473 = arith.divf %471, %472 : vector<8x128xf32>
    %474 = vector.extract_strided_slice %460 {offsets = [0, 256], sizes = [8, 128], strides = [1, 1]} : vector<8x512xf32> to vector<8x128xf32>
    %475 = math.tanh %474 : vector<8x128xf32>
    %476 = vector.extract_strided_slice %460 {offsets = [0, 384], sizes = [8, 128], strides = [1, 1]} : vector<8x512xf32> to vector<8x128xf32>
    %477 = arith.negf %476 : vector<8x128xf32>
    %478 = math.exp %477 : vector<8x128xf32>
    %cst_282 = arith.constant 1.000000e+00 : f32
    %479 = vector.broadcast %cst_282 : f32 to vector<8x128xf32>
    %480 = arith.addf %479, %478 : vector<8x128xf32>
    %481 = arith.divf %479, %480 : vector<8x128xf32>
    %482 = arith.mulf %473, %461 : vector<8x128xf32>
    %483 = arith.mulf %467, %475 : vector<8x128xf32>
    %484 = arith.addf %482, %483 : vector<8x128xf32>
    %485 = math.tanh %484 : vector<8x128xf32>
    %486 = arith.mulf %481, %485 : vector<8x128xf32>
    %c0_283 = arith.constant 0 : index
    %c0_284 = arith.constant 0 : index
    %487 = vector.load %arg12[%c0_283, %c0_284] : memref<8x128xf32, #tpu.memory_space<vmem>>, vector<8x128xf32>
    tpu.vector_store %arg12[%c0_283, %c0_284], %486 {strides = array<i32>} : memref<8x128xf32, #tpu.memory_space<vmem>>, vector<8x128xf32>,
    %c0_285 = arith.constant 0 : index
    %c0_286 = arith.constant 0 : index
    %488 = vector.load %arg13[%c0_285, %c0_286] : memref<8x128xf32, #tpu.memory_space<vmem>>, vector<8x128xf32>
    tpu.vector_store %arg13[%c0_285, %c0_286], %484 {strides = array<i32>} : memref<8x128xf32, #tpu.memory_space<vmem>>, vector<8x128xf32>,
    %489 = arith.truncf %486 : vector<8x128xf32> to vector<8x128xbf16>
    %c0_287 = arith.constant 0 : index
    %c128_288 = arith.constant 128 : index
    %490 = vector.load %arg14[%c0_287, %c128_288] : memref<8x256xbf16, #tpu.memory_space<vmem>>, vector<8x128xbf16>
    tpu.vector_store %arg14[%c0_287, %c128_288], %489 {strides = array<i32>} : memref<8x256xbf16, #tpu.memory_space<vmem>>, vector<8x128xbf16>,
    %491 = arith.truncf %486 : vector<8x128xf32> to vector<8x128xbf16>
    %c0_289 = arith.constant 0 : index
    %c0_290 = arith.constant 0 : index
    %492 = vector.load %arg9[%c0_289, %c0_290] : memref<128x128xbf16, #tpu.memory_space<vmem>>, vector<128x128xbf16>
    %cst_291 = arith.constant dense<0.000000e+00> : vector<8x128xf32>
    %493 = tpu.matmul %491, %492, %cst_291 {dimension_numbers = #tpu.dot_dimension_numbers<[1], [0], [0], [1], [0, 0, 1, 1], [], []>} : vector<8x128xbf16>, vector<128x128xbf16>, vector<8x128xf32> -> vector<8x128xf32>
    %c0_292 = arith.constant 0 : index
    %c0_293 = arith.constant 0 : index
    %494 = vector.load %arg10[%c0_292, %c0_293] : memref<1x128xf32, #tpu.memory_space<vmem>>, vector<1x128xf32>
    %495 = vector.broadcast %494 : vector<1x128xf32> to vector<8x128xf32>
    %496 = arith.addf %493, %495 : vector<8x128xf32>
    %c4_294 = arith.constant 4 : index
    %c0_295 = arith.constant 0 : index
    %c0_296 = arith.constant 0 : index
    %497 = vector.load %arg11[%c4_294, %c0_295, %c0_296] : memref<7x8x128xf32, #tpu.memory_space<vmem>>, vector<1x8x128xf32>
    %498 = vector.shape_cast %497 : vector<1x8x128xf32> to vector<8x128xf32>
    %499 = vector.shape_cast %496 : vector<8x128xf32> to vector<1x8x128xf32>
    tpu.vector_store %arg11[%c4_294, %c0_295, %c0_296], %499 {strides = array<i32>} : memref<7x8x128xf32, #tpu.memory_space<vmem>>, vector<1x8x128xf32>,
    %c5_297 = arith.constant 5 : index
    %500 = memref.load %arg1[%c5_297] : memref<8xi32, #tpu.memory_space<smem>>
    %c0_i32_298 = arith.constant 0 : i32
    %501 = arith.cmpi eq, %500, %c0_i32_298 : i32
    %502 = arith.extui %501 : i1 to i32
    %c0_i32_299 = arith.constant 0 : i32
    %503 = arith.cmpi ne, %502, %c0_i32_299 : i32
    scf.if %503 {
      %606 = tpu.iota {dimensions = array<i32: 1>} : vector<8x128xi32>
      %c16_i32 = arith.constant 16 : i32
      %607 = vector.broadcast %c16_i32 : i32 to vector<8x128xi32>
      %608 = arith.cmpi slt, %606, %607 : vector<8x128xi32>
      %cst_360 = arith.constant -1.000000e+30 : f32
      %609 = vector.broadcast %cst_360 : f32 to vector<8x128xf32>
      %610 = arith.select %608, %496, %609 : vector<8x128xi1>, vector<8x128xf32>
      %cst_361 = arith.constant dense<0xFF800000> : vector<8xf32>
      %611 = vector.multi_reduction <maximumf>, %610, %cst_361 [1] : vector<8x128xf32> to vector<8xf32>
      %612 = vector.shape_cast %611 : vector<8xf32> to vector<8x1xf32>
      %613 = vector.broadcast %612 : vector<8x1xf32> to vector<8x128xf32>
      %614 = arith.cmpf oge, %610, %613 : vector<8x128xf32>
      %c128_i32 = arith.constant 128 : i32
      %615 = vector.broadcast %c128_i32 : i32 to vector<8x128xi32>
      %616 = arith.select %614, %606, %615 : vector<8x128xi1>, vector<8x128xi32>
      %cst_362 = arith.constant dense<2147483647> : vector<8xi32>
      %617 = vector.multi_reduction <minsi>, %616, %cst_362 [1] : vector<8x128xi32> to vector<8xi32>
      %618 = vector.shape_cast %617 : vector<8xi32> to vector<8x1xi32>
      %619 = vector.broadcast %618 : vector<8x1xi32> to vector<8x128xi32>
      %620 = arith.cmpi eq, %606, %619 : vector<8x128xi32>
      %621 = arith.extui %620 : vector<8x128xi1> to vector<8x128xi32>
      %622 = arith.sitofp %621 : vector<8x128xi32> to vector<8x128xf32>
      %623 = arith.truncf %622 : vector<8x128xf32> to vector<8x128xbf16>
      %c0_363 = arith.constant 0 : index
      %c0_364 = arith.constant 0 : index
      %624 = vector.load %arg8[%c0_363, %c0_364] : memref<128x128xbf16, #tpu.memory_space<vmem>>, vector<128x128xbf16>
      %cst_365 = arith.constant dense<0.000000e+00> : vector<8x128xf32>
      %625 = tpu.matmul %623, %624, %cst_365 {dimension_numbers = #tpu.dot_dimension_numbers<[1], [0], [0], [1], [0, 0, 1, 1], [], []>} : vector<8x128xbf16>, vector<128x128xbf16>, vector<8x128xf32> -> vector<8x128xf32>
      %626 = arith.truncf %625 : vector<8x128xf32> to vector<8x128xbf16>
      %c0_366 = arith.constant 0 : index
      %c0_367 = arith.constant 0 : index
      %627 = vector.load %arg14[%c0_366, %c0_367] : memref<8x256xbf16, #tpu.memory_space<vmem>>, vector<8x128xbf16>
      tpu.vector_store %arg14[%c0_366, %c0_367], %626 {strides = array<i32>} : memref<8x256xbf16, #tpu.memory_space<vmem>>, vector<8x128xbf16>,
    } else {
    }
    %c5_300 = arith.constant 5 : index
    %504 = memref.load %arg1[%c5_300] : memref<8xi32, #tpu.memory_space<smem>>
    %c0_i32_301 = arith.constant 0 : i32
    %505 = arith.cmpi ne, %504, %c0_i32_301 : i32
    %506 = arith.extui %505 : i1 to i32
    %c0_i32_302 = arith.constant 0 : i32
    %507 = arith.cmpi ne, %506, %c0_i32_302 : i32
    scf.if %507 {
      %c5_360 = arith.constant 5 : index
      %c0_361 = arith.constant 0 : index
      %c0_362 = arith.constant 0 : index
      %606 = vector.load %arg3[%c5_360, %c0_361, %c0_362] : memref<8x8x128xbf16, #tpu.memory_space<vmem>>, vector<1x8x128xbf16>
      %607 = vector.shape_cast %606 : vector<1x8x128xbf16> to vector<8x128xbf16>
      %c0_363 = arith.constant 0 : index
      %c0_364 = arith.constant 0 : index
      %608 = vector.load %arg14[%c0_363, %c0_364] : memref<8x256xbf16, #tpu.memory_space<vmem>>, vector<8x128xbf16>
      tpu.vector_store %arg14[%c0_363, %c0_364], %607 {strides = array<i32>} : memref<8x256xbf16, #tpu.memory_space<vmem>>, vector<8x128xbf16>,
    } else {
    }
    %c0_303 = arith.constant 0 : index
    %c0_304 = arith.constant 0 : index
    %508 = vector.load %arg14[%c0_303, %c0_304] : memref<8x256xbf16, #tpu.memory_space<vmem>>, vector<8x256xbf16>
    %c0_305 = arith.constant 0 : index
    %c0_306 = arith.constant 0 : index
    %509 = vector.load %arg6[%c0_305, %c0_306] : memref<256x512xbf16, #tpu.memory_space<vmem>>, vector<256x512xbf16>
    %cst_307 = arith.constant dense<0.000000e+00> : vector<8x512xf32>
    %510 = tpu.matmul %508, %509, %cst_307 {dimension_numbers = #tpu.dot_dimension_numbers<[1], [0], [0], [1], [0, 0, 1, 1], [], []>} : vector<8x256xbf16>, vector<256x512xbf16>, vector<8x512xf32> -> vector<8x512xf32>
    %c0_308 = arith.constant 0 : index
    %c0_309 = arith.constant 0 : index
    %511 = vector.load %arg7[%c0_308, %c0_309] : memref<1x512xf32, #tpu.memory_space<vmem>>, vector<1x512xf32>
    %512 = vector.broadcast %511 : vector<1x512xf32> to vector<8x512xf32>
    %513 = arith.addf %510, %512 : vector<8x512xf32>
    %c0_310 = arith.constant 0 : index
    %c0_311 = arith.constant 0 : index
    %514 = vector.load %arg13[%c0_310, %c0_311] : memref<8x128xf32, #tpu.memory_space<vmem>>, vector<8x128xf32>
    %515 = vector.extract_strided_slice %513 {offsets = [0, 0], sizes = [8, 128], strides = [1, 1]} : vector<8x512xf32> to vector<8x128xf32>
    %516 = arith.negf %515 : vector<8x128xf32>
    %517 = math.exp %516 : vector<8x128xf32>
    %cst_312 = arith.constant 1.000000e+00 : f32
    %518 = vector.broadcast %cst_312 : f32 to vector<8x128xf32>
    %519 = arith.addf %518, %517 : vector<8x128xf32>
    %520 = arith.divf %518, %519 : vector<8x128xf32>
    %521 = vector.extract_strided_slice %513 {offsets = [0, 128], sizes = [8, 128], strides = [1, 1]} : vector<8x512xf32> to vector<8x128xf32>
    %522 = arith.negf %521 : vector<8x128xf32>
    %523 = math.exp %522 : vector<8x128xf32>
    %cst_313 = arith.constant 1.000000e+00 : f32
    %524 = vector.broadcast %cst_313 : f32 to vector<8x128xf32>
    %525 = arith.addf %524, %523 : vector<8x128xf32>
    %526 = arith.divf %524, %525 : vector<8x128xf32>
    %527 = vector.extract_strided_slice %513 {offsets = [0, 256], sizes = [8, 128], strides = [1, 1]} : vector<8x512xf32> to vector<8x128xf32>
    %528 = math.tanh %527 : vector<8x128xf32>
    %529 = vector.extract_strided_slice %513 {offsets = [0, 384], sizes = [8, 128], strides = [1, 1]} : vector<8x512xf32> to vector<8x128xf32>
    %530 = arith.negf %529 : vector<8x128xf32>
    %531 = math.exp %530 : vector<8x128xf32>
    %cst_314 = arith.constant 1.000000e+00 : f32
    %532 = vector.broadcast %cst_314 : f32 to vector<8x128xf32>
    %533 = arith.addf %532, %531 : vector<8x128xf32>
    %534 = arith.divf %532, %533 : vector<8x128xf32>
    %535 = arith.mulf %526, %514 : vector<8x128xf32>
    %536 = arith.mulf %520, %528 : vector<8x128xf32>
    %537 = arith.addf %535, %536 : vector<8x128xf32>
    %538 = math.tanh %537 : vector<8x128xf32>
    %539 = arith.mulf %534, %538 : vector<8x128xf32>
    %c0_315 = arith.constant 0 : index
    %c0_316 = arith.constant 0 : index
    %540 = vector.load %arg12[%c0_315, %c0_316] : memref<8x128xf32, #tpu.memory_space<vmem>>, vector<8x128xf32>
    tpu.vector_store %arg12[%c0_315, %c0_316], %539 {strides = array<i32>} : memref<8x128xf32, #tpu.memory_space<vmem>>, vector<8x128xf32>,
    %c0_317 = arith.constant 0 : index
    %c0_318 = arith.constant 0 : index
    %541 = vector.load %arg13[%c0_317, %c0_318] : memref<8x128xf32, #tpu.memory_space<vmem>>, vector<8x128xf32>
    tpu.vector_store %arg13[%c0_317, %c0_318], %537 {strides = array<i32>} : memref<8x128xf32, #tpu.memory_space<vmem>>, vector<8x128xf32>,
    %542 = arith.truncf %539 : vector<8x128xf32> to vector<8x128xbf16>
    %c0_319 = arith.constant 0 : index
    %c128_320 = arith.constant 128 : index
    %543 = vector.load %arg14[%c0_319, %c128_320] : memref<8x256xbf16, #tpu.memory_space<vmem>>, vector<8x128xbf16>
    tpu.vector_store %arg14[%c0_319, %c128_320], %542 {strides = array<i32>} : memref<8x256xbf16, #tpu.memory_space<vmem>>, vector<8x128xbf16>,
    %544 = arith.truncf %539 : vector<8x128xf32> to vector<8x128xbf16>
    %c0_321 = arith.constant 0 : index
    %c0_322 = arith.constant 0 : index
    %545 = vector.load %arg9[%c0_321, %c0_322] : memref<128x128xbf16, #tpu.memory_space<vmem>>, vector<128x128xbf16>
    %cst_323 = arith.constant dense<0.000000e+00> : vector<8x128xf32>
    %546 = tpu.matmul %544, %545, %cst_323 {dimension_numbers = #tpu.dot_dimension_numbers<[1], [0], [0], [1], [0, 0, 1, 1], [], []>} : vector<8x128xbf16>, vector<128x128xbf16>, vector<8x128xf32> -> vector<8x128xf32>
    %c0_324 = arith.constant 0 : index
    %c0_325 = arith.constant 0 : index
    %547 = vector.load %arg10[%c0_324, %c0_325] : memref<1x128xf32, #tpu.memory_space<vmem>>, vector<1x128xf32>
    %548 = vector.broadcast %547 : vector<1x128xf32> to vector<8x128xf32>
    %549 = arith.addf %546, %548 : vector<8x128xf32>
    %c5_326 = arith.constant 5 : index
    %c0_327 = arith.constant 0 : index
    %c0_328 = arith.constant 0 : index
    %550 = vector.load %arg11[%c5_326, %c0_327, %c0_328] : memref<7x8x128xf32, #tpu.memory_space<vmem>>, vector<1x8x128xf32>
    %551 = vector.shape_cast %550 : vector<1x8x128xf32> to vector<8x128xf32>
    %552 = vector.shape_cast %549 : vector<8x128xf32> to vector<1x8x128xf32>
    tpu.vector_store %arg11[%c5_326, %c0_327, %c0_328], %552 {strides = array<i32>} : memref<7x8x128xf32, #tpu.memory_space<vmem>>, vector<1x8x128xf32>,
    %c6 = arith.constant 6 : index
    %553 = memref.load %arg1[%c6] : memref<8xi32, #tpu.memory_space<smem>>
    %c0_i32_329 = arith.constant 0 : i32
    %554 = arith.cmpi eq, %553, %c0_i32_329 : i32
    %555 = arith.extui %554 : i1 to i32
    %c0_i32_330 = arith.constant 0 : i32
    %556 = arith.cmpi ne, %555, %c0_i32_330 : i32
    scf.if %556 {
      %606 = tpu.iota {dimensions = array<i32: 1>} : vector<8x128xi32>
      %c16_i32 = arith.constant 16 : i32
      %607 = vector.broadcast %c16_i32 : i32 to vector<8x128xi32>
      %608 = arith.cmpi slt, %606, %607 : vector<8x128xi32>
      %cst_360 = arith.constant -1.000000e+30 : f32
      %609 = vector.broadcast %cst_360 : f32 to vector<8x128xf32>
      %610 = arith.select %608, %549, %609 : vector<8x128xi1>, vector<8x128xf32>
      %cst_361 = arith.constant dense<0xFF800000> : vector<8xf32>
      %611 = vector.multi_reduction <maximumf>, %610, %cst_361 [1] : vector<8x128xf32> to vector<8xf32>
      %612 = vector.shape_cast %611 : vector<8xf32> to vector<8x1xf32>
      %613 = vector.broadcast %612 : vector<8x1xf32> to vector<8x128xf32>
      %614 = arith.cmpf oge, %610, %613 : vector<8x128xf32>
      %c128_i32 = arith.constant 128 : i32
      %615 = vector.broadcast %c128_i32 : i32 to vector<8x128xi32>
      %616 = arith.select %614, %606, %615 : vector<8x128xi1>, vector<8x128xi32>
      %cst_362 = arith.constant dense<2147483647> : vector<8xi32>
      %617 = vector.multi_reduction <minsi>, %616, %cst_362 [1] : vector<8x128xi32> to vector<8xi32>
      %618 = vector.shape_cast %617 : vector<8xi32> to vector<8x1xi32>
      %619 = vector.broadcast %618 : vector<8x1xi32> to vector<8x128xi32>
      %620 = arith.cmpi eq, %606, %619 : vector<8x128xi32>
      %621 = arith.extui %620 : vector<8x128xi1> to vector<8x128xi32>
      %622 = arith.sitofp %621 : vector<8x128xi32> to vector<8x128xf32>
      %623 = arith.truncf %622 : vector<8x128xf32> to vector<8x128xbf16>
      %c0_363 = arith.constant 0 : index
      %c0_364 = arith.constant 0 : index
      %624 = vector.load %arg8[%c0_363, %c0_364] : memref<128x128xbf16, #tpu.memory_space<vmem>>, vector<128x128xbf16>
      %cst_365 = arith.constant dense<0.000000e+00> : vector<8x128xf32>
      %625 = tpu.matmul %623, %624, %cst_365 {dimension_numbers = #tpu.dot_dimension_numbers<[1], [0], [0], [1], [0, 0, 1, 1], [], []>} : vector<8x128xbf16>, vector<128x128xbf16>, vector<8x128xf32> -> vector<8x128xf32>
      %626 = arith.truncf %625 : vector<8x128xf32> to vector<8x128xbf16>
      %c0_366 = arith.constant 0 : index
      %c0_367 = arith.constant 0 : index
      %627 = vector.load %arg14[%c0_366, %c0_367] : memref<8x256xbf16, #tpu.memory_space<vmem>>, vector<8x128xbf16>
      tpu.vector_store %arg14[%c0_366, %c0_367], %626 {strides = array<i32>} : memref<8x256xbf16, #tpu.memory_space<vmem>>, vector<8x128xbf16>,
    } else {
    }
    %c6_331 = arith.constant 6 : index
    %557 = memref.load %arg1[%c6_331] : memref<8xi32, #tpu.memory_space<smem>>
    %c0_i32_332 = arith.constant 0 : i32
    %558 = arith.cmpi ne, %557, %c0_i32_332 : i32
    %559 = arith.extui %558 : i1 to i32
    %c0_i32_333 = arith.constant 0 : i32
    %560 = arith.cmpi ne, %559, %c0_i32_333 : i32
    scf.if %560 {
      %c6_360 = arith.constant 6 : index
      %c0_361 = arith.constant 0 : index
      %c0_362 = arith.constant 0 : index
      %606 = vector.load %arg3[%c6_360, %c0_361, %c0_362] : memref<8x8x128xbf16, #tpu.memory_space<vmem>>, vector<1x8x128xbf16>
      %607 = vector.shape_cast %606 : vector<1x8x128xbf16> to vector<8x128xbf16>
      %c0_363 = arith.constant 0 : index
      %c0_364 = arith.constant 0 : index
      %608 = vector.load %arg14[%c0_363, %c0_364] : memref<8x256xbf16, #tpu.memory_space<vmem>>, vector<8x128xbf16>
      tpu.vector_store %arg14[%c0_363, %c0_364], %607 {strides = array<i32>} : memref<8x256xbf16, #tpu.memory_space<vmem>>, vector<8x128xbf16>,
    } else {
    }
    %c0_334 = arith.constant 0 : index
    %c0_335 = arith.constant 0 : index
    %561 = vector.load %arg14[%c0_334, %c0_335] : memref<8x256xbf16, #tpu.memory_space<vmem>>, vector<8x256xbf16>
    %c0_336 = arith.constant 0 : index
    %c0_337 = arith.constant 0 : index
    %562 = vector.load %arg6[%c0_336, %c0_337] : memref<256x512xbf16, #tpu.memory_space<vmem>>, vector<256x512xbf16>
    %cst_338 = arith.constant dense<0.000000e+00> : vector<8x512xf32>
    %563 = tpu.matmul %561, %562, %cst_338 {dimension_numbers = #tpu.dot_dimension_numbers<[1], [0], [0], [1], [0, 0, 1, 1], [], []>} : vector<8x256xbf16>, vector<256x512xbf16>, vector<8x512xf32> -> vector<8x512xf32>
    %c0_339 = arith.constant 0 : index
    %c0_340 = arith.constant 0 : index
    %564 = vector.load %arg7[%c0_339, %c0_340] : memref<1x512xf32, #tpu.memory_space<vmem>>, vector<1x512xf32>
    %565 = vector.broadcast %564 : vector<1x512xf32> to vector<8x512xf32>
    %566 = arith.addf %563, %565 : vector<8x512xf32>
    %c0_341 = arith.constant 0 : index
    %c0_342 = arith.constant 0 : index
    %567 = vector.load %arg13[%c0_341, %c0_342] : memref<8x128xf32, #tpu.memory_space<vmem>>, vector<8x128xf32>
    %568 = vector.extract_strided_slice %566 {offsets = [0, 0], sizes = [8, 128], strides = [1, 1]} : vector<8x512xf32> to vector<8x128xf32>
    %569 = arith.negf %568 : vector<8x128xf32>
    %570 = math.exp %569 : vector<8x128xf32>
    %cst_343 = arith.constant 1.000000e+00 : f32
    %571 = vector.broadcast %cst_343 : f32 to vector<8x128xf32>
    %572 = arith.addf %571, %570 : vector<8x128xf32>
    %573 = arith.divf %571, %572 : vector<8x128xf32>
    %574 = vector.extract_strided_slice %566 {offsets = [0, 128], sizes = [8, 128], strides = [1, 1]} : vector<8x512xf32> to vector<8x128xf32>
    %575 = arith.negf %574 : vector<8x128xf32>
    %576 = math.exp %575 : vector<8x128xf32>
    %cst_344 = arith.constant 1.000000e+00 : f32
    %577 = vector.broadcast %cst_344 : f32 to vector<8x128xf32>
    %578 = arith.addf %577, %576 : vector<8x128xf32>
    %579 = arith.divf %577, %578 : vector<8x128xf32>
    %580 = vector.extract_strided_slice %566 {offsets = [0, 256], sizes = [8, 128], strides = [1, 1]} : vector<8x512xf32> to vector<8x128xf32>
    %581 = math.tanh %580 : vector<8x128xf32>
    %582 = vector.extract_strided_slice %566 {offsets = [0, 384], sizes = [8, 128], strides = [1, 1]} : vector<8x512xf32> to vector<8x128xf32>
    %583 = arith.negf %582 : vector<8x128xf32>
    %584 = math.exp %583 : vector<8x128xf32>
    %cst_345 = arith.constant 1.000000e+00 : f32
    %585 = vector.broadcast %cst_345 : f32 to vector<8x128xf32>
    %586 = arith.addf %585, %584 : vector<8x128xf32>
    %587 = arith.divf %585, %586 : vector<8x128xf32>
    %588 = arith.mulf %579, %567 : vector<8x128xf32>
    %589 = arith.mulf %573, %581 : vector<8x128xf32>
    %590 = arith.addf %588, %589 : vector<8x128xf32>
    %591 = math.tanh %590 : vector<8x128xf32>
    %592 = arith.mulf %587, %591 : vector<8x128xf32>
    %c0_346 = arith.constant 0 : index
    %c0_347 = arith.constant 0 : index
    %593 = vector.load %arg12[%c0_346, %c0_347] : memref<8x128xf32, #tpu.memory_space<vmem>>, vector<8x128xf32>
    tpu.vector_store %arg12[%c0_346, %c0_347], %592 {strides = array<i32>} : memref<8x128xf32, #tpu.memory_space<vmem>>, vector<8x128xf32>,
    %c0_348 = arith.constant 0 : index
    %c0_349 = arith.constant 0 : index
    %594 = vector.load %arg13[%c0_348, %c0_349] : memref<8x128xf32, #tpu.memory_space<vmem>>, vector<8x128xf32>
    tpu.vector_store %arg13[%c0_348, %c0_349], %590 {strides = array<i32>} : memref<8x128xf32, #tpu.memory_space<vmem>>, vector<8x128xf32>,
    %595 = arith.truncf %592 : vector<8x128xf32> to vector<8x128xbf16>
    %c0_350 = arith.constant 0 : index
    %c128_351 = arith.constant 128 : index
    %596 = vector.load %arg14[%c0_350, %c128_351] : memref<8x256xbf16, #tpu.memory_space<vmem>>, vector<8x128xbf16>
    tpu.vector_store %arg14[%c0_350, %c128_351], %595 {strides = array<i32>} : memref<8x256xbf16, #tpu.memory_space<vmem>>, vector<8x128xbf16>,
    %597 = arith.truncf %592 : vector<8x128xf32> to vector<8x128xbf16>
    %c0_352 = arith.constant 0 : index
    %c0_353 = arith.constant 0 : index
    %598 = vector.load %arg9[%c0_352, %c0_353] : memref<128x128xbf16, #tpu.memory_space<vmem>>, vector<128x128xbf16>
    %cst_354 = arith.constant dense<0.000000e+00> : vector<8x128xf32>
    %599 = tpu.matmul %597, %598, %cst_354 {dimension_numbers = #tpu.dot_dimension_numbers<[1], [0], [0], [1], [0, 0, 1, 1], [], []>} : vector<8x128xbf16>, vector<128x128xbf16>, vector<8x128xf32> -> vector<8x128xf32>
    %c0_355 = arith.constant 0 : index
    %c0_356 = arith.constant 0 : index
    %600 = vector.load %arg10[%c0_355, %c0_356] : memref<1x128xf32, #tpu.memory_space<vmem>>, vector<1x128xf32>
    %601 = vector.broadcast %600 : vector<1x128xf32> to vector<8x128xf32>
    %602 = arith.addf %599, %601 : vector<8x128xf32>
    %c6_357 = arith.constant 6 : index
    %c0_358 = arith.constant 0 : index
    %c0_359 = arith.constant 0 : index
    %603 = vector.load %arg11[%c6_357, %c0_358, %c0_359] : memref<7x8x128xf32, #tpu.memory_space<vmem>>, vector<1x8x128xf32>
    %604 = vector.shape_cast %603 : vector<1x8x128xf32> to vector<8x128xf32>
    %605 = vector.shape_cast %602 : vector<8x128xf32> to vector<1x8x128xf32>
    tpu.vector_store %arg11[%c6_357, %c0_358, %c0_359], %605 {strides = array<i32>} : memref<7x8x128xf32, #tpu.memory_space<vmem>>, vector<1x8x128xf32>,
    return
  }
  func.func @transform_0(%arg0: i32, %arg1: memref<8xi32, #tpu.memory_space<smem>>) -> (i32, i32, i32) {
    %c0_i32 = arith.constant 0 : i32
    %c0_i32_0 = arith.constant 0 : i32
    %c0_i32_1 = arith.constant 0 : i32
    %c0_i32_2 = arith.constant 0 : i32
    return %c0_i32, %c0_i32_0, %c0_i32_1 : i32, i32, i32
  }
  func.func @transform_1(%arg0: i32, %arg1: memref<8xi32, #tpu.memory_space<smem>>) -> (i32, i32, i32) {
    %c0_i32 = arith.constant 0 : i32
    %c0_i32_0 = arith.constant 0 : i32
    %c0_i32_1 = arith.constant 0 : i32
    %c0_i32_2 = arith.constant 0 : i32
    return %c0_i32, %c0_i32_0, %c0_i32_1 : i32, i32, i32
  }
  func.func @transform_2(%arg0: i32, %arg1: memref<8xi32, #tpu.memory_space<smem>>) -> (i32, i32) {
    %c0_i32 = arith.constant 0 : i32
    %c0_i32_0 = arith.constant 0 : i32
    %c0_i32_1 = arith.constant 0 : i32
    return %c0_i32, %c0_i32_0 : i32, i32
  }
  func.func @transform_3(%arg0: i32, %arg1: memref<8xi32, #tpu.memory_space<smem>>) -> (i32, i32) {
    %c0_i32 = arith.constant 0 : i32
    %c0_i32_0 = arith.constant 0 : i32
    %c0_i32_1 = arith.constant 0 : i32
    return %c0_i32, %c0_i32_0 : i32, i32
  }
  func.func @transform_4(%arg0: i32, %arg1: memref<8xi32, #tpu.memory_space<smem>>) -> (i32, i32) {
    %c0_i32 = arith.constant 0 : i32
    %c0_i32_0 = arith.constant 0 : i32
    %c0_i32_1 = arith.constant 0 : i32
    return %c0_i32, %c0_i32_0 : i32, i32
  }
  func.func @transform_5(%arg0: i32, %arg1: memref<8xi32, #tpu.memory_space<smem>>) -> (i32, i32) {
    %c0_i32 = arith.constant 0 : i32
    %c0_i32_0 = arith.constant 0 : i32
    %c0_i32_1 = arith.constant 0 : i32
    return %c0_i32, %c0_i32_0 : i32, i32
  }
  func.func @transform_6(%arg0: i32, %arg1: memref<8xi32, #tpu.memory_space<smem>>) -> (i32, i32) {
    %c0_i32 = arith.constant 0 : i32
    %c0_i32_0 = arith.constant 0 : i32
    %c0_i32_1 = arith.constant 0 : i32
    return %c0_i32, %c0_i32_0 : i32, i32
  }
  func.func @transform_7(%arg0: i32, %arg1: memref<8xi32, #tpu.memory_space<smem>>) -> (i32, i32) {
    %c0_i32 = arith.constant 0 : i32
    %c0_i32_0 = arith.constant 0 : i32
    %c0_i32_1 = arith.constant 0 : i32
    return %c0_i32, %c0_i32_0 : i32, i32
  }
  func.func @transform_8(%arg0: i32, %arg1: memref<8xi32, #tpu.memory_space<smem>>) -> (i32, i32) {
    %c0_i32 = arith.constant 0 : i32
    %c0_i32_0 = arith.constant 0 : i32
    %c0_i32_1 = arith.constant 0 : i32
    return %c0_i32, %c0_i32_0 : i32, i32
  }
  func.func @transform_9(%arg0: i32, %arg1: memref<8xi32, #tpu.memory_space<smem>>) -> (i32, i32, i32) {
    %c0_i32 = arith.constant 0 : i32
    %c0_i32_0 = arith.constant 0 : i32
    %c0_i32_1 = arith.constant 0 : i32
    %c0_i32_2 = arith.constant 0 : i32
    return %c0_i32, %c0_i32_0, %c0_i32_1 : i32, i32, i32
  }
}

</mosaic_0001>

<bundles_post_ra>
// kernel: seq2seq_forward.1
= control target key start
LH: loop header
LB: loop body
LE: loop exit
PB: predicated region body
PF: predicated region fallthrough
CT: control target
= control target key end

     0   :  { %s13880_s16 = smov [#allocation6]   ;;  %s17350_s0 = inlined_call_operand.vmem [shape: s32[8], index: 0, kind: input, shape index: {}]   ;;  %s17351_s1 = inlined_call_operand.vmem [shape: bf16[6,8,128], index: 1, kind: input, shape index: {}]   ;;  %s17352_s2 = inlined_call_operand.vmem [shape: bf16[8,8,128], index: 2, kind: input, shape index: {}]   ;;  %s17353_s3 = inlined_call_operand.vmem [shape: bf16[256,512], index: 3, kind: input, shape index: {}]   ;;  %s17354_s4 = inlined_call_operand.vmem [shape: f32[1,512], index: 4, kind: input, shape index: {}]   ;;  %s17355_s5 = inlined_call_operand.hbm [shape: bf16[256,512], index: 5, kind: input, shape index: {}]   ;;  %s17356_s6 = inlined_call_operand.vmem [shape: f32[1,512], index: 6, kind: input, shape index: {}]   ;;  %s17357_s7 = inlined_call_operand.vmem [shape: bf16[128,128], index: 7, kind: input, shape index: {}]   ;;  %s17358_s8 = inlined_call_operand.vmem [shape: bf16[128,128], index: 8, kind: input, shape index: {}]   ;;  %s17359_s9 = inlined_call_operand.vmem [shape: f32[1,128], index: 9, kind: input, shape index: {}]   ;;  %s17360_s10 = inlined_call_operand.vmem [shape: f32[7,8,128], index: 10, kind: output, shape index: {}]  }
   0x1   :  { %s16_s15 = sshll.u32 %s17350_s0, 4  ;;  %s17_s15 = int_to_ptr.vmem [resolvable:$true] %s16_s15 }
   0x2   :  { %19 = dma.vmem_to_smem %s17_s15, 16, %s13880_s16, [#allocation5] }
   0x3   :  { %13876 = dma.done.wait [#allocation5], 16 }
   0x4   :  { %13877 = vsyncadd [#allocation5], 4294967280 }
   0x5   :  { %22 = sfence }
   0x6   :  { %23 = vsyncpa [#allocation8], 0  ;;  %s36_s19 = sshll.u32 %s17355_s5, 4  ;;  %s13881_s20 = smov [#allocation7]   ;;  %s37_s19 = int_to_ptr.hbm [resolvable:$true] %s36_s19 }
   0x7   :  { %s38_s21 = sshll.u32 %s13881_s20, 4  ;;  %s13882_s22 = smov 256   ;;  %s39_s21 = int_to_ptr.vmem [resolvable:$true] %s38_s21 }
   0x8   :  { %s13883_s23 = smov 16  }
   0x9   :  { %44 = dma.hbm_to_vmem [thread:$0]  %s37_s19, 8192, %s39_s21, [#allocation8], %s13882_s22, %s13882_s22, %s13883_s23  }
   0xa   :  { %13878 = dma.done.wait [#allocation8], 8192  }
   0xb   :  { %13879 = vsyncadd [#allocation8], 4294959104  ;;  %s13952_s0 = sld [smem:[#allocation6 + $0x1]]  ;;  %v13884_v0 = vmov 0   ;;  %v8949_v1 = vld [vmem:[%s17353_s3 + $0xe0] sm:$0xf] }
   0xc   :  { %60 = vst [vmem:[#allocation4] sm:$0xff] %v13884_v0  ;;  %v12707_v2 = vld [vmem:[%s17353_s3 + $0xec] sm:$0xf0]  ;;  %v12705_v3 = vld [vmem:[%s17353_s3 + $0xe4] sm:$0xf] }
   0xd   :  { %v8950_v4 = vor.u32 %v12707_v2, %v8949_v1  ;;  %v8951_v5 = vld [vmem:[%s17353_s3 + $0xf0] sm:$0xf0]  ;;  %v12737_v6 = vld [vmem:[%s17353_s3 + $0x1e4] sm:$0xf]  ;;  %v9077_v10 = vld [vmem:[%s17353_s3 + $0x1e0] sm:$0xf] }
   0xe   :  { %v9079_v7 = vld [vmem:[%s17353_s3 + $0x1f0] sm:$0xf0]  ;;  %v8954_v8 = vor.u32 %v12705_v3, %v8951_v5  ;;  %v12739_v11 = vld [vmem:[%s17353_s3 + $0x1ec] sm:$0xf0]  ;;  %v8933_v12 = vld [vmem:[%s17353_s3 + $0xc0] sm:$0xf] }
   0xf   :  { %v9082_v9 = vor.u32 %v12737_v6, %v9079_v7  ;;  %465 = vmatpush.bf16.msra.mxu0 %v8950_v4  ;;  %v9078_v13 = vor.u32 %v12739_v11, %v9077_v10  ;;  %v12703_v14 = vld [vmem:[%s17353_s3 + $0xcc] sm:$0xf0]  ;;  %v12701_v15 = vld [vmem:[%s17353_s3 + $0xc4] sm:$0xf]  ;;  %v8935_v16 = vld [vmem:[%s17353_s3 + $0xd0] sm:$0xf0] }
  0x10   :  { %491 = vmatpush.bf16.msra.mxu2 %v8954_v8  ;;  %v8934_v17 = vor.u32 %v12703_v14, %v8933_v12  ;;  %v8938_v18 = vor.u32 %v12701_v15, %v8935_v16  ;;  %v12733_v19 = vld [vmem:[%s17353_s3 + $0x1c4] sm:$0xf]  ;;  %v9063_v20 = vld [vmem:[%s17353_s3 + $0x1d0] sm:$0xf0]  ;;  %v9061_v21 = vld [vmem:[%s17353_s3 + $0x1c0] sm:$0xf] }
  0x11   :  { %504 = vmatpush.bf16.msra.mxu3 %v9082_v9  ;;  %478 = vmatpush.bf16.msra.mxu1 %v9078_v13  ;;  %v9066_v22 = vor.u32 %v12733_v19, %v9063_v20  ;;  %v12735_v23 = vld [vmem:[%s17353_s3 + $0x1cc] sm:$0xf0]  ;;  %v8917_v24 = vld [vmem:[%s17353_s3 + $0xa0] sm:$0xf]  ;;  %v12697_v27 = vld [vmem:[%s17353_s3 + $0xa4] sm:$0xf] }
  0x12   :  { %v12699_v25 = vld [vmem:[%s17353_s3 + $0xac] sm:$0xf0]  ;;  %v9062_v26 = vor.u32 %v12735_v23, %v9061_v21  ;;  %v8919_v28 = vld [vmem:[%s17353_s3 + $0xb0] sm:$0xf0]  ;;  %v12729_v29 = vld [vmem:[%s17353_s3 + $0x1a4] sm:$0xf] }
  0x13   :  { %466 = vmatpush.bf16.msra.mxu0 %v8934_v17  ;;  %v8918_v30 = vor.u32 %v12699_v25, %v8917_v24  ;;  %v9047_v31 = vld [vmem:[%s17353_s3 + $0x1b0] sm:$0xf0]  ;;  %v9045_v32 = vld [vmem:[%s17353_s3 + $0x1a0] sm:$0xf]  ;;  %v12731_v33 = vld [vmem:[%s17353_s3 + $0x1ac] sm:$0xf0]  ;;  %v8922_v34 = vor.u32 %v12697_v27, %v8919_v28 }
  0x14   :  { %492 = vmatpush.bf16.msra.mxu2 %v8938_v18  ;;  %v9050_v35 = vor.u32 %v12729_v29, %v9047_v31  ;;  %v8901_v36 = vld [vmem:[%s17353_s3 + $0x80] sm:$0xf]  ;;  %v12695_v37 = vld [vmem:[%s17353_s3 + $0x8c] sm:$0xf0]  ;;  %v12693_v38 = vld [vmem:[%s17353_s3 + $0x84] sm:$0xf]  ;;  %v9046_v39 = vor.u32 %v12731_v33, %v9045_v32 }
  0x15   :  { %505 = vmatpush.bf16.msra.mxu3 %v9066_v22  ;;  %479 = vmatpush.bf16.msra.mxu1 %v9062_v26  ;;  %v8903_v40 = vld [vmem:[%s17353_s3 + $0x90] sm:$0xf0]  ;;  %v12725_v41 = vld [vmem:[%s17353_s3 + $0x184] sm:$0xf]  ;;  %v9029_v43 = vld [vmem:[%s17353_s3 + $0x180] sm:$0xf]  ;;  %v8902_v45 = vor.u32 %v12695_v37, %v8901_v36 }
  0x16   :  { %v9031_v42 = vld [vmem:[%s17353_s3 + $0x190] sm:$0xf0]  ;;  %v12727_v44 = vld [vmem:[%s17353_s3 + $0x18c] sm:$0xf0]  ;;  %v8906_v46 = vor.u32 %v12693_v38, %v8903_v40  ;;  %v8885_v48 = vld [vmem:[%s17353_s3 + $0x60] sm:$0xf] }
  0x17   :  { %467 = vmatpush.bf16.msra.mxu0 %v8918_v30  ;;  %v9034_v47 = vor.u32 %v12725_v41, %v9031_v42  ;;  %v12691_v49 = vld [vmem:[%s17353_s3 + $0x6c] sm:$0xf0]  ;;  %v12689_v50 = vld [vmem:[%s17353_s3 + $0x64] sm:$0xf]  ;;  %v9030_v51 = vor.u32 %v12727_v44, %v9029_v43  ;;  %v8887_v52 = vld [vmem:[%s17353_s3 + $0x70] sm:$0xf0] }
  0x18   :  { %493 = vmatpush.bf16.msra.mxu2 %v8922_v34  ;;  %v12721_v53 = vld [vmem:[%s17353_s3 + $0x164] sm:$0xf]  ;;  %v9015_v54 = vld [vmem:[%s17353_s3 + $0x170] sm:$0xf0]  ;;  %v9013_v55 = vld [vmem:[%s17353_s3 + $0x160] sm:$0xf]  ;;  %v8886_v57 = vor.u32 %v12691_v49, %v8885_v48  ;;  %v8890_v58 = vor.u32 %v12689_v50, %v8887_v52 }
  0x19   :  { %506 = vmatpush.bf16.msra.mxu3 %v9050_v35  ;;  %480 = vmatpush.bf16.msra.mxu1 %v9046_v39  ;;  %v12723_v56 = vld [vmem:[%s17353_s3 + $0x16c] sm:$0xf0]  ;;  %v9018_v59 = vor.u32 %v12721_v53, %v9015_v54  ;;  %v8869_v60 = vld [vmem:[%s17353_s3 + $0x40] sm:$0xf]  ;;  %v12685_v62 = vld [vmem:[%s17353_s3 + $0x44] sm:$0xf] }
  0x1a   :  { %v12687_v61 = vld [vmem:[%s17353_s3 + $0x4c] sm:$0xf0]  ;;  %v9014_v63 = vor.u32 %v12723_v56, %v9013_v55  ;;  %v8871_v0 = vld [vmem:[%s17353_s3 + $0x50] sm:$0xf0]  ;;  %v12717_v1 = vld [vmem:[%s17353_s3 + $0x144] sm:$0xf] }
  0x1b   :  { %468 = vmatpush.bf16.msra.mxu0 %v8902_v45  ;;  %v8999_v2 = vld [vmem:[%s17353_s3 + $0x150] sm:$0xf0]  ;;  %v8997_v3 = vld [vmem:[%s17353_s3 + $0x140] sm:$0xf]  ;;  %v12719_v4 = vld [vmem:[%s17353_s3 + $0x14c] sm:$0xf0]  ;;  %v8870_v5 = vor.u32 %v12687_v61, %v8869_v60  ;;  %v8874_v6 = vor.u32 %v12685_v62, %v8871_v0 }
  0x1c   :  { %494 = vmatpush.bf16.msra.mxu2 %v8906_v46  ;;  %v9002_v7 = vor.u32 %v12717_v1, %v8999_v2  ;;  %v8853_v8 = vld [vmem:[%s17353_s3 + $0x20] sm:$0xf]  ;;  %v12683_v9 = vld [vmem:[%s17353_s3 + $0x2c] sm:$0xf0]  ;;  %v12681_v10 = vld [vmem:[%s17353_s3 + $0x24] sm:$0xf]  ;;  %v8998_v11 = vor.u32 %v12719_v4, %v8997_v3 }
  0x1d   :  { %507 = vmatpush.bf16.msra.mxu3 %v9034_v47  ;;  %481 = vmatpush.bf16.msra.mxu1 %v9030_v51  ;;  %v8855_v12 = vld [vmem:[%s17353_s3 + $0x30] sm:$0xf0]  ;;  %v12713_v13 = vld [vmem:[%s17353_s3 + $0x124] sm:$0xf]  ;;  %v8981_v15 = vld [vmem:[%s17353_s3 + $0x120] sm:$0xf]  ;;  %v8854_v18 = vor.u32 %v12683_v9, %v8853_v8 }
  0x1e   :  { %v8983_v14 = vld [vmem:[%s17353_s3 + $0x130] sm:$0xf0]  ;;  %v12715_v16 = vld [vmem:[%s17353_s3 + $0x12c] sm:$0xf0]  ;;  %v8837_v17 = vld [vmem:[%s17353_s3] sm:$0xf]  ;;  %v8858_v22 = vor.u32 %v12681_v10, %v8855_v12 }
  0x1f   :  { %469 = vmatpush.bf16.msra.mxu0 %v8886_v57  ;;  %v12679_v19 = vld [vmem:[%s17353_s3 + $0xc] sm:$0xf0]  ;;  %v12677_v20 = vld [vmem:[%s17353_s3 + $0x4] sm:$0xf]  ;;  %v61_v21 = vld [vmem:[%s17351_s1] sm:$0xf]  ;;  %v8986_v23 = vor.u32 %v12713_v13, %v8983_v14  ;;  %v8982_v26 = vor.u32 %v12715_v16, %v8981_v15 }
  0x20   :  { %495 = vmatpush.bf16.msra.mxu2 %v8890_v58  ;;  %v8839_v24 = vld [vmem:[%s17353_s3 + $0x10] sm:$0xf0]  ;;  %v12709_v25 = vld [vmem:[%s17353_s3 + $0x104] sm:$0xf]  ;;  %62 = vst [vmem:[#allocation4] sm:$0xf] %v61_v21  ;;  %v8838_v33 = vor.u32 %v12679_v19, %v8837_v17 }
  0x21   :  { %508 = vmatpush.bf16.msra.mxu3 %v9018_v59  ;;  %482 = vmatpush.bf16.msra.mxu1 %v9014_v63  ;;  %v8967_v27 = vld [vmem:[%s17353_s3 + $0x110] sm:$0xf0]  ;;  %v8957_v28 = vld [vmem:[%s17353_s3 + $0xe8] sm:$0xf]  ;;  %v12708_v29 = vld [vmem:[%s17353_s3 + $0xf4] sm:$0xf0]  ;;  %v8842_v37 = vor.u32 %v12677_v20, %v8839_v24 }
  0x22   :  { %v12706_v30 = vld [vmem:[%s17353_s3 + $0xec] sm:$0xf]  ;;  %v8959_v31 = vld [vmem:[%s17353_s3 + $0xf8] sm:$0xf0]  ;;  %v8965_v35 = vld [vmem:[%s17353_s3 + $0x100] sm:$0xf]  ;;  %v8970_v38 = vor.u32 %v12709_v25, %v8967_v27  ;;  %v8958_v41 = vor.u32 %v12708_v29, %v8957_v28 }
  0x23   :  { %470 = vmatpush.bf16.msra.mxu0 %v8870_v5  ;;  %v12738_v32 = vld [vmem:[%s17353_s3 + $0x1ec] sm:$0xf]  ;;  %v9087_v34 = vld [vmem:[%s17353_s3 + $0x1f8] sm:$0xf0]  ;;  %v12711_v36 = vld [vmem:[%s17353_s3 + $0x10c] sm:$0xf0]  ;;  %v8962_v42 = vor.u32 %v12706_v30, %v8959_v31 }
  0x24   :  { %496 = vmatpush.bf16.msra.mxu2 %v8874_v6  ;;  %v9085_v39 = vld [vmem:[%s17353_s3 + $0x1e8] sm:$0xf]  ;;  %v12740_v40 = vld [vmem:[%s17353_s3 + $0x1f4] sm:$0xf0]  ;;  %v9090_v44 = vor.u32 %v12738_v32, %v9087_v34  ;;  %v8966_v45 = vor.u32 %v12711_v36, %v8965_v35  ;;  %v12702_v47 = vld [vmem:[%s17353_s3 + $0xcc] sm:$0xf] }
  0x25   :  { %509 = vmatpush.bf16.msra.mxu3 %v9002_v7  ;;  %483 = vmatpush.bf16.msra.mxu1 %v8998_v11  ;;  %v8941_v43 = vld [vmem:[%s17353_s3 + $0xc8] sm:$0xf]  ;;  %v12704_v46 = vld [vmem:[%s17353_s3 + $0xd4] sm:$0xf0]  ;;  %v8943_v48 = vld [vmem:[%s17353_s3 + $0xd8] sm:$0xf0]  ;;  %v9086_v50 = vor.u32 %v12740_v40, %v9085_v39 }
  0x26   :  { %v12734_v51 = vld [vmem:[%s17353_s3 + $0x1cc] sm:$0xf]  ;;  %v9071_v52 = vld [vmem:[%s17353_s3 + $0x1d8] sm:$0xf0]  ;;  %v9069_v55 = vld [vmem:[%s17353_s3 + $0x1c8] sm:$0xf]  ;;  %v8942_v57 = vor.u32 %v12704_v46, %v8941_v43  ;;  %v8946_v58 = vor.u32 %v12702_v47, %v8943_v48 }
  0x27   :  { %471 = vmatpush.bf16.msra.mxu0 %v8854_v18  ;;  %v63_v49 = vld [vmem:[#allocation4] sm:$0xff]  ;;  %v12736_v56 = vld [vmem:[%s17353_s3 + $0x1d4] sm:$0xf0]  ;;  %v9074_v62 = vor.u32 %v12734_v51, %v9071_v52  ;;  %v8927_v1 = vld [vmem:[%s17353_s3 + $0xb8] sm:$0xf0]  ;;  %p10686_p0 = scmp.ne.s32.totalorder %s13952_s0, 0 }
  0x28   :  { %497 = vmatpush.bf16.msra.mxu2 %v8858_v22  ;;  %v139_v53 = vunpack.c.l.b16 %v63_v49  ;;  %v140_v54 = vunpack.c.h.b16 %v63_v49  ;;  %v8925_v59 = vld [vmem:[%s17353_s3 + $0xa8] sm:$0xf]  ;;  %v12700_v63 = vld [vmem:[%s17353_s3 + $0xb4] sm:$0xf0]  ;;  %v12698_v0 = vld [vmem:[%s17353_s3 + $0xac] sm:$0xf]  ;;  %v9070_v2 = vor.u32 %v12736_v56, %v9069_v55 }
  0x29   :  { %510 = vmatpush.bf16.msra.mxu3 %v8986_v23  ;;  %484 = vmatpush.bf16.msra.mxu1 %v8982_v26  ;;  %v12730_v3 = vld [vmem:[%s17353_s3 + $0x1ac] sm:$0xf]  ;;  %v9055_v4 = vld [vmem:[%s17353_s3 + $0x1b8] sm:$0xf0]  ;;  %v9053_v5 = vld [vmem:[%s17353_s3 + $0x1a8] sm:$0xf]  ;;  %v8926_v7 = vor.u32 %v12700_v63, %v8925_v59  ;;  %v8930_v8 = vor.u32 %v12698_v0, %v8927_v1 }
  0x2a   :  { %v14200_v60 = vpack.c.b16 %v139_v53, %v139_v53  ;;  %v14202_v61 = vpack.c.b16 %v140_v54, %v140_v54  ;;  %v12732_v6 = vld [vmem:[%s17353_s3 + $0x1b4] sm:$0xf0]  ;;  %v8909_v9 = vld [vmem:[%s17353_s3 + $0x88] sm:$0xf]  ;;  %v9058_v10 = vor.u32 %v12730_v3, %v9055_v4  ;;  %v12694_v12 = vld [vmem:[%s17353_s3 + $0x8c] sm:$0xf] }
  0x2b   :  { %472 = vmatpush.bf16.msra.mxu0 %v8838_v33  ;;  %v12696_v11 = vld [vmem:[%s17353_s3 + $0x94] sm:$0xf0]  ;;  %v8911_v13 = vld [vmem:[%s17353_s3 + $0x98] sm:$0xf0]  ;;  %v9054_v14 = vor.u32 %v12732_v6, %v9053_v5  ;;  %v12726_v15 = vld [vmem:[%s17353_s3 + $0x18c] sm:$0xf] }
  0x2c   :  { %498 = vmatpush.bf16.msra.mxu2 %v8842_v37  ;;  %v9039_v16 = vld [vmem:[%s17353_s3 + $0x198] sm:$0xf0]  ;;  %v9037_v17 = vld [vmem:[%s17353_s3 + $0x188] sm:$0xf]  ;;  %v12728_v18 = vld [vmem:[%s17353_s3 + $0x194] sm:$0xf0]  ;;  %v8910_v19 = vor.u32 %v12696_v11, %v8909_v9  ;;  %v8914_v20 = vor.u32 %v12694_v12, %v8911_v13 }
  0x2d   :  { %511 = vmatpush.bf16.msra.mxu3 %v8970_v38  ;;  %485 = vmatpush.bf16.msra.mxu1 %v8966_v45  ;;  %v8893_v21 = vld [vmem:[%s17353_s3 + $0x68] sm:$0xf]  ;;  %v9042_v22 = vor.u32 %v12726_v15, %v9039_v16  ;;  %v12692_v23 = vld [vmem:[%s17353_s3 + $0x74] sm:$0xf0]  ;;  %v12690_v24 = vld [vmem:[%s17353_s3 + $0x6c] sm:$0xf]  ;;  %v9038_v26 = vor.u32 %v12728_v18, %v9037_v17 }
  0x2e   :  { %473 = vmatmul.bf16.vlgmr.msra.gmra.mxu0 %v14200_v60  ;;  %v8895_v25 = vld [vmem:[%s17353_s3 + $0x78] sm:$0xf0]  ;;  %v12722_v27 = vld [vmem:[%s17353_s3 + $0x16c] sm:$0xf]  ;;  %v9021_v29 = vld [vmem:[%s17353_s3 + $0x168] sm:$0xf]  ;;  %v8894_v31 = vor.u32 %v12692_v23, %v8893_v21 }
  0x2f   :  { %517 = vmatpush.bf16.msrb.mxu0 %v8958_v41  ;;  %499 = vmatmul.bf16.vlgmr.msra.gmra.mxu2 %v14200_v60  ;;  %v9023_v28 = vld [vmem:[%s17353_s3 + $0x178] sm:$0xf0]  ;;  %v12724_v30 = vld [vmem:[%s17353_s3 + $0x174] sm:$0xf0]  ;;  %v8898_v32 = vor.u32 %v12690_v24, %v8895_v25  ;;  %v8877_v33 = vld [vmem:[%s17353_s3 + $0x48] sm:$0xf] }
  0x30   :  { %543 = vmatpush.bf16.msrb.mxu2 %v8962_v42  ;;  %512 = vmatmul.bf16.vlgmr.msra.gmra.mxu3 %v14202_v61  ;;  %v9026_v34 = vor.u32 %v12722_v27, %v9023_v28  ;;  %v12688_v35 = vld [vmem:[%s17353_s3 + $0x54] sm:$0xf0]  ;;  %v12686_v36 = vld [vmem:[%s17353_s3 + $0x4c] sm:$0xf]  ;;  %v8879_v37 = vld [vmem:[%s17353_s3 + $0x58] sm:$0xf0]  ;;  %v9022_v38 = vor.u32 %v12724_v30, %v9021_v29 }
  0x31   :  { %556 = vmatpush.bf16.msrb.mxu3 %v9090_v44  ;;  %530 = vmatpush.bf16.msrb.mxu1 %v9086_v50  ;;  %v12718_v39 = vld [vmem:[%s17353_s3 + $0x14c] sm:$0xf]  ;;  %v9007_v40 = vld [vmem:[%s17353_s3 + $0x158] sm:$0xf0]  ;;  %v9005_v41 = vld [vmem:[%s17353_s3 + $0x148] sm:$0xf]  ;;  %v8878_v43 = vor.u32 %v12688_v35, %v8877_v33  ;;  %v8882_v44 = vor.u32 %v12686_v36, %v8879_v37 }
  0x32   :  { %486 = vmatmul.bf16.vlgmr.msra.gmra.mxu1 %v14202_v61  ;;  %v12720_v42 = vld [vmem:[%s17353_s3 + $0x154] sm:$0xf0]  ;;  %v8861_v45 = vld [vmem:[%s17353_s3 + $0x28] sm:$0xf]  ;;  %v9010_v46 = vor.u32 %v12718_v39, %v9007_v40  ;;  %v12682_v48 = vld [vmem:[%s17353_s3 + $0x2c] sm:$0xf] }
  0x33   :  { %518 = vmatpush.bf16.msrb.mxu0 %v8942_v57  ;;  %v12684_v47 = vld [vmem:[%s17353_s3 + $0x34] sm:$0xf0]  ;;  %v8863_v49 = vld [vmem:[%s17353_s3 + $0x38] sm:$0xf0]  ;;  %v9006_v50 = vor.u32 %v12720_v42, %v9005_v41  ;;  %v12714_v51 = vld [vmem:[%s17353_s3 + $0x12c] sm:$0xf] }
  0x34   :  { %544 = vmatpush.bf16.msrb.mxu2 %v8946_v58  ;;  %v8991_v52 = vld [vmem:[%s17353_s3 + $0x138] sm:$0xf0]  ;;  %v8989_v53 = vld [vmem:[%s17353_s3 + $0x128] sm:$0xf]  ;;  %v12716_v54 = vld [vmem:[%s17353_s3 + $0x134] sm:$0xf0]  ;;  %v8862_v55 = vor.u32 %v12684_v47, %v8861_v45  ;;  %v8866_v56 = vor.u32 %v12682_v48, %v8863_v49 }
  0x35   :  { %557 = vmatpush.bf16.msrb.mxu3 %v9074_v62  ;;  %531 = vmatpush.bf16.msrb.mxu1 %v9070_v2  ;;  %v8845_v57 = vld [vmem:[%s17353_s3 + $0x8] sm:$0xf]  ;;  %v8994_v58 = vor.u32 %v12714_v51, %v8991_v52  ;;  %v12680_v59 = vld [vmem:[%s17353_s3 + $0x14] sm:$0xf0]  ;;  %v12678_v62 = vld [vmem:[%s17353_s3 + $0xc] sm:$0xf]  ;;  %v8990_v0 = vor.u32 %v12716_v54, %v8989_v53 }
  0x36   :  { %v8847_v63 = vld [vmem:[%s17353_s3 + $0x18] sm:$0xf0]  ;;  %v12710_v1 = vld [vmem:[%s17353_s3 + $0x10c] sm:$0xf]  ;;  %v8973_v3 = vld [vmem:[%s17353_s3 + $0x108] sm:$0xf]  ;;  %v8846_v5 = vor.u32 %v12680_v59, %v8845_v57 }
  0x37   :  { %519 = vmatpush.bf16.msrb.mxu0 %v8926_v7  ;;  %v8975_v2 = vld [vmem:[%s17353_s3 + $0x118] sm:$0xf0]  ;;  %v12712_v4 = vld [vmem:[%s17353_s3 + $0x114] sm:$0xf0]  ;;  %v8850_v6 = vor.u32 %v12678_v62, %v8847_v63  ;;  %v14356_v9 = vld [vmem:[%s17354_s4] sm:$0xf] }
  0x38   :  { %545 = vmatpush.bf16.msrb.mxu2 %v8930_v8  ;;  %v8978_v7 = vor.u32 %v12710_v1, %v8975_v2  ;;  %v8974_v8 = vor.u32 %v12712_v4, %v8973_v3  ;;  %v131_v12 = vperm.slane %v14356_v9, 1  ;;  %v9337_v16 = vld [vmem:[%s17353_s3 + $0x1e0] sm:$0xf]  ;;  %v12769_v21 = vld [vmem:[%s17353_s3 + $0xe4] sm:$0xf] }
  0x39   :  { %558 = vmatpush.bf16.msrb.mxu3 %v9058_v10  ;;  %532 = vmatpush.bf16.msrb.mxu1 %v9054_v14  ;;  %v130_v10 = vperm.slane %v14356_v9, 0  ;;  %v12801_v27 = vld [vmem:[%s17353_s3 + $0x1e4] sm:$0xf]  ;;  %v9339_v28 = vld [vmem:[%s17353_s3 + $0x1f0] sm:$0xf0] }
  0x3a   :  { %v9342_v29 = vor.u32 %v12801_v27, %v9339_v28  ;;  %v9321_v33 = vld [vmem:[%s17353_s3 + $0x1c0] sm:$0xf]  ;;  %v12799_v36 = vld [vmem:[%s17353_s3 + $0x1cc] sm:$0xf0]  ;;  %v12765_v37 = vld [vmem:[%s17353_s3 + $0xc4] sm:$0xf] }
  0x3b   :  { %520 = vmatpush.bf16.msrb.mxu0 %v8910_v19  ;;  %v9322_v40 = vor.u32 %v12799_v36, %v9321_v33  ;;  %v12797_v42 = vld [vmem:[%s17353_s3 + $0x1c4] sm:$0xf]  ;;  %v12763_v47 = vld [vmem:[%s17353_s3 + $0xac] sm:$0xf0]  ;;  %v9305_v48 = vld [vmem:[%s17353_s3 + $0x1a0] sm:$0xf] }
  0x3c   :  { %546 = vmatpush.bf16.msrb.mxu2 %v8914_v20  ;;  %v12803_v20 = vld [vmem:[%s17353_s3 + $0x1ec] sm:$0xf0]  ;;  %v12761_v53 = vld [vmem:[%s17353_s3 + $0xa4] sm:$0xf]  ;;  %v9179_v54 = vld [vmem:[%s17353_s3 + $0xb0] sm:$0xf0] }
  0x3d   :  { %559 = vmatpush.bf16.msrb.mxu3 %v9042_v22  ;;  %533 = vmatpush.bf16.msrb.mxu1 %v9038_v26  ;;  %v9211_v22 = vld [vmem:[%s17353_s3 + $0xf0] sm:$0xf0]  ;;  %v9338_v25 = vor.u32 %v12803_v20, %v9337_v16  ;;  %v12795_v52 = vld [vmem:[%s17353_s3 + $0x1ac] sm:$0xf0]  ;;  %v9182_v57 = vor.u32 %v12761_v53, %v9179_v54  ;;  %v9289_v2 = vld [vmem:[%s17353_s3 + $0x180] sm:$0xf] }
  0x3e   :  { %v9214_v26 = vor.u32 %v12769_v21, %v9211_v22  ;;  %v9307_v59 = vld [vmem:[%s17353_s3 + $0x1b0] sm:$0xf0]  ;;  %v12759_v1 = vld [vmem:[%s17353_s3 + $0x8c] sm:$0xf0]  ;;  %v12785_v21 = vld [vmem:[%s17353_s3 + $0x164] sm:$0xf] }
  0x3f   :  { %521 = vmatpush.bf16.msrb.mxu0 %v8894_v31  ;;  %v9193_v31 = vld [vmem:[%s17353_s3 + $0xc0] sm:$0xf]  ;;  %v12791_v3 = vld [vmem:[%s17353_s3 + $0x18c] sm:$0xf0]  ;;  %v9147_v20 = vld [vmem:[%s17353_s3 + $0x70] sm:$0xf0] }
  0x40   :  { %547 = vmatpush.bf16.msrb.mxu2 %v8898_v32  ;;  %v12767_v32 = vld [vmem:[%s17353_s3 + $0xcc] sm:$0xf0]  ;;  %v9257_v28 = vld [vmem:[%s17353_s3 + $0x140] sm:$0xf]  ;;  %v132_v33 = vperm.slane %v14356_v9, 2 }
  0x41   :  { %560 = vmatpush.bf16.msrb.mxu3 %v9026_v34  ;;  %534 = vmatpush.bf16.msrb.mxu1 %v9022_v38  ;;  %v9194_v35 = vor.u32 %v12767_v32, %v9193_v31  ;;  %v9195_v38 = vld [vmem:[%s17353_s3 + $0xd0] sm:$0xf0]  ;;  %v12787_v16 = vld [vmem:[%s17353_s3 + $0x16c] sm:$0xf0]  ;;  %v12749_v32 = vld [vmem:[%s17353_s3 + $0x44] sm:$0xf] }
  0x42   :  { %v9198_v41 = vor.u32 %v12765_v37, %v9195_v38  ;;  %v12751_v27 = vld [vmem:[%s17353_s3 + $0x4c] sm:$0xf0]  ;;  %v12781_v36 = vld [vmem:[%s17353_s3 + $0x144] sm:$0xf] }
  0x43   :  { %522 = vmatpush.bf16.msrb.mxu0 %v8878_v43  ;;  %v9323_v43 = vld [vmem:[%s17353_s3 + $0x1d0] sm:$0xf0]  ;;  %v12783_v31 = vld [vmem:[%s17353_s3 + $0x14c] sm:$0xf0]  ;;  %v12745_v53 = vld [vmem:[%s17353_s3 + $0x24] sm:$0xf] }
  0x44   :  { %548 = vmatpush.bf16.msrb.mxu2 %v8882_v44  ;;  %v9326_v45 = vor.u32 %v12797_v42, %v9323_v43  ;;  %v9259_v43 = vld [vmem:[%s17353_s3 + $0x150] sm:$0xf0] }
  0x45   :  { %561 = vmatpush.bf16.msrb.mxu3 %v9010_v46  ;;  %535 = vmatpush.bf16.msrb.mxu1 %v9006_v50  ;;  %v9177_v46 = vld [vmem:[%s17353_s3 + $0xa0] sm:$0xf] }
  0x46   :  { %v9178_v51 = vor.u32 %v12763_v47, %v9177_v46  ;;  %v12747_v46 = vld [vmem:[%s17353_s3 + $0x2c] sm:$0xf0] }
  0x47   :  { %523 = vmatpush.bf16.msrb.mxu0 %v8862_v55 }
  0x48   :  { %549 = vmatpush.bf16.msrb.mxu2 %v8866_v56  ;;  %v9306_v56 = vor.u32 %v12795_v52, %v9305_v48  ;;  %v12779_v52 = vld [vmem:[%s17353_s3 + $0x12c] sm:$0xf0] }
  0x49   :  { %562 = vmatpush.bf16.msrb.mxu3 %v8994_v58  ;;  %536 = vmatpush.bf16.msrb.mxu1 %v8990_v0  ;;  %v12793_v58 = vld [vmem:[%s17353_s3 + $0x1a4] sm:$0xf]  ;;  %v9161_v0 = vld [vmem:[%s17353_s3 + $0x80] sm:$0xf] }
  0x4a   :  { %v9310_v63 = vor.u32 %v12793_v58, %v9307_v59 }
  0x4b   :  { %524 = vmatpush.bf16.msrb.mxu0 %v8846_v5  ;;  %v9162_v5 = vor.u32 %v12759_v1, %v9161_v0  ;;  %v9243_v0 = vld [vmem:[%s17353_s3 + $0x130] sm:$0xf0] }
  0x4c   :  { %550 = vmatpush.bf16.msrb.mxu2 %v8850_v6  ;;  %v9290_v6 = vor.u32 %v12791_v3, %v9289_v2  ;;  %v9097_v2 = vld [vmem:[%s17353_s3] sm:$0xf]  ;;  %v12743_v3 = vld [vmem:[%s17353_s3 + $0xc] sm:$0xf0] }
  0x4d   :  { %563 = vmatpush.bf16.msrb.mxu3 %v8978_v7  ;;  %537 = vmatpush.bf16.msrb.mxu1 %v8974_v8  ;;  %v12757_v7 = vld [vmem:[%s17353_s3 + $0x84] sm:$0xf]  ;;  %v9163_v8 = vld [vmem:[%s17353_s3 + $0x90] sm:$0xf0] }
  0x4e   :  { %525 = vmatmul.bf16.vlgmr.msrb.gmra.mxu0 %v14200_v60 }
  0x4f   :  { %551 = vmatmul.bf16.vlgmr.msrb.gmra.mxu2 %v14200_v60  ;;  %v9209_v60 = vld [vmem:[%s17353_s3 + $0xe0] sm:$0xf] }
  0x50   :  { %564 = vmatmul.bf16.vlgmr.msrb.gmra.mxu3 %v14202_v61  ;;  %538 = vmatmul.bf16.vlgmr.msrb.gmra.mxu1 %v14202_v61  ;;  %v12771_v61 = vld [vmem:[%s17353_s3 + $0xec] sm:$0xf0] }
  0x51   :  { %v9210_v19 = vor.u32 %v12771_v61, %v9209_v60  ;;  %1055 = vmatpush.bf16.msra.mxu1 %v9338_v25  ;;  %1068 = vmatpush.bf16.msra.mxu2 %v9214_v26  ;;  %v12755_v60 = vld [vmem:[%s17353_s3 + $0x6c] sm:$0xf0]  ;;  %v9273_v61 = vld [vmem:[%s17353_s3 + $0x160] sm:$0xf] }
  0x52   :  { %1081 = vmatpush.bf16.msra.mxu3 %v9342_v29  ;;  %v9129_v26 = vld [vmem:[%s17353_s3 + $0x40] sm:$0xf] }
  0x53   :  { %1042 = vmatpush.bf16.msra.mxu0 %v9210_v19  ;;  %v12753_v19 = vld [vmem:[%s17353_s3 + $0x64] sm:$0xf] }
  0x54   :  { %v9150_v22 = vor.u32 %v12753_v19, %v9147_v20 }
  0x55   :  { %1056 = vmatpush.bf16.msra.mxu1 %v9322_v40  ;;  %1069 = vmatpush.bf16.msra.mxu2 %v9198_v41  ;;  %v133_v41 = vperm.slane %v14356_v9, 3  ;;  %v9241_v9 = vld [vmem:[%s17353_s3 + $0x120] sm:$0xf] }
  0x56   :  { %1082 = vmatpush.bf16.msra.mxu3 %v9326_v45  ;;  %v9113_v45 = vld [vmem:[%s17353_s3 + $0x20] sm:$0xf] }
  0x57   :  { %1043 = vmatpush.bf16.msra.mxu0 %v9194_v35  ;;  %v9131_v35 = vld [vmem:[%s17353_s3 + $0x50] sm:$0xf0] }
  0x58   :  { %v9134_v42 = vor.u32 %v12749_v32, %v9131_v35  ;;  %v9347_v35 = vld [vmem:[%s17353_s3 + $0x1f8] sm:$0xf0] }
  0x59   :  { %1057 = vmatpush.bf16.msra.mxu1 %v9306_v56  ;;  %1070 = vmatpush.bf16.msra.mxu2 %v9182_v57  ;;  %v9115_v56 = vld [vmem:[%s17353_s3 + $0x30] sm:$0xf0]  ;;  %v12777_v57 = vld [vmem:[%s17353_s3 + $0x124] sm:$0xf] }
  0x5a   :  { %1083 = vmatpush.bf16.msra.mxu3 %v9310_v63  ;;  %v9118_v63 = vor.u32 %v12745_v53, %v9115_v56  ;;  %v9246_v1 = vor.u32 %v12777_v57, %v9243_v0  ;;  %v9185_v53 = vld [vmem:[%s17353_s3 + $0xa8] sm:$0xf]  ;;  %v12762_v0 = vld [vmem:[%s17353_s3 + $0xac] sm:$0xf] }
  0x5b   :  { %1044 = vmatpush.bf16.msra.mxu0 %v9178_v51  ;;  %v9114_v51 = vor.u32 %v12747_v46, %v9113_v45 }
  0x5d   :  { %1058 = vmatpush.bf16.msra.mxu1 %v9290_v6  ;;  %v9098_v6 = vor.u32 %v12743_v3, %v9097_v2  ;;  %v9187_v3 = vld [vmem:[%s17353_s3 + $0xb8] sm:$0xf0] }
  0x5f   :  { %1045 = vmatpush.bf16.msra.mxu0 %v9162_v5 }
  0xab   :  { %v474_v11 = vpop.f32.mrf.mxu0 }
  0xac   :  { %v475_v13 = vadd.f32 %v474_v11, %v130_v10  ;;  %v12789_v10 = vld [vmem:[%s17353_s3 + $0x184] sm:$0xf] }
  0xaf   :  { %v487_v14 = vpop.f32.mrf.mxu1 }
  0xb0   :  { %v488_v15 = vadd.f32 %v487_v14, %v475_v13  ;;  %v9291_v13 = vld [vmem:[%s17353_s3 + $0x190] sm:$0xf0] }
  0xb1   :  { %v9294_v14 = vor.u32 %v12789_v10, %v9291_v13  ;;  %v9099_v10 = vld [vmem:[%s17353_s3 + $0x10] sm:$0xf0] }
  0xb2   :  { %v500_v17 = vpop.f32.mrf.mxu2  ;;  %v9091_v24 = vmul.f32 -1.442695, %v488_v15  ;;  %v9145_v15 = vld [vmem:[%s17353_s3 + $0x60] sm:$0xf] }
  0xb3   :  { %v513_v18 = vpop.f32.mrf.mxu3  ;;  %v501_v23 = vadd.f32 %v500_v17, %v131_v12  ;;  %v476_v34 = vpop.f32.mrf.mxu0  ;;  %v9166_v12 = vor.u32 %v12757_v7, %v9163_v8  ;;  %1084 = vmatpush.bf16.msra.mxu3 %v9294_v14  ;;  %v9146_v17 = vor.u32 %v12755_v60, %v9145_v15  ;;  %v12775_v7 = vld [vmem:[%s17353_s3 + $0x10c] sm:$0xf0]  ;;  %v12741_v8 = vld [vmem:[%s17353_s3 + $0x4] sm:$0xf] }
  0xb4   :  { %13626 = vpow2.f32 %v9091_v24  ;;  %v9258_v34 = vor.u32 %v12783_v31, %v9257_v28  ;;  %v9219_v28 = vld [vmem:[%s17353_s3 + $0xf8] sm:$0xf0] }
  0xb5   :  { %v514_v30 = vadd.f32 %v513_v18, %v501_v23  ;;  %1071 = vmatpush.bf16.msra.mxu2 %v9166_v12  ;;  %v9274_v18 = vor.u32 %v12787_v16, %v9273_v61  ;;  %v9275_v23 = vld [vmem:[%s17353_s3 + $0x170] sm:$0xf0]  ;;  %1046 = vmatpush.bf16.msra.mxu0 %v9146_v17  ;;  %v9102_v61 = vor.u32 %v12741_v8, %v9099_v10  ;;  %v12773_v16 = vld [vmem:[%s17353_s3 + $0x104] sm:$0xf]  ;;  %v9169_v8 = vld [vmem:[%s17353_s3 + $0x88] sm:$0xf] }
  0xb6   :  { %v9278_v25 = vor.u32 %v12785_v21, %v9275_v23  ;;  %v9227_v17 = vld [vmem:[%s17353_s3 + $0x110] sm:$0xf0]  ;;  %v12772_v21 = vld [vmem:[%s17353_s3 + $0xf4] sm:$0xf0] }
  0xb7   :  { %v9092_v39 = vmul.f32 -1.442695, %v514_v30  ;;  %v489_v44 = vpop.f32.mrf.mxu1  ;;  %1059 = vmatpush.bf16.msra.mxu1 %v9274_v18  ;;  %v9130_v30 = vor.u32 %v12751_v27, %v9129_v26  ;;  %v9217_v18 = vld [vmem:[%s17353_s3 + $0xe8] sm:$0xf]  ;;  %v9230_v20 = vor.u32 %v12773_v16, %v9227_v17  ;;  %v12804_v23 = vld [vmem:[%s17353_s3 + $0x1f4] sm:$0xf0] }
  0xb8   :  { %1085 = vmatpush.bf16.msra.mxu3 %v9278_v25  ;;  %v9218_v26 = vor.u32 %v12772_v21, %v9217_v18  ;;  %v12770_v27 = vld [vmem:[%s17353_s3 + $0xec] sm:$0xf]  ;;  %v12760_v10 = vld [vmem:[%s17353_s3 + $0x94] sm:$0xf0]  ;;  %v9171_v16 = vld [vmem:[%s17353_s3 + $0x98] sm:$0xf0] }
  0xb9   :  { %13628 = vpow2.f32 %v9092_v39  ;;  %1072 = vmatpush.bf16.msra.mxu2 %v9150_v22  ;;  %1047 = vmatpush.bf16.msra.mxu0 %v9130_v30  ;;  %v9345_v22 = vld [vmem:[%s17353_s3 + $0x1e8] sm:$0xf]  ;;  %v12790_v18 = vld [vmem:[%s17353_s3 + $0x18c] sm:$0xf] }
  0xba   :  { %v502_v49 = vpop.f32.mrf.mxu2  ;;  %v13627_v55 = vpop.eup %13626 }
  0xbb   :  { %v515_v50 = vpop.f32.mrf.mxu3  ;;  %v14432_v62 = vadd.f32 1.0, %v13627_v55  ;;  %1060 = vmatpush.bf16.msra.mxu1 %v9258_v34  ;;  %v9242_v55 = vor.u32 %v12779_v52, %v9241_v9  ;;  %v9222_v34 = vor.u32 %v12770_v27, %v9219_v28  ;;  %v12766_v9 = vld [vmem:[%s17353_s3 + $0xcc] sm:$0xf]  ;;  %v9331_v52 = vld [vmem:[%s17353_s3 + $0x1d8] sm:$0xf0] }
  0xbc   :  { %v9262_v50 = vor.u32 %v12781_v36, %v9259_v43  ;;  %v9201_v36 = vld [vmem:[%s17353_s3 + $0xc8] sm:$0xf] }
  0xbd   :  { %13630 = vrcp.f32 %v14432_v62  ;;  %v585_v29 = vand.u32 2147483648, %v14432_v62  ;;  %v583_v40 = vand.u32 2147483647, %v14432_v62  ;;  %1073 = vmatpush.bf16.msra.mxu2 %v9134_v42  ;;  %vm579_vm0 = vweird.f32 %v14432_v62  ;;  %1048 = vmatpush.bf16.msra.mxu0 %v9114_v51  ;;  %v9329_v43 = vld [vmem:[%s17353_s3 + $0x1c8] sm:$0xf] }
  0xbe   :  { %1086 = vmatpush.bf16.msra.mxu3 %v9262_v50  ;;  %v12798_v50 = vld [vmem:[%s17353_s3 + $0x1cc] sm:$0xf] }
  0xbf   :  { %v13629_v4 = vpop.eup %13628  ;;  %v14538_v49 = vor.u32 1.1754944e-38, %v585_v29  ;;  %1061 = vmatpush.bf16.msra.mxu1 %v9242_v55  ;;  %v12802_v29 = vld [vmem:[%s17353_s3 + $0x1ec] sm:$0xf]  ;;  %vm14618_vm5 = vcmp.eq.f32.partialorder %v583_v40, 8.507059e+37  ;;  %v12764_v55 = vld [vmem:[%s17353_s3 + $0xb4] sm:$0xf0] }
  0xc0   :  { %v14456_v11 = vadd.f32 1.0, %v13629_v4  ;;  %v9225_v4 = vld [vmem:[%s17353_s3 + $0x100] sm:$0xf]  ;;  %v9186_v2 = vor.u32 %v12764_v55, %v9185_v53  ;;  %v9121_v53 = vld [vmem:[%s17353_s3 + $0x28] sm:$0xf] }
  0xc1   :  { %1074 = vmatpush.bf16.msra.mxu2 %v9118_v63  ;;  %v9226_v60 = vor.u32 %v12775_v7, %v9225_v4  ;;  %1049 = vmatpush.bf16.msra.mxu0 %v9098_v6  ;;  %v12796_v63 = vld [vmem:[%s17353_s3 + $0x1b4] sm:$0xf0]  ;;  %v12794_v4 = vld [vmem:[%s17353_s3 + $0x1ac] sm:$0xf] }
  0xc2   :  { %13632 = vrcp.f32 %v14456_v11  ;;  %v604_v47 = vand.u32 2147483648, %v14456_v11  ;;  %v602_v54 = vand.u32 2147483647, %v14456_v11  ;;  %vm598_vm3 = vweird.f32 %v14456_v11  ;;  %1087 = vmatpush.bf16.msra.mxu3 %v9246_v1  ;;  %v12748_v55 = vld [vmem:[%s17353_s3 + $0x34] sm:$0xf0] }
  0xc3   :  { %v14486_v24 = vpop.eup %13630  ;;  %1062 = vmatpush.bf16.msra.mxu1 %v9226_v60  ;;  %v12792_v60 = vld [vmem:[%s17353_s3 + $0x194] sm:$0xf0] }
  0xc4   :  { %v14515_v38 = vmul.f32 %v14486_v24, %v14432_v62  ;;  %vm580_vm1 = vweird.f32 %v14486_v24  ;;  %v12768_v62 = vld [vmem:[%s17353_s3 + $0xd4] sm:$0xf0]  ;;  %vm603_vm7 = vcmp.eq.f32.partialorder %v602_v54, 8.507059e+37 }
  0xc5   :  { %vm14582_vm2 = vmor %vm579_vm0, %vm580_vm1  ;;  %1075 = vmatpush.bf16.msra.mxu2 %v9102_v61  ;;  %1094 = vmatpush.bf16.msrb.mxu0 %v9218_v26  ;;  %v9202_v42 = vor.u32 %v12768_v62, %v9201_v36  ;;  %v12758_v61 = vld [vmem:[%s17353_s3 + $0x8c] sm:$0xf]  ;;  %v12756_v54 = vld [vmem:[%s17353_s3 + $0x74] sm:$0xf0] }
  0xc6   :  { %v576_v59 = vsub.f32 1.0, %v14515_v38  ;;  %1088 = vmatpush.bf16.msra.mxu3 %v9230_v20  ;;  %v9094_v20 = vld [vmem:[%s17351_s1 + $0x4] sm:$0xf]  ;;  %v12786_v36 = vld [vmem:[%s17353_s3 + $0x16c] sm:$0xf] }
  0xc7   :  { %639 = vst [vmem:[#allocation4] sm:$0xf] %v9094_v20  ;;  %v9283_v62 = vld [vmem:[%s17353_s3 + $0x178] sm:$0xf0]  ;;  %v9137_v38 = vld [vmem:[%s17353_s3 + $0x48] sm:$0xf] }
  0xc8   :  { %v14511_v37 = vpop.eup %13632  ;;  %v577_v30 = vmul.f32 %v14486_v24, %v576_v59  ;;  %v9313_v59 = vld [vmem:[%s17353_s3 + $0x1a8] sm:$0xf]  ;;  %v9235_v20 = vld [vmem:[%s17353_s3 + $0x118] sm:$0xf0] }
  0xc9   :  { %v14524_v44 = vmul.f32 %v14511_v37, %v14456_v11  ;;  %vm599_vm4 = vweird.f32 %v14511_v37  ;;  %1120 = vmatpush.bf16.msrb.mxu2 %v9222_v34  ;;  %1095 = vmatpush.bf16.msrb.mxu0 %v9202_v42  ;;  %v9314_v7 = vor.u32 %v12796_v63, %v9313_v59  ;;  %v9153_v11 = vld [vmem:[%s17353_s3 + $0x68] sm:$0xf]  ;;  %v9155_v34 = vld [vmem:[%s17353_s3 + $0x78] sm:$0xf0]  ;;  %v12780_v63 = vld [vmem:[%s17353_s3 + $0x134] sm:$0xf0] }
  0xca   :  { %vm14635_vm6 = vmor %vm598_vm3, %vm599_vm4  ;;  %v578_v56 = vadd.f32 %v14486_v24, %v577_v30  ;;  %v9154_v31 = vor.u32 %v12756_v54, %v9153_v11  ;;  %v9265_v42 = vld [vmem:[%s17353_s3 + $0x148] sm:$0xf] }
  0xcb   :  { %v526_v39 = vpop.f32.mrf.mxu0  ;;  %v595_v58 = vsub.f32 1.0, %v14524_v44  ;;  %v12800_v44 = vld [vmem:[%s17353_s3 + $0x1d4] sm:$0xf0]  ;;  %v9249_v59 = vld [vmem:[%s17353_s3 + $0x128] sm:$0xf] }
  0xcc   :  { %v527_v12 = vadd.f32 %v526_v39, %v132_v33  ;;  %v9346_v33 = vor.u32 %v12804_v23, %v9345_v22  ;;  %v9330_v46 = vor.u32 %v12800_v44, %v9329_v43  ;;  %v582_v17 = vsel %vm14582_vm2, %v14486_v24, %v578_v56  ;;  %v12784_v43 = vld [vmem:[%s17353_s3 + $0x154] sm:$0xf0] }
  0xcd   :  { %v14536_v48 = vpop.f32.mrf.mxu1  ;;  %v596_v45 = vmul.f32 %v14511_v37, %v595_v58  ;;  %v9334_v58 = vor.u32 %v12798_v50, %v9331_v52  ;;  %v605_v22 = vor.u32 1.1754944e-38, %v604_v47  ;;  %1096 = vmatpush.bf16.msrb.mxu0 %v9186_v2  ;;  %v9170_v23 = vor.u32 %v12760_v10, %v9169_v8  ;;  %v9267_v52 = vld [vmem:[%s17353_s3 + $0x158] sm:$0xf0]  ;;  %v12778_v2 = vld [vmem:[%s17353_s3 + $0x12c] sm:$0xf] }
  0xce   :  { %v540_v39 = vadd.f32 %v14536_v48, %v527_v12  ;;  %1107 = vmatpush.bf16.msrb.mxu1 %v9346_v33  ;;  %v9203_v48 = vld [vmem:[%s17353_s3 + $0xd8] sm:$0xf0]  ;;  %v9297_v12 = vld [vmem:[%s17353_s3 + $0x188] sm:$0xf]  ;;  %v587_v27 = vsel %vm14618_vm5, %v14538_v49, %v582_v17  ;;  %v9174_v47 = vor.u32 %v12758_v61, %v9171_v16  ;;  %v12754_v33 = vld [vmem:[%s17353_s3 + $0x6c] sm:$0xf]  ;;  %v9250_v8 = vor.u32 %v12780_v63, %v9249_v59 }
  0xcf   :  { %v9206_v51 = vor.u32 %v12766_v9, %v9203_v48  ;;  %v597_v6 = vadd.f32 %v14511_v37, %v596_v45  ;;  %v9281_v49 = vld [vmem:[%s17353_s3 + $0x168] sm:$0xf]  ;;  %v12750_v45 = vld [vmem:[%s17353_s3 + $0x4c] sm:$0xf]  ;;  %v12776_v16 = vld [vmem:[%s17353_s3 + $0x114] sm:$0xf0] }
  0xd0   :  { %v12782_v9 = vld [vmem:[%s17353_s3 + $0x14c] sm:$0xf]  ;;  %v9105_v10 = vld [vmem:[%s17353_s3 + $0x8] sm:$0xf]  ;;  %v12861_v59 = vld [vmem:[%s17353_s3 + $0x1c4] sm:$0xf] }
  0xd1   :  { %1121 = vmatpush.bf16.msrb.mxu2 %v9206_v51  ;;  %v601_v24 = vsel %vm14635_vm6, %v14511_v37, %v597_v6  ;;  %1097 = vmatpush.bf16.msrb.mxu0 %v9170_v23  ;;  %v9266_v51 = vor.u32 %v12784_v43, %v9265_v42  ;;  %v9251_v6 = vld [vmem:[%s17353_s3 + $0x138] sm:$0xf0]  ;;  %v9233_v61 = vld [vmem:[%s17353_s3 + $0x108] sm:$0xf]  ;;  %v12742_v17 = vld [vmem:[%s17353_s3 + $0xc] sm:$0xf] }
  0xd2   :  { %v552_v5 = vpop.f32.mrf.mxu2  ;;  %1108 = vmatpush.bf16.msrb.mxu1 %v9330_v46  ;;  %v606_v37 = vsel %vm603_vm7, %v605_v22, %v601_v24  ;;  %v9139_v46 = vld [vmem:[%s17353_s3 + $0x58] sm:$0xf0]  ;;  %v9234_v24 = vor.u32 %v12776_v16, %v9233_v61  ;;  %v9599_v42 = vld [vmem:[%s17353_s3 + $0x1f0] sm:$0xf0] }
  0xd3   :  { %v553_v14 = vadd.f32 %v552_v5, %v133_v41  ;;  %v565_v15 = vpop.f32.mrf.mxu3  ;;  %v528_v19 = vpop.f32.mrf.mxu0  ;;  %v9350_v41 = vor.u32 %v12802_v29, %v9347_v35  ;;  %v9315_v5 = vld [vmem:[%s17353_s3 + $0x1b8] sm:$0xf0]  ;;  %v12788_v29 = vld [vmem:[%s17353_s3 + $0x174] sm:$0xf0]  ;;  %v9158_v35 = vor.u32 %v12754_v33, %v9155_v34  ;;  %v12835_v33 = vld [vmem:[%s17353_s3 + $0xec] sm:$0xf0] }
  0xd4   :  { %v9299_v19 = vld [vmem:[%s17353_s3 + $0x198] sm:$0xf0]  ;;  %v9597_v34 = vld [vmem:[%s17353_s3 + $0x1e0] sm:$0xf]  ;;  %v9583_v63 = vld [vmem:[%s17353_s3 + $0x1d0] sm:$0xf0] }
  0xd5   :  { %v566_v25 = vadd.f32 %v565_v15, %v553_v14  ;;  %v541_v32 = vpop.f32.mrf.mxu1  ;;  %1133 = vmatpush.bf16.msrb.mxu3 %v9350_v41  ;;  %v9190_v14 = vor.u32 %v12762_v0, %v9187_v3  ;;  %v9318_v15 = vor.u32 %v12794_v4, %v9315_v5  ;;  %v9302_v28 = vor.u32 %v12790_v18, %v9299_v19  ;;  %v12752_v41 = vld [vmem:[%s17353_s3 + $0x54] sm:$0xf0]  ;;  %v12746_v0 = vld [vmem:[%s17353_s3 + $0x2c] sm:$0xf]  ;;  %v9107_v18 = vld [vmem:[%s17353_s3 + $0x18] sm:$0xf0] }
  0xd6   :  { %1109 = vmatpush.bf16.msrb.mxu1 %v9314_v7  ;;  %v9282_v32 = vor.u32 %v12788_v29, %v9281_v49  ;;  %1098 = vmatpush.bf16.msrb.mxu0 %v9154_v31  ;;  %v9138_v44 = vor.u32 %v12752_v41, %v9137_v38  ;;  %v9122_v5 = vor.u32 %v12748_v55, %v9121_v53  ;;  %v12774_v19 = vld [vmem:[%s17353_s3 + $0x10c] sm:$0xf]  ;;  %v14835_v31 = vld [vmem:[%s17354_s4] sm:$0xf]  ;;  %v9471_v38 = vld [vmem:[%s17353_s3 + $0xf0] sm:$0xf0] }
  0xd7   :  { %v9093_v40 = vmul.f32 -1.442695, %v566_v25  ;;  %v9298_v25 = vor.u32 %v12792_v60, %v9297_v12  ;;  %1122 = vmatpush.bf16.msrb.mxu2 %v9190_v14  ;;  %v12744_v12 = vld [vmem:[%s17353_s3 + $0x14] sm:$0xf0]  ;;  %v9254_v60 = vor.u32 %v12778_v2, %v9251_v6  ;;  %v12865_v41 = vld [vmem:[%s17353_s3 + $0x1e4] sm:$0xf] }
  0xd8   :  { %v9106_v22 = vor.u32 %v12744_v12, %v9105_v10  ;;  %v707_v43 = vperm.slane %v14835_v31, 0  ;;  %v9455_v53 = vld [vmem:[%s17353_s3 + $0xd0] sm:$0xf0]  ;;  %v9437_v2 = vld [vmem:[%s17353_s3 + $0xa0] sm:$0xf]  ;;  %v708_v12 = vperm.slane %v14835_v31, 1 }
  0xd9   :  { %13634 = vpow2.f32 %v9093_v40  ;;  %1134 = vmatpush.bf16.msrb.mxu3 %v9334_v58  ;;  %v9286_v40 = vor.u32 %v12786_v36, %v9283_v62  ;;  %v9270_v58 = vor.u32 %v12782_v9, %v9267_v52  ;;  %v12867_v36 = vld [vmem:[%s17353_s3 + $0x1ec] sm:$0xf0]  ;;  %v12833_v62 = vld [vmem:[%s17353_s3 + $0xe4] sm:$0xf]  ;;  %v9581_v9 = vld [vmem:[%s17353_s3 + $0x1c0] sm:$0xf] }
  0xda   :  { %v554_v57 = vpop.f32.mrf.mxu2  ;;  %13636 = vtanh.f32 %v540_v39  ;;  %1110 = vmatpush.bf16.msrb.mxu1 %v9298_v25  ;;  %v628_v39 = vmul.f32 0.0, %v606_v37  ;;  %1099 = vmatpush.bf16.msrb.mxu0 %v9138_v44  ;;  %v9602_v44 = vor.u32 %v12865_v41, %v9599_v42  ;;  %v12829_v52 = vld [vmem:[%s17353_s3 + $0xc4] sm:$0xf]  ;;  %v9439_v10 = vld [vmem:[%s17353_s3 + $0xb0] sm:$0xf0] }
  0xdb   :  { %v567_v1 = vpop.f32.mrf.mxu3  ;;  %1123 = vmatpush.bf16.msrb.mxu2 %v9174_v47  ;;  %v9142_v57 = vor.u32 %v12750_v45, %v9139_v46  ;;  %v9453_v45 = vld [vmem:[%s17353_s3 + $0xc0] sm:$0xf]  ;;  %v12831_v46 = vld [vmem:[%s17353_s3 + $0xcc] sm:$0xf0]  ;;  %v9567_v61 = vld [vmem:[%s17353_s3 + $0x1b0] sm:$0xf0] }
  0xdc   :  { %v9123_v1 = vld [vmem:[%s17353_s3 + $0x38] sm:$0xf0]  ;;  %v12849_v41 = vld [vmem:[%s17353_s3 + $0x164] sm:$0xf]  ;;  %v9535_v42 = vld [vmem:[%s17353_s3 + $0x170] sm:$0xf0] }
  0xdd   :  { %1135 = vmatpush.bf16.msrb.mxu3 %v9318_v15  ;;  %v9126_v15 = vor.u32 %v12746_v0, %v9123_v1  ;;  %v9586_v1 = vor.u32 %v12861_v59, %v9583_v63  ;;  %v9391_v59 = vld [vmem:[%s17353_s3 + $0x50] sm:$0xf0] }
  0xde   :  { %1111 = vmatpush.bf16.msrb.mxu1 %v9282_v32  ;;  %1100 = vmatpush.bf16.msrb.mxu0 %v9122_v5  ;;  %v9469_v32 = vld [vmem:[%s17353_s3 + $0xe0] sm:$0xf] }
  0xdf   :  { %v13635_v21 = vpop.eup %13634  ;;  %1124 = vmatpush.bf16.msrb.mxu2 %v9158_v35  ;;  %v9470_v35 = vor.u32 %v12835_v33, %v9469_v32  ;;  %v12819_v32 = vld [vmem:[%s17353_s3 + $0x6c] sm:$0xf0]  ;;  %v9533_v33 = vld [vmem:[%s17353_s3 + $0x160] sm:$0xf] }
  0xe0   :  { %v14722_v13 = vadd.f32 1.0, %v13635_v21  ;;  %v13637_v26 = vpop.eup %13636 }
  0xe1   :  { %v629_v30 = vmul.f32 %v13637_v26, %v587_v27  ;;  %1136 = vmatpush.bf16.msrb.mxu3 %v9302_v28  ;;  %v9110_v26 = vor.u32 %v12742_v17, %v9107_v18  ;;  %v9238_v27 = vor.u32 %v12774_v19, %v9235_v20  ;;  %v9421_v18 = vld [vmem:[%s17353_s3 + $0x80] sm:$0xf]  ;;  %v12823_v19 = vld [vmem:[%s17353_s3 + $0x8c] sm:$0xf0] }
  0xe2   :  { %13638 = vrcp.f32 %v14722_v13  ;;  %v622_v4 = vand.u32 2147483647, %v14722_v13  ;;  %v624_v7 = vand.u32 2147483648, %v14722_v13  ;;  %1112 = vmatpush.bf16.msrb.mxu1 %v9266_v51  ;;  %vm618_vm9 = vweird.f32 %v14722_v13  ;;  %1101 = vmatpush.bf16.msrb.mxu0 %v9106_v22  ;;  %v12863_v51 = vld [vmem:[%s17353_s3 + $0x1cc] sm:$0xf0] }
  0xe3   :  { %v14773_v50 = vadd.f32 %v629_v30, %v628_v39  ;;  %1125 = vmatpush.bf16.msrb.mxu2 %v9142_v57  ;;  %v9598_v39 = vor.u32 %v12867_v36, %v9597_v34  ;;  %v9582_v57 = vor.u32 %v12863_v51, %v9581_v9  ;;  %v9549_v20 = vld [vmem:[%s17353_s3 + $0x180] sm:$0xf]  ;;  %v12817_v36 = vld [vmem:[%s17353_s3 + $0x64] sm:$0xf]  ;;  %v12815_v9 = vld [vmem:[%s17353_s3 + $0x4c] sm:$0xf0] }
  0xe4   :  { %v625_v23 = vor.u32 1.1754944e-38, %v624_v7  ;;  %vm623_vm11 = vcmp.eq.f32.partialorder %v622_v4, 8.507059e+37  ;;  %v9565_v4 = vld [vmem:[%s17353_s3 + $0x1a0] sm:$0xf]  ;;  %v12859_v7 = vld [vmem:[%s17353_s3 + $0x1ac] sm:$0xf0] }
  0xe5   :  { %1137 = vmatpush.bf16.msrb.mxu3 %v9286_v40  ;;  %13640 = vtanh.f32 %v14773_v50  ;;  %v9474_v40 = vor.u32 %v12833_v62, %v9471_v38  ;;  %v9407_v62 = vld [vmem:[%s17353_s3 + $0x70] sm:$0xf0] }
  0xe6   :  { %1113 = vmatpush.bf16.msrb.mxu1 %v9250_v8  ;;  %v12825_v8 = vld [vmem:[%s17353_s3 + $0xa4] sm:$0xf] }
  0xe7   :  { %1126 = vmatpush.bf16.msrb.mxu2 %v9126_v15  ;;  %v9442_v15 = vor.u32 %v12825_v8, %v9439_v10  ;;  %v9501_v8 = vld [vmem:[%s17353_s3 + $0x120] sm:$0xf]  ;;  %v12843_v10 = vld [vmem:[%s17353_s3 + $0x12c] sm:$0xf0] }
  0xe8   :  { %v13639_v48 = vpop.eup %13638 }
  0xe9   :  { %v614_v56 = vmul.f32 %v13639_v48, %v14722_v13  ;;  %vm619_vm8 = vweird.f32 %v13639_v48  ;;  %1138 = vmatpush.bf16.msrb.mxu3 %v9270_v58  ;;  %v9458_v58 = vor.u32 %v12829_v52, %v9455_v53  ;;  %v9517_v53 = vld [vmem:[%s17353_s3 + $0x140] sm:$0xf] }
  0xea   :  { %vm620_vm10 = vmor %vm618_vm9, %vm619_vm8  ;;  %1114 = vmatpush.bf16.msrb.mxu1 %v9234_v24  ;;  %v12855_v24 = vld [vmem:[%s17353_s3 + $0x18c] sm:$0xf0] }
  0xeb   :  { %v615_v3 = vsub.f32 1.0, %v614_v56  ;;  %v13641_v47 = vpop.eup %13640  ;;  %1127 = vmatpush.bf16.msrb.mxu2 %v9110_v26  ;;  %v9423_v26 = vld [vmem:[%s17353_s3 + $0x90] sm:$0xf0] }
  0xed   :  { %v616_v14 = vmul.f32 %v13639_v48, %v615_v3  ;;  %1139 = vmatpush.bf16.msrb.mxu3 %v9254_v60  ;;  %v12827_v3 = vld [vmem:[%s17353_s3 + $0xac] sm:$0xf0]  ;;  %v12857_v60 = vld [vmem:[%s17353_s3 + $0x1a4] sm:$0xf] }
  0xee   :  { %v9438_v6 = vor.u32 %v12827_v3, %v9437_v2  ;;  %v9570_v17 = vor.u32 %v12857_v60, %v9567_v61  ;;  %v9519_v2 = vld [vmem:[%s17353_s3 + $0x150] sm:$0xf0]  ;;  %v710_v3 = vperm.slane %v14835_v31, 3  ;;  %v12841_v61 = vld [vmem:[%s17353_s3 + $0x124] sm:$0xf] }
  0xef   :  { %v617_v21 = vadd.f32 %v13639_v48, %v616_v14  ;;  %v9566_v14 = vor.u32 %v12859_v7, %v9565_v4  ;;  %v9375_v60 = vld [vmem:[%s17353_s3 + $0x30] sm:$0xf0] }
  0xf1   :  { %v621_v25 = vsel %vm620_vm10, %v13639_v48, %v617_v21  ;;  %1140 = vmatpush.bf16.msrb.mxu3 %v9238_v27  ;;  %v9454_v48 = vor.u32 %v12831_v46, %v9453_v45  ;;  %v9389_v46 = vld [vmem:[%s17353_s3 + $0x40] sm:$0xf] }
  0xf2   :  { %v626_v28 = vsel %vm623_vm11, %v625_v23, %v621_v25  ;;  %v9422_v23 = vor.u32 %v12823_v19, %v9421_v18  ;;  %v12821_v25 = vld [vmem:[%s17353_s3 + $0x84] sm:$0xf]  ;;  %v9390_v52 = vor.u32 %v12815_v9, %v9389_v46  ;;  %v9479_v46 = vld [vmem:[%s17353_s3 + $0xf8] sm:$0xf0] }
  0xf3   :  { %v632_v11 = vmul.f32 %v13641_v47, %v626_v28 }
  0xf5   :  { %v635_v37 = vpack.c.bf16 %v632_v11, %v632_v11  ;;  %v9550_v11 = vor.u32 %v12855_v24, %v9549_v20  ;;  %v9485_v24 = vld [vmem:[%s17353_s3 + $0x100] sm:$0xf] }
  0xf7   :  { %636 = vst [vmem:[#allocation4 + $0x4] sm:$0xf] %v635_v37  ;;  %v9426_v37 = vor.u32 %v12821_v25, %v9423_v26  ;;  %v709_v26 = vperm.slane %v14835_v31, 2  ;;  %v9359_v31 = vld [vmem:[%s17353_s3 + $0x10] sm:$0xf0] }
  0xfe   :  { %v640_v13 = vld [vmem:[#allocation4] sm:$0xff] }
  0xff   :  { %v716_v54 = vunpack.c.l.b16 %v640_v13  ;;  %v717_v49 = vunpack.c.h.b16 %v640_v13  ;;  %v12853_v13 = vld [vmem:[%s17353_s3 + $0x184] sm:$0xf] }
 0x101   :  { %v718_v29 = vpack.c.b16 %v716_v54, %v716_v54  ;;  %v719_v30 = vpack.c.b16 %v717_v49, %v717_v49  ;;  %v9551_v54 = vld [vmem:[%s17353_s3 + $0x190] sm:$0xf0] }
 0x102   :  { %v9554_v49 = vor.u32 %v12853_v13, %v9551_v54 }
 0x103   :  { %1050 = vmatmul.bf16.vlgmr.msra.gmra.mxu0 %v718_v29  ;;  %1063 = vmatmul.bf16.vlgmr.msra.gmra.mxu1 %v719_v30 }
 0x104   :  { %1076 = vmatmul.bf16.vlgmr.msra.gmra.mxu2 %v718_v29  ;;  %1089 = vmatmul.bf16.vlgmr.msra.gmra.mxu3 %v719_v30 }
 0x105   :  { %1619 = vmatpush.bf16.msra.mxu0 %v9470_v35  ;;  %1632 = vmatpush.bf16.msra.mxu1 %v9598_v39  ;;  %v12851_v35 = vld [vmem:[%s17353_s3 + $0x16c] sm:$0xf0] }
 0x106   :  { %1645 = vmatpush.bf16.msra.mxu2 %v9474_v40  ;;  %1658 = vmatpush.bf16.msra.mxu3 %v9602_v44  ;;  %v9534_v39 = vor.u32 %v12851_v35, %v9533_v33  ;;  %v9410_v40 = vor.u32 %v12817_v36, %v9407_v62  ;;  %v9538_v44 = vor.u32 %v12849_v41, %v9535_v42  ;;  %v9487_v35 = vld [vmem:[%s17353_s3 + $0x110] sm:$0xf0]  ;;  %v9477_v36 = vld [vmem:[%s17353_s3 + $0xe8] sm:$0xf] }
 0x107   :  { %v9605_v41 = vld [vmem:[%s17353_s3 + $0x1e8] sm:$0xf] }
 0x109   :  { %1620 = vmatpush.bf16.msra.mxu0 %v9454_v48  ;;  %1633 = vmatpush.bf16.msra.mxu1 %v9582_v57 }
 0x10a   :  { %1646 = vmatpush.bf16.msra.mxu2 %v9458_v58  ;;  %1659 = vmatpush.bf16.msra.mxu3 %v9586_v1  ;;  %v12845_v1 = vld [vmem:[%s17353_s3 + $0x144] sm:$0xf] }
 0x10b   :  { %v9522_v4 = vor.u32 %v12845_v1, %v9519_v2  ;;  %v9589_v1 = vld [vmem:[%s17353_s3 + $0x1c8] sm:$0xf] }
 0x10d   :  { %1621 = vmatpush.bf16.msra.mxu0 %v9438_v6  ;;  %1634 = vmatpush.bf16.msra.mxu1 %v9566_v14  ;;  %v12811_v6 = vld [vmem:[%s17353_s3 + $0x2c] sm:$0xf0] }
 0x10e   :  { %1647 = vmatpush.bf16.msra.mxu2 %v9442_v15  ;;  %1660 = vmatpush.bf16.msra.mxu3 %v9570_v17  ;;  %v9502_v15 = vor.u32 %v12843_v10, %v9501_v8 }
 0x111   :  { %1622 = vmatpush.bf16.msra.mxu0 %v9422_v23  ;;  %1635 = vmatpush.bf16.msra.mxu1 %v9550_v11  ;;  %v12807_v23 = vld [vmem:[%s17353_s3 + $0xc] sm:$0xf0]  ;;  %v12805_v11 = vld [vmem:[%s17353_s3 + $0x4] sm:$0xf] }
 0x112   :  { %1648 = vmatpush.bf16.msra.mxu2 %v9426_v37  ;;  %1661 = vmatpush.bf16.msra.mxu3 %v9554_v49 }
 0x113   :  { %1102 = vmatmul.bf16.vlgmr.msrb.gmra.mxu0 %v718_v29  ;;  %1115 = vmatmul.bf16.vlgmr.msrb.gmra.mxu1 %v719_v30 }
 0x114   :  { %1128 = vmatmul.bf16.vlgmr.msrb.gmra.mxu2 %v718_v29  ;;  %1141 = vmatmul.bf16.vlgmr.msrb.gmra.mxu3 %v719_v30  ;;  %v9405_v30 = vld [vmem:[%s17353_s3 + $0x60] sm:$0xf] }
 0x115   :  { %v9406_v34 = vor.u32 %v12819_v32, %v9405_v30  ;;  %1636 = vmatpush.bf16.msra.mxu1 %v9534_v39  ;;  %v12837_v30 = vld [vmem:[%s17353_s3 + $0x104] sm:$0xf] }
 0x116   :  { %1649 = vmatpush.bf16.msra.mxu2 %v9410_v40  ;;  %1662 = vmatpush.bf16.msra.mxu3 %v9538_v44  ;;  %v9490_v39 = vor.u32 %v12837_v30, %v9487_v35  ;;  %v12836_v40 = vld [vmem:[%s17353_s3 + $0xf4] sm:$0xf0]  ;;  %v12834_v44 = vld [vmem:[%s17353_s3 + $0xec] sm:$0xf] }
 0x117   :  { %1623 = vmatpush.bf16.msra.mxu0 %v9406_v34  ;;  %v9362_v34 = vor.u32 %v12805_v11, %v9359_v31  ;;  %v9478_v42 = vor.u32 %v12836_v40, %v9477_v36  ;;  %v9447_v11 = vld [vmem:[%s17353_s3 + $0xb8] sm:$0xf0]  ;;  %v9429_v31 = vld [vmem:[%s17353_s3 + $0x88] sm:$0xf]  ;;  %v12824_v30 = vld [vmem:[%s17353_s3 + $0x94] sm:$0xf0] }
 0x118   :  { %v12856_v35 = vld [vmem:[%s17353_s3 + $0x194] sm:$0xf0]  ;;  %v12822_v36 = vld [vmem:[%s17353_s3 + $0x8c] sm:$0xf] }
 0x11a   :  { %1663 = vmatpush.bf16.msra.mxu3 %v9522_v4  ;;  %v12864_v4 = vld [vmem:[%s17353_s3 + $0x1d4] sm:$0xf0] }
 0x11b   :  { %1624 = vmatpush.bf16.msra.mxu0 %v9390_v52  ;;  %v9482_v52 = vor.u32 %v12834_v44, %v9479_v46  ;;  %v9559_v44 = vld [vmem:[%s17353_s3 + $0x198] sm:$0xf0] }
 0x180   :  { %v1051_v55 = vpop.f32.mrf.mxu0  ;;  %v1064_v56 = vpop.f32.mrf.mxu1 }
 0x181   :  { %v1052_v0 = vadd.f32 %v1051_v55, %v707_v43  ;;  %v12847_v55 = vld [vmem:[%s17353_s3 + $0x14c] sm:$0xf0] }
 0x182   :  { %v9518_v63 = vor.u32 %v12847_v55, %v9517_v53  ;;  %v12866_v53 = vld [vmem:[%s17353_s3 + $0x1ec] sm:$0xf]  ;;  %v9607_v55 = vld [vmem:[%s17353_s3 + $0x1f8] sm:$0xf0] }
 0x183   :  { %v1065_v5 = vadd.f32 %v1064_v56, %v1052_v0  ;;  %v12813_v56 = vld [vmem:[%s17353_s3 + $0x44] sm:$0xf] }
 0x184   :  { %v9394_v0 = vor.u32 %v12813_v56, %v9391_v59  ;;  %1637 = vmatpush.bf16.msra.mxu1 %v9518_v63  ;;  %v9461_v63 = vld [vmem:[%s17353_s3 + $0xc8] sm:$0xf] }
 0x185   :  { %v9351_v16 = vmul.f32 -1.442695, %v1065_v5  ;;  %v9373_v5 = vld [vmem:[%s17353_s3 + $0x20] sm:$0xf] }
 0x186   :  { %1650 = vmatpush.bf16.msra.mxu2 %v9394_v0  ;;  %v9374_v7 = vor.u32 %v12811_v6, %v9373_v5  ;;  %v12832_v0 = vld [vmem:[%s17353_s3 + $0xd4] sm:$0xf0]  ;;  %v12830_v5 = vld [vmem:[%s17353_s3 + $0xcc] sm:$0xf]  ;;  %v9463_v6 = vld [vmem:[%s17353_s3 + $0xd8] sm:$0xf0] }
 0x187   :  { %13642 = vpow2.f32 %v9351_v16  ;;  %v1077_v21 = vpop.f32.mrf.mxu2  ;;  %v1090_v22 = vpop.f32.mrf.mxu3  ;;  %v9503_v16 = vld [vmem:[%s17353_s3 + $0x130] sm:$0xf0] }
 0x188   :  { %v1078_v27 = vadd.f32 %v1077_v21, %v708_v12  ;;  %v1053_v47 = vpop.f32.mrf.mxu0  ;;  %v1066_v28 = vpop.f32.mrf.mxu1  ;;  %v12809_v12 = vld [vmem:[%s17353_s3 + $0x24] sm:$0xf]  ;;  %1625 = vmatpush.bf16.msra.mxu0 %v9374_v7  ;;  %v9506_v20 = vor.u32 %v12841_v61, %v9503_v16  ;;  %1638 = vmatpush.bf16.msra.mxu1 %v9502_v15  ;;  %v12862_v15 = vld [vmem:[%s17353_s3 + $0x1cc] sm:$0xf] }
 0x189   :  { %v9378_v19 = vor.u32 %v12809_v12, %v9375_v60  ;;  %v12839_v28 = vld [vmem:[%s17353_s3 + $0x10c] sm:$0xf0]  ;;  %v9590_v12 = vor.u32 %v12864_v4, %v9589_v1  ;;  %v9591_v60 = vld [vmem:[%s17353_s3 + $0x1d8] sm:$0xf0] }
 0x18a   :  { %v1091_v29 = vadd.f32 %v1090_v22, %v1078_v27  ;;  %v9357_v22 = vld [vmem:[%s17353_s3] sm:$0xf]  ;;  %1664 = vmatpush.bf16.msra.mxu3 %v9506_v20  ;;  %v9486_v33 = vor.u32 %v12839_v28, %v9485_v24  ;;  %v9594_v20 = vor.u32 %v12862_v15, %v9591_v60  ;;  %v9415_v1 = vld [vmem:[%s17353_s3 + $0x78] sm:$0xf0] }
 0x18b   :  { %1651 = vmatpush.bf16.msra.mxu2 %v9378_v19  ;;  %v9543_v4 = vld [vmem:[%s17353_s3 + $0x178] sm:$0xf0] }
 0x18c   :  { %v9352_v38 = vmul.f32 -1.442695, %v1091_v29  ;;  %v9358_v29 = vor.u32 %v12807_v23, %v9357_v22  ;;  %1639 = vmatpush.bf16.msra.mxu1 %v9486_v33  ;;  %v9445_v22 = vld [vmem:[%s17353_s3 + $0xa8] sm:$0xf]  ;;  %v12828_v23 = vld [vmem:[%s17353_s3 + $0xb4] sm:$0xf0] }
 0x18d   :  { %v13643_v43 = vpop.eup %13642 }
 0x18e   :  { %v14959_v45 = vadd.f32 1.0, %v13643_v43  ;;  %13644 = vpow2.f32 %v9352_v38  ;;  %1626 = vmatpush.bf16.msra.mxu0 %v9358_v29  ;;  %v12868_v43 = vld [vmem:[%s17353_s3 + $0x1f4] sm:$0xf0]  ;;  %1665 = vmatpush.bf16.msra.mxu3 %v9490_v39  ;;  %v12806_v39 = vld [vmem:[%s17353_s3 + $0xc] sm:$0xf] }
 0x18f   :  { %v1079_v48 = vpop.f32.mrf.mxu2  ;;  %v1092_v51 = vpop.f32.mrf.mxu3  ;;  %1652 = vmatpush.bf16.msra.mxu2 %v9362_v34 }
 0x190   :  { %13646 = vrcp.f32 %v14959_v45  ;;  %v14977_v57 = vpop.f32.mrf.mxu0  ;;  %v14979_v58 = vpop.f32.mrf.mxu1  ;;  %v1162_v18 = vand.u32 2147483648, %v14959_v45  ;;  %v1160_v37 = vand.u32 2147483647, %v14959_v45  ;;  %v9606_v51 = vor.u32 %v12868_v43, %v9605_v41  ;;  %v12854_v43 = vld [vmem:[%s17353_s3 + $0x18c] sm:$0xf] }
 0x191   :  { %v1104_v9 = vadd.f32 %v14977_v57, %v709_v26  ;;  %v9610_v57 = vor.u32 %v12866_v53, %v9607_v55  ;;  %vm1156_vm13 = vweird.f32 %v14959_v45  ;;  %v12860_v26 = vld [vmem:[%s17353_s3 + $0x1b4] sm:$0xf0]  ;;  %v9413_v53 = vld [vmem:[%s17353_s3 + $0x68] sm:$0xf] }
 0x192   :  { %v15052_v62 = vor.u32 1.1754944e-38, %v1162_v18  ;;  %1671 = vmatpush.bf16.msrb.mxu0 %v9478_v42  ;;  %1684 = vmatpush.bf16.msrb.mxu1 %v9606_v51  ;;  %v9430_v42 = vor.u32 %v12824_v30, %v9429_v31  ;;  %vm1161_vm3 = vcmp.eq.f32.partialorder %v1160_v37, 8.507059e+37 }
 0x193   :  { %1697 = vmatpush.bf16.msrb.mxu2 %v9482_v52  ;;  %1710 = vmatpush.bf16.msrb.mxu3 %v9610_v57  ;;  %v1117_v18 = vadd.f32 %v14979_v58, %v1104_v9  ;;  %v9573_v58 = vld [vmem:[%s17353_s3 + $0x1a8] sm:$0xf]  ;;  %v9562_v52 = vor.u32 %v12854_v43, %v9559_v44  ;;  %v12852_v57 = vld [vmem:[%s17353_s3 + $0x174] sm:$0xf0]  ;;  %v9495_v43 = vld [vmem:[%s17353_s3 + $0x118] sm:$0xf0] }
 0x194   :  { %v13645_v14 = vpop.eup %13644  ;;  %v9574_v28 = vor.u32 %v12860_v26, %v9573_v58  ;;  %v9509_v58 = vld [vmem:[%s17353_s3 + $0x128] sm:$0xf]  ;;  %v12844_v26 = vld [vmem:[%s17353_s3 + $0x134] sm:$0xf0] }
 0x195   :  { %v15015_v17 = vadd.f32 1.0, %v13645_v14  ;;  %v9466_v14 = vor.u32 %v12830_v5, %v9463_v6  ;;  %v9397_v5 = vld [vmem:[%s17353_s3 + $0x48] sm:$0xf]  ;;  %v12816_v6 = vld [vmem:[%s17353_s3 + $0x54] sm:$0xf0]  ;;  %v9510_v30 = vor.u32 %v12844_v26, %v9509_v58 }
 0x196   :  { %v15018_v21 = vpop.eup %13646  ;;  %1685 = vmatpush.bf16.msrb.mxu1 %v9590_v12  ;;  %v12814_v12 = vld [vmem:[%s17353_s3 + $0x4c] sm:$0xf]  ;;  %v9398_v60 = vor.u32 %v12816_v6, %v9397_v5  ;;  %v12925_v58 = vld [vmem:[%s17353_s3 + $0x1c4] sm:$0xf]  ;;  %v9843_v26 = vld [vmem:[%s17353_s3 + $0x1d0] sm:$0xf0] }
 0x197   :  { %v1152_v25 = vmul.f32 %v15018_v21, %v14959_v45  ;;  %13648 = vrcp.f32 %v15015_v17  ;;  %v1129_v27 = vpop.f32.mrf.mxu2  ;;  %v1142_v47 = vpop.f32.mrf.mxu3  ;;  %vm1157_vm12 = vweird.f32 %v15018_v21  ;;  %v1179_v7 = vand.u32 2147483647, %v15015_v17  ;;  %1698 = vmatpush.bf16.msrb.mxu2 %v9466_v14  ;;  %1711 = vmatpush.bf16.msrb.mxu3 %v9594_v20  ;;  %v9541_v45 = vld [vmem:[%s17353_s3 + $0x168] sm:$0xf] }
 0x198   :  { %v1130_v13 = vadd.f32 %v1129_v27, %v710_v3  ;;  %v1105_v54 = vpop.f32.mrf.mxu0  ;;  %v1118_v49 = vpop.f32.mrf.mxu1  ;;  %v9462_v3 = vor.u32 %v12832_v0, %v9461_v63  ;;  %v1181_v16 = vand.u32 2147483648, %v15015_v17  ;;  %vm15112_vm14 = vmor %vm1156_vm13, %vm1157_vm12  ;;  %v12826_v27 = vld [vmem:[%s17353_s3 + $0xac] sm:$0xf]  ;;  %vm1175_vm0 = vweird.f32 %v15015_v17 }
 0x199   :  { %v1153_v32 = vsub.f32 1.0, %v1152_v25  ;;  %v9446_v25 = vor.u32 %v12828_v23, %v9445_v22  ;;  %v9575_v54 = vld [vmem:[%s17353_s3 + $0x1b8] sm:$0xf0]  ;;  %v9450_v49 = vor.u32 %v12826_v27, %v9447_v11  ;;  %vm1180_vm2 = vcmp.eq.f32.partialorder %v1179_v7, 8.507059e+37  ;;  %v9381_v23 = vld [vmem:[%s17353_s3 + $0x28] sm:$0xf] }
 0x19a   :  { %v1143_v38 = vadd.f32 %v1142_v47, %v1130_v13  ;;  %1672 = vmatpush.bf16.msrb.mxu0 %v9462_v3  ;;  %v12858_v13 = vld [vmem:[%s17353_s3 + $0x1ac] sm:$0xf]  ;;  %1686 = vmatpush.bf16.msrb.mxu1 %v9574_v28  ;;  %v9542_v0 = vor.u32 %v12852_v57, %v9541_v45  ;;  %v9383_v28 = vld [vmem:[%s17353_s3 + $0x38] sm:$0xf0] }
 0x19b   :  { %v1154_v59 = vmul.f32 %v15018_v21, %v1153_v32  ;;  %v9578_v29 = vor.u32 %v12858_v13, %v9575_v54  ;;  %v9557_v32 = vld [vmem:[%s17353_s3 + $0x188] sm:$0xf]  ;;  %1699 = vmatpush.bf16.msrb.mxu2 %v9450_v49  ;;  %v12810_v27 = vld [vmem:[%s17353_s3 + $0x2c] sm:$0xf] }
 0x19c   :  { %v9353_v48 = vmul.f32 -1.442695, %v1143_v38  ;;  %v9431_v38 = vld [vmem:[%s17353_s3 + $0x98] sm:$0xf0]  ;;  %v12842_v11 = vld [vmem:[%s17353_s3 + $0x12c] sm:$0xf] }
 0x19d   :  { %v15076_v56 = vpop.eup %13648  ;;  %v1155_v24 = vadd.f32 %v15018_v21, %v1154_v59  ;;  %v9434_v9 = vor.u32 %v12822_v36, %v9431_v38  ;;  %1712 = vmatpush.bf16.msrb.mxu3 %v9578_v29  ;;  %v9511_v29 = vld [vmem:[%s17353_s3 + $0x138] sm:$0xf0]  ;;  %v12840_v38 = vld [vmem:[%s17353_s3 + $0x114] sm:$0xf0] }
 0x19e   :  { %v1171_v2 = vmul.f32 %v15076_v56, %v15015_v17  ;;  %13650 = vpow2.f32 %v9353_v48  ;;  %vm1176_vm15 = vweird.f32 %v15076_v56  ;;  %v1182_v17 = vor.u32 1.1754944e-38, %v1181_v16  ;;  %1673 = vmatpush.bf16.msrb.mxu0 %v9446_v25  ;;  %v9354_v48 = vld [vmem:[%s17351_s1 + $0x8] sm:$0xf]  ;;  %v12846_v16 = vld [vmem:[%s17353_s3 + $0x14c] sm:$0xf] }
 0x19f   :  { %v1131_v8 = vpop.f32.mrf.mxu2  ;;  %v1144_v10 = vpop.f32.mrf.mxu3  ;;  %13652 = vtanh.f32 %v1117_v18  ;;  %vm15165_vm1 = vmor %vm1175_vm0, %vm1176_vm15  ;;  %v1159_v40 = vsel %vm15112_vm14, %v15018_v21, %v1155_v24  ;;  %v9558_v21 = vor.u32 %v12856_v35, %v9557_v32  ;;  %1216 = vst [vmem:[#allocation4] sm:$0xf] %v9354_v48  ;;  %1700 = vmatpush.bf16.msrb.mxu2 %v9434_v9  ;;  %v9527_v18 = vld [vmem:[%s17353_s3 + $0x158] sm:$0xf0]  ;;  %v12812_v24 = vld [vmem:[%s17353_s3 + $0x34] sm:$0xf0]  ;;  %v9386_v32 = vor.u32 %v12810_v27, %v9383_v28 }
 0x1a0   :  { %v1172_v61 = vsub.f32 1.0, %v1171_v2  ;;  %v1164_v55 = vsel %vm1161_vm3, %v15052_v62, %v1159_v40  ;;  %v12818_v62 = vld [vmem:[%s17353_s3 + $0x6c] sm:$0xf]  ;;  %v9525_v8 = vld [vmem:[%s17353_s3 + $0x148] sm:$0xf]  ;;  %v9530_v25 = vor.u32 %v12846_v16, %v9527_v18  ;;  %v9382_v49 = vor.u32 %v12812_v24, %v9381_v23 }
 0x1a1   :  { %1687 = vmatpush.bf16.msrb.mxu1 %v9558_v21  ;;  %1713 = vmatpush.bf16.msrb.mxu3 %v9562_v52  ;;  %v9418_v3 = vor.u32 %v12818_v62, %v9415_v1  ;;  %v12848_v10 = vld [vmem:[%s17353_s3 + $0x154] sm:$0xf0]  ;;  %v9493_v35 = vld [vmem:[%s17353_s3 + $0x108] sm:$0xf]  ;;  %v9514_v36 = vor.u32 %v12842_v11, %v9511_v29  ;;  %v15298_v62 = vld [vmem:[%s17354_s4] sm:$0xf] }
 0x1a2   :  { %v1173_v47 = vmul.f32 %v15076_v56, %v1172_v61  ;;  %1674 = vmatpush.bf16.msrb.mxu0 %v9430_v42  ;;  %v9399_v61 = vld [vmem:[%s17353_s3 + $0x58] sm:$0xf0]  ;;  %v9526_v20 = vor.u32 %v12848_v10, %v9525_v8  ;;  %v12838_v42 = vld [vmem:[%s17353_s3 + $0x10c] sm:$0xf]  ;;  %v9494_v9 = vor.u32 %v12840_v38, %v9493_v35  ;;  %v9857_v1 = vld [vmem:[%s17353_s3 + $0x1e0] sm:$0xf] }
 0x1a3   :  { %1701 = vmatpush.bf16.msrb.mxu2 %v9418_v3  ;;  %v9402_v22 = vor.u32 %v12814_v12, %v9399_v61  ;;  %v9498_v52 = vor.u32 %v12838_v42, %v9495_v43  ;;  %v12897_v3 = vld [vmem:[%s17353_s3 + $0xe4] sm:$0xf]  ;;  %v9859_v8 = vld [vmem:[%s17353_s3 + $0x1f0] sm:$0xf0]  ;;  %v1284_v10 = vperm.slane %v15298_v62, 0 }
 0x1a4   :  { %v13651_v33 = vpop.eup %13650  ;;  %v1174_v34 = vadd.f32 %v15076_v56, %v1173_v47  ;;  %v9841_v61 = vld [vmem:[%s17353_s3 + $0x1c0] sm:$0xf]  ;;  %v12927_v18 = vld [vmem:[%s17353_s3 + $0x1cc] sm:$0xf0]  ;;  %v12921_v35 = vld [vmem:[%s17353_s3 + $0x1a4] sm:$0xf] }
 0x1a5   :  { %v15172_v41 = vadd.f32 1.0, %v13651_v33  ;;  %v13653_v63 = vpop.eup %13652  ;;  %1688 = vmatpush.bf16.msrb.mxu1 %v9542_v0  ;;  %v9365_v33 = vld [vmem:[%s17353_s3 + $0x8] sm:$0xf]  ;;  %v12899_v0 = vld [vmem:[%s17353_s3 + $0xec] sm:$0xf0]  ;;  %v9842_v24 = vor.u32 %v12927_v18, %v9841_v61 }
 0x1a6   :  { %v1178_v46 = vsel %vm15165_vm1, %v15076_v56, %v1174_v34  ;;  %v12820_v56 = vld [vmem:[%s17353_s3 + $0x74] sm:$0xf0]  ;;  %v1206_v2 = vmul.f32 %v13653_v63, %v1164_v55  ;;  %v9729_v63 = vld [vmem:[%s17353_s3 + $0xe0] sm:$0xf]  ;;  %v12891_v11 = vld [vmem:[%s17353_s3 + $0xac] sm:$0xf0] }
 0x1a7   :  { %v1183_v51 = vsel %vm1180_vm2, %v1182_v17, %v1178_v46  ;;  %13654 = vrcp.f32 %v15172_v41  ;;  %v9414_v59 = vor.u32 %v12820_v56, %v9413_v53  ;;  %v1199_v13 = vand.u32 2147483647, %v15172_v41  ;;  %1702 = vmatpush.bf16.msrb.mxu2 %v9402_v22  ;;  %v12808_v34 = vld [vmem:[%s17353_s3 + $0x14] sm:$0xf0]  ;;  %v9367_v17 = vld [vmem:[%s17353_s3 + $0x18] sm:$0xf0] }
 0x1a8   :  { %v1205_v37 = vmul.f32 %v1183_v51, %v14773_v50  ;;  %v12850_v50 = vld [vmem:[%s17353_s3 + $0x16c] sm:$0xf]  ;;  %v1201_v54 = vand.u32 2147483648, %v15172_v41  ;;  %vm1195_vm5 = vweird.f32 %v15172_v41  ;;  %v9366_v46 = vor.u32 %v12808_v34, %v9365_v33  ;;  %v9697_v28 = vld [vmem:[%s17353_s3 + $0xa0] sm:$0xf] }
 0x1a9   :  { %v9546_v7 = vor.u32 %v12850_v50, %v9543_v4  ;;  %1675 = vmatpush.bf16.msrb.mxu0 %v9414_v59  ;;  %1689 = vmatpush.bf16.msrb.mxu1 %v9526_v20  ;;  %vm1200_vm7 = vcmp.eq.f32.partialorder %v1199_v13, 8.507059e+37  ;;  %v9370_v48 = vor.u32 %v12806_v39, %v9367_v17  ;;  %v9730_v50 = vor.u32 %v12899_v0, %v9729_v63  ;;  %v9731_v4 = vld [vmem:[%s17353_s3 + $0xf0] sm:$0xf0]  ;;  %v9825_v13 = vld [vmem:[%s17353_s3 + $0x1a0] sm:$0xf] }
 0x1aa   :  { %v15230_v15 = vadd.f32 %v1206_v2, %v1205_v37  ;;  %v1202_v44 = vor.u32 1.1754944e-38, %v1201_v54  ;;  %v12931_v2 = vld [vmem:[%s17353_s3 + $0x1ec] sm:$0xf0]  ;;  %v9734_v6 = vor.u32 %v12897_v3, %v9731_v4  ;;  %v9715_v20 = vld [vmem:[%s17353_s3 + $0xd0] sm:$0xf0] }
 0x1ab   :  { %1714 = vmatpush.bf16.msrb.mxu3 %v9546_v7  ;;  %1703 = vmatpush.bf16.msrb.mxu2 %v9386_v32  ;;  %v9858_v5 = vor.u32 %v12931_v2, %v9857_v1  ;;  %v12929_v7 = vld [vmem:[%s17353_s3 + $0x1e4] sm:$0xf]  ;;  %v12923_v29 = vld [vmem:[%s17353_s3 + $0x1ac] sm:$0xf0]  ;;  %v1285_v32 = vperm.slane %v15298_v62, 1 }
 0x1ac   :  { %13656 = vtanh.f32 %v15230_v15  ;;  %v9862_v12 = vor.u32 %v12929_v7, %v9859_v8  ;;  %v9826_v33 = vor.u32 %v12923_v29, %v9825_v13  ;;  %v9681_v17 = vld [vmem:[%s17353_s3 + $0x80] sm:$0xf]  ;;  %v12883_v63 = vld [vmem:[%s17353_s3 + $0x6c] sm:$0xf0]  ;;  %v12881_v2 = vld [vmem:[%s17353_s3 + $0x64] sm:$0xf] }
 0x1ad   :  { %v13655_v14 = vpop.eup %13654  ;;  %1676 = vmatpush.bf16.msrb.mxu0 %v9398_v60  ;;  %1690 = vmatpush.bf16.msrb.mxu1 %v9510_v30  ;;  %v12895_v60 = vld [vmem:[%s17353_s3 + $0xcc] sm:$0xf0]  ;;  %v9699_v30 = vld [vmem:[%s17353_s3 + $0xb0] sm:$0xf0]  ;;  %v9809_v42 = vld [vmem:[%s17353_s3 + $0x180] sm:$0xf] }
 0x1ae   :  { %v1191_v19 = vmul.f32 %v13655_v14, %v15172_v41  ;;  %vm1196_vm4 = vweird.f32 %v13655_v14  ;;  %v9793_v0 = vld [vmem:[%s17353_s3 + $0x160] sm:$0xf]  ;;  %v9667_v3 = vld [vmem:[%s17353_s3 + $0x70] sm:$0xf0]  ;;  %v12913_v7 = vld [vmem:[%s17353_s3 + $0x164] sm:$0xf] }
 0x1af   :  { %1715 = vmatpush.bf16.msrb.mxu3 %v9530_v25  ;;  %vm1197_vm6 = vmor %vm1195_vm5, %vm1196_vm4  ;;  %1704 = vmatpush.bf16.msrb.mxu2 %v9370_v48  ;;  %v9683_v48 = vld [vmem:[%s17353_s3 + $0x90] sm:$0xf0]  ;;  %v12879_v61 = vld [vmem:[%s17353_s3 + $0x4c] sm:$0xf0] }
 0x1b0   :  { %v1192_v47 = vsub.f32 1.0, %v1191_v19  ;;  %v12893_v19 = vld [vmem:[%s17353_s3 + $0xc4] sm:$0xf]  ;;  %v9795_v8 = vld [vmem:[%s17353_s3 + $0x170] sm:$0xf0] }
 0x1b1   :  { %1677 = vmatpush.bf16.msrb.mxu0 %v9382_v49  ;;  %1691 = vmatpush.bf16.msrb.mxu1 %v9494_v9  ;;  %v9718_v25 = vor.u32 %v12893_v19, %v9715_v20  ;;  %v9698_v49 = vor.u32 %v12891_v11, %v9697_v28  ;;  %v12885_v9 = vld [vmem:[%s17353_s3 + $0x84] sm:$0xf]  ;;  %v9777_v20 = vld [vmem:[%s17353_s3 + $0x140] sm:$0xf]  ;;  %v9779_v28 = vld [vmem:[%s17353_s3 + $0x150] sm:$0xf0] }
 0x1b2   :  { %v1193_v31 = vmul.f32 %v13655_v14, %v1192_v47  ;;  %v13657_v41 = vpop.eup %13656  ;;  %v9846_v47 = vor.u32 %v12925_v58, %v9843_v26  ;;  %v9651_v58 = vld [vmem:[%s17353_s3 + $0x50] sm:$0xf0]  ;;  %v1287_v11 = vperm.slane %v15298_v62, 3 }
 0x1b3   :  { %1716 = vmatpush.bf16.msrb.mxu3 %v9514_v36  ;;  %v9827_v36 = vld [vmem:[%s17353_s3 + $0x1b0] sm:$0xf0] }
 0x1b4   :  { %v1194_v40 = vadd.f32 %v13655_v14, %v1193_v31  ;;  %v12889_v31 = vld [vmem:[%s17353_s3 + $0xa4] sm:$0xf]  ;;  %v9830_v39 = vor.u32 %v12921_v35, %v9827_v36  ;;  %v9635_v35 = vld [vmem:[%s17353_s3 + $0x30] sm:$0xf0] }
 0x1b5   :  { %1678 = vmatpush.bf16.msrb.mxu0 %v9366_v46  ;;  %v9702_v34 = vor.u32 %v12889_v31, %v9699_v30  ;;  %v9761_v31 = vld [vmem:[%s17353_s3 + $0x120] sm:$0xf]  ;;  %v12907_v30 = vld [vmem:[%s17353_s3 + $0x12c] sm:$0xf0]  ;;  %v12905_v36 = vld [vmem:[%s17353_s3 + $0x124] sm:$0xf] }
 0x1b6   :  { %v1198_v21 = vsel %vm1197_vm6, %v13655_v14, %v1194_v40  ;;  %v9713_v14 = vld [vmem:[%s17353_s3 + $0xc0] sm:$0xf]  ;;  %v12887_v40 = vld [vmem:[%s17353_s3 + $0x8c] sm:$0xf0] }
 0x1b7   :  { %v1203_v51 = vsel %vm1200_vm7, %v1202_v44, %v1198_v21  ;;  %1717 = vmatpush.bf16.msrb.mxu3 %v9498_v52  ;;  %v9714_v16 = vor.u32 %v12895_v60, %v9713_v14  ;;  %v9682_v46 = vor.u32 %v12887_v40, %v9681_v17  ;;  %v12919_v21 = vld [vmem:[%s17353_s3 + $0x18c] sm:$0xf0]  ;;  %v9649_v60 = vld [vmem:[%s17353_s3 + $0x40] sm:$0xf] }
 0x1b8   :  { %v1209_v53 = vmul.f32 %v13657_v41, %v1203_v51  ;;  %v9650_v19 = vor.u32 %v12879_v61, %v9649_v60  ;;  %v9739_v60 = vld [vmem:[%s17353_s3 + $0xf8] sm:$0xf0] }
 0x1ba   :  { %v1212_v55 = vpack.c.bf16 %v1209_v53, %v1209_v53  ;;  %v9810_v53 = vor.u32 %v12919_v21, %v9809_v42  ;;  %v9745_v21 = vld [vmem:[%s17353_s3 + $0x100] sm:$0xf] }
 0x1bc   :  { %1213 = vst [vmem:[#allocation4 + $0x4] sm:$0xf] %v1212_v55  ;;  %v9686_v55 = vor.u32 %v12885_v9, %v9683_v48  ;;  %v1286_v48 = vperm.slane %v15298_v62, 2  ;;  %v9619_v62 = vld [vmem:[%s17353_s3 + $0x10] sm:$0xf0] }
 0x1c3   :  { %v1217_v56 = vld [vmem:[#allocation4] sm:$0xff] }
 0x1c4   :  { %v1293_v45 = vunpack.c.l.b16 %v1217_v56  ;;  %v1294_v37 = vunpack.c.h.b16 %v1217_v56  ;;  %v12917_v56 = vld [vmem:[%s17353_s3 + $0x184] sm:$0xf] }
 0x1c6   :  { %v1295_v59 = vpack.c.b16 %v1293_v45, %v1293_v45  ;;  %v1296_v57 = vpack.c.b16 %v1294_v37, %v1294_v37  ;;  %v9811_v45 = vld [vmem:[%s17353_s3 + $0x190] sm:$0xf0] }
 0x1c7   :  { %v9814_v37 = vor.u32 %v12917_v56, %v9811_v45 }
 0x1c8   :  { %1627 = vmatmul.bf16.vlgmr.msra.gmra.mxu0 %v1295_v59  ;;  %1640 = vmatmul.bf16.vlgmr.msra.gmra.mxu1 %v1296_v57 }
 0x1c9   :  { %1653 = vmatmul.bf16.vlgmr.msra.gmra.mxu2 %v1295_v59  ;;  %1666 = vmatmul.bf16.vlgmr.msra.gmra.mxu3 %v1296_v57 }
 0x1ca   :  { %2196 = vmatpush.bf16.msra.mxu0 %v9730_v50  ;;  %2209 = vmatpush.bf16.msra.mxu1 %v9858_v5  ;;  %v12915_v50 = vld [vmem:[%s17353_s3 + $0x16c] sm:$0xf0] }
 0x1cb   :  { %2222 = vmatpush.bf16.msra.mxu2 %v9734_v6  ;;  %2235 = vmatpush.bf16.msra.mxu3 %v9862_v12  ;;  %v9794_v5 = vor.u32 %v12915_v50, %v9793_v0  ;;  %v9670_v6 = vor.u32 %v12881_v2, %v9667_v3  ;;  %v9798_v12 = vor.u32 %v12913_v7, %v9795_v8  ;;  %v9747_v50 = vld [vmem:[%s17353_s3 + $0x110] sm:$0xf0]  ;;  %v9737_v2 = vld [vmem:[%s17353_s3 + $0xe8] sm:$0xf] }
 0x1cc   :  { %v9865_v7 = vld [vmem:[%s17353_s3 + $0x1e8] sm:$0xf] }
 0x1ce   :  { %2197 = vmatpush.bf16.msra.mxu0 %v9714_v16  ;;  %2210 = vmatpush.bf16.msra.mxu1 %v9842_v24 }
 0x1cf   :  { %2223 = vmatpush.bf16.msra.mxu2 %v9718_v25  ;;  %2236 = vmatpush.bf16.msra.mxu3 %v9846_v47  ;;  %v12909_v47 = vld [vmem:[%s17353_s3 + $0x144] sm:$0xf] }
 0x1d0   :  { %v9782_v13 = vor.u32 %v12909_v47, %v9779_v28  ;;  %v9849_v47 = vld [vmem:[%s17353_s3 + $0x1c8] sm:$0xf] }
 0x1d2   :  { %2198 = vmatpush.bf16.msra.mxu0 %v9698_v49  ;;  %2211 = vmatpush.bf16.msra.mxu1 %v9826_v33  ;;  %v12875_v49 = vld [vmem:[%s17353_s3 + $0x2c] sm:$0xf0] }
 0x1d3   :  { %2224 = vmatpush.bf16.msra.mxu2 %v9702_v34  ;;  %2237 = vmatpush.bf16.msra.mxu3 %v9830_v39  ;;  %v9762_v34 = vor.u32 %v12907_v30, %v9761_v31 }
 0x1d6   :  { %2199 = vmatpush.bf16.msra.mxu0 %v9682_v46  ;;  %2212 = vmatpush.bf16.msra.mxu1 %v9810_v53  ;;  %v12871_v46 = vld [vmem:[%s17353_s3 + $0xc] sm:$0xf0]  ;;  %v12869_v53 = vld [vmem:[%s17353_s3 + $0x4] sm:$0xf] }
 0x1d7   :  { %2225 = vmatpush.bf16.msra.mxu2 %v9686_v55  ;;  %2238 = vmatpush.bf16.msra.mxu3 %v9814_v37 }
 0x1d8   :  { %1679 = vmatmul.bf16.vlgmr.msrb.gmra.mxu0 %v1295_v59  ;;  %1692 = vmatmul.bf16.vlgmr.msrb.gmra.mxu1 %v1296_v57 }
 0x1d9   :  { %1705 = vmatmul.bf16.vlgmr.msrb.gmra.mxu2 %v1295_v59  ;;  %1718 = vmatmul.bf16.vlgmr.msrb.gmra.mxu3 %v1296_v57  ;;  %v9665_v57 = vld [vmem:[%s17353_s3 + $0x60] sm:$0xf] }
 0x1da   :  { %v9666_v1 = vor.u32 %v12883_v63, %v9665_v57  ;;  %2213 = vmatpush.bf16.msra.mxu1 %v9794_v5  ;;  %v12901_v57 = vld [vmem:[%s17353_s3 + $0x104] sm:$0xf] }
 0x1db   :  { %2226 = vmatpush.bf16.msra.mxu2 %v9670_v6  ;;  %2239 = vmatpush.bf16.msra.mxu3 %v9798_v12  ;;  %v9750_v5 = vor.u32 %v12901_v57, %v9747_v50  ;;  %v12900_v6 = vld [vmem:[%s17353_s3 + $0xf4] sm:$0xf0]  ;;  %v12898_v12 = vld [vmem:[%s17353_s3 + $0xec] sm:$0xf] }
 0x1dc   :  { %2200 = vmatpush.bf16.msra.mxu0 %v9666_v1  ;;  %v9622_v1 = vor.u32 %v12869_v53, %v9619_v62  ;;  %v9738_v8 = vor.u32 %v12900_v6, %v9737_v2  ;;  %v9707_v53 = vld [vmem:[%s17353_s3 + $0xb8] sm:$0xf0]  ;;  %v9689_v62 = vld [vmem:[%s17353_s3 + $0x88] sm:$0xf]  ;;  %v12888_v57 = vld [vmem:[%s17353_s3 + $0x94] sm:$0xf0] }
 0x1dd   :  { %v12920_v50 = vld [vmem:[%s17353_s3 + $0x194] sm:$0xf0]  ;;  %v12886_v2 = vld [vmem:[%s17353_s3 + $0x8c] sm:$0xf] }
 0x1df   :  { %2240 = vmatpush.bf16.msra.mxu3 %v9782_v13  ;;  %v12928_v13 = vld [vmem:[%s17353_s3 + $0x1d4] sm:$0xf0] }
 0x1e0   :  { %2201 = vmatpush.bf16.msra.mxu0 %v9650_v19  ;;  %v9742_v19 = vor.u32 %v12898_v12, %v9739_v60  ;;  %v9819_v12 = vld [vmem:[%s17353_s3 + $0x198] sm:$0xf0] }
 0x245   :  { %v1628_v22 = vpop.f32.mrf.mxu0  ;;  %v1641_v23 = vpop.f32.mrf.mxu1 }
 0x246   :  { %v1629_v27 = vadd.f32 %v1628_v22, %v1284_v10  ;;  %v12911_v22 = vld [vmem:[%s17353_s3 + $0x14c] sm:$0xf0] }
 0x247   :  { %v9778_v26 = vor.u32 %v12911_v22, %v9777_v20  ;;  %v12930_v20 = vld [vmem:[%s17353_s3 + $0x1ec] sm:$0xf]  ;;  %v9867_v22 = vld [vmem:[%s17353_s3 + $0x1f8] sm:$0xf0] }
 0x248   :  { %v1642_v54 = vadd.f32 %v1641_v23, %v1629_v27  ;;  %v12877_v23 = vld [vmem:[%s17353_s3 + $0x44] sm:$0xf] }
 0x249   :  { %v9654_v27 = vor.u32 %v12877_v23, %v9651_v58  ;;  %2214 = vmatpush.bf16.msra.mxu1 %v9778_v26  ;;  %v9721_v26 = vld [vmem:[%s17353_s3 + $0xc8] sm:$0xf] }
 0x24a   :  { %v9611_v38 = vmul.f32 -1.442695, %v1642_v54  ;;  %v9633_v54 = vld [vmem:[%s17353_s3 + $0x20] sm:$0xf] }
 0x24b   :  { %2227 = vmatpush.bf16.msra.mxu2 %v9654_v27  ;;  %v9634_v29 = vor.u32 %v12875_v49, %v9633_v54  ;;  %v12896_v27 = vld [vmem:[%s17353_s3 + $0xd4] sm:$0xf0]  ;;  %v12894_v54 = vld [vmem:[%s17353_s3 + $0xcc] sm:$0xf]  ;;  %v9723_v49 = vld [vmem:[%s17353_s3 + $0xd8] sm:$0xf0] }
 0x24c   :  { %13658 = vpow2.f32 %v9611_v38  ;;  %v1654_v43 = vpop.f32.mrf.mxu2  ;;  %v1667_v44 = vpop.f32.mrf.mxu3  ;;  %v9763_v38 = vld [vmem:[%s17353_s3 + $0x130] sm:$0xf0] }
 0x24d   :  { %v1655_v41 = vadd.f32 %v1654_v43, %v1285_v32  ;;  %v1630_v51 = vpop.f32.mrf.mxu0  ;;  %v1643_v52 = vpop.f32.mrf.mxu1  ;;  %v12873_v32 = vld [vmem:[%s17353_s3 + $0x24] sm:$0xf]  ;;  %2202 = vmatpush.bf16.msra.mxu0 %v9634_v29  ;;  %v9766_v42 = vor.u32 %v12905_v36, %v9763_v38  ;;  %2215 = vmatpush.bf16.msra.mxu1 %v9762_v34  ;;  %v12926_v34 = vld [vmem:[%s17353_s3 + $0x1cc] sm:$0xf] }
 0x24e   :  { %v9638_v40 = vor.u32 %v12873_v32, %v9635_v35  ;;  %v12903_v52 = vld [vmem:[%s17353_s3 + $0x10c] sm:$0xf0]  ;;  %v9850_v32 = vor.u32 %v12928_v13, %v9849_v47  ;;  %v9851_v35 = vld [vmem:[%s17353_s3 + $0x1d8] sm:$0xf0] }
 0x24f   :  { %v1668_v59 = vadd.f32 %v1667_v44, %v1655_v41  ;;  %v9617_v44 = vld [vmem:[%s17353_s3] sm:$0xf]  ;;  %2241 = vmatpush.bf16.msra.mxu3 %v9766_v42  ;;  %v9746_v0 = vor.u32 %v12903_v52, %v9745_v21  ;;  %v9854_v42 = vor.u32 %v12926_v34, %v9851_v35  ;;  %v9803_v13 = vld [vmem:[%s17353_s3 + $0x178] sm:$0xf0]  ;;  %v12878_v35 = vld [vmem:[%s17353_s3 + $0x4c] sm:$0xf] }
 0x250   :  { %2228 = vmatpush.bf16.msra.mxu2 %v9638_v40 }
 0x251   :  { %v9612_v4 = vmul.f32 -1.442695, %v1668_v59  ;;  %v9618_v59 = vor.u32 %v12871_v46, %v9617_v44  ;;  %2216 = vmatpush.bf16.msra.mxu1 %v9746_v0  ;;  %v9705_v44 = vld [vmem:[%s17353_s3 + $0xa8] sm:$0xf]  ;;  %v12892_v46 = vld [vmem:[%s17353_s3 + $0xb4] sm:$0xf0] }
 0x252   :  { %v13659_v10 = vpop.eup %13658 }
 0x253   :  { %v15422_v14 = vadd.f32 1.0, %v13659_v10  ;;  %13660 = vpow2.f32 %v9612_v4  ;;  %2203 = vmatpush.bf16.msra.mxu0 %v9618_v59  ;;  %v12932_v10 = vld [vmem:[%s17353_s3 + $0x1f4] sm:$0xf0]  ;;  %2242 = vmatpush.bf16.msra.mxu3 %v9750_v5  ;;  %v12870_v5 = vld [vmem:[%s17353_s3 + $0xc] sm:$0xf] }
 0x254   :  { %v1656_v16 = vpop.f32.mrf.mxu2  ;;  %v1669_v18 = vpop.f32.mrf.mxu3  ;;  %2229 = vmatpush.bf16.msra.mxu2 %v9622_v1 }
 0x255   :  { %13662 = vrcp.f32 %v15422_v14  ;;  %v15440_v24 = vpop.f32.mrf.mxu0  ;;  %v15442_v25 = vpop.f32.mrf.mxu1  ;;  %v1739_v17 = vand.u32 2147483648, %v15422_v14  ;;  %v1737_v55 = vand.u32 2147483647, %v15422_v14  ;;  %v9866_v18 = vor.u32 %v12932_v10, %v9865_v7  ;;  %v12918_v10 = vld [vmem:[%s17353_s3 + $0x18c] sm:$0xf] }
 0x256   :  { %v1681_v61 = vadd.f32 %v15440_v24, %v1286_v48  ;;  %v9870_v24 = vor.u32 %v12930_v20, %v9867_v22  ;;  %vm1733_vm9 = vweird.f32 %v15422_v14  ;;  %v12924_v48 = vld [vmem:[%s17353_s3 + $0x1b4] sm:$0xf0]  ;;  %v9673_v20 = vld [vmem:[%s17353_s3 + $0x68] sm:$0xf] }
 0x257   :  { %v15515_v3 = vor.u32 1.1754944e-38, %v1739_v17  ;;  %2248 = vmatpush.bf16.msrb.mxu0 %v9738_v8  ;;  %2261 = vmatpush.bf16.msrb.mxu1 %v9866_v18  ;;  %v9690_v8 = vor.u32 %v12888_v57, %v9689_v62  ;;  %vm1738_vm15 = vcmp.eq.f32.partialorder %v1737_v55, 8.507059e+37  ;;  %v9801_v55 = vld [vmem:[%s17353_s3 + $0x168] sm:$0xf] }
 0x258   :  { %2274 = vmatpush.bf16.msrb.mxu2 %v9742_v19  ;;  %2287 = vmatpush.bf16.msrb.mxu3 %v9870_v24  ;;  %v1694_v17 = vadd.f32 %v15442_v25, %v1681_v61  ;;  %v9833_v25 = vld [vmem:[%s17353_s3 + $0x1a8] sm:$0xf]  ;;  %v9822_v19 = vor.u32 %v12918_v10, %v9819_v12  ;;  %v12916_v24 = vld [vmem:[%s17353_s3 + $0x174] sm:$0xf0]  ;;  %v9755_v10 = vld [vmem:[%s17353_s3 + $0x118] sm:$0xf0] }
 0x259   :  { %v13661_v33 = vpop.eup %13660  ;;  %v9834_v52 = vor.u32 %v12924_v48, %v9833_v25  ;;  %v9769_v48 = vld [vmem:[%s17353_s3 + $0x128] sm:$0xf] }
 0x25a   :  { %v15478_v39 = vadd.f32 1.0, %v13661_v33  ;;  %v9726_v33 = vor.u32 %v12894_v54, %v9723_v49  ;;  %v9657_v54 = vld [vmem:[%s17353_s3 + $0x48] sm:$0xf] }
 0x25b   :  { %v15481_v43 = vpop.eup %13662  ;;  %2262 = vmatpush.bf16.msrb.mxu1 %v9850_v32 }
 0x25c   :  { %v1729_v9 = vmul.f32 %v15481_v43, %v15422_v14  ;;  %13664 = vrcp.f32 %v15478_v39  ;;  %v1706_v41 = vpop.f32.mrf.mxu2  ;;  %v1719_v51 = vpop.f32.mrf.mxu3  ;;  %vm1734_vm8 = vweird.f32 %v15481_v43  ;;  %v1756_v29 = vand.u32 2147483647, %v15478_v39  ;;  %2275 = vmatpush.bf16.msrb.mxu2 %v9726_v33  ;;  %2288 = vmatpush.bf16.msrb.mxu3 %v9854_v42 }
 0x25d   :  { %v1707_v56 = vadd.f32 %v1706_v41, %v1287_v11  ;;  %v1682_v45 = vpop.f32.mrf.mxu0  ;;  %v1695_v37 = vpop.f32.mrf.mxu1  ;;  %v9722_v11 = vor.u32 %v12896_v27, %v9721_v26  ;;  %v1758_v38 = vand.u32 2147483648, %v15478_v39  ;;  %vm15575_vm10 = vmor %vm1733_vm9, %vm1734_vm8  ;;  %v12890_v41 = vld [vmem:[%s17353_s3 + $0xac] sm:$0xf]  ;;  %vm1752_vm12 = vweird.f32 %v15478_v39 }
 0x25e   :  { %v1730_v63 = vsub.f32 1.0, %v1729_v9  ;;  %v9706_v9 = vor.u32 %v12892_v46, %v9705_v44  ;;  %v9835_v45 = vld [vmem:[%s17353_s3 + $0x1b8] sm:$0xf0]  ;;  %v9710_v37 = vor.u32 %v12890_v41, %v9707_v53  ;;  %vm1757_vm14 = vcmp.eq.f32.partialorder %v1756_v29, 8.507059e+37  ;;  %v12882_v27 = vld [vmem:[%s17353_s3 + $0x6c] sm:$0xf] }
 0x25f   :  { %v1720_v4 = vadd.f32 %v1719_v51, %v1707_v56  ;;  %2249 = vmatpush.bf16.msrb.mxu0 %v9722_v11  ;;  %v12922_v56 = vld [vmem:[%s17353_s3 + $0x1ac] sm:$0xf]  ;;  %2263 = vmatpush.bf16.msrb.mxu1 %v9834_v52  ;;  %v12880_v29 = vld [vmem:[%s17353_s3 + $0x54] sm:$0xf0]  ;;  %v9787_v44 = vld [vmem:[%s17353_s3 + $0x158] sm:$0xf0] }
 0x260   :  { %v1731_v58 = vmul.f32 %v15481_v43, %v1730_v63  ;;  %v9838_v59 = vor.u32 %v12922_v56, %v9835_v45  ;;  %v9817_v63 = vld [vmem:[%s17353_s3 + $0x188] sm:$0xf]  ;;  %2276 = vmatpush.bf16.msrb.mxu2 %v9710_v37  ;;  %v12914_v11 = vld [vmem:[%s17353_s3 + $0x16c] sm:$0xf]  ;;  %v9658_v34 = vor.u32 %v12880_v29, %v9657_v54  ;;  %v12908_v41 = vld [vmem:[%s17353_s3 + $0x134] sm:$0xf0] }
 0x261   :  { %v9613_v16 = vmul.f32 -1.442695, %v1720_v4  ;;  %v9691_v4 = vld [vmem:[%s17353_s3 + $0x98] sm:$0xf0]  ;;  %v9806_v49 = vor.u32 %v12914_v11, %v9803_v13  ;;  %v9641_v46 = vld [vmem:[%s17353_s3 + $0x28] sm:$0xf]  ;;  %v9770_v57 = vor.u32 %v12908_v41, %v9769_v48 }
 0x262   :  { %v15539_v23 = vpop.eup %13664  ;;  %v1732_v21 = vadd.f32 %v15481_v43, %v1731_v58  ;;  %v9694_v61 = vor.u32 %v12886_v2, %v9691_v4  ;;  %2289 = vmatpush.bf16.msrb.mxu3 %v9838_v59  ;;  %v12874_v52 = vld [vmem:[%s17353_s3 + $0x2c] sm:$0xf]  ;;  %v9643_v53 = vld [vmem:[%s17353_s3 + $0x38] sm:$0xf0]  ;;  %v12904_v4 = vld [vmem:[%s17353_s3 + $0x114] sm:$0xf0] }
 0x263   :  { %v1748_v28 = vmul.f32 %v15539_v23, %v15478_v39  ;;  %13666 = vpow2.f32 %v9613_v16  ;;  %vm1753_vm11 = vweird.f32 %v15539_v23  ;;  %v1759_v39 = vor.u32 1.1754944e-38, %v1758_v38  ;;  %2250 = vmatpush.bf16.msrb.mxu0 %v9706_v9  ;;  %v9614_v16 = vld [vmem:[%s17351_s1 + $0xc] sm:$0xf]  ;;  %v9771_v59 = vld [vmem:[%s17353_s3 + $0x138] sm:$0xf0] }
 0x264   :  { %v1708_v31 = vpop.f32.mrf.mxu2  ;;  %v1721_v30 = vpop.f32.mrf.mxu3  ;;  %13668 = vtanh.f32 %v1694_v17  ;;  %vm15628_vm13 = vmor %vm1752_vm12, %vm1753_vm11  ;;  %v1736_v6 = vsel %vm15575_vm10, %v15481_v43, %v1732_v21  ;;  %v9818_v43 = vor.u32 %v12920_v50, %v9817_v63  ;;  %1793 = vst [vmem:[#allocation4] sm:$0xf] %v9614_v16  ;;  %2277 = vmatpush.bf16.msrb.mxu2 %v9694_v61  ;;  %v12910_v38 = vld [vmem:[%s17353_s3 + $0x14c] sm:$0xf]  ;;  %v12876_v21 = vld [vmem:[%s17353_s3 + $0x34] sm:$0xf0]  ;;  %v9646_v63 = vor.u32 %v12874_v52, %v9643_v53 }
 0x265   :  { %v1749_v36 = vsub.f32 1.0, %v1748_v28  ;;  %v1741_v22 = vsel %vm1738_vm15, %v15515_v3, %v1736_v6  ;;  %v9802_v3 = vor.u32 %v12916_v24, %v9801_v55  ;;  %v9785_v31 = vld [vmem:[%s17353_s3 + $0x148] sm:$0xf]  ;;  %v12912_v30 = vld [vmem:[%s17353_s3 + $0x154] sm:$0xf0]  ;;  %v9790_v25 = vor.u32 %v12910_v38, %v9787_v44 }
 0x266   :  { %2264 = vmatpush.bf16.msrb.mxu1 %v9818_v43  ;;  %2290 = vmatpush.bf16.msrb.mxu3 %v9822_v19  ;;  %v9786_v40 = vor.u32 %v12912_v30, %v9785_v31  ;;  %v9642_v45 = vor.u32 %v12876_v21, %v9641_v46  ;;  %v12906_v37 = vld [vmem:[%s17353_s3 + $0x12c] sm:$0xf]  ;;  %v9753_v50 = vld [vmem:[%s17353_s3 + $0x108] sm:$0xf]  ;;  %v12995_v11 = vld [vmem:[%s17353_s3 + $0x1ec] sm:$0xf0] }
 0x267   :  { %v1750_v51 = vmul.f32 %v15539_v23, %v1749_v36  ;;  %2251 = vmatpush.bf16.msrb.mxu0 %v9690_v8  ;;  %v9659_v36 = vld [vmem:[%s17353_s3 + $0x58] sm:$0xf0]  ;;  %v9774_v2 = vor.u32 %v12906_v37, %v9771_v59  ;;  %v12902_v8 = vld [vmem:[%s17353_s3 + $0x10c] sm:$0xf]  ;;  %v9754_v61 = vor.u32 %v12904_v4, %v9753_v50  ;;  %v12961_v13 = vld [vmem:[%s17353_s3 + $0xe4] sm:$0xf] }
 0x268   :  { %v9662_v42 = vor.u32 %v12878_v35, %v9659_v36  ;;  %v9758_v19 = vor.u32 %v12902_v8, %v9755_v10  ;;  %v9991_v54 = vld [vmem:[%s17353_s3 + $0xf0] sm:$0xf0]  ;;  %v12993_v31 = vld [vmem:[%s17353_s3 + $0x1e4] sm:$0xf]  ;;  %v9973_v35 = vld [vmem:[%s17353_s3 + $0xc0] sm:$0xf] }
 0x269   :  { %v13667_v0 = vpop.eup %13666  ;;  %v1751_v1 = vadd.f32 %v15539_v23, %v1750_v51  ;;  %v9994_v29 = vor.u32 %v12961_v13, %v9991_v54  ;;  %v10119_v30 = vld [vmem:[%s17353_s3 + $0x1f0] sm:$0xf0]  ;;  %v12959_v36 = vld [vmem:[%s17353_s3 + $0xcc] sm:$0xf0]  ;;  %v10101_v38 = vld [vmem:[%s17353_s3 + $0x1c0] sm:$0xf] }
 0x26a   :  { %v15635_v7 = vadd.f32 1.0, %v13667_v0  ;;  %v13669_v26 = vpop.eup %13668  ;;  %2265 = vmatpush.bf16.msrb.mxu1 %v9802_v3  ;;  %2291 = vmatpush.bf16.msrb.mxu3 %v9806_v49  ;;  %v9625_v0 = vld [vmem:[%s17353_s3 + $0x8] sm:$0xf]  ;;  %v15764_v3 = vld [vmem:[%s17354_s4] sm:$0xf] }
 0x26b   :  { %v1755_v60 = vsel %vm15628_vm13, %v15539_v23, %v1751_v1  ;;  %v12884_v23 = vld [vmem:[%s17353_s3 + $0x74] sm:$0xf0]  ;;  %v1783_v47 = vmul.f32 %v13669_v26, %v1741_v22  ;;  %v9975_v44 = vld [vmem:[%s17353_s3 + $0xd0] sm:$0xf0]  ;;  %v12989_v48 = vld [vmem:[%s17353_s3 + $0x1c4] sm:$0xf] }
 0x26c   :  { %v1760_v18 = vsel %vm1757_vm14, %v1759_v39, %v1755_v60  ;;  %13670 = vrcp.f32 %v15635_v7  ;;  %v9674_v14 = vor.u32 %v12884_v23, %v9673_v20  ;;  %v1776_v9 = vand.u32 2147483647, %v15635_v7  ;;  %v12872_v1 = vld [vmem:[%s17353_s3 + $0x14] sm:$0xf0]  ;;  %v9627_v39 = vld [vmem:[%s17353_s3 + $0x18] sm:$0xf0] }
 0x26d   :  { %v1782_v58 = vmul.f32 %v1760_v18, %v15230_v15  ;;  %v9675_v15 = vld [vmem:[%s17353_s3 + $0x78] sm:$0xf0]  ;;  %v1778_v56 = vand.u32 2147483648, %v15635_v7  ;;  %vm1772_vm1 = vweird.f32 %v15635_v7  ;;  %v9626_v60 = vor.u32 %v12872_v1, %v9625_v0  ;;  %v9874_v23 = vld [vmem:[%s17351_s1 + $0x10] sm:$0xf] }
 0x26e   :  { %v9678_v28 = vor.u32 %v12882_v27, %v9675_v15  ;;  %2252 = vmatpush.bf16.msrb.mxu0 %v9674_v14  ;;  %2266 = vmatpush.bf16.msrb.mxu1 %v9786_v40  ;;  %vm1777_vm3 = vcmp.eq.f32.partialorder %v1776_v9, 8.507059e+37  ;;  %v9630_v16 = vor.u32 %v12870_v5, %v9627_v39  ;;  %v9989_v27 = vld [vmem:[%s17353_s3 + $0xe0] sm:$0xf]  ;;  %v12963_v15 = vld [vmem:[%s17353_s3 + $0xec] sm:$0xf0]  ;;  %v1862_v0 = vperm.slane %v15764_v3, 1 }
 0x26f   :  { %v15690_v33 = vadd.f32 %v1783_v47, %v1782_v58  ;;  %2292 = vmatpush.bf16.msrb.mxu3 %v9790_v25  ;;  %v1779_v12 = vor.u32 1.1754944e-38, %v1778_v56  ;;  %v10117_v47 = vld [vmem:[%s17353_s3 + $0x1e0] sm:$0xf]  ;;  %v12991_v40 = vld [vmem:[%s17353_s3 + $0x1cc] sm:$0xf0] }
 0x270   :  { %2278 = vmatpush.bf16.msrb.mxu2 %v9678_v28  ;;  %v9990_v28 = vor.u32 %v12963_v15, %v9989_v27  ;;  %v10118_v49 = vor.u32 %v12995_v11, %v10117_v47  ;;  %v10102_v9 = vor.u32 %v12991_v40, %v10101_v38  ;;  %v10103_v41 = vld [vmem:[%s17353_s3 + $0x1d0] sm:$0xf0]  ;;  %v9957_v53 = vld [vmem:[%s17353_s3 + $0xa0] sm:$0xf]  ;;  %v12955_v56 = vld [vmem:[%s17353_s3 + $0xac] sm:$0xf0] }
 0x271   :  { %13672 = vtanh.f32 %v15690_v33  ;;  %v10106_v52 = vor.u32 %v12989_v48, %v10103_v41  ;;  %v9958_v59 = vor.u32 %v12955_v56, %v9957_v53  ;;  %v10087_v4 = vld [vmem:[%s17353_s3 + $0x1b0] sm:$0xf0]  ;;  %v12951_v8 = vld [vmem:[%s17353_s3 + $0x8c] sm:$0xf0]  ;;  %v10069_v10 = vld [vmem:[%s17353_s3 + $0x180] sm:$0xf] }
 0x272   :  { %v13671_v32 = vpop.eup %13670  ;;  %2253 = vmatpush.bf16.msrb.mxu0 %v9658_v34  ;;  %2267 = vmatpush.bf16.msrb.mxu1 %v9770_v57  ;;  %v10122_v34 = vor.u32 %v12993_v31, %v10119_v30  ;;  %v12953_v57 = vld [vmem:[%s17353_s3 + $0xa4] sm:$0xf]  ;;  %v12947_v27 = vld [vmem:[%s17353_s3 + $0x6c] sm:$0xf0]  ;;  %v10053_v15 = vld [vmem:[%s17353_s3 + $0x160] sm:$0xf] }
 0x273   :  { %v1768_v17 = vmul.f32 %v13671_v32, %v15635_v7  ;;  %vm1773_vm0 = vweird.f32 %v13671_v32  ;;  %2293 = vmatpush.bf16.msrb.mxu3 %v9774_v2  ;;  %v12985_v2 = vld [vmem:[%s17353_s3 + $0x1a4] sm:$0xf]  ;;  %v9927_v13 = vld [vmem:[%s17353_s3 + $0x70] sm:$0xf0]  ;;  %v12943_v38 = vld [vmem:[%s17353_s3 + $0x4c] sm:$0xf0] }
 0x274   :  { %2279 = vmatpush.bf16.msrb.mxu2 %v9662_v42  ;;  %vm1774_vm2 = vmor %vm1772_vm1, %vm1773_vm0  ;;  %v12957_v42 = vld [vmem:[%s17353_s3 + $0xc4] sm:$0xf]  ;;  %v10090_v39 = vor.u32 %v12985_v2, %v10087_v4  ;;  %v10055_v30 = vld [vmem:[%s17353_s3 + $0x170] sm:$0xf0]  ;;  %v1864_v56 = vperm.slane %v15764_v3, 3 }
 0x275   :  { %v1769_v51 = vsub.f32 1.0, %v1768_v17  ;;  %v9974_v17 = vor.u32 %v12959_v36, %v9973_v35  ;;  %v9978_v25 = vor.u32 %v12957_v42, %v9975_v44  ;;  %v12945_v11 = vld [vmem:[%s17353_s3 + $0x64] sm:$0xf]  ;;  %v9909_v36 = vld [vmem:[%s17353_s3 + $0x40] sm:$0xf] }
 0x276   :  { %2254 = vmatpush.bf16.msrb.mxu0 %v9642_v45  ;;  %2268 = vmatpush.bf16.msrb.mxu1 %v9754_v61  ;;  %v10085_v45 = vld [vmem:[%s17353_s3 + $0x1a0] sm:$0xf]  ;;  %v12983_v61 = vld [vmem:[%s17353_s3 + $0x18c] sm:$0xf0]  ;;  %v12977_v31 = vld [vmem:[%s17353_s3 + $0x164] sm:$0xf]  ;;  %v9910_v42 = vor.u32 %v12943_v38, %v9909_v36 }
 0x277   :  { %v1770_v62 = vmul.f32 %v13671_v32, %v1769_v51  ;;  %v13673_v7 = vpop.eup %13672  ;;  %2294 = vmatpush.bf16.msrb.mxu3 %v9758_v19  ;;  %v10037_v44 = vld [vmem:[%s17353_s3 + $0x140] sm:$0xf]  ;;  %v9911_v48 = vld [vmem:[%s17353_s3 + $0x50] sm:$0xf0]  ;;  %v12969_v4 = vld [vmem:[%s17353_s3 + $0x124] sm:$0xf] }
 0x278   :  { %2280 = vmatpush.bf16.msrb.mxu2 %v9646_v63  ;;  %v9959_v63 = vld [vmem:[%s17353_s3 + $0xb0] sm:$0xf0]  ;;  %v9999_v36 = vld [vmem:[%s17353_s3 + $0xf8] sm:$0xf0] }
 0x279   :  { %v1771_v6 = vadd.f32 %v13671_v32, %v1770_v62  ;;  %v12987_v62 = vld [vmem:[%s17353_s3 + $0x1ac] sm:$0xf0]  ;;  %v9962_v50 = vor.u32 %v12953_v57, %v9959_v63  ;;  %v10039_v53 = vld [vmem:[%s17353_s3 + $0x150] sm:$0xf0]  ;;  %v10021_v57 = vld [vmem:[%s17353_s3 + $0x120] sm:$0xf] }
 0x27a   :  { %2255 = vmatpush.bf16.msrb.mxu0 %v9626_v60  ;;  %v10086_v1 = vor.u32 %v12987_v62, %v10085_v45  ;;  %v12971_v63 = vld [vmem:[%s17353_s3 + $0x12c] sm:$0xf0]  ;;  %v9895_v2 = vld [vmem:[%s17353_s3 + $0x30] sm:$0xf0] }
 0x27b   :  { %v1775_v43 = vsel %vm1774_vm2, %v13671_v32, %v1771_v6  ;;  %v1861_v32 = vperm.slane %v15764_v3, 0  ;;  %v9941_v6 = vld [vmem:[%s17353_s3 + $0x80] sm:$0xf] }
 0x27c   :  { %v1780_v18 = vsel %vm1777_vm3, %v1779_v12, %v1775_v43  ;;  %2281 = vmatpush.bf16.msrb.mxu2 %v9630_v16  ;;  %v9942_v43 = vor.u32 %v12951_v8, %v9941_v6  ;;  %v12949_v16 = vld [vmem:[%s17353_s3 + $0x84] sm:$0xf] }
 0x27d   :  { %v1786_v20 = vmul.f32 %v13673_v7, %v1780_v18  ;;  %v9943_v7 = vld [vmem:[%s17353_s3 + $0x90] sm:$0xf0] }
 0x27f   :  { %v1789_v22 = vpack.c.bf16 %v1786_v20, %v1786_v20 }
 0x281   :  { %1790 = vst [vmem:[#allocation4 + $0x4] sm:$0xf] %v1789_v22  ;;  %v10070_v22 = vor.u32 %v12983_v61, %v10069_v10  ;;  %v10005_v61 = vld [vmem:[%s17353_s3 + $0x100] sm:$0xf] }
 0x288   :  { %v1794_v58 = vld [vmem:[#allocation4] sm:$0xff] }
 0x289   :  { %v1870_v14 = vunpack.c.l.b16 %v1794_v58  ;;  %2370 = vst [vmem:[#allocation4] sm:$0xf] %v9874_v23  ;;  %v1871_v55 = vunpack.c.h.b16 %v1794_v58  ;;  %v9946_v23 = vor.u32 %v12949_v16, %v9943_v7  ;;  %v12981_v58 = vld [vmem:[%s17353_s3 + $0x184] sm:$0xf]  ;;  %v1863_v7 = vperm.slane %v15764_v3, 2 }
 0x28a   :  { %v9879_v3 = vld [vmem:[%s17353_s3 + $0x10] sm:$0xf0] }
 0x28b   :  { %v1872_v24 = vpack.c.b16 %v1870_v14, %v1870_v14  ;;  %v1873_v26 = vpack.c.b16 %v1871_v55, %v1871_v55  ;;  %v10071_v14 = vld [vmem:[%s17353_s3 + $0x190] sm:$0xf0] }
 0x28c   :  { %v10074_v55 = vor.u32 %v12981_v58, %v10071_v14 }
 0x28d   :  { %2204 = vmatmul.bf16.vlgmr.msra.gmra.mxu0 %v1872_v24  ;;  %2217 = vmatmul.bf16.vlgmr.msra.gmra.mxu1 %v1873_v26 }
 0x28e   :  { %2230 = vmatmul.bf16.vlgmr.msra.gmra.mxu2 %v1872_v24  ;;  %2243 = vmatmul.bf16.vlgmr.msra.gmra.mxu3 %v1873_v26 }
 0x28f   :  { %2773 = vmatpush.bf16.msra.mxu0 %v9990_v28  ;;  %2786 = vmatpush.bf16.msra.mxu1 %v10118_v49  ;;  %v12979_v28 = vld [vmem:[%s17353_s3 + $0x16c] sm:$0xf0] }
 0x290   :  { %2799 = vmatpush.bf16.msra.mxu2 %v9994_v29  ;;  %2812 = vmatpush.bf16.msra.mxu3 %v10122_v34  ;;  %v10054_v49 = vor.u32 %v12979_v28, %v10053_v15  ;;  %v9930_v29 = vor.u32 %v12945_v11, %v9927_v13  ;;  %v10058_v34 = vor.u32 %v12977_v31, %v10055_v30  ;;  %v10007_v28 = vld [vmem:[%s17353_s3 + $0x110] sm:$0xf0]  ;;  %v9997_v11 = vld [vmem:[%s17353_s3 + $0xe8] sm:$0xf] }
 0x291   :  { %v10125_v31 = vld [vmem:[%s17353_s3 + $0x1e8] sm:$0xf] }
 0x293   :  { %2774 = vmatpush.bf16.msra.mxu0 %v9974_v17  ;;  %2787 = vmatpush.bf16.msra.mxu1 %v10102_v9 }
 0x294   :  { %2800 = vmatpush.bf16.msra.mxu2 %v9978_v25  ;;  %2813 = vmatpush.bf16.msra.mxu3 %v10106_v52  ;;  %v12973_v52 = vld [vmem:[%s17353_s3 + $0x144] sm:$0xf] }
 0x295   :  { %v10042_v45 = vor.u32 %v12973_v52, %v10039_v53  ;;  %v10109_v52 = vld [vmem:[%s17353_s3 + $0x1c8] sm:$0xf] }
 0x297   :  { %2775 = vmatpush.bf16.msra.mxu0 %v9958_v59  ;;  %2788 = vmatpush.bf16.msra.mxu1 %v10086_v1  ;;  %v12939_v59 = vld [vmem:[%s17353_s3 + $0x2c] sm:$0xf0] }
 0x298   :  { %2801 = vmatpush.bf16.msra.mxu2 %v9962_v50  ;;  %2814 = vmatpush.bf16.msra.mxu3 %v10090_v39  ;;  %v10022_v50 = vor.u32 %v12971_v63, %v10021_v57 }
 0x29b   :  { %2776 = vmatpush.bf16.msra.mxu0 %v9942_v43  ;;  %2789 = vmatpush.bf16.msra.mxu1 %v10070_v22  ;;  %v12935_v43 = vld [vmem:[%s17353_s3 + $0xc] sm:$0xf0]  ;;  %v12933_v22 = vld [vmem:[%s17353_s3 + $0x4] sm:$0xf] }
 0x29c   :  { %2802 = vmatpush.bf16.msra.mxu2 %v9946_v23  ;;  %2815 = vmatpush.bf16.msra.mxu3 %v10074_v55 }
 0x29d   :  { %2256 = vmatmul.bf16.vlgmr.msrb.gmra.mxu0 %v1872_v24  ;;  %2269 = vmatmul.bf16.vlgmr.msrb.gmra.mxu1 %v1873_v26 }
 0x29e   :  { %2282 = vmatmul.bf16.vlgmr.msrb.gmra.mxu2 %v1872_v24  ;;  %2295 = vmatmul.bf16.vlgmr.msrb.gmra.mxu3 %v1873_v26  ;;  %v9925_v26 = vld [vmem:[%s17353_s3 + $0x60] sm:$0xf] }
 0x29f   :  { %v9926_v47 = vor.u32 %v12947_v27, %v9925_v26  ;;  %2790 = vmatpush.bf16.msra.mxu1 %v10054_v49  ;;  %v12965_v26 = vld [vmem:[%s17353_s3 + $0x104] sm:$0xf] }
 0x2a0   :  { %2803 = vmatpush.bf16.msra.mxu2 %v9930_v29  ;;  %2816 = vmatpush.bf16.msra.mxu3 %v10058_v34  ;;  %v10010_v49 = vor.u32 %v12965_v26, %v10007_v28  ;;  %v12964_v29 = vld [vmem:[%s17353_s3 + $0xf4] sm:$0xf0]  ;;  %v12962_v34 = vld [vmem:[%s17353_s3 + $0xec] sm:$0xf] }
 0x2a1   :  { %2777 = vmatpush.bf16.msra.mxu0 %v9926_v47  ;;  %v9882_v47 = vor.u32 %v12933_v22, %v9879_v3  ;;  %v9998_v30 = vor.u32 %v12964_v29, %v9997_v11  ;;  %v9967_v22 = vld [vmem:[%s17353_s3 + $0xb8] sm:$0xf0]  ;;  %v9949_v3 = vld [vmem:[%s17353_s3 + $0x88] sm:$0xf]  ;;  %v12952_v26 = vld [vmem:[%s17353_s3 + $0x94] sm:$0xf0] }
 0x2a2   :  { %v12984_v28 = vld [vmem:[%s17353_s3 + $0x194] sm:$0xf0]  ;;  %v12950_v11 = vld [vmem:[%s17353_s3 + $0x8c] sm:$0xf] }
 0x2a4   :  { %2817 = vmatpush.bf16.msra.mxu3 %v10042_v45  ;;  %v12992_v45 = vld [vmem:[%s17353_s3 + $0x1d4] sm:$0xf0] }
 0x2a5   :  { %2778 = vmatpush.bf16.msra.mxu0 %v9910_v42  ;;  %v10002_v42 = vor.u32 %v12962_v34, %v9999_v36  ;;  %v10079_v34 = vld [vmem:[%s17353_s3 + $0x198] sm:$0xf0] }
 0x30a   :  { %v2205_v46 = vpop.f32.mrf.mxu0  ;;  %v2218_v21 = vpop.f32.mrf.mxu1 }
 0x30b   :  { %v2206_v51 = vadd.f32 %v2205_v46, %v1861_v32  ;;  %v12975_v46 = vld [vmem:[%s17353_s3 + $0x14c] sm:$0xf0] }
 0x30c   :  { %v10038_v41 = vor.u32 %v12975_v46, %v10037_v44  ;;  %v12994_v44 = vld [vmem:[%s17353_s3 + $0x1ec] sm:$0xf]  ;;  %v10127_v46 = vld [vmem:[%s17353_s3 + $0x1f8] sm:$0xf0] }
 0x30d   :  { %v2219_v37 = vadd.f32 %v2218_v21, %v2206_v51  ;;  %v12941_v21 = vld [vmem:[%s17353_s3 + $0x44] sm:$0xf] }
 0x30e   :  { %v9914_v51 = vor.u32 %v12941_v21, %v9911_v48  ;;  %2791 = vmatpush.bf16.msra.mxu1 %v10038_v41  ;;  %v9981_v41 = vld [vmem:[%s17353_s3 + $0xc8] sm:$0xf] }
 0x30f   :  { %v9871_v5 = vmul.f32 -1.442695, %v2219_v37  ;;  %v9893_v37 = vld [vmem:[%s17353_s3 + $0x20] sm:$0xf] }
 0x310   :  { %2804 = vmatpush.bf16.msra.mxu2 %v9914_v51  ;;  %v9894_v62 = vor.u32 %v12939_v59, %v9893_v37  ;;  %v12960_v51 = vld [vmem:[%s17353_s3 + $0xd4] sm:$0xf0]  ;;  %v12958_v37 = vld [vmem:[%s17353_s3 + $0xcc] sm:$0xf]  ;;  %v9983_v59 = vld [vmem:[%s17353_s3 + $0xd8] sm:$0xf0] }
 0x311   :  { %13674 = vpow2.f32 %v9871_v5  ;;  %v2231_v12 = vpop.f32.mrf.mxu2  ;;  %v2244_v60 = vpop.f32.mrf.mxu3  ;;  %v10023_v5 = vld [vmem:[%s17353_s3 + $0x130] sm:$0xf0] }
 0x312   :  { %v2232_v18 = vadd.f32 %v2231_v12, %v1862_v0  ;;  %v2207_v19 = vpop.f32.mrf.mxu0  ;;  %v2220_v20 = vpop.f32.mrf.mxu1  ;;  %v12937_v0 = vld [vmem:[%s17353_s3 + $0x24] sm:$0xf]  ;;  %2779 = vmatpush.bf16.msra.mxu0 %v9894_v62  ;;  %v10026_v10 = vor.u32 %v12969_v4, %v10023_v5  ;;  %2792 = vmatpush.bf16.msra.mxu1 %v10022_v50  ;;  %v12990_v50 = vld [vmem:[%s17353_s3 + $0x1cc] sm:$0xf] }
 0x313   :  { %v9898_v8 = vor.u32 %v12937_v0, %v9895_v2  ;;  %v12967_v20 = vld [vmem:[%s17353_s3 + $0x10c] sm:$0xf0]  ;;  %v10110_v0 = vor.u32 %v12992_v45, %v10109_v52  ;;  %v10111_v2 = vld [vmem:[%s17353_s3 + $0x1d8] sm:$0xf0]  ;;  %v9917_v45 = vld [vmem:[%s17353_s3 + $0x48] sm:$0xf] }
 0x314   :  { %v2245_v24 = vadd.f32 %v2244_v60, %v2232_v18  ;;  %v9877_v60 = vld [vmem:[%s17353_s3] sm:$0xf]  ;;  %2818 = vmatpush.bf16.msra.mxu3 %v10026_v10  ;;  %v10006_v15 = vor.u32 %v12967_v20, %v10005_v61  ;;  %v10114_v10 = vor.u32 %v12990_v50, %v10111_v2  ;;  %v9919_v2 = vld [vmem:[%s17353_s3 + $0x58] sm:$0xf0] }
 0x315   :  { %2805 = vmatpush.bf16.msra.mxu2 %v9898_v8 }
 0x316   :  { %v9872_v54 = vmul.f32 -1.442695, %v2245_v24  ;;  %v9878_v24 = vor.u32 %v12935_v43, %v9877_v60  ;;  %2793 = vmatpush.bf16.msra.mxu1 %v10006_v15  ;;  %v9965_v60 = vld [vmem:[%s17353_s3 + $0xa8] sm:$0xf]  ;;  %v12956_v43 = vld [vmem:[%s17353_s3 + $0xb4] sm:$0xf0] }
 0x317   :  { %v13675_v32 = vpop.eup %13674 }
 0x318   :  { %v15888_v35 = vadd.f32 1.0, %v13675_v32  ;;  %13676 = vpow2.f32 %v9872_v54  ;;  %2780 = vmatpush.bf16.msra.mxu0 %v9878_v24  ;;  %v12996_v32 = vld [vmem:[%s17353_s3 + $0x1f4] sm:$0xf0]  ;;  %2819 = vmatpush.bf16.msra.mxu3 %v10010_v49  ;;  %v9887_v49 = vld [vmem:[%s17353_s3 + $0x18] sm:$0xf0] }
 0x319   :  { %v2233_v17 = vpop.f32.mrf.mxu2  ;;  %v2246_v40 = vpop.f32.mrf.mxu3  ;;  %2806 = vmatpush.bf16.msra.mxu2 %v9882_v47 }
 0x31a   :  { %13678 = vrcp.f32 %v15888_v35  ;;  %v15906_v9 = vpop.f32.mrf.mxu0  ;;  %v15908_v25 = vpop.f32.mrf.mxu1  ;;  %v2316_v6 = vand.u32 2147483648, %v15888_v35  ;;  %v2314_v23 = vand.u32 2147483647, %v15888_v35  ;;  %v10126_v40 = vor.u32 %v12996_v32, %v10125_v31  ;;  %v12982_v32 = vld [vmem:[%s17353_s3 + $0x18c] sm:$0xf] }
 0x31b   :  { %v2258_v38 = vadd.f32 %v15906_v9, %v1863_v7  ;;  %v10130_v9 = vor.u32 %v12994_v44, %v10127_v46  ;;  %vm2310_vm5 = vweird.f32 %v15888_v35  ;;  %v12988_v7 = vld [vmem:[%s17353_s3 + $0x1b4] sm:$0xf0] }
 0x31c   :  { %v15981_v13 = vor.u32 1.1754944e-38, %v2316_v6  ;;  %2825 = vmatpush.bf16.msrb.mxu0 %v9998_v30  ;;  %2838 = vmatpush.bf16.msrb.mxu1 %v10126_v40  ;;  %v9950_v30 = vor.u32 %v12952_v26, %v9949_v3  ;;  %vm2315_vm11 = vcmp.eq.f32.partialorder %v2314_v23, 8.507059e+37  ;;  %v10082_v40 = vor.u32 %v12982_v32, %v10079_v34  ;;  %v12948_v44 = vld [vmem:[%s17353_s3 + $0x74] sm:$0xf0] }
 0x31d   :  { %2851 = vmatpush.bf16.msrb.mxu2 %v10002_v42  ;;  %2864 = vmatpush.bf16.msrb.mxu3 %v10130_v9  ;;  %v2271_v6 = vadd.f32 %v15908_v25, %v2258_v38  ;;  %v10093_v25 = vld [vmem:[%s17353_s3 + $0x1a8] sm:$0xf]  ;;  %v12946_v9 = vld [vmem:[%s17353_s3 + $0x6c] sm:$0xf] }
 0x31e   :  { %v13677_v1 = vpop.eup %13676  ;;  %v10094_v20 = vor.u32 %v12988_v7, %v10093_v25  ;;  %v9933_v42 = vld [vmem:[%s17353_s3 + $0x68] sm:$0xf]  ;;  %v12972_v25 = vld [vmem:[%s17353_s3 + $0x134] sm:$0xf0]  ;;  %v12938_v7 = vld [vmem:[%s17353_s3 + $0x2c] sm:$0xf] }
 0x31f   :  { %v15944_v39 = vadd.f32 1.0, %v13677_v1  ;;  %v9986_v1 = vor.u32 %v12958_v37, %v9983_v59  ;;  %v12944_v37 = vld [vmem:[%s17353_s3 + $0x54] sm:$0xf0] }
 0x320   :  { %v15947_v12 = vpop.eup %13678  ;;  %2839 = vmatpush.bf16.msrb.mxu1 %v10110_v0  ;;  %v9918_v50 = vor.u32 %v12944_v37, %v9917_v45  ;;  %v10251_v45 = vld [vmem:[%s17353_s3 + $0xf0] sm:$0xf0] }
 0x321   :  { %v2306_v16 = vmul.f32 %v15947_v12, %v15888_v35  ;;  %13680 = vrcp.f32 %v15944_v39  ;;  %v2283_v18 = vpop.f32.mrf.mxu2  ;;  %v2296_v19 = vpop.f32.mrf.mxu3  ;;  %vm2311_vm4 = vweird.f32 %v15947_v12  ;;  %v2333_v62 = vand.u32 2147483647, %v15944_v39  ;;  %2852 = vmatpush.bf16.msrb.mxu2 %v9986_v1  ;;  %2865 = vmatpush.bf16.msrb.mxu3 %v10114_v10  ;;  %v10061_v35 = vld [vmem:[%s17353_s3 + $0x168] sm:$0xf] }
 0x322   :  { %v2284_v58 = vadd.f32 %v2283_v18, %v1864_v56  ;;  %v2259_v14 = vpop.f32.mrf.mxu0  ;;  %v2272_v55 = vpop.f32.mrf.mxu1  ;;  %v9982_v56 = vor.u32 %v12960_v51, %v9981_v41  ;;  %v2335_v5 = vand.u32 2147483648, %v15944_v39  ;;  %vm16041_vm6 = vmor %vm2310_vm5, %vm2311_vm4  ;;  %v12954_v18 = vld [vmem:[%s17353_s3 + $0xac] sm:$0xf]  ;;  %vm2329_vm8 = vweird.f32 %v15944_v39  ;;  %v9935_v51 = vld [vmem:[%s17353_s3 + $0x78] sm:$0xf0] }
 0x323   :  { %v2307_v27 = vsub.f32 1.0, %v2306_v16  ;;  %v9966_v16 = vor.u32 %v12956_v43, %v9965_v60  ;;  %v10095_v14 = vld [vmem:[%s17353_s3 + $0x1b8] sm:$0xf0]  ;;  %v9970_v55 = vor.u32 %v12954_v18, %v9967_v22  ;;  %vm2334_vm10 = vcmp.eq.f32.partialorder %v2333_v62, 8.507059e+37  ;;  %v10045_v62 = vld [vmem:[%s17353_s3 + $0x148] sm:$0xf] }
 0x324   :  { %v2297_v54 = vadd.f32 %v2296_v19, %v2284_v58  ;;  %2826 = vmatpush.bf16.msrb.mxu0 %v9982_v56  ;;  %v12986_v58 = vld [vmem:[%s17353_s3 + $0x1ac] sm:$0xf]  ;;  %2840 = vmatpush.bf16.msrb.mxu1 %v10094_v20  ;;  %v10063_v56 = vld [vmem:[%s17353_s3 + $0x178] sm:$0xf0]  ;;  %v9901_v60 = vld [vmem:[%s17353_s3 + $0x28] sm:$0xf] }
 0x325   :  { %v2308_v48 = vmul.f32 %v15947_v12, %v2307_v27  ;;  %v10098_v24 = vor.u32 %v12986_v58, %v10095_v14  ;;  %v10077_v27 = vld [vmem:[%s17353_s3 + $0x188] sm:$0xf]  ;;  %2853 = vmatpush.bf16.msrb.mxu2 %v9970_v55  ;;  %v12940_v43 = vld [vmem:[%s17353_s3 + $0x34] sm:$0xf0]  ;;  %v12970_v20 = vld [vmem:[%s17353_s3 + $0x12c] sm:$0xf] }
 0x326   :  { %v9873_v17 = vmul.f32 -1.442695, %v2297_v54  ;;  %v9951_v54 = vld [vmem:[%s17353_s3 + $0x98] sm:$0xf0]  ;;  %v9902_v14 = vor.u32 %v12940_v43, %v9901_v60 }
 0x327   :  { %v16005_v21 = vpop.eup %13680  ;;  %v2309_v61 = vadd.f32 %v15947_v12, %v2308_v48  ;;  %v9954_v38 = vor.u32 %v12950_v11, %v9951_v54  ;;  %2866 = vmatpush.bf16.msrb.mxu3 %v10098_v24  ;;  %v12980_v48 = vld [vmem:[%s17353_s3 + $0x174] sm:$0xf0]  ;;  %v10031_v55 = vld [vmem:[%s17353_s3 + $0x138] sm:$0xf0]  ;;  %v12934_v54 = vld [vmem:[%s17353_s3 + $0xc] sm:$0xf] }
 0x328   :  { %v2325_v53 = vmul.f32 %v16005_v21, %v15944_v39  ;;  %13682 = vpow2.f32 %v9873_v17  ;;  %vm2330_vm7 = vweird.f32 %v16005_v21  ;;  %v2336_v39 = vor.u32 1.1754944e-38, %v2335_v5  ;;  %2827 = vmatpush.bf16.msrb.mxu0 %v9966_v16  ;;  %v10047_v5 = vld [vmem:[%s17353_s3 + $0x158] sm:$0xf0]  ;;  %v10029_v16 = vld [vmem:[%s17353_s3 + $0x128] sm:$0xf] }
 0x329   :  { %v2285_v57 = vpop.f32.mrf.mxu2  ;;  %v2298_v63 = vpop.f32.mrf.mxu3  ;;  %13684 = vtanh.f32 %v2271_v6  ;;  %vm16094_vm9 = vmor %vm2329_vm8, %vm2330_vm7  ;;  %v2313_v29 = vsel %vm16041_vm6, %v15947_v12, %v2309_v61  ;;  %v10078_v12 = vor.u32 %v12984_v28, %v10077_v27  ;;  %2854 = vmatpush.bf16.msrb.mxu2 %v9954_v38  ;;  %v10030_v3 = vor.u32 %v12972_v25, %v10029_v16  ;;  %v9885_v27 = vld [vmem:[%s17353_s3 + $0x8] sm:$0xf]  ;;  %v12968_v11 = vld [vmem:[%s17353_s3 + $0x114] sm:$0xf0] }
 0x32a   :  { %v2326_v4 = vsub.f32 1.0, %v2325_v53  ;;  %v2318_v46 = vsel %vm2315_vm11, %v15981_v13, %v2313_v29  ;;  %v10062_v13 = vor.u32 %v12980_v48, %v10061_v35  ;;  %v9938_v53 = vor.u32 %v12946_v9, %v9935_v51  ;;  %v12976_v57 = vld [vmem:[%s17353_s3 + $0x154] sm:$0xf0]  ;;  %v12942_v63 = vld [vmem:[%s17353_s3 + $0x4c] sm:$0xf] }
 0x32b   :  { %2841 = vmatpush.bf16.msrb.mxu1 %v10078_v12  ;;  %2867 = vmatpush.bf16.msrb.mxu3 %v10082_v40  ;;  %v10046_v8 = vor.u32 %v12976_v57, %v10045_v62  ;;  %v9922_v10 = vor.u32 %v12942_v63, %v9919_v2  ;;  %v10034_v28 = vor.u32 %v12970_v20, %v10031_v55  ;;  %v12966_v29 = vld [vmem:[%s17353_s3 + $0x10c] sm:$0xf]  ;;  %v13027_v51 = vld [vmem:[%s17353_s3 + $0xec] sm:$0xf0]  ;;  %v13057_v62 = vld [vmem:[%s17353_s3 + $0x1e4] sm:$0xf] }
 0x32c   :  { %v2327_v19 = vmul.f32 %v16005_v21, %v2326_v4  ;;  %2828 = vmatpush.bf16.msrb.mxu0 %v9950_v30  ;;  %v12974_v4 = vld [vmem:[%s17353_s3 + $0x14c] sm:$0xf]  ;;  %v10015_v30 = vld [vmem:[%s17353_s3 + $0x118] sm:$0xf0]  ;;  %v9890_v38 = vor.u32 %v12934_v54, %v9887_v49  ;;  %v10379_v57 = vld [vmem:[%s17353_s3 + $0x1f0] sm:$0xf0] }
 0x32d   :  { %2855 = vmatpush.bf16.msrb.mxu2 %v9938_v53  ;;  %v10050_v61 = vor.u32 %v12974_v4, %v10047_v5  ;;  %v10018_v40 = vor.u32 %v12966_v29, %v10015_v30  ;;  %v13059_v53 = vld [vmem:[%s17353_s3 + $0x1ec] sm:$0xf0]  ;;  %v10361_v4 = vld [vmem:[%s17353_s3 + $0x1c0] sm:$0xf]  ;;  %v13053_v25 = vld [vmem:[%s17353_s3 + $0x1c4] sm:$0xf] }
 0x32e   :  { %v13683_v15 = vpop.eup %13682  ;;  %v2328_v47 = vadd.f32 %v16005_v21, %v2327_v19  ;;  %v9903_v19 = vld [vmem:[%s17353_s3 + $0x38] sm:$0xf0]  ;;  %v13023_v2 = vld [vmem:[%s17353_s3 + $0xcc] sm:$0xf0]  ;;  %v10217_v20 = vld [vmem:[%s17353_s3 + $0xa0] sm:$0xf] }
 0x32f   :  { %v16101_v31 = vadd.f32 1.0, %v13683_v15  ;;  %v13685_v41 = vpop.eup %13684  ;;  %2842 = vmatpush.bf16.msrb.mxu1 %v10062_v13  ;;  %v9906_v26 = vor.u32 %v12938_v7, %v9903_v19  ;;  %v12936_v15 = vld [vmem:[%s17353_s3 + $0x14] sm:$0xf0]  ;;  %v10249_v13 = vld [vmem:[%s17353_s3 + $0xe0] sm:$0xf] }
 0x330   :  { %v2332_v36 = vsel %vm16094_vm9, %v16005_v21, %v2328_v47  ;;  %v9934_v21 = vor.u32 %v12948_v44, %v9933_v42  ;;  %v2360_v52 = vmul.f32 %v13685_v41, %v2318_v46  ;;  %v10013_v47 = vld [vmem:[%s17353_s3 + $0x108] sm:$0xf]  ;;  %v9886_v34 = vor.u32 %v12936_v15, %v9885_v27  ;;  %v10134_v46 = vld [vmem:[%s17351_s1 + $0x14] sm:$0xf]  ;;  %v16227_v41 = vld [vmem:[%s17354_s4] sm:$0xf] }
 0x331   :  { %v2337_v17 = vsel %vm2334_vm10, %v2336_v39, %v2332_v36  ;;  %13686 = vrcp.f32 %v16101_v31  ;;  %v2353_v22 = vand.u32 2147483647, %v16101_v31  ;;  %v2355_v58 = vand.u32 2147483648, %v16101_v31  ;;  %2856 = vmatpush.bf16.msrb.mxu2 %v9922_v10  ;;  %v10235_v10 = vld [vmem:[%s17353_s3 + $0xd0] sm:$0xf0] }
 0x332   :  { %v2359_v23 = vmul.f32 %v2337_v17, %v15690_v33  ;;  %v12978_v33 = vld [vmem:[%s17353_s3 + $0x16c] sm:$0xf]  ;;  %2829 = vmatpush.bf16.msrb.mxu0 %v9934_v21  ;;  %vm2349_vm13 = vweird.f32 %v16101_v31  ;;  %v10014_v12 = vor.u32 %v12968_v11, %v10013_v47  ;;  %v2438_v63 = vperm.slane %v16227_v41, 0  ;;  %v10363_v7 = vld [vmem:[%s17353_s3 + $0x1d0] sm:$0xf0] }
 0x333   :  { %v10066_v59 = vor.u32 %v12978_v33, %v10063_v56  ;;  %2843 = vmatpush.bf16.msrb.mxu1 %v10046_v8  ;;  %v2356_v32 = vor.u32 1.1754944e-38, %v2355_v58  ;;  %vm2354_vm15 = vcmp.eq.f32.partialorder %v2353_v22, 8.507059e+37  ;;  %v10377_v33 = vld [vmem:[%s17353_s3 + $0x1e0] sm:$0xf]  ;;  %v13025_v56 = vld [vmem:[%s17353_s3 + $0xe4] sm:$0xf]  ;;  %v10366_v19 = vor.u32 %v13053_v25, %v10363_v7 }
 0x334   :  { %v16156_v1 = vadd.f32 %v2360_v52, %v2359_v23  ;;  %v10250_v52 = vor.u32 %v13027_v51, %v10249_v13  ;;  %v10378_v37 = vor.u32 %v13059_v53, %v10377_v33  ;;  %v13021_v8 = vld [vmem:[%s17353_s3 + $0xc4] sm:$0xf]  ;;  %v13019_v22 = vld [vmem:[%s17353_s3 + $0xac] sm:$0xf0]  ;;  %v10345_v58 = vld [vmem:[%s17353_s3 + $0x1a0] sm:$0xf] }
 0x335   :  { %2868 = vmatpush.bf16.msrb.mxu3 %v10066_v59  ;;  %2857 = vmatpush.bf16.msrb.mxu2 %v9906_v26  ;;  %v10254_v59 = vor.u32 %v13025_v56, %v10251_v45  ;;  %v10238_v16 = vor.u32 %v13021_v8, %v10235_v10  ;;  %v10218_v55 = vor.u32 %v13019_v22, %v10217_v20  ;;  %v10219_v26 = vld [vmem:[%s17353_s3 + $0xb0] sm:$0xf0]  ;;  %v2439_v27 = vperm.slane %v16227_v41, 1  ;;  %v13015_v29 = vld [vmem:[%s17353_s3 + $0x8c] sm:$0xf0] }
 0x336   :  { %13688 = vtanh.f32 %v16156_v1  ;;  %2830 = vmatpush.bf16.msrb.mxu0 %v9918_v50  ;;  %v10233_v50 = vld [vmem:[%s17353_s3 + $0xc0] sm:$0xf]  ;;  %v10347_v11 = vld [vmem:[%s17353_s3 + $0x1b0] sm:$0xf0]  ;;  %v13011_v13 = vld [vmem:[%s17353_s3 + $0x6c] sm:$0xf0] }
 0x337   :  { %v13687_v0 = vpop.eup %13686  ;;  %2844 = vmatpush.bf16.msrb.mxu1 %v10030_v3  ;;  %v10234_v5 = vor.u32 %v13023_v2, %v10233_v50  ;;  %v13017_v3 = vld [vmem:[%s17353_s3 + $0xa4] sm:$0xf]  ;;  %v10329_v30 = vld [vmem:[%s17353_s3 + $0x180] sm:$0xf]  ;;  %v10187_v56 = vld [vmem:[%s17353_s3 + $0x70] sm:$0xf0] }
 0x338   :  { %v2345_v6 = vmul.f32 %v13687_v0, %v16101_v31  ;;  %vm2350_vm12 = vweird.f32 %v13687_v0  ;;  %v10222_v47 = vor.u32 %v13017_v3, %v10219_v26  ;;  %v10313_v51 = vld [vmem:[%s17353_s3 + $0x160] sm:$0xf]  ;;  %v13009_v53 = vld [vmem:[%s17353_s3 + $0x64] sm:$0xf]  ;;  %v10171_v25 = vld [vmem:[%s17353_s3 + $0x50] sm:$0xf0] }
 0x339   :  { %2869 = vmatpush.bf16.msrb.mxu3 %v10050_v61  ;;  %vm2351_vm14 = vmor %vm2349_vm13, %vm2350_vm12  ;;  %2858 = vmatpush.bf16.msrb.mxu2 %v9890_v38  ;;  %v13013_v38 = vld [vmem:[%s17353_s3 + $0x84] sm:$0xf]  ;;  %v10169_v2 = vld [vmem:[%s17353_s3 + $0x40] sm:$0xf]  ;;  %v2441_v22 = vperm.slane %v16227_v41, 3 }
 0x33a   :  { %v2346_v18 = vsub.f32 1.0, %v2345_v6  ;;  %2831 = vmatpush.bf16.msrb.mxu0 %v9902_v14  ;;  %v13055_v6 = vld [vmem:[%s17353_s3 + $0x1cc] sm:$0xf0]  ;;  %v10297_v10 = vld [vmem:[%s17353_s3 + $0x140] sm:$0xf] }
 0x33b   :  { %2845 = vmatpush.bf16.msrb.mxu1 %v10014_v12  ;;  %v10362_v61 = vor.u32 %v13055_v6, %v10361_v4  ;;  %v13047_v12 = vld [vmem:[%s17353_s3 + $0x18c] sm:$0xf0]  ;;  %v10299_v20 = vld [vmem:[%s17353_s3 + $0x150] sm:$0xf0]  ;;  %v10281_v3 = vld [vmem:[%s17353_s3 + $0x120] sm:$0xf] }
 0x33c   :  { %v2347_v24 = vmul.f32 %v13687_v0, %v2346_v18  ;;  %v13689_v31 = vpop.eup %13688  ;;  %v13007_v4 = vld [vmem:[%s17353_s3 + $0x4c] sm:$0xf0] }
 0x33d   :  { %2870 = vmatpush.bf16.msrb.mxu3 %v10034_v28  ;;  %v13049_v28 = vld [vmem:[%s17353_s3 + $0x1a4] sm:$0xf]  ;;  %v10170_v8 = vor.u32 %v13007_v4, %v10169_v2  ;;  %v13035_v26 = vld [vmem:[%s17353_s3 + $0x12c] sm:$0xf0]  ;;  %v10259_v2 = vld [vmem:[%s17353_s3 + $0xf8] sm:$0xf0] }
 0x33e   :  { %v2348_v39 = vadd.f32 %v13687_v0, %v2347_v24  ;;  %2832 = vmatpush.bf16.msrb.mxu0 %v9886_v34  ;;  %v13051_v24 = vld [vmem:[%s17353_s3 + $0x1ac] sm:$0xf0]  ;;  %v10350_v49 = vor.u32 %v13049_v28, %v10347_v11  ;;  %v10155_v28 = vld [vmem:[%s17353_s3 + $0x30] sm:$0xf0]  ;;  %v13033_v11 = vld [vmem:[%s17353_s3 + $0x124] sm:$0xf] }
 0x33f   :  { %v10346_v15 = vor.u32 %v13051_v24, %v10345_v58 }
 0x340   :  { %v2352_v36 = vsel %vm2351_vm14, %v13687_v0, %v2348_v39  ;;  %v10382_v0 = vor.u32 %v13057_v62, %v10379_v57  ;;  %v10201_v39 = vld [vmem:[%s17353_s3 + $0x80] sm:$0xf]  ;;  %v13041_v62 = vld [vmem:[%s17353_s3 + $0x164] sm:$0xf]  ;;  %v10315_v57 = vld [vmem:[%s17353_s3 + $0x170] sm:$0xf0] }
 0x341   :  { %v2357_v17 = vsel %vm2354_vm15, %v2356_v32, %v2352_v36  ;;  %2871 = vmatpush.bf16.msrb.mxu3 %v10018_v40  ;;  %v10202_v36 = vor.u32 %v13015_v29, %v10201_v39 }
 0x342   :  { %v2363_v42 = vmul.f32 %v13689_v31, %v2357_v17  ;;  %v10203_v31 = vld [vmem:[%s17353_s3 + $0x90] sm:$0xf0] }
 0x344   :  { %v2366_v44 = vpack.c.bf16 %v2363_v42, %v2363_v42 }
 0x346   :  { %2367 = vst [vmem:[#allocation4 + $0x4] sm:$0xf] %v2366_v44  ;;  %v10330_v44 = vor.u32 %v13047_v12, %v10329_v30  ;;  %v10265_v12 = vld [vmem:[%s17353_s3 + $0x100] sm:$0xf] }
 0x34d   :  { %v2371_v35 = vld [vmem:[#allocation4] sm:$0xff] }
 0x34e   :  { %v2447_v23 = vunpack.c.l.b16 %v2371_v35  ;;  %2947 = vst [vmem:[#allocation4] sm:$0xf] %v10134_v46  ;;  %v2448_v21 = vunpack.c.h.b16 %v2371_v35  ;;  %v10206_v46 = vor.u32 %v13013_v38, %v10203_v31  ;;  %v13045_v35 = vld [vmem:[%s17353_s3 + $0x184] sm:$0xf]  ;;  %v2440_v31 = vperm.slane %v16227_v41, 2 }
 0x34f   :  { %v10139_v41 = vld [vmem:[%s17353_s3 + $0x10] sm:$0xf0] }
 0x350   :  { %v2449_v48 = vpack.c.b16 %v2447_v23, %v2447_v23  ;;  %v2450_v9 = vpack.c.b16 %v2448_v21, %v2448_v21  ;;  %v10331_v23 = vld [vmem:[%s17353_s3 + $0x190] sm:$0xf0] }
 0x351   :  { %v10334_v21 = vor.u32 %v13045_v35, %v10331_v23 }
 0x352   :  { %2781 = vmatmul.bf16.vlgmr.msra.gmra.mxu0 %v2449_v48  ;;  %2794 = vmatmul.bf16.vlgmr.msra.gmra.mxu1 %v2450_v9 }
 0x353   :  { %2807 = vmatmul.bf16.vlgmr.msra.gmra.mxu2 %v2449_v48  ;;  %2820 = vmatmul.bf16.vlgmr.msra.gmra.mxu3 %v2450_v9 }
 0x354   :  { %3350 = vmatpush.bf16.msra.mxu0 %v10250_v52  ;;  %3363 = vmatpush.bf16.msra.mxu1 %v10378_v37  ;;  %v13043_v52 = vld [vmem:[%s17353_s3 + $0x16c] sm:$0xf0] }
 0x355   :  { %3376 = vmatpush.bf16.msra.mxu2 %v10254_v59  ;;  %3389 = vmatpush.bf16.msra.mxu3 %v10382_v0  ;;  %v10314_v37 = vor.u32 %v13043_v52, %v10313_v51  ;;  %v10190_v59 = vor.u32 %v13009_v53, %v10187_v56  ;;  %v10318_v0 = vor.u32 %v13041_v62, %v10315_v57  ;;  %v10267_v52 = vld [vmem:[%s17353_s3 + $0x110] sm:$0xf0]  ;;  %v10257_v53 = vld [vmem:[%s17353_s3 + $0xe8] sm:$0xf] }
 0x356   :  { %v10385_v62 = vld [vmem:[%s17353_s3 + $0x1e8] sm:$0xf] }
 0x358   :  { %3351 = vmatpush.bf16.msra.mxu0 %v10234_v5  ;;  %3364 = vmatpush.bf16.msra.mxu1 %v10362_v61 }
 0x359   :  { %3377 = vmatpush.bf16.msra.mxu2 %v10238_v16  ;;  %3390 = vmatpush.bf16.msra.mxu3 %v10366_v19  ;;  %v13037_v19 = vld [vmem:[%s17353_s3 + $0x144] sm:$0xf] }
 0x35a   :  { %v10302_v58 = vor.u32 %v13037_v19, %v10299_v20  ;;  %v10369_v19 = vld [vmem:[%s17353_s3 + $0x1c8] sm:$0xf] }
 0x35c   :  { %3352 = vmatpush.bf16.msra.mxu0 %v10218_v55  ;;  %3365 = vmatpush.bf16.msra.mxu1 %v10346_v15  ;;  %v13003_v55 = vld [vmem:[%s17353_s3 + $0x2c] sm:$0xf0] }
 0x35d   :  { %3378 = vmatpush.bf16.msra.mxu2 %v10222_v47  ;;  %3391 = vmatpush.bf16.msra.mxu3 %v10350_v49  ;;  %v10282_v47 = vor.u32 %v13035_v26, %v10281_v3 }
 0x360   :  { %3353 = vmatpush.bf16.msra.mxu0 %v10202_v36  ;;  %3366 = vmatpush.bf16.msra.mxu1 %v10330_v44  ;;  %v12999_v36 = vld [vmem:[%s17353_s3 + $0xc] sm:$0xf0]  ;;  %v12997_v44 = vld [vmem:[%s17353_s3 + $0x4] sm:$0xf] }
 0x361   :  { %3379 = vmatpush.bf16.msra.mxu2 %v10206_v46  ;;  %3392 = vmatpush.bf16.msra.mxu3 %v10334_v21 }
 0x362   :  { %2833 = vmatmul.bf16.vlgmr.msrb.gmra.mxu0 %v2449_v48  ;;  %2846 = vmatmul.bf16.vlgmr.msrb.gmra.mxu1 %v2450_v9 }
 0x363   :  { %2859 = vmatmul.bf16.vlgmr.msrb.gmra.mxu2 %v2449_v48  ;;  %2872 = vmatmul.bf16.vlgmr.msrb.gmra.mxu3 %v2450_v9  ;;  %v10185_v9 = vld [vmem:[%s17353_s3 + $0x60] sm:$0xf] }
 0x364   :  { %v10186_v33 = vor.u32 %v13011_v13, %v10185_v9  ;;  %3367 = vmatpush.bf16.msra.mxu1 %v10314_v37  ;;  %v13029_v9 = vld [vmem:[%s17353_s3 + $0x104] sm:$0xf] }
 0x365   :  { %3380 = vmatpush.bf16.msra.mxu2 %v10190_v59  ;;  %3393 = vmatpush.bf16.msra.mxu3 %v10318_v0  ;;  %v10270_v37 = vor.u32 %v13029_v9, %v10267_v52  ;;  %v13028_v59 = vld [vmem:[%s17353_s3 + $0xf4] sm:$0xf0]  ;;  %v13026_v0 = vld [vmem:[%s17353_s3 + $0xec] sm:$0xf] }
 0x366   :  { %3354 = vmatpush.bf16.msra.mxu0 %v10186_v33  ;;  %v10142_v33 = vor.u32 %v12997_v44, %v10139_v41  ;;  %v10258_v57 = vor.u32 %v13028_v59, %v10257_v53  ;;  %v10227_v44 = vld [vmem:[%s17353_s3 + $0xb8] sm:$0xf0]  ;;  %v10209_v41 = vld [vmem:[%s17353_s3 + $0x88] sm:$0xf]  ;;  %v13016_v9 = vld [vmem:[%s17353_s3 + $0x94] sm:$0xf0] }
 0x367   :  { %v13048_v52 = vld [vmem:[%s17353_s3 + $0x194] sm:$0xf0]  ;;  %v13014_v53 = vld [vmem:[%s17353_s3 + $0x8c] sm:$0xf] }
 0x369   :  { %3394 = vmatpush.bf16.msra.mxu3 %v10302_v58  ;;  %v13056_v58 = vld [vmem:[%s17353_s3 + $0x1d4] sm:$0xf0] }
 0x36a   :  { %3355 = vmatpush.bf16.msra.mxu0 %v10170_v8  ;;  %v10262_v8 = vor.u32 %v13026_v0, %v10259_v2  ;;  %v10339_v0 = vld [vmem:[%s17353_s3 + $0x198] sm:$0xf0] }
 0x3cf   :  { %v2782_v60 = vpop.f32.mrf.mxu0  ;;  %v2795_v43 = vpop.f32.mrf.mxu1 }
 0x3d0   :  { %v2783_v18 = vadd.f32 %v2782_v60, %v2438_v63  ;;  %v13039_v60 = vld [vmem:[%s17353_s3 + $0x14c] sm:$0xf0] }
 0x3d1   :  { %v10298_v7 = vor.u32 %v13039_v60, %v10297_v10  ;;  %v13058_v10 = vld [vmem:[%s17353_s3 + $0x1ec] sm:$0xf]  ;;  %v10387_v60 = vld [vmem:[%s17353_s3 + $0x1f8] sm:$0xf0] }
 0x3d2   :  { %v2796_v14 = vadd.f32 %v2795_v43, %v2783_v18  ;;  %v13005_v43 = vld [vmem:[%s17353_s3 + $0x44] sm:$0xf] }
 0x3d3   :  { %v10174_v18 = vor.u32 %v13005_v43, %v10171_v25  ;;  %3368 = vmatpush.bf16.msra.mxu1 %v10298_v7  ;;  %v10241_v7 = vld [vmem:[%s17353_s3 + $0xc8] sm:$0xf] }
 0x3d4   :  { %v10131_v54 = vmul.f32 -1.442695, %v2796_v14  ;;  %v10153_v14 = vld [vmem:[%s17353_s3 + $0x20] sm:$0xf] }
 0x3d5   :  { %3381 = vmatpush.bf16.msra.mxu2 %v10174_v18  ;;  %v10154_v24 = vor.u32 %v13003_v55, %v10153_v14  ;;  %v13024_v18 = vld [vmem:[%s17353_s3 + $0xd4] sm:$0xf0]  ;;  %v13022_v14 = vld [vmem:[%s17353_s3 + $0xcc] sm:$0xf]  ;;  %v10243_v55 = vld [vmem:[%s17353_s3 + $0xd8] sm:$0xf0] }
 0x3d6   :  { %13690 = vpow2.f32 %v10131_v54  ;;  %v2808_v32 = vpop.f32.mrf.mxu2  ;;  %v2821_v34 = vpop.f32.mrf.mxu3  ;;  %v10283_v54 = vld [vmem:[%s17353_s3 + $0x130] sm:$0xf0] }
 0x3d7   :  { %v2809_v17 = vadd.f32 %v2808_v32, %v2439_v27  ;;  %v2784_v40 = vpop.f32.mrf.mxu0  ;;  %v2797_v42 = vpop.f32.mrf.mxu1  ;;  %v13001_v27 = vld [vmem:[%s17353_s3 + $0x24] sm:$0xf]  ;;  %3356 = vmatpush.bf16.msra.mxu0 %v10154_v24  ;;  %v10286_v30 = vor.u32 %v13033_v11, %v10283_v54  ;;  %3369 = vmatpush.bf16.msra.mxu1 %v10282_v47  ;;  %v13054_v47 = vld [vmem:[%s17353_s3 + $0x1cc] sm:$0xf] }
 0x3d8   :  { %v10158_v29 = vor.u32 %v13001_v27, %v10155_v28  ;;  %v13031_v42 = vld [vmem:[%s17353_s3 + $0x10c] sm:$0xf0]  ;;  %v10370_v27 = vor.u32 %v13056_v58, %v10369_v19  ;;  %v10371_v28 = vld [vmem:[%s17353_s3 + $0x1d8] sm:$0xf0]  ;;  %v10177_v58 = vld [vmem:[%s17353_s3 + $0x48] sm:$0xf] }
 0x3d9   :  { %v2822_v48 = vadd.f32 %v2821_v34, %v2809_v17  ;;  %v10137_v34 = vld [vmem:[%s17353_s3] sm:$0xf]  ;;  %3395 = vmatpush.bf16.msra.mxu3 %v10286_v30  ;;  %v10266_v51 = vor.u32 %v13031_v42, %v10265_v12  ;;  %v10374_v30 = vor.u32 %v13054_v47, %v10371_v28  ;;  %v10179_v28 = vld [vmem:[%s17353_s3 + $0x58] sm:$0xf0] }
 0x3da   :  { %3382 = vmatpush.bf16.msra.mxu2 %v10158_v29 }
 0x3db   :  { %v10132_v45 = vmul.f32 -1.442695, %v2822_v48  ;;  %v10138_v48 = vor.u32 %v12999_v36, %v10137_v34  ;;  %3370 = vmatpush.bf16.msra.mxu1 %v10266_v51  ;;  %v10225_v34 = vld [vmem:[%s17353_s3 + $0xa8] sm:$0xf]  ;;  %v13020_v36 = vld [vmem:[%s17353_s3 + $0xb4] sm:$0xf0] }
 0x3dc   :  { %v13691_v63 = vpop.eup %13690 }
 0x3dd   :  { %v16351_v50 = vadd.f32 1.0, %v13691_v63  ;;  %13692 = vpow2.f32 %v10132_v45  ;;  %3357 = vmatpush.bf16.msra.mxu0 %v10138_v48  ;;  %v13060_v63 = vld [vmem:[%s17353_s3 + $0x1f4] sm:$0xf0]  ;;  %3396 = vmatpush.bf16.msra.mxu3 %v10270_v37  ;;  %v10147_v37 = vld [vmem:[%s17353_s3 + $0x18] sm:$0xf0] }
 0x3de   :  { %v2810_v5 = vpop.f32.mrf.mxu2  ;;  %v2823_v6 = vpop.f32.mrf.mxu3  ;;  %3383 = vmatpush.bf16.msra.mxu2 %v10142_v33 }
 0x3df   :  { %13694 = vrcp.f32 %v16351_v50  ;;  %v16369_v61 = vpop.f32.mrf.mxu0  ;;  %v16371_v16 = vpop.f32.mrf.mxu1  ;;  %v2893_v39 = vand.u32 2147483648, %v16351_v50  ;;  %v2891_v46 = vand.u32 2147483647, %v16351_v50  ;;  %v10386_v6 = vor.u32 %v13060_v63, %v10385_v62  ;;  %v13046_v63 = vld [vmem:[%s17353_s3 + $0x18c] sm:$0xf] }
 0x3e0   :  { %v2835_v4 = vadd.f32 %v16369_v61, %v2440_v31  ;;  %v10390_v61 = vor.u32 %v13058_v10, %v10387_v60  ;;  %vm2887_vm1 = vweird.f32 %v16351_v50  ;;  %v13052_v31 = vld [vmem:[%s17353_s3 + $0x1b4] sm:$0xf0] }
 0x3e1   :  { %v16444_v56 = vor.u32 1.1754944e-38, %v2893_v39  ;;  %3402 = vmatpush.bf16.msrb.mxu0 %v10258_v57  ;;  %3415 = vmatpush.bf16.msrb.mxu1 %v10386_v6  ;;  %v10210_v57 = vor.u32 %v13016_v9, %v10209_v41  ;;  %vm2892_vm7 = vcmp.eq.f32.partialorder %v2891_v46, 8.507059e+37  ;;  %v10342_v6 = vor.u32 %v13046_v63, %v10339_v0  ;;  %v13012_v10 = vld [vmem:[%s17353_s3 + $0x74] sm:$0xf0] }
 0x3e2   :  { %3428 = vmatpush.bf16.msrb.mxu2 %v10262_v8  ;;  %3441 = vmatpush.bf16.msrb.mxu3 %v10390_v61  ;;  %v2848_v39 = vadd.f32 %v16371_v16, %v2835_v4  ;;  %v10353_v16 = vld [vmem:[%s17353_s3 + $0x1a8] sm:$0xf]  ;;  %v13010_v61 = vld [vmem:[%s17353_s3 + $0x6c] sm:$0xf] }
 0x3e3   :  { %v13693_v15 = vpop.eup %13692  ;;  %v10354_v42 = vor.u32 %v13052_v31, %v10353_v16  ;;  %v10193_v8 = vld [vmem:[%s17353_s3 + $0x68] sm:$0xf]  ;;  %v13036_v16 = vld [vmem:[%s17353_s3 + $0x134] sm:$0xf0]  ;;  %v13002_v31 = vld [vmem:[%s17353_s3 + $0x2c] sm:$0xf] }
 0x3e4   :  { %v16407_v49 = vadd.f32 1.0, %v13693_v15  ;;  %v10246_v15 = vor.u32 %v13022_v14, %v10243_v55  ;;  %v13008_v14 = vld [vmem:[%s17353_s3 + $0x54] sm:$0xf0] }
 0x3e5   :  { %v16410_v32 = vpop.eup %13694  ;;  %3416 = vmatpush.bf16.msrb.mxu1 %v10370_v27  ;;  %v10178_v47 = vor.u32 %v13008_v14, %v10177_v58  ;;  %v10510_v58 = vld [vmem:[#allocation7 + $0xf0] sm:$0xf0] }
 0x3e6   :  { %v2883_v38 = vmul.f32 %v16410_v32, %v16351_v50  ;;  %13696 = vrcp.f32 %v16407_v49  ;;  %v2860_v17 = vpop.f32.mrf.mxu2  ;;  %v2873_v40 = vpop.f32.mrf.mxu3  ;;  %vm2888_vm0 = vweird.f32 %v16410_v32  ;;  %v2910_v24 = vand.u32 2147483647, %v16407_v49  ;;  %3429 = vmatpush.bf16.msrb.mxu2 %v10246_v15  ;;  %3442 = vmatpush.bf16.msrb.mxu3 %v10374_v30  ;;  %v10321_v50 = vld [vmem:[%s17353_s3 + $0x168] sm:$0xf] }
 0x3e7   :  { %v2861_v35 = vadd.f32 %v2860_v17, %v2441_v22  ;;  %v2836_v23 = vpop.f32.mrf.mxu0  ;;  %v2849_v21 = vpop.f32.mrf.mxu1  ;;  %v10242_v22 = vor.u32 %v13024_v18, %v10241_v7  ;;  %v2912_v54 = vand.u32 2147483648, %v16407_v49  ;;  %vm16504_vm2 = vmor %vm2887_vm1, %vm2888_vm0  ;;  %v13018_v17 = vld [vmem:[%s17353_s3 + $0xac] sm:$0xf]  ;;  %vm2906_vm4 = vweird.f32 %v16407_v49  ;;  %v10195_v18 = vld [vmem:[%s17353_s3 + $0x78] sm:$0xf0] }
 0x3e8   :  { %v2884_v13 = vsub.f32 1.0, %v2883_v38  ;;  %v10226_v38 = vor.u32 %v13020_v36, %v10225_v34  ;;  %v10355_v23 = vld [vmem:[%s17353_s3 + $0x1b8] sm:$0xf0]  ;;  %v10230_v21 = vor.u32 %v13018_v17, %v10227_v44  ;;  %vm2911_vm6 = vcmp.eq.f32.partialorder %v2910_v24, 8.507059e+37  ;;  %v10305_v24 = vld [vmem:[%s17353_s3 + $0x148] sm:$0xf] }
 0x3e9   :  { %v2874_v45 = vadd.f32 %v2873_v40, %v2861_v35  ;;  %3403 = vmatpush.bf16.msrb.mxu0 %v10242_v22  ;;  %v13050_v35 = vld [vmem:[%s17353_s3 + $0x1ac] sm:$0xf]  ;;  %3417 = vmatpush.bf16.msrb.mxu1 %v10354_v42  ;;  %v10323_v22 = vld [vmem:[%s17353_s3 + $0x178] sm:$0xf0]  ;;  %v10161_v34 = vld [vmem:[%s17353_s3 + $0x28] sm:$0xf] }
 0x3ea   :  { %v2885_v25 = vmul.f32 %v16410_v32, %v2884_v13  ;;  %v10358_v48 = vor.u32 %v13050_v35, %v10355_v23  ;;  %v10337_v13 = vld [vmem:[%s17353_s3 + $0x188] sm:$0xf]  ;;  %3430 = vmatpush.bf16.msrb.mxu2 %v10230_v21  ;;  %v13004_v36 = vld [vmem:[%s17353_s3 + $0x34] sm:$0xf0]  ;;  %v13034_v42 = vld [vmem:[%s17353_s3 + $0x12c] sm:$0xf] }
 0x3eb   :  { %v10133_v5 = vmul.f32 -1.442695, %v2874_v45  ;;  %v10211_v45 = vld [vmem:[%s17353_s3 + $0x98] sm:$0xf0]  ;;  %v10162_v23 = vor.u32 %v13004_v36, %v10161_v34 }
 0x3ec   :  { %v16468_v43 = vpop.eup %13696  ;;  %v2886_v12 = vadd.f32 %v16410_v32, %v2885_v25  ;;  %v10214_v4 = vor.u32 %v13014_v53, %v10211_v45  ;;  %3443 = vmatpush.bf16.msrb.mxu3 %v10358_v48  ;;  %v13044_v25 = vld [vmem:[%s17353_s3 + $0x174] sm:$0xf0]  ;;  %v10291_v21 = vld [vmem:[%s17353_s3 + $0x138] sm:$0xf0]  ;;  %v12998_v45 = vld [vmem:[%s17353_s3 + $0xc] sm:$0xf] }
 0x3ed   :  { %v2902_v20 = vmul.f32 %v16468_v43, %v16407_v49  ;;  %13698 = vpow2.f32 %v10133_v5  ;;  %vm2907_vm3 = vweird.f32 %v16468_v43  ;;  %v2913_v49 = vor.u32 1.1754944e-38, %v2912_v54  ;;  %3404 = vmatpush.bf16.msrb.mxu0 %v10226_v38  ;;  %v10307_v54 = vld [vmem:[%s17353_s3 + $0x158] sm:$0xf0]  ;;  %v10289_v38 = vld [vmem:[%s17353_s3 + $0x128] sm:$0xf] }
 0x3ee   :  { %v2862_v3 = vpop.f32.mrf.mxu2  ;;  %v2875_v26 = vpop.f32.mrf.mxu3  ;;  %13700 = vtanh.f32 %v2848_v39  ;;  %vm16557_vm5 = vmor %vm2906_vm4, %vm2907_vm3  ;;  %v2890_v59 = vsel %vm16504_vm2, %v16410_v32, %v2886_v12  ;;  %v10338_v32 = vor.u32 %v13048_v52, %v10337_v13  ;;  %3431 = vmatpush.bf16.msrb.mxu2 %v10214_v4  ;;  %v10290_v41 = vor.u32 %v13036_v16, %v10289_v38  ;;  %v10145_v13 = vld [vmem:[%s17353_s3 + $0x8] sm:$0xf]  ;;  %v13032_v53 = vld [vmem:[%s17353_s3 + $0x114] sm:$0xf0] }
 0x3ef   :  { %v2903_v11 = vsub.f32 1.0, %v2902_v20  ;;  %v2895_v60 = vsel %vm2892_vm7, %v16444_v56, %v2890_v59  ;;  %v10322_v56 = vor.u32 %v13044_v25, %v10321_v50  ;;  %v10198_v20 = vor.u32 %v13010_v61, %v10195_v18  ;;  %v13040_v3 = vld [vmem:[%s17353_s3 + $0x154] sm:$0xf0]  ;;  %v13006_v26 = vld [vmem:[%s17353_s3 + $0x4c] sm:$0xf] }
 0x3f0   :  { %3418 = vmatpush.bf16.msrb.mxu1 %v10338_v32  ;;  %3444 = vmatpush.bf16.msrb.mxu3 %v10342_v6  ;;  %v10306_v29 = vor.u32 %v13040_v3, %v10305_v24  ;;  %v10182_v30 = vor.u32 %v13006_v26, %v10179_v28  ;;  %v10294_v52 = vor.u32 %v13034_v42, %v10291_v21  ;;  %v13030_v59 = vld [vmem:[%s17353_s3 + $0x10c] sm:$0xf]  ;;  %v13091_v18 = vld [vmem:[#allocation7 + $0xec] sm:$0xf0]  ;;  %v13121_v24 = vld [vmem:[#allocation7 + $0x1e4] sm:$0xf] }
 0x3f1   :  { %v2904_v40 = vmul.f32 %v16468_v43, %v2903_v11  ;;  %3405 = vmatpush.bf16.msrb.mxu0 %v10210_v57  ;;  %v13038_v11 = vld [vmem:[%s17353_s3 + $0x14c] sm:$0xf]  ;;  %v10275_v57 = vld [vmem:[%s17353_s3 + $0x118] sm:$0xf0]  ;;  %v10150_v4 = vor.u32 %v12998_v45, %v10147_v37  ;;  %v10638_v3 = vld [vmem:[#allocation7 + $0x1f0] sm:$0xf0] }
 0x3f2   :  { %3432 = vmatpush.bf16.msrb.mxu2 %v10198_v20  ;;  %v10310_v12 = vor.u32 %v13038_v11, %v10307_v54  ;;  %v10278_v6 = vor.u32 %v13030_v59, %v10275_v57  ;;  %v13123_v20 = vld [vmem:[#allocation7 + $0x1ec] sm:$0xf0]  ;;  %v10620_v11 = vld [vmem:[#allocation7 + $0x1c0] sm:$0xf]  ;;  %v13117_v16 = vld [vmem:[#allocation7 + $0x1c4] sm:$0xf] }
 0x3f3   :  { %v13699_v51 = vpop.eup %13698  ;;  %v2905_v33 = vadd.f32 %v16468_v43, %v2904_v40  ;;  %v10163_v40 = vld [vmem:[%s17353_s3 + $0x38] sm:$0xf0]  ;;  %v13087_v28 = vld [vmem:[#allocation7 + $0xcc] sm:$0xf0]  ;;  %v10476_v42 = vld [vmem:[#allocation7 + $0xa0] sm:$0xf] }
 0x3f4   :  { %v16564_v62 = vadd.f32 1.0, %v13699_v51  ;;  %v13701_v7 = vpop.eup %13700  ;;  %3419 = vmatpush.bf16.msrb.mxu1 %v10322_v56  ;;  %v10166_v9 = vor.u32 %v13002_v31, %v10163_v40  ;;  %v13000_v51 = vld [vmem:[%s17353_s3 + $0x14] sm:$0xf0]  ;;  %v10508_v56 = vld [vmem:[#allocation7 + $0xe0] sm:$0xf] }
 0x3f5   :  { %v2909_v2 = vsel %vm16557_vm5, %v16468_v43, %v2905_v33  ;;  %v10194_v43 = vor.u32 %v13012_v10, %v10193_v8  ;;  %v2937_v19 = vmul.f32 %v13701_v7, %v2895_v60  ;;  %v10273_v33 = vld [vmem:[%s17353_s3 + $0x108] sm:$0xf]  ;;  %v10146_v0 = vor.u32 %v13000_v51, %v10145_v13  ;;  %v3522_v60 = vld [vmem:[%s17352_s2] sm:$0xf]  ;;  %v10622_v31 = vld [vmem:[#allocation7 + $0x1d0] sm:$0xf0] }
 0x3f6   :  { %v2914_v5 = vsel %vm2911_vm6, %v2913_v49, %v2909_v2  ;;  %13702 = vrcp.f32 %v16564_v62  ;;  %v2930_v44 = vand.u32 2147483647, %v16564_v62  ;;  %v2932_v35 = vand.u32 2147483648, %v16564_v62  ;;  %3433 = vmatpush.bf16.msrb.mxu2 %v10182_v30  ;;  %v16690_v7 = vld [vmem:[%s17354_s4] sm:$0xf] }
 0x3f7   :  { %v2936_v46 = vmul.f32 %v2914_v5, %v16156_v1  ;;  %v13042_v1 = vld [vmem:[%s17353_s3 + $0x16c] sm:$0xf]  ;;  %3406 = vmatpush.bf16.msrb.mxu0 %v10194_v43  ;;  %vm2926_vm9 = vweird.f32 %v16564_v62  ;;  %v10274_v32 = vor.u32 %v13032_v53, %v10273_v33  ;;  %v3015_v26 = vperm.slane %v16690_v7, 0  ;;  %v10494_v30 = vld [vmem:[#allocation7 + $0xd0] sm:$0xf0] }
 0x3f8   :  { %v10326_v55 = vor.u32 %v13042_v1, %v10323_v22  ;;  %3420 = vmatpush.bf16.msrb.mxu1 %v10306_v29  ;;  %v2933_v63 = vor.u32 1.1754944e-38, %v2932_v35  ;;  %vm2931_vm11 = vcmp.eq.f32.partialorder %v2930_v44, 8.507059e+37  ;;  %v10636_v1 = vld [vmem:[#allocation7 + $0x1e0] sm:$0xf]  ;;  %v13089_v22 = vld [vmem:[#allocation7 + $0xe4] sm:$0xf]  ;;  %v10625_v40 = vor.u32 %v13117_v16, %v10622_v31 }
 0x3f9   :  { %v16619_v15 = vadd.f32 %v2937_v19, %v2936_v46  ;;  %v10509_v19 = vor.u32 %v13091_v18, %v10508_v56  ;;  %v10637_v14 = vor.u32 %v13123_v20, %v10636_v1  ;;  %v13085_v29 = vld [vmem:[#allocation7 + $0xc4] sm:$0xf]  ;;  %v13083_v44 = vld [vmem:[#allocation7 + $0xac] sm:$0xf0]  ;;  %v10604_v35 = vld [vmem:[#allocation7 + $0x1a0] sm:$0xf] }
 0x3fa   :  { %3445 = vmatpush.bf16.msrb.mxu3 %v10326_v55  ;;  %3434 = vmatpush.bf16.msrb.mxu2 %v10166_v9  ;;  %v10513_v55 = vor.u32 %v13089_v22, %v10510_v58  ;;  %v10497_v38 = vor.u32 %v13085_v29, %v10494_v30  ;;  %v10477_v21 = vor.u32 %v13083_v44, %v10476_v42  ;;  %v10478_v9 = vld [vmem:[#allocation7 + $0xb0] sm:$0xf0]  ;;  %v3016_v13 = vperm.slane %v16690_v7, 1  ;;  %v13079_v59 = vld [vmem:[#allocation7 + $0x8c] sm:$0xf0] }
 0x3fb   :  { %13704 = vtanh.f32 %v16619_v15  ;;  %3407 = vmatpush.bf16.msrb.mxu0 %v10178_v47  ;;  %v10492_v47 = vld [vmem:[#allocation7 + $0xc0] sm:$0xf]  ;;  %v10606_v53 = vld [vmem:[#allocation7 + $0x1b0] sm:$0xf0]  ;;  %v13075_v56 = vld [vmem:[#allocation7 + $0x6c] sm:$0xf0] }
 0x3fc   :  { %v13703_v27 = vpop.eup %13702  ;;  %3421 = vmatpush.bf16.msrb.mxu1 %v10290_v41  ;;  %v10493_v54 = vor.u32 %v13087_v28, %v10492_v47  ;;  %v13081_v41 = vld [vmem:[#allocation7 + $0xa4] sm:$0xf]  ;;  %v10588_v57 = vld [vmem:[#allocation7 + $0x180] sm:$0xf]  ;;  %v10446_v22 = vld [vmem:[#allocation7 + $0x70] sm:$0xf0] }
 0x3fd   :  { %v2922_v39 = vmul.f32 %v13703_v27, %v16564_v62  ;;  %vm2927_vm8 = vweird.f32 %v13703_v27  ;;  %v10481_v33 = vor.u32 %v13081_v41, %v10478_v9  ;;  %v10572_v18 = vld [vmem:[#allocation7 + $0x160] sm:$0xf]  ;;  %v13073_v20 = vld [vmem:[#allocation7 + $0x64] sm:$0xf]  ;;  %v10430_v16 = vld [vmem:[#allocation7 + $0x50] sm:$0xf0] }
 0x3fe   :  { %3446 = vmatpush.bf16.msrb.mxu3 %v10310_v12  ;;  %vm2928_vm10 = vmor %vm2926_vm9, %vm2927_vm8  ;;  %3435 = vmatpush.bf16.msrb.mxu2 %v10150_v4  ;;  %v13077_v4 = vld [vmem:[#allocation7 + $0x84] sm:$0xf]  ;;  %v10428_v28 = vld [vmem:[#allocation7 + $0x40] sm:$0xf]  ;;  %v3018_v44 = vperm.slane %v16690_v7, 3 }
 0x3ff   :  { %v2923_v17 = vsub.f32 1.0, %v2922_v39  ;;  %3408 = vmatpush.bf16.msrb.mxu0 %v10162_v23  ;;  %v13119_v39 = vld [vmem:[#allocation7 + $0x1cc] sm:$0xf0]  ;;  %v10556_v30 = vld [vmem:[#allocation7 + $0x140] sm:$0xf] }
 0x400   :  { %3422 = vmatpush.bf16.msrb.mxu1 %v10274_v32  ;;  %v10621_v12 = vor.u32 %v13119_v39, %v10620_v11  ;;  %v13111_v32 = vld [vmem:[#allocation7 + $0x18c] sm:$0xf0]  ;;  %v10558_v42 = vld [vmem:[#allocation7 + $0x150] sm:$0xf0]  ;;  %v10540_v41 = vld [vmem:[#allocation7 + $0x120] sm:$0xf] }
 0x401   :  { %v2924_v48 = vmul.f32 %v13703_v27, %v2923_v17  ;;  %v13705_v62 = vpop.eup %13704  ;;  %v13071_v11 = vld [vmem:[#allocation7 + $0x4c] sm:$0xf0] }
 0x402   :  { %3447 = vmatpush.bf16.msrb.mxu3 %v10294_v52  ;;  %v13113_v52 = vld [vmem:[#allocation7 + $0x1a4] sm:$0xf]  ;;  %v10429_v29 = vor.u32 %v13071_v11, %v10428_v28  ;;  %v13099_v9 = vld [vmem:[#allocation7 + $0x12c] sm:$0xf0]  ;;  %v10518_v28 = vld [vmem:[#allocation7 + $0xf8] sm:$0xf0] }
 0x403   :  { %v2925_v49 = vadd.f32 %v13703_v27, %v2924_v48  ;;  %3409 = vmatpush.bf16.msrb.mxu0 %v10146_v0  ;;  %v13115_v48 = vld [vmem:[#allocation7 + $0x1ac] sm:$0xf0]  ;;  %v10609_v37 = vor.u32 %v13113_v52, %v10606_v53  ;;  %v10414_v52 = vld [vmem:[#allocation7 + $0x30] sm:$0xf0]  ;;  %v13097_v53 = vld [vmem:[#allocation7 + $0x124] sm:$0xf] }
 0x404   :  { %v10605_v51 = vor.u32 %v13115_v48, %v10604_v35 }
 0x405   :  { %v2929_v2 = vsel %vm2928_vm10, %v13703_v27, %v2925_v49  ;;  %v10641_v27 = vor.u32 %v13121_v24, %v10638_v3  ;;  %v10460_v49 = vld [vmem:[#allocation7 + $0x80] sm:$0xf]  ;;  %v13105_v24 = vld [vmem:[#allocation7 + $0x164] sm:$0xf]  ;;  %v10574_v3 = vld [vmem:[#allocation7 + $0x170] sm:$0xf0] }
 0x406   :  { %v2934_v5 = vsel %vm2931_vm11, %v2933_v63, %v2929_v2  ;;  %3448 = vmatpush.bf16.msrb.mxu3 %v10278_v6  ;;  %v10461_v2 = vor.u32 %v13079_v59, %v10460_v49 }
 0x407   :  { %v2940_v8 = vmul.f32 %v13705_v62, %v2934_v5  ;;  %v10462_v62 = vld [vmem:[#allocation7 + $0x90] sm:$0xf0] }
 0x409   :  { %v2943_v10 = vpack.c.bf16 %v2940_v8, %v2940_v8 }
 0x40b   :  { %2944 = vst [vmem:[#allocation4 + $0x4] sm:$0xf] %v2943_v10  ;;  %v10589_v10 = vor.u32 %v13111_v32, %v10588_v57  ;;  %v10524_v32 = vld [vmem:[#allocation7 + $0x100] sm:$0xf] }
 0x412   :  { %v2948_v50 = vld [vmem:[#allocation4] sm:$0xff] }
 0x413   :  { %v3024_v46 = vunpack.c.l.b16 %v2948_v50  ;;  %3523 = vst [vmem:[#allocation4] sm:$0xf] %v3522_v60  ;;  %v3025_v43 = vunpack.c.h.b16 %v2948_v50  ;;  %v10465_v60 = vor.u32 %v13077_v4, %v10462_v62  ;;  %v13109_v50 = vld [vmem:[#allocation7 + $0x184] sm:$0xf]  ;;  %v3017_v62 = vperm.slane %v16690_v7, 2 }
 0x414   :  { %v10516_v7 = vld [vmem:[#allocation7 + $0xe8] sm:$0xf] }
 0x415   :  { %v3026_v25 = vpack.c.b16 %v3024_v46, %v3024_v46  ;;  %v3027_v61 = vpack.c.b16 %v3025_v43, %v3025_v43  ;;  %v10590_v46 = vld [vmem:[#allocation7 + $0x190] sm:$0xf0] }
 0x416   :  { %v10593_v43 = vor.u32 %v13109_v50, %v10590_v46 }
 0x417   :  { %3358 = vmatmul.bf16.vlgmr.msra.gmra.mxu0 %v3026_v25  ;;  %3371 = vmatmul.bf16.vlgmr.msra.gmra.mxu1 %v3027_v61 }
 0x418   :  { %3384 = vmatmul.bf16.vlgmr.msra.gmra.mxu2 %v3026_v25  ;;  %3397 = vmatmul.bf16.vlgmr.msra.gmra.mxu3 %v3027_v61 }
 0x419   :  { %3926 = vmatpush.bf16.msra.mxu0 %v10509_v19  ;;  %3939 = vmatpush.bf16.msra.mxu1 %v10637_v14  ;;  %v13107_v19 = vld [vmem:[#allocation7 + $0x16c] sm:$0xf0] }
 0x41a   :  { %3952 = vmatpush.bf16.msra.mxu2 %v10513_v55  ;;  %3965 = vmatpush.bf16.msra.mxu3 %v10641_v27  ;;  %v10573_v14 = vor.u32 %v13107_v19, %v10572_v18  ;;  %v10449_v55 = vor.u32 %v13073_v20, %v10446_v22  ;;  %v10577_v27 = vor.u32 %v13105_v24, %v10574_v3  ;;  %v10526_v20 = vld [vmem:[#allocation7 + $0x110] sm:$0xf0]  ;;  %v10644_v24 = vld [vmem:[#allocation7 + $0x1e8] sm:$0xf] }
 0x41d   :  { %3927 = vmatpush.bf16.msra.mxu0 %v10493_v54  ;;  %3940 = vmatpush.bf16.msra.mxu1 %v10621_v12 }
 0x41e   :  { %3953 = vmatpush.bf16.msra.mxu2 %v10497_v38  ;;  %3966 = vmatpush.bf16.msra.mxu3 %v10625_v40  ;;  %v13101_v40 = vld [vmem:[#allocation7 + $0x144] sm:$0xf] }
 0x41f   :  { %v10561_v35 = vor.u32 %v13101_v40, %v10558_v42  ;;  %v13088_v40 = vld [vmem:[#allocation7 + $0xd4] sm:$0xf0]  ;;  %v10628_v42 = vld [vmem:[#allocation7 + $0x1c8] sm:$0xf] }
 0x421   :  { %3928 = vmatpush.bf16.msra.mxu0 %v10477_v21  ;;  %3941 = vmatpush.bf16.msra.mxu1 %v10605_v51  ;;  %v13067_v21 = vld [vmem:[#allocation7 + $0x2c] sm:$0xf0] }
 0x422   :  { %3954 = vmatpush.bf16.msra.mxu2 %v10481_v33  ;;  %3967 = vmatpush.bf16.msra.mxu3 %v10609_v37  ;;  %v10541_v33 = vor.u32 %v13099_v9, %v10540_v41 }
 0x425   :  { %3929 = vmatpush.bf16.msra.mxu0 %v10461_v2  ;;  %3942 = vmatpush.bf16.msra.mxu1 %v10589_v10  ;;  %v13063_v2 = vld [vmem:[#allocation7 + $0xc] sm:$0xf0]  ;;  %v13061_v10 = vld [vmem:[#allocation7 + $0x4] sm:$0xf] }
 0x426   :  { %3955 = vmatpush.bf16.msra.mxu2 %v10465_v60  ;;  %3968 = vmatpush.bf16.msra.mxu3 %v10593_v43 }
 0x427   :  { %3410 = vmatmul.bf16.vlgmr.msrb.gmra.mxu0 %v3026_v25  ;;  %3423 = vmatmul.bf16.vlgmr.msrb.gmra.mxu1 %v3027_v61 }
 0x428   :  { %3436 = vmatmul.bf16.vlgmr.msrb.gmra.mxu2 %v3026_v25  ;;  %3449 = vmatmul.bf16.vlgmr.msrb.gmra.mxu3 %v3027_v61  ;;  %v10444_v61 = vld [vmem:[#allocation7 + $0x60] sm:$0xf] }
 0x429   :  { %v10445_v1 = vor.u32 %v13075_v56, %v10444_v61  ;;  %3943 = vmatpush.bf16.msra.mxu1 %v10573_v14  ;;  %v10398_v61 = vld [vmem:[#allocation7 + $0x10] sm:$0xf0]  ;;  %v13093_v56 = vld [vmem:[#allocation7 + $0x104] sm:$0xf] }
 0x42a   :  { %3956 = vmatpush.bf16.msra.mxu2 %v10449_v55  ;;  %3969 = vmatpush.bf16.msra.mxu3 %v10577_v27  ;;  %v10401_v19 = vor.u32 %v13061_v10, %v10398_v61  ;;  %v10529_v14 = vor.u32 %v13093_v56, %v10526_v20  ;;  %v13092_v55 = vld [vmem:[#allocation7 + $0xf4] sm:$0xf0]  ;;  %v13090_v27 = vld [vmem:[#allocation7 + $0xec] sm:$0xf]  ;;  %v10486_v10 = vld [vmem:[#allocation7 + $0xb8] sm:$0xf0] }
 0x42b   :  { %3930 = vmatpush.bf16.msra.mxu0 %v10445_v1  ;;  %v10517_v3 = vor.u32 %v13092_v55, %v10516_v7  ;;  %v10468_v61 = vld [vmem:[#allocation7 + $0x88] sm:$0xf]  ;;  %v13080_v56 = vld [vmem:[#allocation7 + $0x94] sm:$0xf0]  ;;  %v13078_v7 = vld [vmem:[#allocation7 + $0x8c] sm:$0xf] }
 0x42c   :  { %v13112_v20 = vld [vmem:[#allocation7 + $0x194] sm:$0xf0] }
 0x42e   :  { %3970 = vmatpush.bf16.msra.mxu3 %v10561_v35  ;;  %v13120_v35 = vld [vmem:[#allocation7 + $0x1d4] sm:$0xf0] }
 0x42f   :  { %3931 = vmatpush.bf16.msra.mxu0 %v10429_v29  ;;  %v10521_v29 = vor.u32 %v13090_v27, %v10518_v28  ;;  %v10598_v27 = vld [vmem:[#allocation7 + $0x198] sm:$0xf0] }
 0x494   :  { %v3359_v34 = vpop.f32.mrf.mxu0  ;;  %v3372_v36 = vpop.f32.mrf.mxu1 }
 0x495   :  { %v3360_v17 = vadd.f32 %v3359_v34, %v3015_v26  ;;  %v13103_v34 = vld [vmem:[#allocation7 + $0x14c] sm:$0xf0] }
 0x496   :  { %v10557_v31 = vor.u32 %v13103_v34, %v10556_v30  ;;  %v13122_v30 = vld [vmem:[#allocation7 + $0x1ec] sm:$0xf]  ;;  %v10646_v34 = vld [vmem:[#allocation7 + $0x1f8] sm:$0xf0] }
 0x497   :  { %v3373_v23 = vadd.f32 %v3372_v36, %v3360_v17  ;;  %v13069_v36 = vld [vmem:[#allocation7 + $0x44] sm:$0xf] }
 0x498   :  { %v10433_v17 = vor.u32 %v13069_v36, %v10430_v16  ;;  %3944 = vmatpush.bf16.msra.mxu1 %v10557_v31  ;;  %v10649_v31 = vor.u32 %v13122_v30, %v10646_v34  ;;  %v13076_v30 = vld [vmem:[#allocation7 + $0x74] sm:$0xf0] }
 0x499   :  { %v10391_v45 = vmul.f32 -1.442695, %v3373_v23  ;;  %v10412_v23 = vld [vmem:[#allocation7 + $0x20] sm:$0xf] }
 0x49a   :  { %3957 = vmatpush.bf16.msra.mxu2 %v10433_v17  ;;  %v10413_v48 = vor.u32 %v13067_v21, %v10412_v23  ;;  %v10500_v17 = vld [vmem:[#allocation7 + $0xc8] sm:$0xf]  ;;  %v13086_v23 = vld [vmem:[#allocation7 + $0xcc] sm:$0xf]  ;;  %v10502_v21 = vld [vmem:[#allocation7 + $0xd8] sm:$0xf0] }
 0x49b   :  { %13706 = vpow2.f32 %v10391_v45  ;;  %v3385_v63 = vpop.f32.mrf.mxu2  ;;  %v3398_v0 = vpop.f32.mrf.mxu3  ;;  %v10542_v45 = vld [vmem:[#allocation7 + $0x130] sm:$0xf0] }
 0x49c   :  { %v3386_v5 = vadd.f32 %v3385_v63, %v3016_v13  ;;  %v3361_v6 = vpop.f32.mrf.mxu0  ;;  %v3374_v8 = vpop.f32.mrf.mxu1  ;;  %v13065_v13 = vld [vmem:[#allocation7 + $0x24] sm:$0xf]  ;;  %3932 = vmatpush.bf16.msra.mxu0 %v10413_v48  ;;  %v10545_v57 = vor.u32 %v13097_v53, %v10542_v45  ;;  %3945 = vmatpush.bf16.msra.mxu1 %v10541_v33  ;;  %v13118_v33 = vld [vmem:[#allocation7 + $0x1cc] sm:$0xf] }
 0x49d   :  { %v10417_v59 = vor.u32 %v13065_v13, %v10414_v52  ;;  %v13095_v8 = vld [vmem:[#allocation7 + $0x10c] sm:$0xf0]  ;;  %v10629_v13 = vor.u32 %v13120_v35, %v10628_v42  ;;  %v10630_v52 = vld [vmem:[#allocation7 + $0x1d8] sm:$0xf0] }
 0x49e   :  { %v3399_v25 = vadd.f32 %v3398_v0, %v3386_v5  ;;  %v10396_v0 = vld [vmem:[#allocation7] sm:$0xf]  ;;  %3971 = vmatpush.bf16.msra.mxu3 %v10545_v57  ;;  %v10525_v1 = vor.u32 %v13095_v8, %v10524_v32  ;;  %v10633_v57 = vor.u32 %v13118_v33, %v10630_v52  ;;  %v10454_v42 = vld [vmem:[#allocation7 + $0x78] sm:$0xf0] }
 0x49f   :  { %3958 = vmatpush.bf16.msra.mxu2 %v10417_v59  ;;  %v10582_v35 = vld [vmem:[#allocation7 + $0x178] sm:$0xf0] }
 0x4a0   :  { %v10392_v58 = vmul.f32 -1.442695, %v3399_v25  ;;  %v10397_v25 = vor.u32 %v13063_v2, %v10396_v0  ;;  %3946 = vmatpush.bf16.msra.mxu1 %v10525_v1  ;;  %v10484_v0 = vld [vmem:[#allocation7 + $0xa8] sm:$0xf]  ;;  %v13084_v2 = vld [vmem:[#allocation7 + $0xb4] sm:$0xf0] }
 0x4a1   :  { %v13707_v26 = vpop.eup %13706 }
 0x4a2   :  { %v16694_v47 = vadd.f32 1.0, %v13707_v26  ;;  %13708 = vpow2.f32 %v10392_v58  ;;  %3933 = vmatpush.bf16.msra.mxu0 %v10397_v25  ;;  %v13124_v26 = vld [vmem:[#allocation7 + $0x1f4] sm:$0xf0]  ;;  %3972 = vmatpush.bf16.msra.mxu3 %v10529_v14  ;;  %v10406_v14 = vld [vmem:[#allocation7 + $0x18] sm:$0xf0] }
 0x4a3   :  { %v3387_v54 = vpop.f32.mrf.mxu2  ;;  %v3400_v39 = vpop.f32.mrf.mxu3  ;;  %3959 = vmatpush.bf16.msra.mxu2 %v10401_v19 }
 0x4a4   :  { %13710 = vrcp.f32 %v16694_v47  ;;  %v16697_v12 = vpop.f32.mrf.mxu0  ;;  %v16699_v38 = vpop.f32.mrf.mxu1  ;;  %v3470_v49 = vand.u32 2147483648, %v16694_v47  ;;  %v3468_v60 = vand.u32 2147483647, %v16694_v47  ;;  %v10645_v39 = vor.u32 %v13124_v26, %v10644_v24  ;;  %v13110_v26 = vld [vmem:[#allocation7 + $0x18c] sm:$0xf] }
 0x4a5   :  { %v3412_v11 = vadd.f32 %v16697_v12, %v3017_v62  ;;  %vm3464_vm13 = vweird.f32 %v16694_v47  ;;  %v10612_v62 = vld [vmem:[#allocation7 + $0x1a8] sm:$0xf] }
 0x4a6   :  { %v16712_v22 = vor.u32 1.1754944e-38, %v3470_v49  ;;  %3978 = vmatpush.bf16.msrb.mxu0 %v10517_v3  ;;  %3991 = vmatpush.bf16.msrb.mxu1 %v10645_v39  ;;  %vm3469_vm3 = vcmp.eq.f32.partialorder %v3468_v60, 8.507059e+37 }
 0x4a7   :  { %4004 = vmatpush.bf16.msrb.mxu2 %v10521_v29  ;;  %4017 = vmatpush.bf16.msrb.mxu3 %v10649_v31  ;;  %v3425_v49 = vadd.f32 %v16699_v38, %v3412_v11  ;;  %v10452_v29 = vld [vmem:[#allocation7 + $0x68] sm:$0xf]  ;;  %v13108_v31 = vld [vmem:[#allocation7 + $0x174] sm:$0xf0] }
 0x4a8   :  { %v13709_v51 = vpop.eup %13708 }
 0x4a9   :  { %v16702_v37 = vadd.f32 1.0, %v13709_v51  ;;  %v10505_v51 = vor.u32 %v13086_v23, %v10502_v21 }
 0x4aa   :  { %v16705_v63 = vpop.eup %13710  ;;  %3992 = vmatpush.bf16.msrb.mxu1 %v10629_v13  ;;  %v13070_v13 = vld [vmem:[#allocation7 + $0x4c] sm:$0xf] }
 0x4ab   :  { %v3460_v4 = vmul.f32 %v16705_v63, %v16694_v47  ;;  %13712 = vrcp.f32 %v16702_v37  ;;  %v3437_v5 = vpop.f32.mrf.mxu2  ;;  %v3450_v6 = vpop.f32.mrf.mxu3  ;;  %vm3465_vm12 = vweird.f32 %v16705_v63  ;;  %v3487_v48 = vand.u32 2147483647, %v16702_v37  ;;  %4005 = vmatpush.bf16.msrb.mxu2 %v10505_v51  ;;  %4018 = vmatpush.bf16.msrb.mxu3 %v10633_v57 }
 0x4ac   :  { %v3438_v50 = vadd.f32 %v3437_v5, %v3018_v44  ;;  %v3413_v46 = vpop.f32.mrf.mxu0  ;;  %v3426_v43 = vpop.f32.mrf.mxu1  ;;  %v10501_v44 = vor.u32 %v13088_v40, %v10500_v17  ;;  %v3489_v45 = vand.u32 2147483648, %v16702_v37  ;;  %vm16727_vm14 = vmor %vm3464_vm13, %vm3465_vm12  ;;  %v13116_v5 = vld [vmem:[#allocation7 + $0x1b4] sm:$0xf0]  ;;  %vm3483_vm0 = vweird.f32 %v16702_v37  ;;  %v13074_v40 = vld [vmem:[#allocation7 + $0x6c] sm:$0xf] }
 0x4ad   :  { %v3461_v18 = vsub.f32 1.0, %v3460_v4  ;;  %v10485_v4 = vor.u32 %v13084_v2, %v10484_v0  ;;  %v10613_v38 = vor.u32 %v13116_v5, %v10612_v62  ;;  %v10614_v46 = vld [vmem:[#allocation7 + $0x1b8] sm:$0xf0]  ;;  %vm3488_vm2 = vcmp.eq.f32.partialorder %v3487_v48, 8.507059e+37  ;;  %v10436_v48 = vld [vmem:[#allocation7 + $0x48] sm:$0xf] }
 0x4ae   :  { %v3451_v58 = vadd.f32 %v3450_v6, %v3438_v50  ;;  %3979 = vmatpush.bf16.msrb.mxu0 %v10501_v44  ;;  %v13082_v6 = vld [vmem:[#allocation7 + $0xac] sm:$0xf]  ;;  %v3490_v55 = vor.u32 1.1754944e-38, %v3489_v45  ;;  %v10453_v17 = vor.u32 %v13076_v30, %v10452_v29  ;;  %v10457_v60 = vor.u32 %v13074_v40, %v10454_v42  ;;  %v10566_v45 = vld [vmem:[#allocation7 + $0x158] sm:$0xf0] }
 0x4af   :  { %v3462_v16 = vmul.f32 %v16705_v63, %v3461_v18  ;;  %v13114_v50 = vld [vmem:[#allocation7 + $0x1ac] sm:$0xf]  ;;  %v10489_v43 = vor.u32 %v13082_v6, %v10486_v10  ;;  %v10596_v18 = vld [vmem:[#allocation7 + $0x188] sm:$0xf]  ;;  %3993 = vmatpush.bf16.msrb.mxu1 %v10613_v38  ;;  %v13068_v2 = vld [vmem:[#allocation7 + $0x34] sm:$0xf0] }
 0x4b0   :  { %v10393_v54 = vmul.f32 -1.442695, %v3451_v58  ;;  %v10617_v25 = vor.u32 %v13114_v50, %v10614_v46  ;;  %v10470_v58 = vld [vmem:[#allocation7 + $0x98] sm:$0xf0]  ;;  %v10597_v11 = vor.u32 %v13112_v20, %v10596_v18  ;;  %v13106_v44 = vld [vmem:[#allocation7 + $0x16c] sm:$0xf] }
 0x4b1   :  { %v16715_v36 = vpop.eup %13712  ;;  %v3463_v32 = vadd.f32 %v16705_v63, %v3462_v16  ;;  %4006 = vmatpush.bf16.msrb.mxu2 %v10489_v43  ;;  %v10580_v16 = vld [vmem:[#allocation7 + $0x168] sm:$0xf]  ;;  %v10585_v21 = vor.u32 %v13106_v44, %v10582_v35  ;;  %v13100_v62 = vld [vmem:[#allocation7 + $0x134] sm:$0xf0]  ;;  %v13066_v5 = vld [vmem:[#allocation7 + $0x2c] sm:$0xf] }
 0x4b2   :  { %v3479_v12 = vmul.f32 %v16715_v36, %v16702_v37  ;;  %13714 = vpow2.f32 %v10393_v54  ;;  %vm3484_vm15 = vweird.f32 %v16715_v36  ;;  %3980 = vmatpush.bf16.msrb.mxu0 %v10485_v4  ;;  %v10469_v37 = vor.u32 %v13080_v56, %v10468_v61  ;;  %4019 = vmatpush.bf16.msrb.mxu3 %v10617_v25  ;;  %v10420_v0 = vld [vmem:[#allocation7 + $0x28] sm:$0xf]  ;;  %v10422_v6 = vld [vmem:[#allocation7 + $0x38] sm:$0xf0]  ;;  %v13098_v38 = vld [vmem:[#allocation7 + $0x12c] sm:$0xf] }
 0x4b3   :  { %v3439_v41 = vpop.f32.mrf.mxu2  ;;  %v3452_v9 = vpop.f32.mrf.mxu3  ;;  %13716 = vtanh.f32 %v3425_v49  ;;  %vm16738_vm1 = vmor %vm3483_vm0, %vm3484_vm15  ;;  %v3467_v24 = vsel %vm16727_vm14, %v16705_v63, %v3463_v32  ;;  %v10473_v54 = vor.u32 %v13078_v7, %v10470_v58  ;;  %v10601_v63 = vor.u32 %v13110_v26, %v10598_v27  ;;  %3994 = vmatpush.bf16.msrb.mxu1 %v10597_v11  ;;  %v10548_v32 = vld [vmem:[#allocation7 + $0x128] sm:$0xf]  ;;  %v10550_v10 = vld [vmem:[#allocation7 + $0x138] sm:$0xf0] }
 0x4b4   :  { %v3480_v53 = vsub.f32 1.0, %v3479_v12  ;;  %v3472_v34 = vsel %vm3469_vm3, %v16712_v22, %v3467_v24  ;;  %v10581_v47 = vor.u32 %v13108_v31, %v10580_v16  ;;  %v13072_v22 = vld [vmem:[#allocation7 + $0x54] sm:$0xf0]  ;;  %v10564_v41 = vld [vmem:[#allocation7 + $0x148] sm:$0xf]  ;;  %v10421_v43 = vor.u32 %v13068_v2, %v10420_v0  ;;  %v13131_v44 = vld [vmem:[%s17358_s8 + $0x30] sm:$0xff] }
 0x4b5   :  { %4007 = vmatpush.bf16.msrb.mxu2 %v10473_v54  ;;  %v13104_v9 = vld [vmem:[#allocation7 + $0x154] sm:$0xf0]  ;;  %v10437_v52 = vor.u32 %v13072_v22, %v10436_v48  ;;  %v10549_v61 = vor.u32 %v13100_v62, %v10548_v32  ;;  %v10425_v56 = vor.u32 %v13066_v5, %v10422_v6  ;;  %v10404_v18 = vld [vmem:[#allocation7 + $0x8] sm:$0xf]  ;;  %v10553_v20 = vor.u32 %v13098_v38, %v10550_v10  ;;  %v13062_v58 = vld [vmem:[#allocation7 + $0xc] sm:$0xf] }
 0x4b6   :  { %v3481_v8 = vmul.f32 %v16715_v36, %v3480_v53  ;;  %3981 = vmatpush.bf16.msrb.mxu0 %v10469_v37  ;;  %4020 = vmatpush.bf16.msrb.mxu3 %v10601_v63  ;;  %v13102_v53 = vld [vmem:[#allocation7 + $0x14c] sm:$0xf]  ;;  %v10565_v59 = vor.u32 %v13104_v9, %v10564_v41  ;;  %v13096_v7 = vld [vmem:[#allocation7 + $0x114] sm:$0xf0]  ;;  %v10534_v37 = vld [vmem:[#allocation7 + $0x118] sm:$0xf0]  ;;  %v10409_v54 = vor.u32 %v13062_v58, %v10406_v14 }
 0x4b7   :  { %3995 = vmatpush.bf16.msrb.mxu1 %v10581_v47  ;;  %v10569_v4 = vor.u32 %v13102_v53, %v10566_v45  ;;  %v13094_v24 = vld [vmem:[#allocation7 + $0x10c] sm:$0xf]  ;;  %v3589_v40 = vld [vmem:[%s17356_s6] sm:$0xf]  ;;  %v13130_v48 = vld [vmem:[%s17358_s8 + $0x28] sm:$0xff] }
 0x4b8   :  { %v13715_v1 = vpop.eup %13714  ;;  %v3482_v19 = vadd.f32 %v16715_v36, %v3481_v8  ;;  %v10537_v29 = vor.u32 %v13094_v24, %v10534_v37  ;;  %v13132_v42 = vld [vmem:[%s17358_s8 + $0x38] sm:$0xff]  ;;  %v13127_v62 = vld [vmem:[%s17358_s8 + $0x10] sm:$0xff]  ;;  %v3594_v6 = vperm.slane %v3589_v40, 3  ;;  %v3593_v10 = vperm.slane %v3589_v40, 2 }
 0x4b9   :  { %v16745_v3 = vadd.f32 1.0, %v13715_v1  ;;  %v13717_v12 = vpop.eup %13716  ;;  %4008 = vmatpush.bf16.msrb.mxu2 %v10457_v60  ;;  %v13064_v1 = vld [vmem:[#allocation7 + $0x14] sm:$0xf0] }
 0x4ba   :  { %v3486_v28 = vsel %vm16738_vm1, %v16715_v36, %v3482_v19  ;;  %v3514_v23 = vmul.f32 %v13717_v12, %v3472_v34  ;;  %3982 = vmatpush.bf16.msrb.mxu0 %v10453_v17  ;;  %4021 = vmatpush.bf16.msrb.mxu3 %v10585_v21  ;;  %v10532_v19 = vld [vmem:[#allocation7 + $0x108] sm:$0xf]  ;;  %v10405_v27 = vor.u32 %v13064_v1, %v10404_v18  ;;  %v3591_v12 = vperm.slane %v3589_v40, 0 }
 0x4bb   :  { %v3491_v39 = vsel %vm3488_vm2, %v3490_v55, %v3486_v28  ;;  %13718 = vrcp.f32 %v16745_v3  ;;  %v3507_v50 = vand.u32 2147483647, %v16745_v3  ;;  %v3509_v46 = vand.u32 2147483648, %v16745_v3  ;;  %3996 = vmatpush.bf16.msrb.mxu1 %v10565_v59 }
 0x4bc   :  { %v3513_v36 = vmul.f32 %v3491_v39, %v16619_v15  ;;  %v10438_v15 = vld [vmem:[#allocation7 + $0x58] sm:$0xf0]  ;;  %vm3503_vm5 = vweird.f32 %v16745_v3  ;;  %v10533_v11 = vor.u32 %v13096_v7, %v10532_v19  ;;  %v3592_v21 = vperm.slane %v3589_v40, 1 }
 0x4bd   :  { %v10441_v57 = vor.u32 %v13070_v13, %v10438_v15  ;;  %v3510_v26 = vor.u32 1.1754944e-38, %v3509_v46  ;;  %vm3508_vm7 = vcmp.eq.f32.partialorder %v3507_v50, 8.507059e+37  ;;  %v13125_v46 = vld [vmem:[%s17358_s8] sm:$0xff] }
 0x4be   :  { %v16755_v33 = vadd.f32 %v3514_v23, %v3513_v36  ;;  %3983 = vmatpush.bf16.msrb.mxu0 %v10437_v52  ;;  %4022 = vmatpush.bf16.msrb.mxu3 %v10569_v4  ;;  %v13129_v52 = vld [vmem:[%s17358_s8 + $0x20] sm:$0xff] }
 0x4bf   :  { %4009 = vmatpush.bf16.msrb.mxu2 %v10441_v57  ;;  %3997 = vmatpush.bf16.msrb.mxu1 %v10549_v61 }
 0x4c0   :  { %13720 = vtanh.f32 %v16755_v33 }
 0x4c1   :  { %v13719_v51 = vpop.eup %13718 }
 0x4c2   :  { %v3499_v49 = vmul.f32 %v13719_v51, %v16745_v3  ;;  %vm3504_vm4 = vweird.f32 %v13719_v51  ;;  %3984 = vmatpush.bf16.msrb.mxu0 %v10421_v43  ;;  %4023 = vmatpush.bf16.msrb.mxu3 %v10553_v20 }
 0x4c3   :  { %vm3505_vm6 = vmor %vm3503_vm5, %vm3504_vm4  ;;  %4010 = vmatpush.bf16.msrb.mxu2 %v10425_v56  ;;  %3998 = vmatpush.bf16.msrb.mxu1 %v10533_v11 }
 0x4c4   :  { %v3500_v8 = vsub.f32 1.0, %v3499_v49  ;;  %v13128_v49 = vld [vmem:[%s17358_s8 + $0x18] sm:$0xff] }
 0x4c6   :  { %v3501_v25 = vmul.f32 %v13719_v51, %v3500_v8  ;;  %v13721_v39 = vpop.eup %13720  ;;  %3985 = vmatpush.bf16.msrb.mxu0 %v10405_v27  ;;  %4024 = vmatpush.bf16.msrb.mxu3 %v10537_v29  ;;  %v13126_v8 = vld [vmem:[%s17358_s8 + $0x8] sm:$0xff] }
 0x4c7   :  { %4011 = vmatpush.bf16.msrb.mxu2 %v10409_v54 }
 0x4c8   :  { %v3502_v55 = vadd.f32 %v13719_v51, %v3501_v25 }
 0x4ca   :  { %v3506_v28 = vsel %vm3505_vm6, %v13719_v51, %v3502_v55 }
 0x4cb   :  { %v3511_v63 = vsel %vm3508_vm7, %v3510_v26, %v3506_v28 }
 0x4cc   :  { %v3517_v30 = vmul.f32 %v13721_v39, %v3511_v63 }
 0x4ce   :  { %v3520_v3 = vpack.c.bf16 %v3517_v30, %v3517_v30 }
 0x4d0   :  { %3521 = vst [vmem:[#allocation4 + $0x4] sm:$0xf] %v3520_v3 }
 0x4d7   :  { %v3524_v34 = vld [vmem:[#allocation4] sm:$0xff] }
 0x4d8   :  { %v3600_v16 = vunpack.c.l.b16 %v3524_v34  ;;  %v3601_v31 = vunpack.c.h.b16 %v3524_v34 }
 0x4da   :  { %v3602_v36 = vpack.c.b16 %v3600_v16, %v3600_v16  ;;  %v3603_v17 = vpack.c.b16 %v3601_v31, %v3601_v31 }
 0x4dc   :  { %3934 = vmatmul.bf16.vlgmr.msra.gmra.mxu0 %v3602_v36  ;;  %3947 = vmatmul.bf16.vlgmr.msra.gmra.mxu1 %v3603_v17 }
 0x4dd   :  { %3960 = vmatmul.bf16.vlgmr.msra.gmra.mxu2 %v3602_v36  ;;  %3973 = vmatmul.bf16.vlgmr.msra.gmra.mxu3 %v3603_v17 }
 0x4de   :  { %4166 = vmatpush.bf16.msra.mxu0 %v13132_v42 }
 0x4e2   :  { %4167 = vmatpush.bf16.msra.mxu0 %v13131_v44 }
 0x4e6   :  { %4168 = vmatpush.bf16.msra.mxu0 %v13130_v48 }
 0x4ea   :  { %4169 = vmatpush.bf16.msra.mxu0 %v13129_v52 }
 0x4ec   :  { %3986 = vmatmul.bf16.vlgmr.msrb.gmra.mxu0 %v3602_v36  ;;  %3999 = vmatmul.bf16.vlgmr.msrb.gmra.mxu1 %v3603_v17 }
 0x4ed   :  { %4012 = vmatmul.bf16.vlgmr.msrb.gmra.mxu2 %v3602_v36  ;;  %4025 = vmatmul.bf16.vlgmr.msrb.gmra.mxu3 %v3603_v17 }
 0x4ee   :  { %4170 = vmatpush.bf16.msra.mxu0 %v13128_v49  ;;  %v13625_v49 = vld [vmem:[%s17359_s9] ss:$0 sm:$0xff] }
 0x4f2   :  { %4171 = vmatpush.bf16.msra.mxu0 %v13127_v62 }
 0x4f6   :  { %4172 = vmatpush.bf16.msra.mxu0 %v13126_v8 }
 0x4fa   :  { %4173 = vmatpush.bf16.msra.mxu0 %v13125_v46 }
 0x559   :  { %v3935_v47 = vpop.f32.mrf.mxu0  ;;  %v3948_v60 = vpop.f32.mrf.mxu1 }
 0x55a   :  { %v3936_v35 = vadd.f32 %v3935_v47, %v3591_v12 }
 0x55c   :  { %v3949_v23 = vadd.f32 %v3948_v60, %v3936_v35 }
 0x55e   :  { %v10650_v22 = vmul.f32 -1.442695, %v3949_v23 }
 0x560   :  { %13722 = vpow2.f32 %v10650_v22  ;;  %v3961_v41 = vpop.f32.mrf.mxu2  ;;  %v3974_v9 = vpop.f32.mrf.mxu3 }
 0x561   :  { %v3962_v13 = vadd.f32 %v3961_v41, %v3592_v21  ;;  %v3937_v15 = vpop.f32.mrf.mxu0  ;;  %v3950_v51 = vpop.f32.mrf.mxu1 }
 0x563   :  { %v3975_v53 = vadd.f32 %v3974_v9, %v3962_v13 }
 0x565   :  { %v10651_v45 = vmul.f32 -1.442695, %v3975_v53 }
 0x566   :  { %v13723_v59 = vpop.eup %13722 }
 0x567   :  { %v4034_v57 = vadd.f32 1.0, %v13723_v59  ;;  %13724 = vpow2.f32 %v10651_v45 }
 0x568   :  { %v3963_v0 = vpop.f32.mrf.mxu2  ;;  %v3976_v2 = vpop.f32.mrf.mxu3 }
 0x569   :  { %13726 = vrcp.f32 %v4034_v57  ;;  %v3987_v32 = vpop.f32.mrf.mxu0  ;;  %v4000_v4 = vpop.f32.mrf.mxu1  ;;  %v4046_v27 = vand.u32 2147483648, %v4034_v57  ;;  %vm4040_vm9 = vweird.f32 %v4034_v57  ;;  %v4044_v39 = vand.u32 2147483647, %v4034_v57 }
 0x56a   :  { %v3988_v20 = vadd.f32 %v3987_v32, %v3593_v10 }
 0x56b   :  { %v4047_v34 = vor.u32 1.1754944e-38, %v4046_v27  ;;  %vm4045_vm13 = vcmp.eq.f32.partialorder %v4044_v39, 8.507059e+37 }
 0x56c   :  { %v4001_v24 = vadd.f32 %v4000_v4, %v3988_v20 }
 0x56d   :  { %v13725_v5 = vpop.eup %13724 }
 0x56e   :  { %v4053_v38 = vadd.f32 1.0, %v13725_v5 }
 0x56f   :  { %v13727_v50 = vpop.eup %13726 }
 0x570   :  { %v4036_v43 = vmul.f32 %v13727_v50, %v4034_v57  ;;  %13728 = vrcp.f32 %v4053_v38  ;;  %v4013_v25 = vpop.f32.mrf.mxu2  ;;  %v4026_v61 = vpop.f32.mrf.mxu3  ;;  %vm4041_vm8 = vweird.f32 %v13727_v50  ;;  %v4065_v63 = vand.u32 2147483648, %v4053_v38 }
 0x571   :  { %v4014_v56 = vadd.f32 %v4013_v25, %v3594_v6  ;;  %v3989_v18 = vpop.f32.mrf.mxu0  ;;  %v4002_v1 = vpop.f32.mrf.mxu1  ;;  %vm4042_vm10 = vmor %vm4040_vm9, %vm4041_vm8  ;;  %v4063_v3 = vand.u32 2147483647, %v4053_v38  ;;  %vm4059_vm12 = vweird.f32 %v4053_v38 }
 0x572   :  { %v4037_v19 = vsub.f32 1.0, %v4036_v43  ;;  %v4066_v36 = vor.u32 1.1754944e-38, %v4065_v63 }
 0x573   :  { %v4027_v7 = vadd.f32 %v4026_v61, %v4014_v56  ;;  %vm4064_vm15 = vcmp.eq.f32.partialorder %v4063_v3, 8.507059e+37 }
 0x574   :  { %v4038_v58 = vmul.f32 %v13727_v50, %v4037_v19 }
 0x575   :  { %v10652_v14 = vmul.f32 -1.442695, %v4027_v7 }
 0x576   :  { %v13729_v55 = vpop.eup %13728  ;;  %v4039_v26 = vadd.f32 %v13727_v50, %v4038_v58 }
 0x577   :  { %v4055_v37 = vmul.f32 %v13729_v55, %v4053_v38  ;;  %13730 = vpow2.f32 %v10652_v14  ;;  %vm4060_vm11 = vweird.f32 %v13729_v55 }
 0x578   :  { %v4015_v28 = vpop.f32.mrf.mxu2  ;;  %v4028_v11 = vpop.f32.mrf.mxu3  ;;  %13732 = vtanh.f32 %v4001_v24  ;;  %v4043_v30 = vsel %vm4042_vm10, %v13727_v50, %v4039_v26  ;;  %vm4061_vm14 = vmor %vm4059_vm12, %vm4060_vm11 }
 0x579   :  { %v4056_v54 = vsub.f32 1.0, %v4055_v37  ;;  %v4048_v17 = vsel %vm4045_vm13, %v4047_v34, %v4043_v30 }
 0x57b   :  { %v4057_v29 = vmul.f32 %v13729_v55, %v4056_v54 }
 0x57d   :  { %v13731_v16 = vpop.eup %13730  ;;  %v4058_v31 = vadd.f32 %v13729_v55, %v4057_v29 }
 0x57e   :  { %v4073_v40 = vadd.f32 1.0, %v13731_v16  ;;  %v13733_v12 = vpop.eup %13732 }
 0x57f   :  { %v4062_v42 = vsel %vm4061_vm14, %v13729_v55, %v4058_v31  ;;  %v4090_v44 = vmul.f32 %v13733_v12, %v4048_v17 }
 0x580   :  { %v4067_v47 = vsel %vm4064_vm15, %v4066_v36, %v4062_v42  ;;  %13734 = vrcp.f32 %v4073_v40  ;;  %v4085_v22 = vand.u32 2147483648, %v4073_v40  ;;  %v4083_v9 = vand.u32 2147483647, %v4073_v40 }
 0x581   :  { %v4089_v60 = vmul.f32 %v4067_v47, %v16755_v33  ;;  %vm4079_vm1 = vweird.f32 %v4073_v40 }
 0x582   :  { %v4086_v15 = vor.u32 1.1754944e-38, %v4085_v22  ;;  %vm4084_vm3 = vcmp.eq.f32.partialorder %v4083_v9, 8.507059e+37 }
 0x583   :  { %v4091_v35 = vadd.f32 %v4090_v44, %v4089_v60 }
 0x585   :  { %4095 = vst [vmem:[#allocation3] sm:$0xff] %v4091_v35  ;;  %13736 = vtanh.f32 %v4091_v35 }
 0x586   :  { %v13735_v23 = vpop.eup %13734 }
 0x587   :  { %v4075_v21 = vmul.f32 %v13735_v23, %v4073_v40  ;;  %vm4080_vm0 = vweird.f32 %v13735_v23 }
 0x588   :  { %vm4081_vm2 = vmor %vm4079_vm1, %vm4080_vm0 }
 0x589   :  { %v4076_v48 = vsub.f32 1.0, %v4075_v21 }
 0x58b   :  { %v4077_v41 = vmul.f32 %v13735_v23, %v4076_v48  ;;  %v13737_v52 = vpop.eup %13736 }
 0x58d   :  { %v4078_v13 = vadd.f32 %v13735_v23, %v4077_v41 }
 0x58f   :  { %v4082_v51 = vsel %vm4081_vm2, %v13735_v23, %v4078_v13 }
 0x590   :  { %v4087_v53 = vsel %vm4084_vm3, %v4086_v15, %v4082_v51 }
 0x591   :  { %v4093_v33 = vmul.f32 %v13737_v52, %v4087_v53 }
 0x593   :  { %v4096_v45 = vpack.c.bf16 %v4093_v33, %v4093_v33 }
 0x595   :  { %4097 = vst [vmem:[#allocation4 + $0x4] sm:$0xf] %v4096_v45  ;;  %4174 = vmatmul.bf16.vlgmr.msra.gmra.mxu0 %v4096_v45 }
 0x612   :  { %v4175_v59 = vpop.f32.mrf.mxu0 }
 0x613   :  { %v4176_v57 = vadd.f32 %v13625_v49, %v4175_v59 }
 0x615   :  { %4179 = vst [vmem:[%s17360_s10] sm:$0xff] %v4176_v57 }
 0x616   :  { %4184 = sbr.rel (%p10686_p0) target bundleno = 2065 (0x811), region = 45 }
 0x61a   :  { %v4177_v0 = vpop.f32.mrf.mxu0 }
 0x61b   :  { %v4185_v2 = vlaneseq  ;;  %v13140_v38 = vld [vmem:[%s17357_s7 + $0x38] sm:$0xff]  ;;  %v13139_v10 = vld [vmem:[%s17357_s7 + $0x30] sm:$0xff]  ;;  %v13138_v50 = vld [vmem:[%s17357_s7 + $0x28] sm:$0xff]  ;;  %v13885_v37 = vmov 1.0|1.0  }
 0x61c   :  { %4275 = vmatpush.bf16.msra.mxu0 %v13140_v38  ;;  %v13137_v46 = vld [vmem:[%s17357_s7 + $0x20] sm:$0xff]  ;;  %v13136_v43 = vld [vmem:[%s17357_s7 + $0x18] sm:$0xff]  ;;  %v13135_v25 = vld [vmem:[%s17357_s7 + $0x10] sm:$0xff] }
 0x61d   :  { %v4186_v32 = vand.u32 127, %v4185_v2  ;;  %v13134_v61 = vld [vmem:[%s17357_s7 + $0x8] sm:$0xff]  ;;  %v13133_v20 = vld [vmem:[%s17357_s7] sm:$0xff] }
 0x61f   :  { %vm4187_vm4 = vcmp.lt.s32.totalorder %v4186_v32, 16 }
 0x620   :  { %v4188_v4 = vsel %vm4187_vm4, %v4176_v57, -1e+30  ;;  %4276 = vmatpush.bf16.msra.mxu0 %v13139_v10 }
 0x621   :  { %4189 = vmax.xlane.f32.xlu0 %v4188_v4 }
 0x624   :  { %4277 = vmatpush.bf16.msra.mxu0 %v13138_v50 }
 0x628   :  { %4278 = vmatpush.bf16.msra.mxu0 %v13137_v46 }
 0x62c   :  { %4279 = vmatpush.bf16.msra.mxu0 %v13136_v43 }
 0x630   :  { %4280 = vmatpush.bf16.msra.mxu0 %v13135_v25 }
 0x634   :  { %4281 = vmatpush.bf16.msra.mxu0 %v13134_v61 }
 0x638   :  { %4282 = vmatpush.bf16.msra.mxu0 %v13133_v20 }
 0x694   :  { %v4190_v62 = vpop.xlane.xlu0 %4189 }
 0x695   :  { %vm4191_vm5 = vcmp.ge.f32.partialorder %v4188_v4, %v4190_v62 }
 0x696   :  { %v4192_v5 = vsel %vm4191_vm5, %v4186_v32, 128 }
 0x697   :  { %v4194_v6 = vshra.s32 %v4192_v5, 16  ;;  %v4193_v56 = vand.u32 65535, %v4192_v5 }
 0x699   :  { %v4196_v8 = vcvt.s32.f32 %v4194_v6  ;;  %v4195_v1 = vcvt.s32.f32 %v4193_v56 }
 0x69b   :  { %4197 = vmin.xlane.f32.xlu0 %v4196_v8 }
 0x70e   :  { %v4198_v18 = vpop.xlane.xlu0 %4197 }
 0x70f   :  { %vm4199_vm6 = vcmp.eq.f32.partialorder %v4196_v8, %v4198_v18  ;;  %v4204_v7 = vcvt.f32.s32 %v4198_v18 }
 0x710   :  { %v4200_v19 = vsel %vm4199_vm6, %v4195_v1, inf }
 0x711   :  { %4201 = vmin.xlane.f32.xlu1 %v4200_v19  ;;  %v4205_v14 = vshll.u32 %v4204_v7, 16 }
 0x784   :  { %v4202_v58 = vpop.xlane.xlu1 %4201 }
 0x785   :  { %v4203_v55 = vcvt.f32.s32 %v4202_v58 }
 0x787   :  { %v4206_v24 = vadd.s32 %v4205_v14, %v4203_v55 }
 0x789   :  { %vm4207_vm7 = vcmp.eq.s32.totalorder %v4186_v32, %v4206_v24 }
 0x78a   :  { %vm10720_vm8 = vmpackc.low %vm4207_vm7, %vm4207_vm7 }
 0x78b   :  { %10721 = vmatmul.msk.bf16.vlgmr.msra.gmra.mxu0 %vm10720_vm8, %v13885_v37 }
 0x808   :  { %v4284_v26 = vpop.f32.mrf.mxu0 }
 0x809   :  { %v4288_v27 = vpack.c.bf16 %v4284_v26, %v4284_v26 }
 0x80b   :  { %4289 = vst [vmem:[#allocation4] sm:$0xf] %v4288_v27 }
 0x810   :  { %v4286_v28 = vpop.f32.mrf.mxu0 }
 0x811 PF:  { %s10722_s29 = sld [smem:[#allocation6 + $0x1]] }
 0x817   :  { %p10723_p1 = scmp.eq.s32.totalorder %s10722_s29, 0 }
 0x819   :  { %4294 = sbr.rel (%p10723_p1) target bundleno = 2080 (0x820), region = 49 }
 0x81e   :  { %v10724_v11 = vld [vmem:[%s17352_s2 + $0x4] sm:$0xf] }
 0x81f   :  { %4297 = vst [vmem:[#allocation4] sm:$0xf] %v10724_v11 }
 0x820 PF:  { %v10839_v54 = vld [vmem:[#allocation7 + $0xe0] sm:$0xf]  ;;  %v13171_v39 = vld [vmem:[#allocation7 + $0xec] sm:$0xf0]  ;;  %v13169_v63 = vld [vmem:[#allocation7 + $0xe4] sm:$0xf] }
 0x821   :  { %v10840_v29 = vor.u32 %v13171_v39, %v10839_v54  ;;  %v10841_v30 = vld [vmem:[#allocation7 + $0xf0] sm:$0xf0]  ;;  %v13201_v3 = vld [vmem:[#allocation7 + $0x1e4] sm:$0xf]  ;;  %v10967_v36 = vld [vmem:[#allocation7 + $0x1e0] sm:$0xf] }
 0x822   :  { %v10969_v34 = vld [vmem:[#allocation7 + $0x1f0] sm:$0xf0]  ;;  %v10844_v16 = vor.u32 %v13169_v63, %v10841_v30  ;;  %v13203_v17 = vld [vmem:[#allocation7 + $0x1ec] sm:$0xf0]  ;;  %v10823_v40 = vld [vmem:[#allocation7 + $0xc0] sm:$0xf] }
 0x823   :  { %v10972_v31 = vor.u32 %v13201_v3, %v10969_v34  ;;  %4700 = vmatpush.bf16.msra.mxu0 %v10840_v29  ;;  %v10968_v42 = vor.u32 %v13203_v17, %v10967_v36  ;;  %v13167_v12 = vld [vmem:[#allocation7 + $0xcc] sm:$0xf0]  ;;  %v13165_v47 = vld [vmem:[#allocation7 + $0xc4] sm:$0xf]  ;;  %v10825_v60 = vld [vmem:[#allocation7 + $0xd0] sm:$0xf0] }
 0x824   :  { %4726 = vmatpush.bf16.msra.mxu2 %v10844_v16  ;;  %v10824_v44 = vor.u32 %v13167_v12, %v10823_v40  ;;  %v10828_v35 = vor.u32 %v13165_v47, %v10825_v60  ;;  %v13197_v23 = vld [vmem:[#allocation7 + $0x1c4] sm:$0xf]  ;;  %v10953_v21 = vld [vmem:[#allocation7 + $0x1d0] sm:$0xf0]  ;;  %v10951_v48 = vld [vmem:[#allocation7 + $0x1c0] sm:$0xf] }
 0x825   :  { %4739 = vmatpush.bf16.msra.mxu3 %v10972_v31  ;;  %4713 = vmatpush.bf16.msra.mxu1 %v10968_v42  ;;  %v10956_v22 = vor.u32 %v13197_v23, %v10953_v21  ;;  %v13199_v41 = vld [vmem:[#allocation7 + $0x1cc] sm:$0xf0]  ;;  %v10807_v9 = vld [vmem:[#allocation7 + $0xa0] sm:$0xf]  ;;  %v13161_v51 = vld [vmem:[#allocation7 + $0xa4] sm:$0xf] }
 0x826   :  { %v13163_v13 = vld [vmem:[#allocation7 + $0xac] sm:$0xf0]  ;;  %v10952_v15 = vor.u32 %v13199_v41, %v10951_v48  ;;  %v10809_v52 = vld [vmem:[#allocation7 + $0xb0] sm:$0xf0]  ;;  %v13193_v53 = vld [vmem:[#allocation7 + $0x1a4] sm:$0xf] }
 0x827   :  { %4701 = vmatpush.bf16.msra.mxu0 %v10824_v44  ;;  %v10808_v33 = vor.u32 %v13163_v13, %v10807_v9  ;;  %v10937_v45 = vld [vmem:[#allocation7 + $0x1b0] sm:$0xf0]  ;;  %v10935_v49 = vld [vmem:[#allocation7 + $0x1a0] sm:$0xf]  ;;  %v13195_v59 = vld [vmem:[#allocation7 + $0x1ac] sm:$0xf0]  ;;  %v10812_v57 = vor.u32 %v13161_v51, %v10809_v52 }
 0x828   :  { %4727 = vmatpush.bf16.msra.mxu2 %v10828_v35  ;;  %v10940_v0 = vor.u32 %v13193_v53, %v10937_v45  ;;  %v10791_v2 = vld [vmem:[#allocation7 + $0x80] sm:$0xf]  ;;  %v13159_v32 = vld [vmem:[#allocation7 + $0x8c] sm:$0xf0]  ;;  %v13157_v4 = vld [vmem:[#allocation7 + $0x84] sm:$0xf]  ;;  %v10936_v62 = vor.u32 %v13195_v59, %v10935_v49 }
 0x829   :  { %4740 = vmatpush.bf16.msra.mxu3 %v10956_v22  ;;  %4714 = vmatpush.bf16.msra.mxu1 %v10952_v15  ;;  %v10793_v5 = vld [vmem:[#allocation7 + $0x90] sm:$0xf0]  ;;  %v13189_v6 = vld [vmem:[#allocation7 + $0x184] sm:$0xf]  ;;  %v10919_v38 = vld [vmem:[#allocation7 + $0x180] sm:$0xf]  ;;  %v10792_v50 = vor.u32 %v13159_v32, %v10791_v2 }
 0x82a   :  { %v10921_v8 = vld [vmem:[#allocation7 + $0x190] sm:$0xf0]  ;;  %v13191_v10 = vld [vmem:[#allocation7 + $0x18c] sm:$0xf0]  ;;  %v10796_v46 = vor.u32 %v13157_v4, %v10793_v5  ;;  %v10775_v25 = vld [vmem:[#allocation7 + $0x60] sm:$0xf] }
 0x82b   :  { %4702 = vmatpush.bf16.msra.mxu0 %v10808_v33  ;;  %v10924_v43 = vor.u32 %v13189_v6, %v10921_v8  ;;  %v13155_v61 = vld [vmem:[#allocation7 + $0x6c] sm:$0xf0]  ;;  %v13153_v56 = vld [vmem:[#allocation7 + $0x64] sm:$0xf]  ;;  %v10920_v18 = vor.u32 %v13191_v10, %v10919_v38  ;;  %v10777_v1 = vld [vmem:[#allocation7 + $0x70] sm:$0xf0] }
 0x82c   :  { %4728 = vmatpush.bf16.msra.mxu2 %v10812_v57  ;;  %v13185_v19 = vld [vmem:[#allocation7 + $0x164] sm:$0xf]  ;;  %v10905_v20 = vld [vmem:[#allocation7 + $0x170] sm:$0xf0]  ;;  %v10903_v7 = vld [vmem:[#allocation7 + $0x160] sm:$0xf]  ;;  %v10776_v14 = vor.u32 %v13155_v61, %v10775_v25  ;;  %v10780_v55 = vor.u32 %v13153_v56, %v10777_v1 }
 0x82d   :  { %4741 = vmatpush.bf16.msra.mxu3 %v10940_v0  ;;  %4715 = vmatpush.bf16.msra.mxu1 %v10936_v62  ;;  %v13187_v58 = vld [vmem:[#allocation7 + $0x16c] sm:$0xf0]  ;;  %v10908_v24 = vor.u32 %v13185_v19, %v10905_v20  ;;  %v10759_v37 = vld [vmem:[#allocation7 + $0x40] sm:$0xf]  ;;  %v13149_v27 = vld [vmem:[#allocation7 + $0x44] sm:$0xf] }
 0x82e   :  { %v13151_v26 = vld [vmem:[#allocation7 + $0x4c] sm:$0xf0]  ;;  %v10904_v28 = vor.u32 %v13187_v58, %v10903_v7  ;;  %v10761_v11 = vld [vmem:[#allocation7 + $0x50] sm:$0xf0]  ;;  %v13181_v54 = vld [vmem:[#allocation7 + $0x144] sm:$0xf] }
 0x82f   :  { %4703 = vmatpush.bf16.msra.mxu0 %v10792_v50  ;;  %v10889_v39 = vld [vmem:[#allocation7 + $0x150] sm:$0xf0]  ;;  %v10887_v63 = vld [vmem:[#allocation7 + $0x140] sm:$0xf]  ;;  %v13183_v29 = vld [vmem:[#allocation7 + $0x14c] sm:$0xf0]  ;;  %v10760_v30 = vor.u32 %v13151_v26, %v10759_v37  ;;  %v10764_v3 = vor.u32 %v13149_v27, %v10761_v11 }
 0x830   :  { %4729 = vmatpush.bf16.msra.mxu2 %v10796_v46  ;;  %v10892_v34 = vor.u32 %v13181_v54, %v10889_v39  ;;  %v10743_v16 = vld [vmem:[#allocation7 + $0x20] sm:$0xf]  ;;  %v13147_v31 = vld [vmem:[#allocation7 + $0x2c] sm:$0xf0]  ;;  %v13145_v36 = vld [vmem:[#allocation7 + $0x24] sm:$0xf]  ;;  %v10888_v17 = vor.u32 %v13183_v29, %v10887_v63 }
 0x831   :  { %4742 = vmatpush.bf16.msra.mxu3 %v10924_v43  ;;  %4716 = vmatpush.bf16.msra.mxu1 %v10920_v18  ;;  %v10745_v40 = vld [vmem:[#allocation7 + $0x30] sm:$0xf0]  ;;  %v13177_v42 = vld [vmem:[#allocation7 + $0x124] sm:$0xf]  ;;  %v10871_v47 = vld [vmem:[#allocation7 + $0x120] sm:$0xf]  ;;  %v10744_v44 = vor.u32 %v13147_v31, %v10743_v16 }
 0x832   :  { %v10873_v12 = vld [vmem:[#allocation7 + $0x130] sm:$0xf0]  ;;  %v13179_v60 = vld [vmem:[#allocation7 + $0x12c] sm:$0xf0]  ;;  %v10727_v35 = vld [vmem:[#allocation7] sm:$0xf]  ;;  %v10748_v48 = vor.u32 %v13145_v36, %v10745_v40 }
 0x833   :  { %4704 = vmatpush.bf16.msra.mxu0 %v10776_v14  ;;  %v13143_v23 = vld [vmem:[#allocation7 + $0xc] sm:$0xf0]  ;;  %v13141_v21 = vld [vmem:[#allocation7 + $0x4] sm:$0xf]  ;;  %v10876_v22 = vor.u32 %v13177_v42, %v10873_v12  ;;  %v10729_v41 = vld [vmem:[#allocation7 + $0x10] sm:$0xf0]  ;;  %v10872_v15 = vor.u32 %v13179_v60, %v10871_v47 }
 0x834   :  { %4730 = vmatpush.bf16.msra.mxu2 %v10780_v55  ;;  %v13173_v9 = vld [vmem:[#allocation7 + $0x104] sm:$0xf]  ;;  %v4298_v13 = vld [vmem:[#allocation4] sm:$0xff]  ;;  %v10857_v51 = vld [vmem:[#allocation7 + $0x110] sm:$0xf0]  ;;  %v10728_v59 = vor.u32 %v13143_v23, %v10727_v35  ;;  %v10732_v4 = vor.u32 %v13141_v21, %v10729_v41  ;;  %s11017_s26 = sld [smem:[#allocation6 + $0x2]] }
 0x835   :  { %4743 = vmatpush.bf16.msra.mxu3 %v10908_v24  ;;  %4717 = vmatpush.bf16.msra.mxu1 %v10904_v28  ;;  %v10847_v52 = vld [vmem:[#allocation7 + $0xe8] sm:$0xf]  ;;  %v13172_v53 = vld [vmem:[#allocation7 + $0xf4] sm:$0xf0]  ;;  %v13170_v33 = vld [vmem:[#allocation7 + $0xec] sm:$0xf]  ;;  %v4374_v32 = vunpack.c.l.b16 %v4298_v13  ;;  %v10860_v62 = vor.u32 %v13173_v9, %v10857_v51  ;;  %v4375_v8 = vunpack.c.h.b16 %v4298_v13 }
 0x836   :  { %v10849_v45 = vld [vmem:[#allocation7 + $0xf8] sm:$0xf0]  ;;  %v13202_v49 = vld [vmem:[#allocation7 + $0x1ec] sm:$0xf]  ;;  %v10855_v0 = vld [vmem:[#allocation7 + $0x100] sm:$0xf]  ;;  %v10848_v38 = vor.u32 %v13172_v53, %v10847_v52 }
 0x837   :  { %4705 = vmatpush.bf16.msra.mxu0 %v10760_v30  ;;  %v10977_v57 = vld [vmem:[#allocation7 + $0x1f8] sm:$0xf0]  ;;  %v13175_v2 = vld [vmem:[#allocation7 + $0x10c] sm:$0xf0]  ;;  %v10975_v5 = vld [vmem:[#allocation7 + $0x1e8] sm:$0xf]  ;;  %v10852_v10 = vor.u32 %v13170_v33, %v10849_v45  ;;  %v16825_v18 = vpack.c.b16 %v4374_v32, %v4374_v32  ;;  %v16827_v7 = vpack.c.b16 %v4375_v8, %v4375_v8 }
 0x838   :  { %4731 = vmatpush.bf16.msra.mxu2 %v10764_v3  ;;  %v13204_v6 = vld [vmem:[#allocation7 + $0x1f4] sm:$0xf0]  ;;  %v10831_v50 = vld [vmem:[#allocation7 + $0xc8] sm:$0xf]  ;;  %v10980_v46 = vor.u32 %v13202_v49, %v10977_v57  ;;  %v10856_v43 = vor.u32 %v13175_v2, %v10855_v0  ;;  %v13166_v61 = vld [vmem:[#allocation7 + $0xcc] sm:$0xf] }
 0x839   :  { %4744 = vmatpush.bf16.msra.mxu3 %v10892_v34  ;;  %4718 = vmatpush.bf16.msra.mxu1 %v10888_v17  ;;  %v13168_v25 = vld [vmem:[#allocation7 + $0xd4] sm:$0xf0]  ;;  %v10833_v56 = vld [vmem:[#allocation7 + $0xd8] sm:$0xf0]  ;;  %v10976_v1 = vor.u32 %v13204_v6, %v10975_v5  ;;  %v13198_v19 = vld [vmem:[#allocation7 + $0x1cc] sm:$0xf] }
 0x83a   :  { %v10961_v20 = vld [vmem:[#allocation7 + $0x1d8] sm:$0xf0]  ;;  %v10959_v58 = vld [vmem:[#allocation7 + $0x1c8] sm:$0xf]  ;;  %v13200_v14 = vld [vmem:[#allocation7 + $0x1d4] sm:$0xf0]  ;;  %v10832_v55 = vor.u32 %v13168_v25, %v10831_v50  ;;  %v10836_v24 = vor.u32 %v13166_v61, %v10833_v56 }
 0x83b   :  { %4706 = vmatpush.bf16.msra.mxu0 %v10744_v44  ;;  %v10815_v37 = vld [vmem:[#allocation7 + $0xa8] sm:$0xf]  ;;  %v10964_v26 = vor.u32 %v13198_v19, %v10961_v20  ;;  %v13164_v27 = vld [vmem:[#allocation7 + $0xb4] sm:$0xf0]  ;;  %v13162_v28 = vld [vmem:[#allocation7 + $0xac] sm:$0xf]  ;;  %v10960_v54 = vor.u32 %v13200_v14, %v10959_v58 }
 0x83c   :  { %4732 = vmatpush.bf16.msra.mxu2 %v10748_v48  ;;  %v10817_v11 = vld [vmem:[#allocation7 + $0xb8] sm:$0xf0]  ;;  %v13194_v39 = vld [vmem:[#allocation7 + $0x1ac] sm:$0xf]  ;;  %v10943_v29 = vld [vmem:[#allocation7 + $0x1a8] sm:$0xf]  ;;  %v10816_v3 = vor.u32 %v13164_v27, %v10815_v37 }
 0x83d   :  { %4745 = vmatpush.bf16.msra.mxu3 %v10876_v22  ;;  %4719 = vmatpush.bf16.msra.mxu1 %v10872_v15  ;;  %v10945_v63 = vld [vmem:[#allocation7 + $0x1b8] sm:$0xf0]  ;;  %v13196_v30 = vld [vmem:[#allocation7 + $0x1b4] sm:$0xf0]  ;;  %v10820_v34 = vor.u32 %v13162_v28, %v10817_v11  ;;  %v10799_v16 = vld [vmem:[#allocation7 + $0x88] sm:$0xf] }
 0x83e   :  { %v10948_v31 = vor.u32 %v13194_v39, %v10945_v63  ;;  %v13160_v36 = vld [vmem:[#allocation7 + $0x94] sm:$0xf0]  ;;  %v13158_v17 = vld [vmem:[#allocation7 + $0x8c] sm:$0xf]  ;;  %v10801_v40 = vld [vmem:[#allocation7 + $0x98] sm:$0xf0]  ;;  %v10944_v42 = vor.u32 %v13196_v30, %v10943_v29 }
 0x83f   :  { %4707 = vmatpush.bf16.msra.mxu0 %v10728_v59  ;;  %v13190_v12 = vld [vmem:[#allocation7 + $0x18c] sm:$0xf]  ;;  %v10929_v47 = vld [vmem:[#allocation7 + $0x198] sm:$0xf0]  ;;  %v10927_v60 = vld [vmem:[#allocation7 + $0x188] sm:$0xf]  ;;  %v10800_v35 = vor.u32 %v13160_v36, %v10799_v16  ;;  %v10804_v23 = vor.u32 %v13158_v17, %v10801_v40 }
 0x840   :  { %4733 = vmatpush.bf16.msra.mxu2 %v10732_v4  ;;  %v13192_v44 = vld [vmem:[#allocation7 + $0x194] sm:$0xf0]  ;;  %v10783_v21 = vld [vmem:[#allocation7 + $0x68] sm:$0xf]  ;;  %v10932_v48 = vor.u32 %v13190_v12, %v10929_v47  ;;  %v13154_v41 = vld [vmem:[#allocation7 + $0x6c] sm:$0xf] }
 0x841   :  { %4746 = vmatpush.bf16.msra.mxu3 %v10860_v62  ;;  %4720 = vmatpush.bf16.msra.mxu1 %v10856_v43  ;;  %v13156_v22 = vld [vmem:[#allocation7 + $0x74] sm:$0xf0]  ;;  %v10785_v9 = vld [vmem:[#allocation7 + $0x78] sm:$0xf0]  ;;  %v10928_v13 = vor.u32 %v13192_v44, %v10927_v60  ;;  %v13186_v15 = vld [vmem:[#allocation7 + $0x16c] sm:$0xf] }
 0x842   :  { %4708 = vmatmul.bf16.vlgmr.msra.gmra.mxu0 %v16825_v18  ;;  %v10913_v51 = vld [vmem:[#allocation7 + $0x178] sm:$0xf0]  ;;  %v10911_v52 = vld [vmem:[#allocation7 + $0x168] sm:$0xf]  ;;  %v13188_v53 = vld [vmem:[#allocation7 + $0x174] sm:$0xf0]  ;;  %v10784_v33 = vor.u32 %v13156_v22, %v10783_v21  ;;  %v10788_v45 = vor.u32 %v13154_v41, %v10785_v9 }
 0x843   :  { %4752 = vmatpush.bf16.msrb.mxu0 %v10848_v38  ;;  %4734 = vmatmul.bf16.vlgmr.msra.gmra.mxu2 %v16825_v18  ;;  %v10767_v49 = vld [vmem:[#allocation7 + $0x48] sm:$0xf]  ;;  %v10916_v59 = vor.u32 %v13186_v15, %v10913_v51  ;;  %v13152_v57 = vld [vmem:[#allocation7 + $0x54] sm:$0xf0]  ;;  %v13150_v0 = vld [vmem:[#allocation7 + $0x4c] sm:$0xf]  ;;  %v10912_v32 = vor.u32 %v13188_v53, %v10911_v52 }
 0x844   :  { %4778 = vmatpush.bf16.msrb.mxu2 %v10852_v10  ;;  %4747 = vmatmul.bf16.vlgmr.msra.gmra.mxu3 %v16827_v7  ;;  %v10769_v2 = vld [vmem:[#allocation7 + $0x58] sm:$0xf0]  ;;  %v13182_v4 = vld [vmem:[#allocation7 + $0x14c] sm:$0xf]  ;;  %v10895_v5 = vld [vmem:[#allocation7 + $0x148] sm:$0xf]  ;;  %v10768_v8 = vor.u32 %v13152_v57, %v10767_v49 }
 0x845   :  { %4791 = vmatpush.bf16.msrb.mxu3 %v10980_v46  ;;  %4765 = vmatpush.bf16.msrb.mxu1 %v10976_v1  ;;  %v10897_v62 = vld [vmem:[#allocation7 + $0x158] sm:$0xf0]  ;;  %v13184_v6 = vld [vmem:[#allocation7 + $0x154] sm:$0xf0]  ;;  %v10772_v38 = vor.u32 %v13150_v0, %v10769_v2  ;;  %v10751_v10 = vld [vmem:[#allocation7 + $0x28] sm:$0xf] }
 0x846   :  { %4721 = vmatmul.bf16.vlgmr.msra.gmra.mxu1 %v16827_v7  ;;  %v10900_v50 = vor.u32 %v13182_v4, %v10897_v62  ;;  %v13148_v46 = vld [vmem:[#allocation7 + $0x34] sm:$0xf0]  ;;  %v13146_v43 = vld [vmem:[#allocation7 + $0x2c] sm:$0xf]  ;;  %v10753_v25 = vld [vmem:[#allocation7 + $0x38] sm:$0xf0]  ;;  %v10896_v61 = vor.u32 %v13184_v6, %v10895_v5 }
 0x847   :  { %4753 = vmatpush.bf16.msrb.mxu0 %v10832_v55  ;;  %v13178_v56 = vld [vmem:[#allocation7 + $0x12c] sm:$0xf]  ;;  %v10881_v1 = vld [vmem:[#allocation7 + $0x138] sm:$0xf0]  ;;  %v10879_v19 = vld [vmem:[#allocation7 + $0x128] sm:$0xf]  ;;  %v10752_v58 = vor.u32 %v13148_v46, %v10751_v10  ;;  %v10756_v14 = vor.u32 %v13146_v43, %v10753_v25 }
 0x848   :  { %4779 = vmatpush.bf16.msrb.mxu2 %v10836_v24  ;;  %v13180_v20 = vld [vmem:[#allocation7 + $0x134] sm:$0xf0]  ;;  %v10735_v55 = vld [vmem:[#allocation7 + $0x8] sm:$0xf]  ;;  %v10884_v24 = vor.u32 %v13178_v56, %v10881_v1  ;;  %v10737_v27 = vld [vmem:[#allocation7 + $0x18] sm:$0xf0] }
 0x849   :  { %4792 = vmatpush.bf16.msrb.mxu3 %v10964_v26  ;;  %4766 = vmatpush.bf16.msrb.mxu1 %v10960_v54  ;;  %v13144_v37 = vld [vmem:[#allocation7 + $0x14] sm:$0xf0]  ;;  %v13142_v26 = vld [vmem:[#allocation7 + $0xc] sm:$0xf]  ;;  %v10880_v28 = vor.u32 %v13180_v20, %v10879_v19  ;;  %v10865_v54 = vld [vmem:[#allocation7 + $0x118] sm:$0xf0] }
 0x84a   :  { %v13174_v11 = vld [vmem:[#allocation7 + $0x10c] sm:$0xf]  ;;  %v10863_v39 = vld [vmem:[#allocation7 + $0x108] sm:$0xf]  ;;  %v13176_v63 = vld [vmem:[#allocation7 + $0x114] sm:$0xf0]  ;;  %v10736_v29 = vor.u32 %v13144_v37, %v10735_v55  ;;  %v10740_v30 = vor.u32 %v13142_v26, %v10737_v27 }
 0x84b   :  { %4754 = vmatpush.bf16.msrb.mxu0 %v10816_v3  ;;  %v10868_v3 = vor.u32 %v13174_v11, %v10865_v54  ;;  %v16840_v16 = vld [vmem:[%s17356_s6] sm:$0xf]  ;;  %v13211_v22 = vld [vmem:[%s17358_s8 + $0x30] sm:$0xff]  ;;  %v13210_v51 = vld [vmem:[%s17358_s8 + $0x28] sm:$0xff]  ;;  %p11018_p2 = scmp.ne.s32.totalorder %s11017_s26, 0 }
 0x84c   :  { %4780 = vmatpush.bf16.msrb.mxu2 %v10820_v34  ;;  %v10864_v34 = vor.u32 %v13176_v63, %v10863_v39  ;;  %v4366_v40 = vperm.slane %v16840_v16, 1  ;;  %v4367_v0 = vperm.slane %v16840_v16, 2  ;;  %v13207_v4 = vld [vmem:[%s17358_s8 + $0x10] sm:$0xff]  ;;  %v4368_v19 = vperm.slane %v16840_v16, 3  ;;  %v4804_v63 = vld [vmem:[#allocation3] sm:$0xff] }
 0x84d   :  { %4793 = vmatpush.bf16.msrb.mxu3 %v10948_v31  ;;  %4767 = vmatpush.bf16.msrb.mxu1 %v10944_v42  ;;  %v4365_v31 = vperm.slane %v16840_v16, 0 }
 0x84f   :  { %4755 = vmatpush.bf16.msrb.mxu0 %v10800_v35 }
 0x850   :  { %4781 = vmatpush.bf16.msrb.mxu2 %v10804_v23 }
 0x851   :  { %4794 = vmatpush.bf16.msrb.mxu3 %v10932_v48  ;;  %4768 = vmatpush.bf16.msrb.mxu1 %v10928_v13 }
 0x853   :  { %4756 = vmatpush.bf16.msrb.mxu0 %v10784_v33  ;;  %v13209_v33 = vld [vmem:[%s17358_s8 + $0x20] sm:$0xff] }
 0x854   :  { %4782 = vmatpush.bf16.msrb.mxu2 %v10788_v45 }
 0x855   :  { %4795 = vmatpush.bf16.msrb.mxu3 %v10916_v59  ;;  %4769 = vmatpush.bf16.msrb.mxu1 %v10912_v32  ;;  %v13208_v59 = vld [vmem:[%s17358_s8 + $0x18] sm:$0xff] }
 0x857   :  { %4757 = vmatpush.bf16.msrb.mxu0 %v10768_v8 }
 0x858   :  { %4783 = vmatpush.bf16.msrb.mxu2 %v10772_v38 }
 0x859   :  { %4796 = vmatpush.bf16.msrb.mxu3 %v10900_v50  ;;  %4770 = vmatpush.bf16.msrb.mxu1 %v10896_v61  ;;  %v13206_v50 = vld [vmem:[%s17358_s8 + $0x8] sm:$0xff] }
 0x85b   :  { %4758 = vmatpush.bf16.msrb.mxu0 %v10752_v58 }
 0x85c   :  { %4784 = vmatpush.bf16.msrb.mxu2 %v10756_v14 }
 0x85d   :  { %4797 = vmatpush.bf16.msrb.mxu3 %v10884_v24  ;;  %4771 = vmatpush.bf16.msrb.mxu1 %v10880_v28  ;;  %v13205_v24 = vld [vmem:[%s17358_s8] sm:$0xff] }
 0x85f   :  { %4759 = vmatpush.bf16.msrb.mxu0 %v10736_v29 }
 0x860   :  { %4785 = vmatpush.bf16.msrb.mxu2 %v10740_v30 }
 0x861   :  { %4798 = vmatpush.bf16.msrb.mxu3 %v10868_v3  ;;  %4772 = vmatpush.bf16.msrb.mxu1 %v10864_v34 }
 0x862   :  { %4760 = vmatmul.bf16.vlgmr.msrb.gmra.mxu0 %v16825_v18 }
 0x863   :  { %4786 = vmatmul.bf16.vlgmr.msrb.gmra.mxu2 %v16825_v18 }
 0x864   :  { %4799 = vmatmul.bf16.vlgmr.msrb.gmra.mxu3 %v16827_v7  ;;  %4773 = vmatmul.bf16.vlgmr.msrb.gmra.mxu1 %v16827_v7  ;;  %v13212_v7 = vld [vmem:[%s17358_s8 + $0x38] sm:$0xff] }
 0x865   :  { %4940 = vmatpush.bf16.msra.mxu0 %v13212_v7 }
 0x869   :  { %4941 = vmatpush.bf16.msra.mxu0 %v13211_v22 }
 0x86d   :  { %4942 = vmatpush.bf16.msra.mxu0 %v13210_v51 }
 0x871   :  { %4943 = vmatpush.bf16.msra.mxu0 %v13209_v33 }
 0x875   :  { %4944 = vmatpush.bf16.msra.mxu0 %v13208_v59 }
 0x879   :  { %4945 = vmatpush.bf16.msra.mxu0 %v13207_v4 }
 0x87d   :  { %4946 = vmatpush.bf16.msra.mxu0 %v13206_v50 }
 0x881   :  { %4947 = vmatpush.bf16.msra.mxu0 %v13205_v24 }
 0x8bf   :  { %v4709_v36 = vpop.f32.mrf.mxu0 }
 0x8c0   :  { %v4710_v17 = vadd.f32 %v4709_v36, %v4365_v31 }
 0x8c3   :  { %v4722_v42 = vpop.f32.mrf.mxu1 }
 0x8c4   :  { %v4723_v12 = vadd.f32 %v4722_v42, %v4710_v17 }
 0x8c6   :  { %v4735_v47 = vpop.f32.mrf.mxu2  ;;  %v10981_v60 = vmul.f32 -1.442695, %v4723_v12 }
 0x8c7   :  { %v4736_v18 = vadd.f32 %v4735_v47, %v4366_v40  ;;  %v4748_v44 = vpop.f32.mrf.mxu3  ;;  %v4711_v23 = vpop.f32.mrf.mxu0 }
 0x8c8   :  { %13739 = vpow2.f32 %v10981_v60 }
 0x8c9   :  { %v4749_v35 = vadd.f32 %v4748_v44, %v4736_v18 }
 0x8cb   :  { %v10982_v21 = vmul.f32 -1.442695, %v4749_v35  ;;  %v4724_v48 = vpop.f32.mrf.mxu1 }
 0x8cd   :  { %13741 = vpow2.f32 %v10982_v21 }
 0x8ce   :  { %v13740_v41 = vpop.eup %13739  ;;  %v4737_v9 = vpop.f32.mrf.mxu2 }
 0x8cf   :  { %v4808_v13 = vadd.f32 1.0, %v13740_v41  ;;  %v4750_v15 = vpop.f32.mrf.mxu3 }
 0x8d1   :  { %13743 = vrcp.f32 %v4808_v13  ;;  %vm4814_vm9 = vweird.f32 %v4808_v13  ;;  %v4818_v6 = vand.u32 2147483647, %v4808_v13  ;;  %v4820_v10 = vand.u32 2147483648, %v4808_v13 }
 0x8d3   :  { %v13742_v52 = vpop.eup %13741  ;;  %v4821_v55 = vor.u32 1.1754944e-38, %v4820_v10  ;;  %vm4819_vm15 = vcmp.eq.f32.partialorder %v4818_v6, 8.507059e+37 }
 0x8d4   :  { %v4827_v53 = vadd.f32 1.0, %v13742_v52  ;;  %v13738_v52 = vld [vmem:[%s17359_s9] ss:$0 sm:$0xff] }
 0x8d6   :  { %13745 = vrcp.f32 %v4827_v53  ;;  %vm4833_vm11 = vweird.f32 %v4827_v53  ;;  %v4839_v8 = vand.u32 2147483648, %v4827_v53  ;;  %v4837_v61 = vand.u32 2147483647, %v4827_v53 }
 0x8d7   :  { %v13744_v45 = vpop.eup %13743 }
 0x8d8   :  { %v4810_v49 = vmul.f32 %v13744_v45, %v4808_v13  ;;  %vm4815_vm10 = vweird.f32 %v13744_v45  ;;  %v4840_v14 = vor.u32 1.1754944e-38, %v4839_v8  ;;  %vm4838_vm0 = vcmp.eq.f32.partialorder %v4837_v61, 8.507059e+37 }
 0x8d9   :  { %vm16867_vm13 = vmor %vm4814_vm9, %vm4815_vm10 }
 0x8da   :  { %v4811_v57 = vsub.f32 1.0, %v4810_v49 }
 0x8dc   :  { %v13746_v2 = vpop.eup %13745  ;;  %v4812_v32 = vmul.f32 %v13744_v45, %v4811_v57 }
 0x8dd   :  { %v4829_v62 = vmul.f32 %v13746_v2, %v4827_v53  ;;  %vm4834_vm12 = vweird.f32 %v13746_v2 }
 0x8de   :  { %v4813_v25 = vadd.f32 %v13744_v45, %v4812_v32  ;;  %vm16873_vm14 = vmor %vm4833_vm11, %vm4834_vm12 }
 0x8df   :  { %v4761_v5 = vpop.f32.mrf.mxu0  ;;  %v4830_v46 = vsub.f32 1.0, %v4829_v62 }
 0x8e0   :  { %v4762_v38 = vadd.f32 %v4761_v5, %v4367_v0  ;;  %v4817_v37 = vsel %vm16867_vm13, %v13744_v45, %v4813_v25 }
 0x8e1   :  { %v4774_v43 = vpop.f32.mrf.mxu1  ;;  %v4831_v20 = vmul.f32 %v13746_v2, %v4830_v46  ;;  %v4822_v29 = vsel %vm4819_vm15, %v4821_v55, %v4817_v37 }
 0x8e2   :  { %v4775_v56 = vadd.f32 %v4774_v43, %v4762_v38 }
 0x8e3   :  { %v4832_v26 = vadd.f32 %v13746_v2, %v4831_v20 }
 0x8e4   :  { %13747 = vtanh.f32 %v4775_v56 }
 0x8e5   :  { %v4836_v54 = vsel %vm16873_vm14, %v13746_v2, %v4832_v26 }
 0x8e6   :  { %v4787_v27 = vpop.f32.mrf.mxu2  ;;  %v4841_v30 = vsel %vm4838_vm0, %v4840_v14, %v4836_v54 }
 0x8e7   :  { %v4788_v28 = vadd.f32 %v4787_v27, %v4368_v19  ;;  %v4800_v11 = vpop.f32.mrf.mxu3  ;;  %v4763_v39 = vpop.f32.mrf.mxu0  ;;  %v4863_v36 = vmul.f32 %v4841_v30, %v4804_v63 }
 0x8e9   :  { %v4801_v3 = vadd.f32 %v4800_v11, %v4788_v28  ;;  %v4776_v34 = vpop.f32.mrf.mxu1 }
 0x8ea   :  { %v13748_v16 = vpop.eup %13747 }
 0x8eb   :  { %v10983_v31 = vmul.f32 -1.442695, %v4801_v3  ;;  %v4864_v17 = vmul.f32 %v13748_v16, %v4822_v29 }
 0x8ed   :  { %13749 = vpow2.f32 %v10983_v31  ;;  %v4865_v40 = vadd.f32 %v4864_v17, %v4863_v36 }
 0x8ee   :  { %v4789_v42 = vpop.f32.mrf.mxu2 }
 0x8ef   :  { %v4802_v12 = vpop.f32.mrf.mxu3  ;;  %4869 = vst [vmem:[#allocation3] sm:$0xff] %v4865_v40 }
 0x8f3   :  { %v13750_v47 = vpop.eup %13749 }
 0x8f4   :  { %v4847_v60 = vadd.f32 1.0, %v13750_v47 }
 0x8f6   :  { %13751 = vrcp.f32 %v4847_v60  ;;  %v4859_v35 = vand.u32 2147483648, %v4847_v60  ;;  %v4857_v21 = vand.u32 2147483647, %v4847_v60  ;;  %vm4853_vm2 = vweird.f32 %v4847_v60 }
 0x8f7   :  { %13753 = vtanh.f32 %v4865_v40 }
 0x8f8   :  { %v4860_v22 = vor.u32 1.1754944e-38, %v4859_v35  ;;  %vm4858_vm4 = vcmp.eq.f32.partialorder %v4857_v21, 8.507059e+37 }
 0x8fc   :  { %v13752_v18 = vpop.eup %13751 }
 0x8fd   :  { %v4849_v44 = vmul.f32 %v13752_v18, %v4847_v60  ;;  %vm4854_vm1 = vweird.f32 %v13752_v18  ;;  %v13754_v9 = vpop.eup %13753 }
 0x8fe   :  { %vm4855_vm3 = vmor %vm4853_vm2, %vm4854_vm1 }
 0x8ff   :  { %v4850_v7 = vsub.f32 1.0, %v4849_v44 }
 0x901   :  { %v4851_v23 = vmul.f32 %v13752_v18, %v4850_v7 }
 0x903   :  { %v4852_v48 = vadd.f32 %v13752_v18, %v4851_v23 }
 0x905   :  { %v4856_v41 = vsel %vm4855_vm3, %v13752_v18, %v4852_v48 }
 0x906   :  { %v4861_v13 = vsel %vm4858_vm4, %v4860_v22, %v4856_v41 }
 0x907   :  { %v4867_v15 = vmul.f32 %v13754_v9, %v4861_v13 }
 0x909   :  { %v4870_v51 = vpack.c.bf16 %v4867_v15, %v4867_v15 }
 0x90b   :  { %4871 = vst [vmem:[#allocation4 + $0x4] sm:$0xf] %v4870_v51  ;;  %4948 = vmatmul.bf16.vlgmr.msra.gmra.mxu0 %v4870_v51 }
 0x988   :  { %v4949_v53 = vpop.f32.mrf.mxu0 }
 0x989   :  { %v4950_v33 = vadd.f32 %v13738_v52, %v4949_v53 }
 0x98b   :  { %11016 = vst [vmem:[%s17360_s10 + $0x8] sm:$0xff] %v4950_v33 }
 0x98c   :  { %4959 = sbr.rel (%p11018_p2) target bundleno = 2951 (0xb87), region = 53 }
 0x990   :  { %v4951_v45 = vpop.f32.mrf.mxu0 }
 0x991   :  { %v4960_v49 = vlaneseq  ;;  %v13220_v62 = vld [vmem:[%s17357_s7 + $0x38] sm:$0xff]  ;;  %v13219_v5 = vld [vmem:[%s17357_s7 + $0x30] sm:$0xff]  ;;  %v13218_v6 = vld [vmem:[%s17357_s7 + $0x28] sm:$0xff]  ;;  %v13886_v55 = vmov 1.0|1.0  }
 0x992   :  { %5050 = vmatpush.bf16.msra.mxu0 %v13220_v62  ;;  %v13217_v8 = vld [vmem:[%s17357_s7 + $0x20] sm:$0xff]  ;;  %v13216_v38 = vld [vmem:[%s17357_s7 + $0x18] sm:$0xff]  ;;  %v13215_v10 = vld [vmem:[%s17357_s7 + $0x10] sm:$0xff] }
 0x993   :  { %v4961_v59 = vand.u32 127, %v4960_v49  ;;  %v13214_v50 = vld [vmem:[%s17357_s7 + $0x8] sm:$0xff]  ;;  %v13213_v56 = vld [vmem:[%s17357_s7] sm:$0xff] }
 0x995   :  { %vm4962_vm5 = vcmp.lt.s32.totalorder %v4961_v59, 16 }
 0x996   :  { %v4963_v57 = vsel %vm4962_vm5, %v4950_v33, -1e+30  ;;  %5051 = vmatpush.bf16.msra.mxu0 %v13219_v5 }
 0x997   :  { %4964 = vmax.xlane.f32.xlu0 %v4963_v57 }
 0x99a   :  { %5052 = vmatpush.bf16.msra.mxu0 %v13218_v6 }
 0x99e   :  { %5053 = vmatpush.bf16.msra.mxu0 %v13217_v8 }
 0x9a2   :  { %5054 = vmatpush.bf16.msra.mxu0 %v13216_v38 }
 0x9a6   :  { %5055 = vmatpush.bf16.msra.mxu0 %v13215_v10 }
 0x9aa   :  { %5056 = vmatpush.bf16.msra.mxu0 %v13214_v50 }
 0x9ae   :  { %5057 = vmatpush.bf16.msra.mxu0 %v13213_v56 }
 0xa0a   :  { %v4965_v0 = vpop.xlane.xlu0 %4964 }
 0xa0b   :  { %vm4966_vm6 = vcmp.ge.f32.partialorder %v4963_v57, %v4965_v0 }
 0xa0c   :  { %v4967_v2 = vsel %vm4966_vm6, %v4961_v59, 128 }
 0xa0d   :  { %v4969_v32 = vshra.s32 %v4967_v2, 16  ;;  %v4968_v46 = vand.u32 65535, %v4967_v2 }
 0xa0f   :  { %v4971_v4 = vcvt.s32.f32 %v4969_v32  ;;  %v4970_v25 = vcvt.s32.f32 %v4968_v46 }
 0xa11   :  { %4972 = vmin.xlane.f32.xlu0 %v4971_v4 }
 0xa84   :  { %v4973_v43 = vpop.xlane.xlu0 %4972 }
 0xa85   :  { %vm4974_vm7 = vcmp.eq.f32.partialorder %v4971_v4, %v4973_v43  ;;  %v4979_v1 = vcvt.f32.s32 %v4973_v43 }
 0xa86   :  { %v4975_v61 = vsel %vm4974_vm7, %v4970_v25, inf }
 0xa87   :  { %4976 = vmin.xlane.f32.xlu1 %v4975_v61  ;;  %v4980_v20 = vshll.u32 %v4979_v1, 16 }
 0xafa   :  { %v4977_v19 = vpop.xlane.xlu1 %4976 }
 0xafb   :  { %v4978_v58 = vcvt.f32.s32 %v4977_v19 }
 0xafd   :  { %v4981_v14 = vadd.s32 %v4980_v20, %v4978_v58 }
 0xaff   :  { %vm4982_vm8 = vcmp.eq.s32.totalorder %v4961_v59, %v4981_v14 }
 0xb00   :  { %vm11052_vm9 = vmpackc.low %vm4982_vm8, %vm4982_vm8 }
 0xb01   :  { %11053 = vmatmul.msk.bf16.vlgmr.msra.gmra.mxu0 %vm11052_vm9, %v13886_v55 }
 0xb7e   :  { %v5059_v24 = vpop.f32.mrf.mxu0 }
 0xb7f   :  { %v5063_v37 = vpack.c.bf16 %v5059_v24, %v5059_v24 }
 0xb81   :  { %5064 = vst [vmem:[#allocation4] sm:$0xf] %v5063_v37 }
 0xb86   :  { %v5061_v26 = vpop.f32.mrf.mxu0 }
 0xb87 PF:  { %s11054_s23 = sld [smem:[#allocation6 + $0x2]] }
 0xb8d   :  { %p11055_p3 = scmp.eq.s32.totalorder %s11054_s23, 0 }
 0xb8f   :  { %5069 = sbr.rel (%p11055_p3) target bundleno = 2966 (0xb96), region = 57 }
 0xb94   :  { %v11056_v27 = vld [vmem:[%s17352_s2 + $0x8] sm:$0xf] }
 0xb95   :  { %5072 = vst [vmem:[#allocation4] sm:$0xf] %v11056_v27 }
 0xb96 PF:  { %v11171_v28 = vld [vmem:[#allocation7 + $0xe0] sm:$0xf]  ;;  %v13251_v11 = vld [vmem:[#allocation7 + $0xec] sm:$0xf0]  ;;  %v13249_v54 = vld [vmem:[#allocation7 + $0xe4] sm:$0xf] }
 0xb97   :  { %v11172_v39 = vor.u32 %v13251_v11, %v11171_v28  ;;  %v11173_v63 = vld [vmem:[#allocation7 + $0xf0] sm:$0xf0]  ;;  %v13281_v29 = vld [vmem:[#allocation7 + $0x1e4] sm:$0xf]  ;;  %v11299_v16 = vld [vmem:[#allocation7 + $0x1e0] sm:$0xf] }
 0xb98   :  { %v11301_v30 = vld [vmem:[#allocation7 + $0x1f0] sm:$0xf0]  ;;  %v11176_v3 = vor.u32 %v13249_v54, %v11173_v63  ;;  %v13283_v31 = vld [vmem:[#allocation7 + $0x1ec] sm:$0xf0]  ;;  %v11155_v36 = vld [vmem:[#allocation7 + $0xc0] sm:$0xf] }
 0xb99   :  { %v11304_v34 = vor.u32 %v13281_v29, %v11301_v30  ;;  %5475 = vmatpush.bf16.msra.mxu0 %v11172_v39  ;;  %v11300_v17 = vor.u32 %v13283_v31, %v11299_v16  ;;  %v13247_v40 = vld [vmem:[#allocation7 + $0xcc] sm:$0xf0]  ;;  %v13245_v42 = vld [vmem:[#allocation7 + $0xc4] sm:$0xf]  ;;  %v11157_v12 = vld [vmem:[#allocation7 + $0xd0] sm:$0xf0] }
 0xb9a   :  { %5501 = vmatpush.bf16.msra.mxu2 %v11176_v3  ;;  %v11156_v47 = vor.u32 %v13247_v40, %v11155_v36  ;;  %v11160_v60 = vor.u32 %v13245_v42, %v11157_v12  ;;  %v13277_v18 = vld [vmem:[#allocation7 + $0x1c4] sm:$0xf]  ;;  %v11285_v44 = vld [vmem:[#allocation7 + $0x1d0] sm:$0xf0]  ;;  %v11283_v7 = vld [vmem:[#allocation7 + $0x1c0] sm:$0xf] }
 0xb9b   :  { %5514 = vmatpush.bf16.msra.mxu3 %v11304_v34  ;;  %5488 = vmatpush.bf16.msra.mxu1 %v11300_v17  ;;  %v11288_v35 = vor.u32 %v13277_v18, %v11285_v44  ;;  %v13279_v23 = vld [vmem:[#allocation7 + $0x1cc] sm:$0xf0]  ;;  %v11139_v21 = vld [vmem:[#allocation7 + $0xa0] sm:$0xf]  ;;  %v13241_v41 = vld [vmem:[#allocation7 + $0xa4] sm:$0xf] }
 0xb9c   :  { %v13243_v48 = vld [vmem:[#allocation7 + $0xac] sm:$0xf0]  ;;  %v11284_v22 = vor.u32 %v13279_v23, %v11283_v7  ;;  %v11141_v9 = vld [vmem:[#allocation7 + $0xb0] sm:$0xf0]  ;;  %v13273_v13 = vld [vmem:[#allocation7 + $0x1a4] sm:$0xf] }
 0xb9d   :  { %5476 = vmatpush.bf16.msra.mxu0 %v11156_v47  ;;  %v11140_v15 = vor.u32 %v13243_v48, %v11139_v21  ;;  %v11269_v51 = vld [vmem:[#allocation7 + $0x1b0] sm:$0xf0]  ;;  %v11267_v52 = vld [vmem:[#allocation7 + $0x1a0] sm:$0xf]  ;;  %v13275_v53 = vld [vmem:[#allocation7 + $0x1ac] sm:$0xf0]  ;;  %v11144_v33 = vor.u32 %v13241_v41, %v11141_v9 }
 0xb9e   :  { %5502 = vmatpush.bf16.msra.mxu2 %v11160_v60  ;;  %v11272_v45 = vor.u32 %v13273_v13, %v11269_v51  ;;  %v11123_v49 = vld [vmem:[#allocation7 + $0x80] sm:$0xf]  ;;  %v13239_v59 = vld [vmem:[#allocation7 + $0x8c] sm:$0xf0]  ;;  %v13237_v57 = vld [vmem:[#allocation7 + $0x84] sm:$0xf]  ;;  %v11268_v0 = vor.u32 %v13275_v53, %v11267_v52 }
 0xb9f   :  { %5515 = vmatpush.bf16.msra.mxu3 %v11288_v35  ;;  %5489 = vmatpush.bf16.msra.mxu1 %v11284_v22  ;;  %v11125_v2 = vld [vmem:[#allocation7 + $0x90] sm:$0xf0]  ;;  %v13269_v32 = vld [vmem:[#allocation7 + $0x184] sm:$0xf]  ;;  %v11251_v62 = vld [vmem:[#allocation7 + $0x180] sm:$0xf]  ;;  %v11124_v6 = vor.u32 %v13239_v59, %v11123_v49 }
 0xba0   :  { %v11253_v4 = vld [vmem:[#allocation7 + $0x190] sm:$0xf0]  ;;  %v13271_v5 = vld [vmem:[#allocation7 + $0x18c] sm:$0xf0]  ;;  %v11128_v8 = vor.u32 %v13237_v57, %v11125_v2  ;;  %v11107_v10 = vld [vmem:[#allocation7 + $0x60] sm:$0xf] }
 0xba1   :  { %5477 = vmatpush.bf16.msra.mxu0 %v11140_v15  ;;  %v11256_v38 = vor.u32 %v13269_v32, %v11253_v4  ;;  %v13235_v50 = vld [vmem:[#allocation7 + $0x6c] sm:$0xf0]  ;;  %v13233_v46 = vld [vmem:[#allocation7 + $0x64] sm:$0xf]  ;;  %v11252_v43 = vor.u32 %v13271_v5, %v11251_v62  ;;  %v11109_v25 = vld [vmem:[#allocation7 + $0x70] sm:$0xf0] }
 0xba2   :  { %5503 = vmatpush.bf16.msra.mxu2 %v11144_v33  ;;  %v13265_v61 = vld [vmem:[#allocation7 + $0x164] sm:$0xf]  ;;  %v11237_v56 = vld [vmem:[#allocation7 + $0x170] sm:$0xf0]  ;;  %v11235_v1 = vld [vmem:[#allocation7 + $0x160] sm:$0xf]  ;;  %v11108_v20 = vor.u32 %v13235_v50, %v11107_v10  ;;  %v11112_v58 = vor.u32 %v13233_v46, %v11109_v25 }
 0xba3   :  { %5516 = vmatpush.bf16.msra.mxu3 %v11272_v45  ;;  %5490 = vmatpush.bf16.msra.mxu1 %v11268_v0  ;;  %v13267_v19 = vld [vmem:[#allocation7 + $0x16c] sm:$0xf0]  ;;  %v11240_v14 = vor.u32 %v13265_v61, %v11237_v56  ;;  %v11091_v55 = vld [vmem:[#allocation7 + $0x40] sm:$0xf]  ;;  %v13229_v37 = vld [vmem:[#allocation7 + $0x44] sm:$0xf] }
 0xba4   :  { %v13231_v24 = vld [vmem:[#allocation7 + $0x4c] sm:$0xf0]  ;;  %v11236_v26 = vor.u32 %v13267_v19, %v11235_v1  ;;  %v11093_v27 = vld [vmem:[#allocation7 + $0x50] sm:$0xf0]  ;;  %v13261_v28 = vld [vmem:[#allocation7 + $0x144] sm:$0xf] }
 0xba5   :  { %5478 = vmatpush.bf16.msra.mxu0 %v11124_v6  ;;  %v11221_v11 = vld [vmem:[#allocation7 + $0x150] sm:$0xf0]  ;;  %v11219_v54 = vld [vmem:[#allocation7 + $0x140] sm:$0xf]  ;;  %v13263_v39 = vld [vmem:[#allocation7 + $0x14c] sm:$0xf0]  ;;  %v11092_v63 = vor.u32 %v13231_v24, %v11091_v55  ;;  %v11096_v29 = vor.u32 %v13229_v37, %v11093_v27 }
 0xba6   :  { %5504 = vmatpush.bf16.msra.mxu2 %v11128_v8  ;;  %v11224_v30 = vor.u32 %v13261_v28, %v11221_v11  ;;  %v11075_v3 = vld [vmem:[#allocation7 + $0x20] sm:$0xf]  ;;  %v13227_v34 = vld [vmem:[#allocation7 + $0x2c] sm:$0xf0]  ;;  %v13225_v16 = vld [vmem:[#allocation7 + $0x24] sm:$0xf]  ;;  %v11220_v31 = vor.u32 %v13263_v39, %v11219_v54 }
 0xba7   :  { %5517 = vmatpush.bf16.msra.mxu3 %v11256_v38  ;;  %5491 = vmatpush.bf16.msra.mxu1 %v11252_v43  ;;  %v11077_v36 = vld [vmem:[#allocation7 + $0x30] sm:$0xf0]  ;;  %v13257_v17 = vld [vmem:[#allocation7 + $0x124] sm:$0xf]  ;;  %v11203_v42 = vld [vmem:[#allocation7 + $0x120] sm:$0xf]  ;;  %v11076_v47 = vor.u32 %v13227_v34, %v11075_v3 }
 0xba8   :  { %v11205_v40 = vld [vmem:[#allocation7 + $0x130] sm:$0xf0]  ;;  %v13259_v12 = vld [vmem:[#allocation7 + $0x12c] sm:$0xf0]  ;;  %v11059_v60 = vld [vmem:[#allocation7] sm:$0xf]  ;;  %v11080_v7 = vor.u32 %v13225_v16, %v11077_v36 }
 0xba9   :  { %5479 = vmatpush.bf16.msra.mxu0 %v11108_v20  ;;  %v13223_v18 = vld [vmem:[#allocation7 + $0xc] sm:$0xf0]  ;;  %v13221_v44 = vld [vmem:[#allocation7 + $0x4] sm:$0xf]  ;;  %v11208_v35 = vor.u32 %v13257_v17, %v11205_v40  ;;  %v11061_v23 = vld [vmem:[#allocation7 + $0x10] sm:$0xf0]  ;;  %v11204_v22 = vor.u32 %v13259_v12, %v11203_v42 }
 0xbaa   :  { %5505 = vmatpush.bf16.msra.mxu2 %v11112_v58  ;;  %v13253_v21 = vld [vmem:[#allocation7 + $0x104] sm:$0xf]  ;;  %v5073_v48 = vld [vmem:[#allocation4] sm:$0xff]  ;;  %v11189_v41 = vld [vmem:[#allocation7 + $0x110] sm:$0xf0]  ;;  %v11060_v53 = vor.u32 %v13223_v18, %v11059_v60  ;;  %v11064_v57 = vor.u32 %v13221_v44, %v11061_v23  ;;  %s11349_s0 = sld [smem:[#allocation6 + $0x3]] }
 0xbab   :  { %5518 = vmatpush.bf16.msra.mxu3 %v11240_v14  ;;  %5492 = vmatpush.bf16.msra.mxu1 %v11236_v26  ;;  %v11179_v9 = vld [vmem:[#allocation7 + $0xe8] sm:$0xf]  ;;  %v13252_v13 = vld [vmem:[#allocation7 + $0xf4] sm:$0xf0]  ;;  %v13250_v15 = vld [vmem:[#allocation7 + $0xec] sm:$0xf]  ;;  %v5149_v59 = vunpack.c.l.b16 %v5073_v48  ;;  %v11192_v0 = vor.u32 %v13253_v21, %v11189_v41  ;;  %v5150_v4 = vunpack.c.h.b16 %v5073_v48 }
 0xbac   :  { %v11181_v51 = vld [vmem:[#allocation7 + $0xf8] sm:$0xf0]  ;;  %v13282_v52 = vld [vmem:[#allocation7 + $0x1ec] sm:$0xf]  ;;  %v11187_v45 = vld [vmem:[#allocation7 + $0x100] sm:$0xf]  ;;  %v11180_v62 = vor.u32 %v13252_v13, %v11179_v9 }
 0xbad   :  { %5480 = vmatpush.bf16.msra.mxu0 %v11092_v63  ;;  %v11309_v33 = vld [vmem:[#allocation7 + $0x1f8] sm:$0xf0]  ;;  %v13255_v49 = vld [vmem:[#allocation7 + $0x10c] sm:$0xf0]  ;;  %v11307_v2 = vld [vmem:[#allocation7 + $0x1e8] sm:$0xf]  ;;  %v11184_v5 = vor.u32 %v13250_v15, %v11181_v51  ;;  %v16917_v43 = vpack.c.b16 %v5149_v59, %v5149_v59  ;;  %v16919_v1 = vpack.c.b16 %v5150_v4, %v5150_v4 }
 0xbae   :  { %5506 = vmatpush.bf16.msra.mxu2 %v11096_v29  ;;  %v13284_v32 = vld [vmem:[#allocation7 + $0x1f4] sm:$0xf0]  ;;  %v11163_v6 = vld [vmem:[#allocation7 + $0xc8] sm:$0xf]  ;;  %v11312_v8 = vor.u32 %v13282_v52, %v11309_v33  ;;  %v11188_v38 = vor.u32 %v13255_v49, %v11187_v45  ;;  %v13246_v50 = vld [vmem:[#allocation7 + $0xcc] sm:$0xf] }
 0xbaf   :  { %5519 = vmatpush.bf16.msra.mxu3 %v11224_v30  ;;  %5493 = vmatpush.bf16.msra.mxu1 %v11220_v31  ;;  %v13248_v10 = vld [vmem:[#allocation7 + $0xd4] sm:$0xf0]  ;;  %v11165_v46 = vld [vmem:[#allocation7 + $0xd8] sm:$0xf0]  ;;  %v11308_v25 = vor.u32 %v13284_v32, %v11307_v2  ;;  %v13278_v61 = vld [vmem:[#allocation7 + $0x1cc] sm:$0xf] }
 0xbb0   :  { %v11293_v56 = vld [vmem:[#allocation7 + $0x1d8] sm:$0xf0]  ;;  %v11291_v19 = vld [vmem:[#allocation7 + $0x1c8] sm:$0xf]  ;;  %v13280_v20 = vld [vmem:[#allocation7 + $0x1d4] sm:$0xf0]  ;;  %v11164_v58 = vor.u32 %v13248_v10, %v11163_v6  ;;  %v11168_v14 = vor.u32 %v13246_v50, %v11165_v46 }
 0xbb1   :  { %5481 = vmatpush.bf16.msra.mxu0 %v11076_v47  ;;  %v11147_v55 = vld [vmem:[#allocation7 + $0xa8] sm:$0xf]  ;;  %v11296_v24 = vor.u32 %v13278_v61, %v11293_v56  ;;  %v13244_v37 = vld [vmem:[#allocation7 + $0xb4] sm:$0xf0]  ;;  %v13242_v26 = vld [vmem:[#allocation7 + $0xac] sm:$0xf]  ;;  %v11292_v28 = vor.u32 %v13280_v20, %v11291_v19 }
 0xbb2   :  { %5507 = vmatpush.bf16.msra.mxu2 %v11080_v7  ;;  %v11149_v27 = vld [vmem:[#allocation7 + $0xb8] sm:$0xf0]  ;;  %v13274_v11 = vld [vmem:[#allocation7 + $0x1ac] sm:$0xf]  ;;  %v11275_v39 = vld [vmem:[#allocation7 + $0x1a8] sm:$0xf]  ;;  %v11148_v29 = vor.u32 %v13244_v37, %v11147_v55 }
 0xbb3   :  { %5520 = vmatpush.bf16.msra.mxu3 %v11208_v35  ;;  %5494 = vmatpush.bf16.msra.mxu1 %v11204_v22  ;;  %v11277_v54 = vld [vmem:[#allocation7 + $0x1b8] sm:$0xf0]  ;;  %v13276_v63 = vld [vmem:[#allocation7 + $0x1b4] sm:$0xf0]  ;;  %v11152_v30 = vor.u32 %v13242_v26, %v11149_v27  ;;  %v11131_v3 = vld [vmem:[#allocation7 + $0x88] sm:$0xf] }
 0xbb4   :  { %v11280_v34 = vor.u32 %v13274_v11, %v11277_v54  ;;  %v13240_v16 = vld [vmem:[#allocation7 + $0x94] sm:$0xf0]  ;;  %v13238_v31 = vld [vmem:[#allocation7 + $0x8c] sm:$0xf]  ;;  %v11133_v36 = vld [vmem:[#allocation7 + $0x98] sm:$0xf0]  ;;  %v11276_v17 = vor.u32 %v13276_v63, %v11275_v39 }
 0xbb5   :  { %5482 = vmatpush.bf16.msra.mxu0 %v11060_v53  ;;  %v13270_v40 = vld [vmem:[#allocation7 + $0x18c] sm:$0xf]  ;;  %v11261_v42 = vld [vmem:[#allocation7 + $0x198] sm:$0xf0]  ;;  %v11259_v12 = vld [vmem:[#allocation7 + $0x188] sm:$0xf]  ;;  %v11132_v60 = vor.u32 %v13240_v16, %v11131_v3  ;;  %v11136_v18 = vor.u32 %v13238_v31, %v11133_v36 }
 0xbb6   :  { %5508 = vmatpush.bf16.msra.mxu2 %v11064_v57  ;;  %v13272_v47 = vld [vmem:[#allocation7 + $0x194] sm:$0xf0]  ;;  %v11115_v44 = vld [vmem:[#allocation7 + $0x68] sm:$0xf]  ;;  %v11264_v7 = vor.u32 %v13270_v40, %v11261_v42  ;;  %v13234_v23 = vld [vmem:[#allocation7 + $0x6c] sm:$0xf] }
 0xbb7   :  { %5521 = vmatpush.bf16.msra.mxu3 %v11192_v0  ;;  %5495 = vmatpush.bf16.msra.mxu1 %v11188_v38  ;;  %v13236_v35 = vld [vmem:[#allocation7 + $0x74] sm:$0xf0]  ;;  %v11117_v21 = vld [vmem:[#allocation7 + $0x78] sm:$0xf0]  ;;  %v11260_v48 = vor.u32 %v13272_v47, %v11259_v12  ;;  %v13266_v22 = vld [vmem:[#allocation7 + $0x16c] sm:$0xf] }
 0xbb8   :  { %5483 = vmatmul.bf16.vlgmr.msra.gmra.mxu0 %v16917_v43  ;;  %v11245_v41 = vld [vmem:[#allocation7 + $0x178] sm:$0xf0]  ;;  %v11243_v9 = vld [vmem:[#allocation7 + $0x168] sm:$0xf]  ;;  %v13268_v13 = vld [vmem:[#allocation7 + $0x174] sm:$0xf0]  ;;  %v11116_v15 = vor.u32 %v13236_v35, %v11115_v44  ;;  %v11120_v51 = vor.u32 %v13234_v23, %v11117_v21 }
 0xbb9   :  { %5527 = vmatpush.bf16.msrb.mxu0 %v11180_v62  ;;  %5509 = vmatmul.bf16.vlgmr.msra.gmra.mxu2 %v16917_v43  ;;  %v11099_v52 = vld [vmem:[#allocation7 + $0x48] sm:$0xf]  ;;  %v11248_v53 = vor.u32 %v13266_v22, %v11245_v41  ;;  %v13232_v33 = vld [vmem:[#allocation7 + $0x54] sm:$0xf0]  ;;  %v13230_v45 = vld [vmem:[#allocation7 + $0x4c] sm:$0xf]  ;;  %v11244_v59 = vor.u32 %v13268_v13, %v11243_v9 }
 0xbba   :  { %5553 = vmatpush.bf16.msrb.mxu2 %v11184_v5  ;;  %5522 = vmatmul.bf16.vlgmr.msra.gmra.mxu3 %v16919_v1  ;;  %v11101_v49 = vld [vmem:[#allocation7 + $0x58] sm:$0xf0]  ;;  %v13262_v57 = vld [vmem:[#allocation7 + $0x14c] sm:$0xf]  ;;  %v11227_v2 = vld [vmem:[#allocation7 + $0x148] sm:$0xf]  ;;  %v11100_v4 = vor.u32 %v13232_v33, %v11099_v52 }
 0xbbb   :  { %5566 = vmatpush.bf16.msrb.mxu3 %v11312_v8  ;;  %5540 = vmatpush.bf16.msrb.mxu1 %v11308_v25  ;;  %v11229_v0 = vld [vmem:[#allocation7 + $0x158] sm:$0xf0]  ;;  %v13264_v32 = vld [vmem:[#allocation7 + $0x154] sm:$0xf0]  ;;  %v11104_v62 = vor.u32 %v13230_v45, %v11101_v49  ;;  %v11083_v5 = vld [vmem:[#allocation7 + $0x28] sm:$0xf] }
 0xbbc   :  { %5496 = vmatmul.bf16.vlgmr.msra.gmra.mxu1 %v16919_v1  ;;  %v11232_v6 = vor.u32 %v13262_v57, %v11229_v0  ;;  %v13228_v8 = vld [vmem:[#allocation7 + $0x34] sm:$0xf0]  ;;  %v13226_v38 = vld [vmem:[#allocation7 + $0x2c] sm:$0xf]  ;;  %v11085_v10 = vld [vmem:[#allocation7 + $0x38] sm:$0xf0]  ;;  %v11228_v50 = vor.u32 %v13264_v32, %v11227_v2 }
 0xbbd   :  { %5528 = vmatpush.bf16.msrb.mxu0 %v11164_v58  ;;  %v13258_v46 = vld [vmem:[#allocation7 + $0x12c] sm:$0xf]  ;;  %v11213_v25 = vld [vmem:[#allocation7 + $0x138] sm:$0xf0]  ;;  %v11211_v61 = vld [vmem:[#allocation7 + $0x128] sm:$0xf]  ;;  %v11084_v19 = vor.u32 %v13228_v8, %v11083_v5  ;;  %v11088_v20 = vor.u32 %v13226_v38, %v11085_v10 }
 0xbbe   :  { %5554 = vmatpush.bf16.msrb.mxu2 %v11168_v14  ;;  %v13260_v56 = vld [vmem:[#allocation7 + $0x134] sm:$0xf0]  ;;  %v11067_v58 = vld [vmem:[#allocation7 + $0x8] sm:$0xf]  ;;  %v11216_v14 = vor.u32 %v13258_v46, %v11213_v25  ;;  %v11069_v37 = vld [vmem:[#allocation7 + $0x18] sm:$0xf0] }
 0xbbf   :  { %5567 = vmatpush.bf16.msrb.mxu3 %v11296_v24  ;;  %5541 = vmatpush.bf16.msrb.mxu1 %v11292_v28  ;;  %v13224_v55 = vld [vmem:[#allocation7 + $0x14] sm:$0xf0]  ;;  %v13222_v24 = vld [vmem:[#allocation7 + $0xc] sm:$0xf]  ;;  %v11212_v26 = vor.u32 %v13260_v56, %v11211_v61  ;;  %v11197_v28 = vld [vmem:[#allocation7 + $0x118] sm:$0xf0] }
 0xbc0   :  { %v13254_v27 = vld [vmem:[#allocation7 + $0x10c] sm:$0xf]  ;;  %v11195_v11 = vld [vmem:[#allocation7 + $0x108] sm:$0xf]  ;;  %v13256_v54 = vld [vmem:[#allocation7 + $0x114] sm:$0xf0]  ;;  %v11068_v39 = vor.u32 %v13224_v55, %v11067_v58  ;;  %v11072_v63 = vor.u32 %v13222_v24, %v11069_v37 }
 0xbc1   :  { %5529 = vmatpush.bf16.msrb.mxu0 %v11148_v29  ;;  %v11200_v29 = vor.u32 %v13254_v27, %v11197_v28  ;;  %v16932_v3 = vld [vmem:[%s17356_s6] sm:$0xf]  ;;  %v13291_v35 = vld [vmem:[%s17358_s8 + $0x30] sm:$0xff]  ;;  %v13290_v41 = vld [vmem:[%s17358_s8 + $0x28] sm:$0xff]  ;;  %p11350_p4 = scmp.ne.s32.totalorder %s11349_s0, 0 }
 0xbc2   :  { %5555 = vmatpush.bf16.msrb.mxu2 %v11152_v30  ;;  %v11196_v30 = vor.u32 %v13256_v54, %v11195_v11  ;;  %v5141_v36 = vperm.slane %v16932_v3, 1  ;;  %v5142_v45 = vperm.slane %v16932_v3, 2  ;;  %v13287_v57 = vld [vmem:[%s17358_s8 + $0x10] sm:$0xff]  ;;  %v5143_v61 = vperm.slane %v16932_v3, 3  ;;  %v5579_v54 = vld [vmem:[#allocation3] sm:$0xff] }
 0xbc3   :  { %5568 = vmatpush.bf16.msrb.mxu3 %v11280_v34  ;;  %5542 = vmatpush.bf16.msrb.mxu1 %v11276_v17  ;;  %v5140_v34 = vperm.slane %v16932_v3, 0 }
 0xbc5   :  { %5530 = vmatpush.bf16.msrb.mxu0 %v11132_v60 }
 0xbc6   :  { %5556 = vmatpush.bf16.msrb.mxu2 %v11136_v18 }
 0xbc7   :  { %5569 = vmatpush.bf16.msrb.mxu3 %v11264_v7  ;;  %5543 = vmatpush.bf16.msrb.mxu1 %v11260_v48 }
 0xbc9   :  { %5531 = vmatpush.bf16.msrb.mxu0 %v11116_v15  ;;  %v13289_v15 = vld [vmem:[%s17358_s8 + $0x20] sm:$0xff] }
 0xbca   :  { %5557 = vmatpush.bf16.msrb.mxu2 %v11120_v51 }
 0xbcb   :  { %5570 = vmatpush.bf16.msrb.mxu3 %v11248_v53  ;;  %5544 = vmatpush.bf16.msrb.mxu1 %v11244_v59  ;;  %v13288_v53 = vld [vmem:[%s17358_s8 + $0x18] sm:$0xff] }
 0xbcd   :  { %5532 = vmatpush.bf16.msrb.mxu0 %v11100_v4 }
 0xbce   :  { %5558 = vmatpush.bf16.msrb.mxu2 %v11104_v62 }
 0xbcf   :  { %5571 = vmatpush.bf16.msrb.mxu3 %v11232_v6  ;;  %5545 = vmatpush.bf16.msrb.mxu1 %v11228_v50  ;;  %v13286_v6 = vld [vmem:[%s17358_s8 + $0x8] sm:$0xff] }
 0xbd1   :  { %5533 = vmatpush.bf16.msrb.mxu0 %v11084_v19 }
 0xbd2   :  { %5559 = vmatpush.bf16.msrb.mxu2 %v11088_v20 }
 0xbd3   :  { %5572 = vmatpush.bf16.msrb.mxu3 %v11216_v14  ;;  %5546 = vmatpush.bf16.msrb.mxu1 %v11212_v26  ;;  %v13285_v14 = vld [vmem:[%s17358_s8] sm:$0xff] }
 0xbd5   :  { %5534 = vmatpush.bf16.msrb.mxu0 %v11068_v39 }
 0xbd6   :  { %5560 = vmatpush.bf16.msrb.mxu2 %v11072_v63 }
 0xbd7   :  { %5573 = vmatpush.bf16.msrb.mxu3 %v11200_v29  ;;  %5547 = vmatpush.bf16.msrb.mxu1 %v11196_v30 }
 0xbd8   :  { %5535 = vmatmul.bf16.vlgmr.msrb.gmra.mxu0 %v16917_v43 }
 0xbd9   :  { %5561 = vmatmul.bf16.vlgmr.msrb.gmra.mxu2 %v16917_v43 }
 0xbda   :  { %5574 = vmatmul.bf16.vlgmr.msrb.gmra.mxu3 %v16919_v1  ;;  %5548 = vmatmul.bf16.vlgmr.msrb.gmra.mxu1 %v16919_v1  ;;  %v13292_v1 = vld [vmem:[%s17358_s8 + $0x38] sm:$0xff] }
 0xbdb   :  { %5715 = vmatpush.bf16.msra.mxu0 %v13292_v1 }
 0xbdf   :  { %5716 = vmatpush.bf16.msra.mxu0 %v13291_v35 }
 0xbe3   :  { %5717 = vmatpush.bf16.msra.mxu0 %v13290_v41 }
 0xbe7   :  { %5718 = vmatpush.bf16.msra.mxu0 %v13289_v15 }
 0xbeb   :  { %5719 = vmatpush.bf16.msra.mxu0 %v13288_v53 }
 0xbef   :  { %5720 = vmatpush.bf16.msra.mxu0 %v13287_v57 }
 0xbf3   :  { %5721 = vmatpush.bf16.msra.mxu0 %v13286_v6 }
 0xbf7   :  { %5722 = vmatpush.bf16.msra.mxu0 %v13285_v14 }
 0xc35   :  { %v5484_v16 = vpop.f32.mrf.mxu0 }
 0xc36   :  { %v5485_v31 = vadd.f32 %v5484_v16, %v5140_v34 }
 0xc39   :  { %v5497_v17 = vpop.f32.mrf.mxu1 }
 0xc3a   :  { %v5498_v40 = vadd.f32 %v5497_v17, %v5485_v31 }
 0xc3c   :  { %v5510_v42 = vpop.f32.mrf.mxu2  ;;  %v11313_v12 = vmul.f32 -1.442695, %v5498_v40 }
 0xc3d   :  { %v5511_v43 = vadd.f32 %v5510_v42, %v5141_v36  ;;  %v5523_v47 = vpop.f32.mrf.mxu3  ;;  %v5486_v18 = vpop.f32.mrf.mxu0 }
 0xc3e   :  { %13756 = vpow2.f32 %v11313_v12 }
 0xc3f   :  { %v5524_v60 = vadd.f32 %v5523_v47, %v5511_v43 }
 0xc41   :  { %v11314_v44 = vmul.f32 -1.442695, %v5524_v60  ;;  %v5499_v7 = vpop.f32.mrf.mxu1 }
 0xc43   :  { %13758 = vpow2.f32 %v11314_v44 }
 0xc44   :  { %v13757_v23 = vpop.eup %13756  ;;  %v5512_v21 = vpop.f32.mrf.mxu2 }
 0xc45   :  { %v5583_v48 = vadd.f32 1.0, %v13757_v23  ;;  %v5525_v22 = vpop.f32.mrf.mxu3 }
 0xc47   :  { %13760 = vrcp.f32 %v5583_v48  ;;  %vm5589_vm10 = vweird.f32 %v5583_v48  ;;  %v5593_v32 = vand.u32 2147483647, %v5583_v48  ;;  %v5595_v5 = vand.u32 2147483648, %v5583_v48 }
 0xc49   :  { %v13759_v9 = vpop.eup %13758  ;;  %v5596_v58 = vor.u32 1.1754944e-38, %v5595_v5  ;;  %vm5594_vm0 = vcmp.eq.f32.partialorder %v5593_v32, 8.507059e+37 }
 0xc4a   :  { %v5602_v13 = vadd.f32 1.0, %v13759_v9  ;;  %v13755_v9 = vld [vmem:[%s17359_s9] ss:$0 sm:$0xff] }
 0xc4c   :  { %13762 = vrcp.f32 %v5602_v13  ;;  %vm5608_vm12 = vweird.f32 %v5602_v13  ;;  %v5614_v4 = vand.u32 2147483648, %v5602_v13  ;;  %v5612_v50 = vand.u32 2147483647, %v5602_v13 }
 0xc4d   :  { %v13761_v51 = vpop.eup %13760 }
 0xc4e   :  { %v5585_v52 = vmul.f32 %v13761_v51, %v5583_v48  ;;  %vm5590_vm11 = vweird.f32 %v13761_v51  ;;  %v5615_v20 = vor.u32 1.1754944e-38, %v5614_v4  ;;  %vm5613_vm1 = vcmp.eq.f32.partialorder %v5612_v50, 8.507059e+37 }
 0xc4f   :  { %vm16959_vm14 = vmor %vm5589_vm10, %vm5590_vm11 }
 0xc50   :  { %v5586_v33 = vsub.f32 1.0, %v5585_v52 }
 0xc52   :  { %v13763_v49 = vpop.eup %13762  ;;  %v5587_v59 = vmul.f32 %v13761_v51, %v5586_v33 }
 0xc53   :  { %v5604_v0 = vmul.f32 %v13763_v49, %v5602_v13  ;;  %vm5609_vm13 = vweird.f32 %v13763_v49 }
 0xc54   :  { %v5588_v10 = vadd.f32 %v13761_v51, %v5587_v59  ;;  %vm16965_vm15 = vmor %vm5608_vm12, %vm5609_vm13 }
 0xc55   :  { %v5536_v2 = vpop.f32.mrf.mxu0  ;;  %v5605_v8 = vsub.f32 1.0, %v5604_v0 }
 0xc56   :  { %v5537_v62 = vadd.f32 %v5536_v2, %v5142_v45  ;;  %v5592_v55 = vsel %vm16959_vm14, %v13761_v51, %v5588_v10 }
 0xc57   :  { %v5549_v38 = vpop.f32.mrf.mxu1  ;;  %v5606_v56 = vmul.f32 %v13763_v49, %v5605_v8  ;;  %v5597_v39 = vsel %vm5594_vm0, %v5596_v58, %v5592_v55 }
 0xc58   :  { %v5550_v46 = vadd.f32 %v5549_v38, %v5537_v62 }
 0xc59   :  { %v5607_v24 = vadd.f32 %v13763_v49, %v5606_v56 }
 0xc5a   :  { %13764 = vtanh.f32 %v5550_v46 }
 0xc5b   :  { %v5611_v28 = vsel %vm16965_vm15, %v13763_v49, %v5607_v24 }
 0xc5c   :  { %v5562_v37 = vpop.f32.mrf.mxu2  ;;  %v5616_v63 = vsel %vm5613_vm1, %v5615_v20, %v5611_v28 }
 0xc5d   :  { %v5563_v26 = vadd.f32 %v5562_v37, %v5143_v61  ;;  %v5575_v27 = vpop.f32.mrf.mxu3  ;;  %v5538_v11 = vpop.f32.mrf.mxu0  ;;  %v5638_v16 = vmul.f32 %v5616_v63, %v5579_v54 }
 0xc5f   :  { %v5576_v29 = vadd.f32 %v5575_v27, %v5563_v26  ;;  %v5551_v30 = vpop.f32.mrf.mxu1 }
 0xc60   :  { %v13765_v3 = vpop.eup %13764 }
 0xc61   :  { %v11315_v34 = vmul.f32 -1.442695, %v5576_v29  ;;  %v5639_v31 = vmul.f32 %v13765_v3, %v5597_v39 }
 0xc63   :  { %13766 = vpow2.f32 %v11315_v34  ;;  %v5640_v36 = vadd.f32 %v5639_v31, %v5638_v16 }
 0xc64   :  { %v5564_v17 = vpop.f32.mrf.mxu2 }
 0xc65   :  { %v5577_v40 = vpop.f32.mrf.mxu3  ;;  %5644 = vst [vmem:[#allocation3] sm:$0xff] %v5640_v36 }
 0xc69   :  { %v13767_v42 = vpop.eup %13766 }
 0xc6a   :  { %v5622_v12 = vadd.f32 1.0, %v13767_v42 }
 0xc6c   :  { %13768 = vrcp.f32 %v5622_v12  ;;  %v5634_v60 = vand.u32 2147483648, %v5622_v12  ;;  %v5632_v44 = vand.u32 2147483647, %v5622_v12  ;;  %vm5628_vm3 = vweird.f32 %v5622_v12 }
 0xc6d   :  { %13770 = vtanh.f32 %v5640_v36 }
 0xc6e   :  { %v5635_v35 = vor.u32 1.1754944e-38, %v5634_v60  ;;  %vm5633_vm5 = vcmp.eq.f32.partialorder %v5632_v44, 8.507059e+37 }
 0xc72   :  { %v13769_v43 = vpop.eup %13768 }
 0xc73   :  { %v5624_v47 = vmul.f32 %v13769_v43, %v5622_v12  ;;  %vm5629_vm2 = vweird.f32 %v13769_v43  ;;  %v13771_v21 = vpop.eup %13770 }
 0xc74   :  { %vm5630_vm4 = vmor %vm5628_vm3, %vm5629_vm2 }
 0xc75   :  { %v5625_v1 = vsub.f32 1.0, %v5624_v47 }
 0xc77   :  { %v5626_v18 = vmul.f32 %v13769_v43, %v5625_v1 }
 0xc79   :  { %v5627_v7 = vadd.f32 %v13769_v43, %v5626_v18 }
 0xc7b   :  { %v5631_v23 = vsel %vm5630_vm4, %v13769_v43, %v5627_v7 }
 0xc7c   :  { %v5636_v48 = vsel %vm5633_vm5, %v5635_v35, %v5631_v23 }
 0xc7d   :  { %v5642_v22 = vmul.f32 %v13771_v21, %v5636_v48 }
 0xc7f   :  { %v5645_v41 = vpack.c.bf16 %v5642_v22, %v5642_v22 }
 0xc81   :  { %5646 = vst [vmem:[#allocation4 + $0x4] sm:$0xf] %v5645_v41  ;;  %5723 = vmatmul.bf16.vlgmr.msra.gmra.mxu0 %v5645_v41 }
 0xcfe   :  { %v5724_v13 = vpop.f32.mrf.mxu0 }
 0xcff   :  { %v5725_v15 = vadd.f32 %v13755_v9, %v5724_v13 }
 0xd01   :  { %11348 = vst [vmem:[%s17360_s10 + $0x10] sm:$0xff] %v5725_v15 }
 0xd02   :  { %5734 = sbr.rel (%p11350_p4) target bundleno = 3837 (0xefd), region = 61 }
 0xd06   :  { %v5726_v51 = vpop.f32.mrf.mxu0 }
 0xd07   :  { %v5735_v52 = vlaneseq  ;;  %v13300_v0 = vld [vmem:[%s17357_s7 + $0x38] sm:$0xff]  ;;  %v13299_v2 = vld [vmem:[%s17357_s7 + $0x30] sm:$0xff]  ;;  %v13298_v32 = vld [vmem:[%s17357_s7 + $0x28] sm:$0xff]  ;;  %v13887_v58 = vmov 1.0|1.0  }
 0xd08   :  { %5825 = vmatpush.bf16.msra.mxu0 %v13300_v0  ;;  %v13297_v4 = vld [vmem:[%s17357_s7 + $0x20] sm:$0xff]  ;;  %v13296_v62 = vld [vmem:[%s17357_s7 + $0x18] sm:$0xff]  ;;  %v13295_v5 = vld [vmem:[%s17357_s7 + $0x10] sm:$0xff] }
 0xd09   :  { %v5736_v53 = vand.u32 127, %v5735_v52  ;;  %v13294_v6 = vld [vmem:[%s17357_s7 + $0x8] sm:$0xff]  ;;  %v13293_v46 = vld [vmem:[%s17357_s7] sm:$0xff] }
 0xd0b   :  { %vm5737_vm6 = vcmp.lt.s32.totalorder %v5736_v53, 16 }
 0xd0c   :  { %v5738_v33 = vsel %vm5737_vm6, %v5725_v15, -1e+30  ;;  %5826 = vmatpush.bf16.msra.mxu0 %v13299_v2 }
 0xd0d   :  { %5739 = vmax.xlane.f32.xlu0 %v5738_v33 }
 0xd10   :  { %5827 = vmatpush.bf16.msra.mxu0 %v13298_v32 }
 0xd14   :  { %5828 = vmatpush.bf16.msra.mxu0 %v13297_v4 }
 0xd18   :  { %5829 = vmatpush.bf16.msra.mxu0 %v13296_v62 }
 0xd1c   :  { %5830 = vmatpush.bf16.msra.mxu0 %v13295_v5 }
 0xd20   :  { %5831 = vmatpush.bf16.msra.mxu0 %v13294_v6 }
 0xd24   :  { %5832 = vmatpush.bf16.msra.mxu0 %v13293_v46 }
 0xd80   :  { %v5740_v45 = vpop.xlane.xlu0 %5739 }
 0xd81   :  { %vm5741_vm7 = vcmp.ge.f32.partialorder %v5738_v33, %v5740_v45 }
 0xd82   :  { %v5742_v49 = vsel %vm5741_vm7, %v5736_v53, 128 }
 0xd83   :  { %v5744_v59 = vshra.s32 %v5742_v49, 16  ;;  %v5743_v8 = vand.u32 65535, %v5742_v49 }
 0xd85   :  { %v5746_v57 = vcvt.s32.f32 %v5744_v59  ;;  %v5745_v10 = vcvt.s32.f32 %v5743_v8 }
 0xd87   :  { %5747 = vmin.xlane.f32.xlu0 %v5746_v57 }
 0xdfa   :  { %v5748_v38 = vpop.xlane.xlu0 %5747 }
 0xdfb   :  { %vm5749_vm8 = vcmp.eq.f32.partialorder %v5746_v57, %v5748_v38  ;;  %v5754_v25 = vcvt.f32.s32 %v5748_v38 }
 0xdfc   :  { %v5750_v50 = vsel %vm5749_vm8, %v5745_v10, inf }
 0xdfd   :  { %5751 = vmin.xlane.f32.xlu1 %v5750_v50  ;;  %v5755_v56 = vshll.u32 %v5754_v25, 16 }
 0xe70   :  { %v5752_v61 = vpop.xlane.xlu1 %5751 }
 0xe71   :  { %v5753_v19 = vcvt.f32.s32 %v5752_v61 }
 0xe73   :  { %v5756_v20 = vadd.s32 %v5755_v56, %v5753_v19 }
 0xe75   :  { %vm5757_vm9 = vcmp.eq.s32.totalorder %v5736_v53, %v5756_v20 }
 0xe76   :  { %vm11384_vm10 = vmpackc.low %vm5757_vm9, %vm5757_vm9 }
 0xe77   :  { %11385 = vmatmul.msk.bf16.vlgmr.msra.gmra.mxu0 %vm11384_vm10, %v13887_v58 }
 0xef4   :  { %v5834_v14 = vpop.f32.mrf.mxu0 }
 0xef5   :  { %v5838_v55 = vpack.c.bf16 %v5834_v14, %v5834_v14 }
 0xef7   :  { %5839 = vst [vmem:[#allocation4] sm:$0xf] %v5838_v55 }
 0xefc   :  { %v5836_v24 = vpop.f32.mrf.mxu0 }
 0xefd PF:  { %s11386_s17 = sld [smem:[#allocation6 + $0x3]] }
 0xf03   :  { %p11387_p5 = scmp.eq.s32.totalorder %s11386_s17, 0 }
 0xf05   :  { %5844 = sbr.rel (%p11387_p5) target bundleno = 3852 (0xf0c), region = 65 }
 0xf0a   :  { %v11388_v37 = vld [vmem:[%s17352_s2 + $0xc] sm:$0xf] }
 0xf0b   :  { %5847 = vst [vmem:[#allocation4] sm:$0xf] %v11388_v37 }
 0xf0c PF:  { %v11503_v26 = vld [vmem:[#allocation7 + $0xe0] sm:$0xf]  ;;  %v13331_v27 = vld [vmem:[#allocation7 + $0xec] sm:$0xf0]  ;;  %v13329_v28 = vld [vmem:[#allocation7 + $0xe4] sm:$0xf] }
 0xf0d   :  { %v11504_v11 = vor.u32 %v13331_v27, %v11503_v26  ;;  %v11505_v54 = vld [vmem:[#allocation7 + $0xf0] sm:$0xf0]  ;;  %v13361_v39 = vld [vmem:[#allocation7 + $0x1e4] sm:$0xf]  ;;  %v11631_v3 = vld [vmem:[#allocation7 + $0x1e0] sm:$0xf] }
 0xf0e   :  { %v11633_v63 = vld [vmem:[#allocation7 + $0x1f0] sm:$0xf0]  ;;  %v11508_v29 = vor.u32 %v13329_v28, %v11505_v54  ;;  %v13363_v34 = vld [vmem:[#allocation7 + $0x1ec] sm:$0xf0]  ;;  %v11487_v16 = vld [vmem:[#allocation7 + $0xc0] sm:$0xf] }
 0xf0f   :  { %v11636_v30 = vor.u32 %v13361_v39, %v11633_v63  ;;  %6250 = vmatpush.bf16.msra.mxu0 %v11504_v11  ;;  %v11632_v31 = vor.u32 %v13363_v34, %v11631_v3  ;;  %v13327_v36 = vld [vmem:[#allocation7 + $0xcc] sm:$0xf0]  ;;  %v13325_v17 = vld [vmem:[#allocation7 + $0xc4] sm:$0xf]  ;;  %v11489_v40 = vld [vmem:[#allocation7 + $0xd0] sm:$0xf0] }
 0xf10   :  { %6276 = vmatpush.bf16.msra.mxu2 %v11508_v29  ;;  %v11488_v42 = vor.u32 %v13327_v36, %v11487_v16  ;;  %v11492_v12 = vor.u32 %v13325_v17, %v11489_v40  ;;  %v13357_v43 = vld [vmem:[#allocation7 + $0x1c4] sm:$0xf]  ;;  %v11617_v47 = vld [vmem:[#allocation7 + $0x1d0] sm:$0xf0]  ;;  %v11615_v1 = vld [vmem:[#allocation7 + $0x1c0] sm:$0xf] }
 0xf11   :  { %6289 = vmatpush.bf16.msra.mxu3 %v11636_v30  ;;  %6263 = vmatpush.bf16.msra.mxu1 %v11632_v31  ;;  %v11620_v60 = vor.u32 %v13357_v43, %v11617_v47  ;;  %v13359_v18 = vld [vmem:[#allocation7 + $0x1cc] sm:$0xf0]  ;;  %v11471_v44 = vld [vmem:[#allocation7 + $0xa0] sm:$0xf]  ;;  %v13321_v23 = vld [vmem:[#allocation7 + $0xa4] sm:$0xf] }
 0xf12   :  { %v13323_v7 = vld [vmem:[#allocation7 + $0xac] sm:$0xf0]  ;;  %v11616_v35 = vor.u32 %v13359_v18, %v11615_v1  ;;  %v11473_v21 = vld [vmem:[#allocation7 + $0xb0] sm:$0xf0]  ;;  %v13353_v48 = vld [vmem:[#allocation7 + $0x1a4] sm:$0xf] }
 0xf13   :  { %6251 = vmatpush.bf16.msra.mxu0 %v11488_v42  ;;  %v11472_v22 = vor.u32 %v13323_v7, %v11471_v44  ;;  %v11601_v41 = vld [vmem:[#allocation7 + $0x1b0] sm:$0xf0]  ;;  %v11599_v9 = vld [vmem:[#allocation7 + $0x1a0] sm:$0xf]  ;;  %v13355_v13 = vld [vmem:[#allocation7 + $0x1ac] sm:$0xf0]  ;;  %v11476_v15 = vor.u32 %v13321_v23, %v11473_v21 }
 0xf14   :  { %6277 = vmatpush.bf16.msra.mxu2 %v11492_v12  ;;  %v11604_v51 = vor.u32 %v13353_v48, %v11601_v41  ;;  %v11455_v52 = vld [vmem:[#allocation7 + $0x80] sm:$0xf]  ;;  %v13319_v53 = vld [vmem:[#allocation7 + $0x8c] sm:$0xf0]  ;;  %v13317_v33 = vld [vmem:[#allocation7 + $0x84] sm:$0xf]  ;;  %v11600_v45 = vor.u32 %v13355_v13, %v11599_v9 }
 0xf15   :  { %6290 = vmatpush.bf16.msra.mxu3 %v11620_v60  ;;  %6264 = vmatpush.bf16.msra.mxu1 %v11616_v35  ;;  %v11457_v49 = vld [vmem:[#allocation7 + $0x90] sm:$0xf0]  ;;  %v13349_v59 = vld [vmem:[#allocation7 + $0x184] sm:$0xf]  ;;  %v11583_v0 = vld [vmem:[#allocation7 + $0x180] sm:$0xf]  ;;  %v11456_v32 = vor.u32 %v13319_v53, %v11455_v52 }
 0xf16   :  { %v11585_v57 = vld [vmem:[#allocation7 + $0x190] sm:$0xf0]  ;;  %v13351_v2 = vld [vmem:[#allocation7 + $0x18c] sm:$0xf0]  ;;  %v11460_v4 = vor.u32 %v13317_v33, %v11457_v49  ;;  %v11439_v5 = vld [vmem:[#allocation7 + $0x60] sm:$0xf] }
 0xf17   :  { %6252 = vmatpush.bf16.msra.mxu0 %v11472_v22  ;;  %v11588_v62 = vor.u32 %v13349_v59, %v11585_v57  ;;  %v13315_v6 = vld [vmem:[#allocation7 + $0x6c] sm:$0xf0]  ;;  %v13313_v8 = vld [vmem:[#allocation7 + $0x64] sm:$0xf]  ;;  %v11584_v38 = vor.u32 %v13351_v2, %v11583_v0  ;;  %v11441_v10 = vld [vmem:[#allocation7 + $0x70] sm:$0xf0] }
 0xf18   :  { %6278 = vmatpush.bf16.msra.mxu2 %v11476_v15  ;;  %v13345_v50 = vld [vmem:[#allocation7 + $0x164] sm:$0xf]  ;;  %v11569_v46 = vld [vmem:[#allocation7 + $0x170] sm:$0xf0]  ;;  %v11567_v25 = vld [vmem:[#allocation7 + $0x160] sm:$0xf]  ;;  %v11440_v56 = vor.u32 %v13315_v6, %v11439_v5  ;;  %v11444_v19 = vor.u32 %v13313_v8, %v11441_v10 }
 0xf19   :  { %6291 = vmatpush.bf16.msra.mxu3 %v11604_v51  ;;  %6265 = vmatpush.bf16.msra.mxu1 %v11600_v45  ;;  %v13347_v61 = vld [vmem:[#allocation7 + $0x16c] sm:$0xf0]  ;;  %v11572_v20 = vor.u32 %v13345_v50, %v11569_v46  ;;  %v11423_v58 = vld [vmem:[#allocation7 + $0x40] sm:$0xf]  ;;  %v13309_v55 = vld [vmem:[#allocation7 + $0x44] sm:$0xf] }
 0xf1a   :  { %v13311_v14 = vld [vmem:[#allocation7 + $0x4c] sm:$0xf0]  ;;  %v11568_v24 = vor.u32 %v13347_v61, %v11567_v25  ;;  %v11425_v37 = vld [vmem:[#allocation7 + $0x50] sm:$0xf0]  ;;  %v13341_v26 = vld [vmem:[#allocation7 + $0x144] sm:$0xf] }
 0xf1b   :  { %6253 = vmatpush.bf16.msra.mxu0 %v11456_v32  ;;  %v11553_v27 = vld [vmem:[#allocation7 + $0x150] sm:$0xf0]  ;;  %v11551_v28 = vld [vmem:[#allocation7 + $0x140] sm:$0xf]  ;;  %v13343_v11 = vld [vmem:[#allocation7 + $0x14c] sm:$0xf0]  ;;  %v11424_v54 = vor.u32 %v13311_v14, %v11423_v58  ;;  %v11428_v39 = vor.u32 %v13309_v55, %v11425_v37 }
 0xf1c   :  { %6279 = vmatpush.bf16.msra.mxu2 %v11460_v4  ;;  %v11556_v63 = vor.u32 %v13341_v26, %v11553_v27  ;;  %v11407_v29 = vld [vmem:[#allocation7 + $0x20] sm:$0xf]  ;;  %v13307_v30 = vld [vmem:[#allocation7 + $0x2c] sm:$0xf0]  ;;  %v13305_v3 = vld [vmem:[#allocation7 + $0x24] sm:$0xf]  ;;  %v11552_v34 = vor.u32 %v13343_v11, %v11551_v28 }
 0xf1d   :  { %6292 = vmatpush.bf16.msra.mxu3 %v11588_v62  ;;  %6266 = vmatpush.bf16.msra.mxu1 %v11584_v38  ;;  %v11409_v16 = vld [vmem:[#allocation7 + $0x30] sm:$0xf0]  ;;  %v13337_v31 = vld [vmem:[#allocation7 + $0x124] sm:$0xf]  ;;  %v11535_v17 = vld [vmem:[#allocation7 + $0x120] sm:$0xf]  ;;  %v11408_v42 = vor.u32 %v13307_v30, %v11407_v29 }
 0xf1e   :  { %v11537_v36 = vld [vmem:[#allocation7 + $0x130] sm:$0xf0]  ;;  %v13339_v40 = vld [vmem:[#allocation7 + $0x12c] sm:$0xf0]  ;;  %v11391_v12 = vld [vmem:[#allocation7] sm:$0xf]  ;;  %v11412_v1 = vor.u32 %v13305_v3, %v11409_v16 }
 0xf1f   :  { %6254 = vmatpush.bf16.msra.mxu0 %v11440_v56  ;;  %v13303_v43 = vld [vmem:[#allocation7 + $0xc] sm:$0xf0]  ;;  %v13301_v47 = vld [vmem:[#allocation7 + $0x4] sm:$0xf]  ;;  %v11540_v60 = vor.u32 %v13337_v31, %v11537_v36  ;;  %v11393_v18 = vld [vmem:[#allocation7 + $0x10] sm:$0xf0]  ;;  %v11536_v35 = vor.u32 %v13339_v40, %v11535_v17 }
 0xf20   :  { %6280 = vmatpush.bf16.msra.mxu2 %v11444_v19  ;;  %v13333_v44 = vld [vmem:[#allocation7 + $0x104] sm:$0xf]  ;;  %v5848_v7 = vld [vmem:[#allocation4] sm:$0xff]  ;;  %v11521_v23 = vld [vmem:[#allocation7 + $0x110] sm:$0xf0]  ;;  %v11392_v13 = vor.u32 %v13303_v43, %v11391_v12  ;;  %v11396_v33 = vor.u32 %v13301_v47, %v11393_v18  ;;  %s11681_s14 = sld [smem:[#allocation6 + $0x4]] }
 0xf21   :  { %6293 = vmatpush.bf16.msra.mxu3 %v11572_v20  ;;  %6267 = vmatpush.bf16.msra.mxu1 %v11568_v24  ;;  %v11511_v21 = vld [vmem:[#allocation7 + $0xe8] sm:$0xf]  ;;  %v13332_v48 = vld [vmem:[#allocation7 + $0xf4] sm:$0xf0]  ;;  %v13330_v22 = vld [vmem:[#allocation7 + $0xec] sm:$0xf]  ;;  %v5924_v53 = vunpack.c.l.b16 %v5848_v7  ;;  %v11524_v45 = vor.u32 %v13333_v44, %v11521_v23  ;;  %v5925_v57 = vunpack.c.h.b16 %v5848_v7 }
 0xf22   :  { %v11513_v41 = vld [vmem:[#allocation7 + $0xf8] sm:$0xf0]  ;;  %v13362_v9 = vld [vmem:[#allocation7 + $0x1ec] sm:$0xf]  ;;  %v11519_v51 = vld [vmem:[#allocation7 + $0x100] sm:$0xf]  ;;  %v11512_v0 = vor.u32 %v13332_v48, %v11511_v21 }
 0xf23   :  { %6255 = vmatpush.bf16.msra.mxu0 %v11424_v54  ;;  %v11641_v15 = vld [vmem:[#allocation7 + $0x1f8] sm:$0xf0]  ;;  %v13335_v52 = vld [vmem:[#allocation7 + $0x10c] sm:$0xf0]  ;;  %v11639_v49 = vld [vmem:[#allocation7 + $0x1e8] sm:$0xf]  ;;  %v11516_v2 = vor.u32 %v13330_v22, %v11513_v41  ;;  %v17009_v38 = vpack.c.b16 %v5924_v53, %v5924_v53  ;;  %v17011_v25 = vpack.c.b16 %v5925_v57, %v5925_v57 }
 0xf24   :  { %6281 = vmatpush.bf16.msra.mxu2 %v11428_v39  ;;  %v13364_v59 = vld [vmem:[#allocation7 + $0x1f4] sm:$0xf0]  ;;  %v11495_v32 = vld [vmem:[#allocation7 + $0xc8] sm:$0xf]  ;;  %v11644_v4 = vor.u32 %v13362_v9, %v11641_v15  ;;  %v11520_v62 = vor.u32 %v13335_v52, %v11519_v51  ;;  %v13326_v6 = vld [vmem:[#allocation7 + $0xcc] sm:$0xf] }
 0xf25   :  { %6294 = vmatpush.bf16.msra.mxu3 %v11556_v63  ;;  %6268 = vmatpush.bf16.msra.mxu1 %v11552_v34  ;;  %v13328_v5 = vld [vmem:[#allocation7 + $0xd4] sm:$0xf0]  ;;  %v11497_v8 = vld [vmem:[#allocation7 + $0xd8] sm:$0xf0]  ;;  %v11640_v10 = vor.u32 %v13364_v59, %v11639_v49  ;;  %v13358_v50 = vld [vmem:[#allocation7 + $0x1cc] sm:$0xf] }
 0xf26   :  { %v11625_v46 = vld [vmem:[#allocation7 + $0x1d8] sm:$0xf0]  ;;  %v11623_v61 = vld [vmem:[#allocation7 + $0x1c8] sm:$0xf]  ;;  %v13360_v56 = vld [vmem:[#allocation7 + $0x1d4] sm:$0xf0]  ;;  %v11496_v19 = vor.u32 %v13328_v5, %v11495_v32  ;;  %v11500_v20 = vor.u32 %v13326_v6, %v11497_v8 }
 0xf27   :  { %6256 = vmatpush.bf16.msra.mxu0 %v11408_v42  ;;  %v11479_v58 = vld [vmem:[#allocation7 + $0xa8] sm:$0xf]  ;;  %v11628_v14 = vor.u32 %v13358_v50, %v11625_v46  ;;  %v13324_v55 = vld [vmem:[#allocation7 + $0xb4] sm:$0xf0]  ;;  %v13322_v24 = vld [vmem:[#allocation7 + $0xac] sm:$0xf]  ;;  %v11624_v26 = vor.u32 %v13360_v56, %v11623_v61 }
 0xf28   :  { %6282 = vmatpush.bf16.msra.mxu2 %v11412_v1  ;;  %v11481_v37 = vld [vmem:[#allocation7 + $0xb8] sm:$0xf0]  ;;  %v13354_v27 = vld [vmem:[#allocation7 + $0x1ac] sm:$0xf]  ;;  %v11607_v11 = vld [vmem:[#allocation7 + $0x1a8] sm:$0xf]  ;;  %v11480_v39 = vor.u32 %v13324_v55, %v11479_v58 }
 0xf29   :  { %6295 = vmatpush.bf16.msra.mxu3 %v11540_v60  ;;  %6269 = vmatpush.bf16.msra.mxu1 %v11536_v35  ;;  %v11609_v28 = vld [vmem:[#allocation7 + $0x1b8] sm:$0xf0]  ;;  %v13356_v54 = vld [vmem:[#allocation7 + $0x1b4] sm:$0xf0]  ;;  %v11484_v63 = vor.u32 %v13322_v24, %v11481_v37  ;;  %v11463_v29 = vld [vmem:[#allocation7 + $0x88] sm:$0xf] }
 0xf2a   :  { %v11612_v30 = vor.u32 %v13354_v27, %v11609_v28  ;;  %v13320_v3 = vld [vmem:[#allocation7 + $0x94] sm:$0xf0]  ;;  %v13318_v34 = vld [vmem:[#allocation7 + $0x8c] sm:$0xf]  ;;  %v11465_v16 = vld [vmem:[#allocation7 + $0x98] sm:$0xf0]  ;;  %v11608_v31 = vor.u32 %v13356_v54, %v11607_v11 }
 0xf2b   :  { %6257 = vmatpush.bf16.msra.mxu0 %v11392_v13  ;;  %v13350_v36 = vld [vmem:[#allocation7 + $0x18c] sm:$0xf]  ;;  %v11593_v17 = vld [vmem:[#allocation7 + $0x198] sm:$0xf0]  ;;  %v11591_v40 = vld [vmem:[#allocation7 + $0x188] sm:$0xf]  ;;  %v11464_v12 = vor.u32 %v13320_v3, %v11463_v29  ;;  %v11468_v43 = vor.u32 %v13318_v34, %v11465_v16 }
 0xf2c   :  { %6283 = vmatpush.bf16.msra.mxu2 %v11396_v33  ;;  %v13352_v42 = vld [vmem:[#allocation7 + $0x194] sm:$0xf0]  ;;  %v11447_v47 = vld [vmem:[#allocation7 + $0x68] sm:$0xf]  ;;  %v11596_v1 = vor.u32 %v13350_v36, %v11593_v17  ;;  %v13314_v18 = vld [vmem:[#allocation7 + $0x6c] sm:$0xf] }
 0xf2d   :  { %6296 = vmatpush.bf16.msra.mxu3 %v11524_v45  ;;  %6270 = vmatpush.bf16.msra.mxu1 %v11520_v62  ;;  %v13316_v60 = vld [vmem:[#allocation7 + $0x74] sm:$0xf0]  ;;  %v11449_v44 = vld [vmem:[#allocation7 + $0x78] sm:$0xf0]  ;;  %v11592_v7 = vor.u32 %v13352_v42, %v11591_v40  ;;  %v13346_v35 = vld [vmem:[#allocation7 + $0x16c] sm:$0xf] }
 0xf2e   :  { %6258 = vmatmul.bf16.vlgmr.msra.gmra.mxu0 %v17009_v38  ;;  %v11577_v23 = vld [vmem:[#allocation7 + $0x178] sm:$0xf0]  ;;  %v11575_v21 = vld [vmem:[#allocation7 + $0x168] sm:$0xf]  ;;  %v13348_v48 = vld [vmem:[#allocation7 + $0x174] sm:$0xf0]  ;;  %v11448_v22 = vor.u32 %v13316_v60, %v11447_v47  ;;  %v11452_v41 = vor.u32 %v13314_v18, %v11449_v44 }
 0xf2f   :  { %6302 = vmatpush.bf16.msrb.mxu0 %v11512_v0  ;;  %6284 = vmatmul.bf16.vlgmr.msra.gmra.mxu2 %v17009_v38  ;;  %v11431_v9 = vld [vmem:[#allocation7 + $0x48] sm:$0xf]  ;;  %v11580_v13 = vor.u32 %v13346_v35, %v11577_v23  ;;  %v13312_v15 = vld [vmem:[#allocation7 + $0x54] sm:$0xf0]  ;;  %v13310_v51 = vld [vmem:[#allocation7 + $0x4c] sm:$0xf]  ;;  %v11576_v53 = vor.u32 %v13348_v48, %v11575_v21 }
 0xf30   :  { %6328 = vmatpush.bf16.msrb.mxu2 %v11516_v2  ;;  %6297 = vmatmul.bf16.vlgmr.msra.gmra.mxu3 %v17011_v25  ;;  %v11433_v52 = vld [vmem:[#allocation7 + $0x58] sm:$0xf0]  ;;  %v13342_v33 = vld [vmem:[#allocation7 + $0x14c] sm:$0xf]  ;;  %v11559_v49 = vld [vmem:[#allocation7 + $0x148] sm:$0xf]  ;;  %v11432_v57 = vor.u32 %v13312_v15, %v11431_v9 }
 0xf31   :  { %6341 = vmatpush.bf16.msrb.mxu3 %v11644_v4  ;;  %6315 = vmatpush.bf16.msrb.mxu1 %v11640_v10  ;;  %v11561_v45 = vld [vmem:[#allocation7 + $0x158] sm:$0xf0]  ;;  %v13344_v59 = vld [vmem:[#allocation7 + $0x154] sm:$0xf0]  ;;  %v11436_v0 = vor.u32 %v13310_v51, %v11433_v52  ;;  %v11415_v2 = vld [vmem:[#allocation7 + $0x28] sm:$0xf] }
 0xf32   :  { %6271 = vmatmul.bf16.vlgmr.msra.gmra.mxu1 %v17011_v25  ;;  %v11564_v32 = vor.u32 %v13342_v33, %v11561_v45  ;;  %v13308_v4 = vld [vmem:[#allocation7 + $0x34] sm:$0xf0]  ;;  %v13306_v62 = vld [vmem:[#allocation7 + $0x2c] sm:$0xf]  ;;  %v11417_v5 = vld [vmem:[#allocation7 + $0x38] sm:$0xf0]  ;;  %v11560_v6 = vor.u32 %v13344_v59, %v11559_v49 }
 0xf33   :  { %6303 = vmatpush.bf16.msrb.mxu0 %v11496_v19  ;;  %v13338_v8 = vld [vmem:[#allocation7 + $0x12c] sm:$0xf]  ;;  %v11545_v10 = vld [vmem:[#allocation7 + $0x138] sm:$0xf0]  ;;  %v11543_v50 = vld [vmem:[#allocation7 + $0x128] sm:$0xf]  ;;  %v11416_v61 = vor.u32 %v13308_v4, %v11415_v2  ;;  %v11420_v56 = vor.u32 %v13306_v62, %v11417_v5 }
 0xf34   :  { %6329 = vmatpush.bf16.msrb.mxu2 %v11500_v20  ;;  %v13340_v46 = vld [vmem:[#allocation7 + $0x134] sm:$0xf0]  ;;  %v11399_v19 = vld [vmem:[#allocation7 + $0x8] sm:$0xf]  ;;  %v11548_v20 = vor.u32 %v13338_v8, %v11545_v10  ;;  %v11401_v55 = vld [vmem:[#allocation7 + $0x18] sm:$0xf0] }
 0xf35   :  { %6342 = vmatpush.bf16.msrb.mxu3 %v11628_v14  ;;  %6316 = vmatpush.bf16.msrb.mxu1 %v11624_v26  ;;  %v13304_v58 = vld [vmem:[#allocation7 + $0x14] sm:$0xf0]  ;;  %v13302_v14 = vld [vmem:[#allocation7 + $0xc] sm:$0xf]  ;;  %v11544_v24 = vor.u32 %v13340_v46, %v11543_v50  ;;  %v11529_v26 = vld [vmem:[#allocation7 + $0x118] sm:$0xf0] }
 0xf36   :  { %v13334_v37 = vld [vmem:[#allocation7 + $0x10c] sm:$0xf]  ;;  %v11527_v27 = vld [vmem:[#allocation7 + $0x108] sm:$0xf]  ;;  %v13336_v28 = vld [vmem:[#allocation7 + $0x114] sm:$0xf0]  ;;  %v11400_v11 = vor.u32 %v13304_v58, %v11399_v19  ;;  %v11404_v54 = vor.u32 %v13302_v14, %v11401_v55 }
 0xf37   :  { %6304 = vmatpush.bf16.msrb.mxu0 %v11480_v39  ;;  %v11532_v39 = vor.u32 %v13334_v37, %v11529_v26  ;;  %v17024_v29 = vld [vmem:[%s17356_s6] sm:$0xf]  ;;  %v13371_v60 = vld [vmem:[%s17358_s8 + $0x30] sm:$0xff]  ;;  %v13370_v23 = vld [vmem:[%s17358_s8 + $0x28] sm:$0xff]  ;;  %p11682_p6 = scmp.ne.s32.totalorder %s11681_s14, 0 }
 0xf38   :  { %6330 = vmatpush.bf16.msrb.mxu2 %v11484_v63  ;;  %v11528_v63 = vor.u32 %v13336_v28, %v11527_v27  ;;  %v5916_v16 = vperm.slane %v17024_v29, 1  ;;  %v5917_v51 = vperm.slane %v17024_v29, 2  ;;  %v13367_v33 = vld [vmem:[%s17358_s8 + $0x10] sm:$0xff]  ;;  %v5918_v50 = vperm.slane %v17024_v29, 3  ;;  %v6354_v28 = vld [vmem:[#allocation3] sm:$0xff] }
 0xf39   :  { %6343 = vmatpush.bf16.msrb.mxu3 %v11612_v30  ;;  %6317 = vmatpush.bf16.msrb.mxu1 %v11608_v31  ;;  %v5915_v30 = vperm.slane %v17024_v29, 0 }
 0xf3b   :  { %6305 = vmatpush.bf16.msrb.mxu0 %v11464_v12 }
 0xf3c   :  { %6331 = vmatpush.bf16.msrb.mxu2 %v11468_v43 }
 0xf3d   :  { %6344 = vmatpush.bf16.msrb.mxu3 %v11596_v1  ;;  %6318 = vmatpush.bf16.msrb.mxu1 %v11592_v7 }
 0xf3f   :  { %6306 = vmatpush.bf16.msrb.mxu0 %v11448_v22  ;;  %v13369_v22 = vld [vmem:[%s17358_s8 + $0x20] sm:$0xff] }
 0xf40   :  { %6332 = vmatpush.bf16.msrb.mxu2 %v11452_v41 }
 0xf41   :  { %6345 = vmatpush.bf16.msrb.mxu3 %v11580_v13  ;;  %6319 = vmatpush.bf16.msrb.mxu1 %v11576_v53  ;;  %v13368_v13 = vld [vmem:[%s17358_s8 + $0x18] sm:$0xff] }
 0xf43   :  { %6307 = vmatpush.bf16.msrb.mxu0 %v11432_v57 }
 0xf44   :  { %6333 = vmatpush.bf16.msrb.mxu2 %v11436_v0 }
 0xf45   :  { %6346 = vmatpush.bf16.msrb.mxu3 %v11564_v32  ;;  %6320 = vmatpush.bf16.msrb.mxu1 %v11560_v6  ;;  %v13366_v32 = vld [vmem:[%s17358_s8 + $0x8] sm:$0xff] }
 0xf47   :  { %6308 = vmatpush.bf16.msrb.mxu0 %v11416_v61 }
 0xf48   :  { %6334 = vmatpush.bf16.msrb.mxu2 %v11420_v56 }
 0xf49   :  { %6347 = vmatpush.bf16.msrb.mxu3 %v11548_v20  ;;  %6321 = vmatpush.bf16.msrb.mxu1 %v11544_v24  ;;  %v13365_v20 = vld [vmem:[%s17358_s8] sm:$0xff] }
 0xf4b   :  { %6309 = vmatpush.bf16.msrb.mxu0 %v11400_v11 }
 0xf4c   :  { %6335 = vmatpush.bf16.msrb.mxu2 %v11404_v54 }
 0xf4d   :  { %6348 = vmatpush.bf16.msrb.mxu3 %v11532_v39  ;;  %6322 = vmatpush.bf16.msrb.mxu1 %v11528_v63 }
 0xf4e   :  { %6310 = vmatmul.bf16.vlgmr.msrb.gmra.mxu0 %v17009_v38 }
 0xf4f   :  { %6336 = vmatmul.bf16.vlgmr.msrb.gmra.mxu2 %v17009_v38 }
 0xf50   :  { %6349 = vmatmul.bf16.vlgmr.msrb.gmra.mxu3 %v17011_v25  ;;  %6323 = vmatmul.bf16.vlgmr.msrb.gmra.mxu1 %v17011_v25  ;;  %v13372_v25 = vld [vmem:[%s17358_s8 + $0x38] sm:$0xff] }
 0xf51   :  { %6490 = vmatpush.bf16.msra.mxu0 %v13372_v25 }
 0xf55   :  { %6491 = vmatpush.bf16.msra.mxu0 %v13371_v60 }
 0xf59   :  { %6492 = vmatpush.bf16.msra.mxu0 %v13370_v23 }
 0xf5d   :  { %6493 = vmatpush.bf16.msra.mxu0 %v13369_v22 }
 0xf61   :  { %6494 = vmatpush.bf16.msra.mxu0 %v13368_v13 }
 0xf65   :  { %6495 = vmatpush.bf16.msra.mxu0 %v13367_v33 }
 0xf69   :  { %6496 = vmatpush.bf16.msra.mxu0 %v13366_v32 }
 0xf6d   :  { %6497 = vmatpush.bf16.msra.mxu0 %v13365_v20 }
 0xfab   :  { %v6259_v3 = vpop.f32.mrf.mxu0 }
 0xfac   :  { %v6260_v34 = vadd.f32 %v6259_v3, %v5915_v30 }
 0xfaf   :  { %v6272_v31 = vpop.f32.mrf.mxu1 }
 0xfb0   :  { %v6273_v36 = vadd.f32 %v6272_v31, %v6260_v34 }
 0xfb2   :  { %v6285_v17 = vpop.f32.mrf.mxu2  ;;  %v11645_v40 = vmul.f32 -1.442695, %v6273_v36 }
 0xfb3   :  { %v6286_v38 = vadd.f32 %v6285_v17, %v5916_v16  ;;  %v6298_v42 = vpop.f32.mrf.mxu3  ;;  %v6261_v43 = vpop.f32.mrf.mxu0 }
 0xfb4   :  { %13773 = vpow2.f32 %v11645_v40 }
 0xfb5   :  { %v6299_v12 = vadd.f32 %v6298_v42, %v6286_v38 }
 0xfb7   :  { %v11646_v47 = vmul.f32 -1.442695, %v6299_v12  ;;  %v6274_v1 = vpop.f32.mrf.mxu1 }
 0xfb9   :  { %13775 = vpow2.f32 %v11646_v47 }
 0xfba   :  { %v13774_v18 = vpop.eup %13773  ;;  %v6287_v44 = vpop.f32.mrf.mxu2 }
 0xfbb   :  { %v6358_v7 = vadd.f32 1.0, %v13774_v18  ;;  %v6300_v35 = vpop.f32.mrf.mxu3 }
 0xfbd   :  { %13777 = vrcp.f32 %v6358_v7  ;;  %vm6364_vm11 = vweird.f32 %v6358_v7  ;;  %v6368_v59 = vand.u32 2147483647, %v6358_v7  ;;  %v6370_v2 = vand.u32 2147483648, %v6358_v7 }
 0xfbf   :  { %v13776_v21 = vpop.eup %13775  ;;  %v6371_v19 = vor.u32 1.1754944e-38, %v6370_v2  ;;  %vm6369_vm1 = vcmp.eq.f32.partialorder %v6368_v59, 8.507059e+37 }
 0xfc0   :  { %v6377_v48 = vadd.f32 1.0, %v13776_v21  ;;  %v13772_v21 = vld [vmem:[%s17359_s9] ss:$0 sm:$0xff] }
 0xfc2   :  { %13779 = vrcp.f32 %v6377_v48  ;;  %vm6383_vm13 = vweird.f32 %v6377_v48  ;;  %v6389_v57 = vand.u32 2147483648, %v6377_v48  ;;  %v6387_v6 = vand.u32 2147483647, %v6377_v48 }
 0xfc3   :  { %v13778_v41 = vpop.eup %13777 }
 0xfc4   :  { %v6360_v9 = vmul.f32 %v13778_v41, %v6358_v7  ;;  %vm6365_vm12 = vweird.f32 %v13778_v41  ;;  %v6390_v56 = vor.u32 1.1754944e-38, %v6389_v57  ;;  %vm6388_vm2 = vcmp.eq.f32.partialorder %v6387_v6, 8.507059e+37 }
 0xfc5   :  { %vm17051_vm15 = vmor %vm6364_vm11, %vm6365_vm12 }
 0xfc6   :  { %v6361_v15 = vsub.f32 1.0, %v6360_v9 }
 0xfc8   :  { %v13780_v52 = vpop.eup %13779  ;;  %v6362_v53 = vmul.f32 %v13778_v41, %v6361_v15 }
 0xfc9   :  { %v6379_v45 = vmul.f32 %v13780_v52, %v6377_v48  ;;  %vm6384_vm14 = vweird.f32 %v13780_v52 }
 0xfca   :  { %v6363_v5 = vadd.f32 %v13778_v41, %v6362_v53  ;;  %vm17057_vm0 = vmor %vm6383_vm13, %vm6384_vm14 }
 0xfcb   :  { %v6311_v49 = vpop.f32.mrf.mxu0  ;;  %v6380_v4 = vsub.f32 1.0, %v6379_v45 }
 0xfcc   :  { %v6312_v0 = vadd.f32 %v6311_v49, %v5917_v51  ;;  %v6367_v58 = vsel %vm17051_vm15, %v13778_v41, %v6363_v5 }
 0xfcd   :  { %v6324_v62 = vpop.f32.mrf.mxu1  ;;  %v6381_v46 = vmul.f32 %v13780_v52, %v6380_v4  ;;  %v6372_v11 = vsel %vm6369_vm1, %v6371_v19, %v6367_v58 }
 0xfce   :  { %v6325_v8 = vadd.f32 %v6324_v62, %v6312_v0 }
 0xfcf   :  { %v6382_v14 = vadd.f32 %v13780_v52, %v6381_v46 }
 0xfd0   :  { %13781 = vtanh.f32 %v6325_v8 }
 0xfd1   :  { %v6386_v26 = vsel %vm17057_vm0, %v13780_v52, %v6382_v14 }
 0xfd2   :  { %v6337_v55 = vpop.f32.mrf.mxu2  ;;  %v6391_v54 = vsel %vm6388_vm2, %v6390_v56, %v6386_v26 }
 0xfd3   :  { %v6338_v24 = vadd.f32 %v6337_v55, %v5918_v50  ;;  %v6350_v37 = vpop.f32.mrf.mxu3  ;;  %v6313_v27 = vpop.f32.mrf.mxu0  ;;  %v6413_v3 = vmul.f32 %v6391_v54, %v6354_v28 }
 0xfd5   :  { %v6351_v39 = vadd.f32 %v6350_v37, %v6338_v24  ;;  %v6326_v63 = vpop.f32.mrf.mxu1 }
 0xfd6   :  { %v13782_v29 = vpop.eup %13781 }
 0xfd7   :  { %v11647_v30 = vmul.f32 -1.442695, %v6351_v39  ;;  %v6414_v34 = vmul.f32 %v13782_v29, %v6372_v11 }
 0xfd9   :  { %13783 = vpow2.f32 %v11647_v30  ;;  %v6415_v16 = vadd.f32 %v6414_v34, %v6413_v3 }
 0xfda   :  { %v6339_v31 = vpop.f32.mrf.mxu2 }
 0xfdb   :  { %v6352_v36 = vpop.f32.mrf.mxu3  ;;  %6419 = vst [vmem:[#allocation3] sm:$0xff] %v6415_v16 }
 0xfdf   :  { %v13784_v17 = vpop.eup %13783 }
 0xfe0   :  { %v6397_v40 = vadd.f32 1.0, %v13784_v17 }
 0xfe2   :  { %13785 = vrcp.f32 %v6397_v40  ;;  %v6409_v12 = vand.u32 2147483648, %v6397_v40  ;;  %v6407_v47 = vand.u32 2147483647, %v6397_v40  ;;  %vm6403_vm4 = vweird.f32 %v6397_v40 }
 0xfe3   :  { %13787 = vtanh.f32 %v6415_v16 }
 0xfe4   :  { %v6410_v60 = vor.u32 1.1754944e-38, %v6409_v12  ;;  %vm6408_vm6 = vcmp.eq.f32.partialorder %v6407_v47, 8.507059e+37 }
 0xfe8   :  { %v13786_v38 = vpop.eup %13785 }
 0xfe9   :  { %v6399_v42 = vmul.f32 %v13786_v38, %v6397_v40  ;;  %vm6404_vm3 = vweird.f32 %v13786_v38  ;;  %v13788_v44 = vpop.eup %13787 }
 0xfea   :  { %vm6405_vm5 = vmor %vm6403_vm4, %vm6404_vm3 }
 0xfeb   :  { %v6400_v25 = vsub.f32 1.0, %v6399_v42 }
 0xfed   :  { %v6401_v43 = vmul.f32 %v13786_v38, %v6400_v25 }
 0xfef   :  { %v6402_v1 = vadd.f32 %v13786_v38, %v6401_v43 }
 0xff1   :  { %v6406_v18 = vsel %vm6405_vm5, %v13786_v38, %v6402_v1 }
 0xff2   :  { %v6411_v7 = vsel %vm6408_vm6, %v6410_v60, %v6406_v18 }
 0xff3   :  { %v6417_v35 = vmul.f32 %v13788_v44, %v6411_v7 }
 0xff5   :  { %v6420_v23 = vpack.c.bf16 %v6417_v35, %v6417_v35 }
 0xff7   :  { %6421 = vst [vmem:[#allocation4 + $0x4] sm:$0xf] %v6420_v23  ;;  %6498 = vmatmul.bf16.vlgmr.msra.gmra.mxu0 %v6420_v23 }
0x1074   :  { %v6499_v48 = vpop.f32.mrf.mxu0 }
0x1075   :  { %v6500_v22 = vadd.f32 %v13772_v21, %v6499_v48 }
0x1077   :  { %11680 = vst [vmem:[%s17360_s10 + $0x18] sm:$0xff] %v6500_v22 }
0x1078   :  { %6509 = sbr.rel (%p11682_p6) target bundleno = 4723 (0x1273), region = 69 }
0x107c   :  { %v6501_v41 = vpop.f32.mrf.mxu0 }
0x107d   :  { %v6510_v9 = vlaneseq  ;;  %v13380_v45 = vld [vmem:[%s17357_s7 + $0x38] sm:$0xff]  ;;  %v13379_v49 = vld [vmem:[%s17357_s7 + $0x30] sm:$0xff]  ;;  %v13378_v59 = vld [vmem:[%s17357_s7 + $0x28] sm:$0xff]  ;;  %v13888_v19 = vmov 1.0|1.0  }
0x107e   :  { %6600 = vmatpush.bf16.msra.mxu0 %v13380_v45  ;;  %v13377_v57 = vld [vmem:[%s17357_s7 + $0x20] sm:$0xff]  ;;  %v13376_v0 = vld [vmem:[%s17357_s7 + $0x18] sm:$0xff]  ;;  %v13375_v2 = vld [vmem:[%s17357_s7 + $0x10] sm:$0xff] }
0x107f   :  { %v6511_v13 = vand.u32 127, %v6510_v9  ;;  %v13374_v32 = vld [vmem:[%s17357_s7 + $0x8] sm:$0xff]  ;;  %v13373_v8 = vld [vmem:[%s17357_s7] sm:$0xff] }
0x1081   :  { %vm6512_vm7 = vcmp.lt.s32.totalorder %v6511_v13, 16 }
0x1082   :  { %v6513_v15 = vsel %vm6512_vm7, %v6500_v22, -1e+30  ;;  %6601 = vmatpush.bf16.msra.mxu0 %v13379_v49 }
0x1083   :  { %6514 = vmax.xlane.f32.xlu0 %v6513_v15 }
0x1086   :  { %6602 = vmatpush.bf16.msra.mxu0 %v13378_v59 }
0x108a   :  { %6603 = vmatpush.bf16.msra.mxu0 %v13377_v57 }
0x108e   :  { %6604 = vmatpush.bf16.msra.mxu0 %v13376_v0 }
0x1092   :  { %6605 = vmatpush.bf16.msra.mxu0 %v13375_v2 }
0x1096   :  { %6606 = vmatpush.bf16.msra.mxu0 %v13374_v32 }
0x109a   :  { %6607 = vmatpush.bf16.msra.mxu0 %v13373_v8 }
0x10f6   :  { %v6515_v51 = vpop.xlane.xlu0 %6514 }
0x10f7   :  { %vm6516_vm8 = vcmp.ge.f32.partialorder %v6513_v15, %v6515_v51 }
0x10f8   :  { %v6517_v52 = vsel %vm6516_vm8, %v6511_v13, 128 }
0x10f9   :  { %v6519_v53 = vshra.s32 %v6517_v52, 16  ;;  %v6518_v4 = vand.u32 65535, %v6517_v52 }
0x10fb   :  { %v6521_v33 = vcvt.s32.f32 %v6519_v53  ;;  %v6520_v5 = vcvt.s32.f32 %v6518_v4 }
0x10fd   :  { %6522 = vmin.xlane.f32.xlu0 %v6521_v33 }
0x1170   :  { %v6523_v62 = vpop.xlane.xlu0 %6522 }
0x1171   :  { %vm6524_vm9 = vcmp.eq.f32.partialorder %v6521_v33, %v6523_v62  ;;  %v6529_v10 = vcvt.f32.s32 %v6523_v62 }
0x1172   :  { %v6525_v6 = vsel %vm6524_vm9, %v6520_v5, inf }
0x1173   :  { %6526 = vmin.xlane.f32.xlu1 %v6525_v6  ;;  %v6530_v46 = vshll.u32 %v6529_v10, 16 }
0x11e6   :  { %v6527_v50 = vpop.xlane.xlu1 %6526 }
0x11e7   :  { %v6528_v61 = vcvt.f32.s32 %v6527_v50 }
0x11e9   :  { %v6531_v56 = vadd.s32 %v6530_v46, %v6528_v61 }
0x11eb   :  { %vm6532_vm10 = vcmp.eq.s32.totalorder %v6511_v13, %v6531_v56 }
0x11ec   :  { %vm11716_vm11 = vmpackc.low %vm6532_vm10, %vm6532_vm10 }
0x11ed   :  { %11717 = vmatmul.msk.bf16.vlgmr.msra.gmra.mxu0 %vm11716_vm11, %v13888_v19 }
0x126a   :  { %v6609_v20 = vpop.f32.mrf.mxu0 }
0x126b   :  { %v6613_v58 = vpack.c.bf16 %v6609_v20, %v6609_v20 }
0x126d   :  { %6614 = vst [vmem:[#allocation4] sm:$0xf] %v6613_v58 }
0x1272   :  { %v6611_v14 = vpop.f32.mrf.mxu0 }
0x1273 PF:  { %s11718_s30 = sld [smem:[#allocation6 + $0x4]] }
0x1279   :  { %p11719_p7 = scmp.eq.s32.totalorder %s11718_s30, 0 }
0x127b   :  { %6619 = sbr.rel (%p11719_p7) target bundleno = 4738 (0x1282), region = 73 }
0x1280   :  { %v11720_v55 = vld [vmem:[%s17352_s2 + $0x10] sm:$0xf] }
0x1281   :  { %6622 = vst [vmem:[#allocation4] sm:$0xf] %v11720_v55 }
0x1282 PF:  { %v11835_v24 = vld [vmem:[#allocation7 + $0xe0] sm:$0xf]  ;;  %v13411_v37 = vld [vmem:[#allocation7 + $0xec] sm:$0xf0]  ;;  %v13409_v26 = vld [vmem:[#allocation7 + $0xe4] sm:$0xf] }
0x1283   :  { %v11836_v27 = vor.u32 %v13411_v37, %v11835_v24  ;;  %v11837_v28 = vld [vmem:[#allocation7 + $0xf0] sm:$0xf0]  ;;  %v13441_v11 = vld [vmem:[#allocation7 + $0x1e4] sm:$0xf]  ;;  %v11963_v29 = vld [vmem:[#allocation7 + $0x1e0] sm:$0xf] }
0x1284   :  { %v11965_v54 = vld [vmem:[#allocation7 + $0x1f0] sm:$0xf0]  ;;  %v11840_v39 = vor.u32 %v13409_v26, %v11837_v28  ;;  %v13443_v30 = vld [vmem:[#allocation7 + $0x1ec] sm:$0xf0]  ;;  %v11819_v3 = vld [vmem:[#allocation7 + $0xc0] sm:$0xf] }
0x1285   :  { %v11968_v63 = vor.u32 %v13441_v11, %v11965_v54  ;;  %7025 = vmatpush.bf16.msra.mxu0 %v11836_v27  ;;  %v11964_v34 = vor.u32 %v13443_v30, %v11963_v29  ;;  %v13407_v16 = vld [vmem:[#allocation7 + $0xcc] sm:$0xf0]  ;;  %v13405_v31 = vld [vmem:[#allocation7 + $0xc4] sm:$0xf]  ;;  %v11821_v36 = vld [vmem:[#allocation7 + $0xd0] sm:$0xf0] }
0x1286   :  { %7051 = vmatpush.bf16.msra.mxu2 %v11840_v39  ;;  %v11820_v17 = vor.u32 %v13407_v16, %v11819_v3  ;;  %v11824_v40 = vor.u32 %v13405_v31, %v11821_v36  ;;  %v13437_v38 = vld [vmem:[#allocation7 + $0x1c4] sm:$0xf]  ;;  %v11949_v42 = vld [vmem:[#allocation7 + $0x1d0] sm:$0xf0]  ;;  %v11947_v25 = vld [vmem:[#allocation7 + $0x1c0] sm:$0xf] }
0x1287   :  { %7064 = vmatpush.bf16.msra.mxu3 %v11968_v63  ;;  %7038 = vmatpush.bf16.msra.mxu1 %v11964_v34  ;;  %v11952_v12 = vor.u32 %v13437_v38, %v11949_v42  ;;  %v13439_v43 = vld [vmem:[#allocation7 + $0x1cc] sm:$0xf0]  ;;  %v11803_v47 = vld [vmem:[#allocation7 + $0xa0] sm:$0xf]  ;;  %v13401_v18 = vld [vmem:[#allocation7 + $0xa4] sm:$0xf] }
0x1288   :  { %v13403_v1 = vld [vmem:[#allocation7 + $0xac] sm:$0xf0]  ;;  %v11948_v60 = vor.u32 %v13439_v43, %v11947_v25  ;;  %v11805_v44 = vld [vmem:[#allocation7 + $0xb0] sm:$0xf0]  ;;  %v13433_v7 = vld [vmem:[#allocation7 + $0x1a4] sm:$0xf] }
0x1289   :  { %7026 = vmatpush.bf16.msra.mxu0 %v11820_v17  ;;  %v11804_v35 = vor.u32 %v13403_v1, %v11803_v47  ;;  %v11933_v23 = vld [vmem:[#allocation7 + $0x1b0] sm:$0xf0]  ;;  %v11931_v21 = vld [vmem:[#allocation7 + $0x1a0] sm:$0xf]  ;;  %v13435_v48 = vld [vmem:[#allocation7 + $0x1ac] sm:$0xf0]  ;;  %v11808_v22 = vor.u32 %v13401_v18, %v11805_v44 }
0x128a   :  { %7052 = vmatpush.bf16.msra.mxu2 %v11824_v40  ;;  %v11936_v41 = vor.u32 %v13433_v7, %v11933_v23  ;;  %v11787_v9 = vld [vmem:[#allocation7 + $0x80] sm:$0xf]  ;;  %v13399_v13 = vld [vmem:[#allocation7 + $0x8c] sm:$0xf0]  ;;  %v13397_v15 = vld [vmem:[#allocation7 + $0x84] sm:$0xf]  ;;  %v11932_v51 = vor.u32 %v13435_v48, %v11931_v21 }
0x128b   :  { %7065 = vmatpush.bf16.msra.mxu3 %v11952_v12  ;;  %7039 = vmatpush.bf16.msra.mxu1 %v11948_v60  ;;  %v11789_v52 = vld [vmem:[#allocation7 + $0x90] sm:$0xf0]  ;;  %v13429_v53 = vld [vmem:[#allocation7 + $0x184] sm:$0xf]  ;;  %v11915_v45 = vld [vmem:[#allocation7 + $0x180] sm:$0xf]  ;;  %v11788_v59 = vor.u32 %v13399_v13, %v11787_v9 }
0x128c   :  { %v11917_v33 = vld [vmem:[#allocation7 + $0x190] sm:$0xf0]  ;;  %v13431_v49 = vld [vmem:[#allocation7 + $0x18c] sm:$0xf0]  ;;  %v11792_v57 = vor.u32 %v13397_v15, %v11789_v52  ;;  %v11771_v2 = vld [vmem:[#allocation7 + $0x60] sm:$0xf] }
0x128d   :  { %7027 = vmatpush.bf16.msra.mxu0 %v11804_v35  ;;  %v11920_v0 = vor.u32 %v13429_v53, %v11917_v33  ;;  %v13395_v32 = vld [vmem:[#allocation7 + $0x6c] sm:$0xf0]  ;;  %v13393_v4 = vld [vmem:[#allocation7 + $0x64] sm:$0xf]  ;;  %v11916_v62 = vor.u32 %v13431_v49, %v11915_v45  ;;  %v11773_v5 = vld [vmem:[#allocation7 + $0x70] sm:$0xf0] }
0x128e   :  { %7053 = vmatpush.bf16.msra.mxu2 %v11808_v22  ;;  %v13425_v6 = vld [vmem:[#allocation7 + $0x164] sm:$0xf]  ;;  %v11901_v8 = vld [vmem:[#allocation7 + $0x170] sm:$0xf0]  ;;  %v11899_v10 = vld [vmem:[#allocation7 + $0x160] sm:$0xf]  ;;  %v11772_v46 = vor.u32 %v13395_v32, %v11771_v2  ;;  %v11776_v61 = vor.u32 %v13393_v4, %v11773_v5 }
0x128f   :  { %7066 = vmatpush.bf16.msra.mxu3 %v11936_v41  ;;  %7040 = vmatpush.bf16.msra.mxu1 %v11932_v51  ;;  %v13427_v50 = vld [vmem:[#allocation7 + $0x16c] sm:$0xf0]  ;;  %v11904_v56 = vor.u32 %v13425_v6, %v11901_v8  ;;  %v11755_v19 = vld [vmem:[#allocation7 + $0x40] sm:$0xf]  ;;  %v13389_v58 = vld [vmem:[#allocation7 + $0x44] sm:$0xf] }
0x1290   :  { %v13391_v20 = vld [vmem:[#allocation7 + $0x4c] sm:$0xf0]  ;;  %v11900_v14 = vor.u32 %v13427_v50, %v11899_v10  ;;  %v11757_v55 = vld [vmem:[#allocation7 + $0x50] sm:$0xf0]  ;;  %v13421_v24 = vld [vmem:[#allocation7 + $0x144] sm:$0xf] }
0x1291   :  { %7028 = vmatpush.bf16.msra.mxu0 %v11788_v59  ;;  %v11885_v37 = vld [vmem:[#allocation7 + $0x150] sm:$0xf0]  ;;  %v11883_v26 = vld [vmem:[#allocation7 + $0x140] sm:$0xf]  ;;  %v13423_v27 = vld [vmem:[#allocation7 + $0x14c] sm:$0xf0]  ;;  %v11756_v28 = vor.u32 %v13391_v20, %v11755_v19  ;;  %v11760_v11 = vor.u32 %v13389_v58, %v11757_v55 }
0x1292   :  { %7054 = vmatpush.bf16.msra.mxu2 %v11792_v57  ;;  %v11888_v54 = vor.u32 %v13421_v24, %v11885_v37  ;;  %v11739_v39 = vld [vmem:[#allocation7 + $0x20] sm:$0xf]  ;;  %v13387_v63 = vld [vmem:[#allocation7 + $0x2c] sm:$0xf0]  ;;  %v13385_v29 = vld [vmem:[#allocation7 + $0x24] sm:$0xf]  ;;  %v11884_v30 = vor.u32 %v13423_v27, %v11883_v26 }
0x1293   :  { %7067 = vmatpush.bf16.msra.mxu3 %v11920_v0  ;;  %7041 = vmatpush.bf16.msra.mxu1 %v11916_v62  ;;  %v11741_v3 = vld [vmem:[#allocation7 + $0x30] sm:$0xf0]  ;;  %v13417_v34 = vld [vmem:[#allocation7 + $0x124] sm:$0xf]  ;;  %v11867_v31 = vld [vmem:[#allocation7 + $0x120] sm:$0xf]  ;;  %v11740_v17 = vor.u32 %v13387_v63, %v11739_v39 }
0x1294   :  { %v11869_v16 = vld [vmem:[#allocation7 + $0x130] sm:$0xf0]  ;;  %v13419_v36 = vld [vmem:[#allocation7 + $0x12c] sm:$0xf0]  ;;  %v11723_v40 = vld [vmem:[#allocation7] sm:$0xf]  ;;  %v11744_v25 = vor.u32 %v13385_v29, %v11741_v3 }
0x1295   :  { %7029 = vmatpush.bf16.msra.mxu0 %v11772_v46  ;;  %v13383_v38 = vld [vmem:[#allocation7 + $0xc] sm:$0xf0]  ;;  %v13381_v42 = vld [vmem:[#allocation7 + $0x4] sm:$0xf]  ;;  %v11872_v12 = vor.u32 %v13417_v34, %v11869_v16  ;;  %v11725_v43 = vld [vmem:[#allocation7 + $0x10] sm:$0xf0]  ;;  %v11868_v60 = vor.u32 %v13419_v36, %v11867_v31 }
0x1296   :  { %7055 = vmatpush.bf16.msra.mxu2 %v11776_v61  ;;  %v13413_v47 = vld [vmem:[#allocation7 + $0x104] sm:$0xf]  ;;  %v6623_v1 = vld [vmem:[#allocation4] sm:$0xff]  ;;  %v11853_v18 = vld [vmem:[#allocation7 + $0x110] sm:$0xf0]  ;;  %v11724_v48 = vor.u32 %v13383_v38, %v11723_v40  ;;  %v11728_v15 = vor.u32 %v13381_v42, %v11725_v43  ;;  %s12013_s27 = sld [smem:[#allocation6 + $0x5]] }
0x1297   :  { %7068 = vmatpush.bf16.msra.mxu3 %v11904_v56  ;;  %7042 = vmatpush.bf16.msra.mxu1 %v11900_v14  ;;  %v11843_v44 = vld [vmem:[#allocation7 + $0xe8] sm:$0xf]  ;;  %v13412_v7 = vld [vmem:[#allocation7 + $0xf4] sm:$0xf0]  ;;  %v13410_v35 = vld [vmem:[#allocation7 + $0xec] sm:$0xf]  ;;  %v6699_v13 = vunpack.c.l.b16 %v6623_v1  ;;  %v11856_v51 = vor.u32 %v13413_v47, %v11853_v18  ;;  %v6700_v33 = vunpack.c.h.b16 %v6623_v1 }
0x1298   :  { %v11845_v23 = vld [vmem:[#allocation7 + $0xf8] sm:$0xf0]  ;;  %v13442_v21 = vld [vmem:[#allocation7 + $0x1ec] sm:$0xf]  ;;  %v11851_v41 = vld [vmem:[#allocation7 + $0x100] sm:$0xf]  ;;  %v11844_v45 = vor.u32 %v13412_v7, %v11843_v44 }
0x1299   :  { %7030 = vmatpush.bf16.msra.mxu0 %v11756_v28  ;;  %v11973_v22 = vld [vmem:[#allocation7 + $0x1f8] sm:$0xf0]  ;;  %v13415_v9 = vld [vmem:[#allocation7 + $0x10c] sm:$0xf0]  ;;  %v11971_v52 = vld [vmem:[#allocation7 + $0x1e8] sm:$0xf]  ;;  %v11848_v49 = vor.u32 %v13410_v35, %v11845_v23  ;;  %v17101_v62 = vpack.c.b16 %v6699_v13, %v6699_v13  ;;  %v17103_v10 = vpack.c.b16 %v6700_v33, %v6700_v33 }
0x129a   :  { %7056 = vmatpush.bf16.msra.mxu2 %v11760_v11  ;;  %v13444_v53 = vld [vmem:[#allocation7 + $0x1f4] sm:$0xf0]  ;;  %v11827_v59 = vld [vmem:[#allocation7 + $0xc8] sm:$0xf]  ;;  %v11976_v57 = vor.u32 %v13442_v21, %v11973_v22  ;;  %v11852_v0 = vor.u32 %v13415_v9, %v11851_v41  ;;  %v13406_v32 = vld [vmem:[#allocation7 + $0xcc] sm:$0xf] }
0x129b   :  { %7069 = vmatpush.bf16.msra.mxu3 %v11888_v54  ;;  %7043 = vmatpush.bf16.msra.mxu1 %v11884_v30  ;;  %v13408_v2 = vld [vmem:[#allocation7 + $0xd4] sm:$0xf0]  ;;  %v11829_v4 = vld [vmem:[#allocation7 + $0xd8] sm:$0xf0]  ;;  %v11972_v5 = vor.u32 %v13444_v53, %v11971_v52  ;;  %v13438_v6 = vld [vmem:[#allocation7 + $0x1cc] sm:$0xf] }
0x129c   :  { %v11957_v8 = vld [vmem:[#allocation7 + $0x1d8] sm:$0xf0]  ;;  %v11955_v50 = vld [vmem:[#allocation7 + $0x1c8] sm:$0xf]  ;;  %v13440_v46 = vld [vmem:[#allocation7 + $0x1d4] sm:$0xf0]  ;;  %v11828_v61 = vor.u32 %v13408_v2, %v11827_v59  ;;  %v11832_v56 = vor.u32 %v13406_v32, %v11829_v4 }
0x129d   :  { %7031 = vmatpush.bf16.msra.mxu0 %v11740_v17  ;;  %v11811_v19 = vld [vmem:[#allocation7 + $0xa8] sm:$0xf]  ;;  %v11960_v20 = vor.u32 %v13438_v6, %v11957_v8  ;;  %v13404_v58 = vld [vmem:[#allocation7 + $0xb4] sm:$0xf0]  ;;  %v13402_v14 = vld [vmem:[#allocation7 + $0xac] sm:$0xf]  ;;  %v11956_v24 = vor.u32 %v13440_v46, %v11955_v50 }
0x129e   :  { %7057 = vmatpush.bf16.msra.mxu2 %v11744_v25  ;;  %v11813_v55 = vld [vmem:[#allocation7 + $0xb8] sm:$0xf0]  ;;  %v13434_v37 = vld [vmem:[#allocation7 + $0x1ac] sm:$0xf]  ;;  %v11939_v27 = vld [vmem:[#allocation7 + $0x1a8] sm:$0xf]  ;;  %v11812_v11 = vor.u32 %v13404_v58, %v11811_v19 }
0x129f   :  { %7070 = vmatpush.bf16.msra.mxu3 %v11872_v12  ;;  %7044 = vmatpush.bf16.msra.mxu1 %v11868_v60  ;;  %v11941_v26 = vld [vmem:[#allocation7 + $0x1b8] sm:$0xf0]  ;;  %v13436_v28 = vld [vmem:[#allocation7 + $0x1b4] sm:$0xf0]  ;;  %v11816_v54 = vor.u32 %v13402_v14, %v11813_v55  ;;  %v11795_v39 = vld [vmem:[#allocation7 + $0x88] sm:$0xf] }
0x12a0   :  { %v11944_v63 = vor.u32 %v13434_v37, %v11941_v26  ;;  %v13400_v29 = vld [vmem:[#allocation7 + $0x94] sm:$0xf0]  ;;  %v13398_v30 = vld [vmem:[#allocation7 + $0x8c] sm:$0xf]  ;;  %v11797_v3 = vld [vmem:[#allocation7 + $0x98] sm:$0xf0]  ;;  %v11940_v34 = vor.u32 %v13436_v28, %v11939_v27 }
0x12a1   :  { %7032 = vmatpush.bf16.msra.mxu0 %v11724_v48  ;;  %v13430_v16 = vld [vmem:[#allocation7 + $0x18c] sm:$0xf]  ;;  %v11925_v31 = vld [vmem:[#allocation7 + $0x198] sm:$0xf0]  ;;  %v11923_v36 = vld [vmem:[#allocation7 + $0x188] sm:$0xf]  ;;  %v11796_v40 = vor.u32 %v13400_v29, %v11795_v39  ;;  %v11800_v38 = vor.u32 %v13398_v30, %v11797_v3 }
0x12a2   :  { %7058 = vmatpush.bf16.msra.mxu2 %v11728_v15  ;;  %v13432_v17 = vld [vmem:[#allocation7 + $0x194] sm:$0xf0]  ;;  %v11779_v42 = vld [vmem:[#allocation7 + $0x68] sm:$0xf]  ;;  %v11928_v25 = vor.u32 %v13430_v16, %v11925_v31  ;;  %v13394_v43 = vld [vmem:[#allocation7 + $0x6c] sm:$0xf] }
0x12a3   :  { %7071 = vmatpush.bf16.msra.mxu3 %v11856_v51  ;;  %7045 = vmatpush.bf16.msra.mxu1 %v11852_v0  ;;  %v13396_v12 = vld [vmem:[#allocation7 + $0x74] sm:$0xf0]  ;;  %v11781_v47 = vld [vmem:[#allocation7 + $0x78] sm:$0xf0]  ;;  %v11924_v1 = vor.u32 %v13432_v17, %v11923_v36  ;;  %v13426_v60 = vld [vmem:[#allocation7 + $0x16c] sm:$0xf] }
0x12a4   :  { %7033 = vmatmul.bf16.vlgmr.msra.gmra.mxu0 %v17101_v62  ;;  %v11909_v18 = vld [vmem:[#allocation7 + $0x178] sm:$0xf0]  ;;  %v11907_v44 = vld [vmem:[#allocation7 + $0x168] sm:$0xf]  ;;  %v13428_v7 = vld [vmem:[#allocation7 + $0x174] sm:$0xf0]  ;;  %v11780_v35 = vor.u32 %v13396_v12, %v11779_v42  ;;  %v11784_v23 = vor.u32 %v13394_v43, %v11781_v47 }
0x12a5   :  { %7077 = vmatpush.bf16.msrb.mxu0 %v11844_v45  ;;  %7059 = vmatmul.bf16.vlgmr.msra.gmra.mxu2 %v17101_v62  ;;  %v11763_v21 = vld [vmem:[#allocation7 + $0x48] sm:$0xf]  ;;  %v11912_v48 = vor.u32 %v13426_v60, %v11909_v18  ;;  %v13392_v22 = vld [vmem:[#allocation7 + $0x54] sm:$0xf0]  ;;  %v13390_v41 = vld [vmem:[#allocation7 + $0x4c] sm:$0xf]  ;;  %v11908_v13 = vor.u32 %v13428_v7, %v11907_v44 }
0x12a6   :  { %7103 = vmatpush.bf16.msrb.mxu2 %v11848_v49  ;;  %7072 = vmatmul.bf16.vlgmr.msra.gmra.mxu3 %v17103_v10  ;;  %v11765_v9 = vld [vmem:[#allocation7 + $0x58] sm:$0xf0]  ;;  %v13422_v15 = vld [vmem:[#allocation7 + $0x14c] sm:$0xf]  ;;  %v11891_v52 = vld [vmem:[#allocation7 + $0x148] sm:$0xf]  ;;  %v11764_v33 = vor.u32 %v13392_v22, %v11763_v21 }
0x12a7   :  { %7116 = vmatpush.bf16.msrb.mxu3 %v11976_v57  ;;  %7090 = vmatpush.bf16.msrb.mxu1 %v11972_v5  ;;  %v11893_v51 = vld [vmem:[#allocation7 + $0x158] sm:$0xf0]  ;;  %v13424_v53 = vld [vmem:[#allocation7 + $0x154] sm:$0xf0]  ;;  %v11768_v45 = vor.u32 %v13390_v41, %v11765_v9  ;;  %v11747_v49 = vld [vmem:[#allocation7 + $0x28] sm:$0xf] }
0x12a8   :  { %7046 = vmatmul.bf16.vlgmr.msra.gmra.mxu1 %v17103_v10  ;;  %v11896_v59 = vor.u32 %v13422_v15, %v11893_v51  ;;  %v13388_v57 = vld [vmem:[#allocation7 + $0x34] sm:$0xf0]  ;;  %v13386_v0 = vld [vmem:[#allocation7 + $0x2c] sm:$0xf]  ;;  %v11749_v2 = vld [vmem:[#allocation7 + $0x38] sm:$0xf0]  ;;  %v11892_v32 = vor.u32 %v13424_v53, %v11891_v52 }
0x12a9   :  { %7078 = vmatpush.bf16.msrb.mxu0 %v11828_v61  ;;  %v13418_v4 = vld [vmem:[#allocation7 + $0x12c] sm:$0xf]  ;;  %v11877_v5 = vld [vmem:[#allocation7 + $0x138] sm:$0xf0]  ;;  %v11875_v6 = vld [vmem:[#allocation7 + $0x128] sm:$0xf]  ;;  %v11748_v50 = vor.u32 %v13388_v57, %v11747_v49  ;;  %v11752_v46 = vor.u32 %v13386_v0, %v11749_v2 }
0x12aa   :  { %7104 = vmatpush.bf16.msrb.mxu2 %v11832_v56  ;;  %v13420_v8 = vld [vmem:[#allocation7 + $0x134] sm:$0xf0]  ;;  %v11731_v61 = vld [vmem:[#allocation7 + $0x8] sm:$0xf]  ;;  %v11880_v56 = vor.u32 %v13418_v4, %v11877_v5  ;;  %v11733_v58 = vld [vmem:[#allocation7 + $0x18] sm:$0xf0] }
0x12ab   :  { %7117 = vmatpush.bf16.msrb.mxu3 %v11960_v20  ;;  %7091 = vmatpush.bf16.msrb.mxu1 %v11956_v24  ;;  %v13384_v19 = vld [vmem:[#allocation7 + $0x14] sm:$0xf0]  ;;  %v13382_v20 = vld [vmem:[#allocation7 + $0xc] sm:$0xf]  ;;  %v11876_v14 = vor.u32 %v13420_v8, %v11875_v6  ;;  %v11861_v24 = vld [vmem:[#allocation7 + $0x118] sm:$0xf0] }
0x12ac   :  { %v13414_v55 = vld [vmem:[#allocation7 + $0x10c] sm:$0xf]  ;;  %v11859_v37 = vld [vmem:[#allocation7 + $0x108] sm:$0xf]  ;;  %v13416_v26 = vld [vmem:[#allocation7 + $0x114] sm:$0xf0]  ;;  %v11732_v27 = vor.u32 %v13384_v19, %v11731_v61  ;;  %v11736_v28 = vor.u32 %v13382_v20, %v11733_v58 }
0x12ad   :  { %7079 = vmatpush.bf16.msrb.mxu0 %v11812_v11  ;;  %v11864_v11 = vor.u32 %v13414_v55, %v11861_v24  ;;  %v17116_v39 = vld [vmem:[%s17356_s6] sm:$0xf]  ;;  %v13451_v12 = vld [vmem:[%s17358_s8 + $0x30] sm:$0xff]  ;;  %v13450_v18 = vld [vmem:[%s17358_s8 + $0x28] sm:$0xff]  ;;  %p12014_p8 = scmp.ne.s32.totalorder %s12013_s27, 0 }
0x12ae   :  { %7105 = vmatpush.bf16.msrb.mxu2 %v11816_v54  ;;  %v11860_v54 = vor.u32 %v13416_v26, %v11859_v37  ;;  %v6691_v3 = vperm.slane %v17116_v39, 1  ;;  %v6692_v41 = vperm.slane %v17116_v39, 2  ;;  %v13447_v15 = vld [vmem:[%s17358_s8 + $0x10] sm:$0xff]  ;;  %v6693_v6 = vperm.slane %v17116_v39, 3  ;;  %v7129_v26 = vld [vmem:[#allocation3] sm:$0xff] }
0x12af   :  { %7118 = vmatpush.bf16.msrb.mxu3 %v11944_v63  ;;  %7092 = vmatpush.bf16.msrb.mxu1 %v11940_v34  ;;  %v6690_v63 = vperm.slane %v17116_v39, 0 }
0x12b1   :  { %7080 = vmatpush.bf16.msrb.mxu0 %v11796_v40 }
0x12b2   :  { %7106 = vmatpush.bf16.msrb.mxu2 %v11800_v38 }
0x12b3   :  { %7119 = vmatpush.bf16.msrb.mxu3 %v11928_v25  ;;  %7093 = vmatpush.bf16.msrb.mxu1 %v11924_v1 }
0x12b5   :  { %7081 = vmatpush.bf16.msrb.mxu0 %v11780_v35  ;;  %v13449_v35 = vld [vmem:[%s17358_s8 + $0x20] sm:$0xff] }
0x12b6   :  { %7107 = vmatpush.bf16.msrb.mxu2 %v11784_v23 }
0x12b7   :  { %7120 = vmatpush.bf16.msrb.mxu3 %v11912_v48  ;;  %7094 = vmatpush.bf16.msrb.mxu1 %v11908_v13  ;;  %v13448_v48 = vld [vmem:[%s17358_s8 + $0x18] sm:$0xff] }
0x12b9   :  { %7082 = vmatpush.bf16.msrb.mxu0 %v11764_v33 }
0x12ba   :  { %7108 = vmatpush.bf16.msrb.mxu2 %v11768_v45 }
0x12bb   :  { %7121 = vmatpush.bf16.msrb.mxu3 %v11896_v59  ;;  %7095 = vmatpush.bf16.msrb.mxu1 %v11892_v32  ;;  %v13446_v59 = vld [vmem:[%s17358_s8 + $0x8] sm:$0xff] }
0x12bd   :  { %7083 = vmatpush.bf16.msrb.mxu0 %v11748_v50 }
0x12be   :  { %7109 = vmatpush.bf16.msrb.mxu2 %v11752_v46 }
0x12bf   :  { %7122 = vmatpush.bf16.msrb.mxu3 %v11880_v56  ;;  %7096 = vmatpush.bf16.msrb.mxu1 %v11876_v14  ;;  %v13445_v56 = vld [vmem:[%s17358_s8] sm:$0xff] }
0x12c1   :  { %7084 = vmatpush.bf16.msrb.mxu0 %v11732_v27 }
0x12c2   :  { %7110 = vmatpush.bf16.msrb.mxu2 %v11736_v28 }
0x12c3   :  { %7123 = vmatpush.bf16.msrb.mxu3 %v11864_v11  ;;  %7097 = vmatpush.bf16.msrb.mxu1 %v11860_v54 }
0x12c4   :  { %7085 = vmatmul.bf16.vlgmr.msrb.gmra.mxu0 %v17101_v62 }
0x12c5   :  { %7111 = vmatmul.bf16.vlgmr.msrb.gmra.mxu2 %v17101_v62 }
0x12c6   :  { %7124 = vmatmul.bf16.vlgmr.msrb.gmra.mxu3 %v17103_v10  ;;  %7098 = vmatmul.bf16.vlgmr.msrb.gmra.mxu1 %v17103_v10  ;;  %v13452_v10 = vld [vmem:[%s17358_s8 + $0x38] sm:$0xff] }
0x12c7   :  { %7265 = vmatpush.bf16.msra.mxu0 %v13452_v10 }
0x12cb   :  { %7266 = vmatpush.bf16.msra.mxu0 %v13451_v12 }
0x12cf   :  { %7267 = vmatpush.bf16.msra.mxu0 %v13450_v18 }
0x12d3   :  { %7268 = vmatpush.bf16.msra.mxu0 %v13449_v35 }
0x12d7   :  { %7269 = vmatpush.bf16.msra.mxu0 %v13448_v48 }
0x12db   :  { %7270 = vmatpush.bf16.msra.mxu0 %v13447_v15 }
0x12df   :  { %7271 = vmatpush.bf16.msra.mxu0 %v13446_v59 }
0x12e3   :  { %7272 = vmatpush.bf16.msra.mxu0 %v13445_v56 }
0x1321   :  { %v7034_v29 = vpop.f32.mrf.mxu0 }
0x1322   :  { %v7035_v30 = vadd.f32 %v7034_v29, %v6690_v63 }
0x1325   :  { %v7047_v34 = vpop.f32.mrf.mxu1 }
0x1326   :  { %v7048_v16 = vadd.f32 %v7047_v34, %v7035_v30 }
0x1328   :  { %v7060_v31 = vpop.f32.mrf.mxu2  ;;  %v11977_v36 = vmul.f32 -1.442695, %v7048_v16 }
0x1329   :  { %v7061_v62 = vadd.f32 %v7060_v31, %v6691_v3  ;;  %v7073_v17 = vpop.f32.mrf.mxu3  ;;  %v7036_v38 = vpop.f32.mrf.mxu0 }
0x132a   :  { %13790 = vpow2.f32 %v11977_v36 }
0x132b   :  { %v7074_v40 = vadd.f32 %v7073_v17, %v7061_v62 }
0x132d   :  { %v11978_v42 = vmul.f32 -1.442695, %v7074_v40  ;;  %v7049_v25 = vpop.f32.mrf.mxu1 }
0x132f   :  { %13792 = vpow2.f32 %v11978_v42 }
0x1330   :  { %v13791_v43 = vpop.eup %13790  ;;  %v7062_v47 = vpop.f32.mrf.mxu2 }
0x1331   :  { %v7133_v1 = vadd.f32 1.0, %v13791_v43  ;;  %v7075_v60 = vpop.f32.mrf.mxu3 }
0x1333   :  { %13794 = vrcp.f32 %v7133_v1  ;;  %vm7139_vm12 = vweird.f32 %v7133_v1  ;;  %v7143_v53 = vand.u32 2147483647, %v7133_v1  ;;  %v7145_v49 = vand.u32 2147483648, %v7133_v1 }
0x1335   :  { %v13793_v44 = vpop.eup %13792  ;;  %v7146_v61 = vor.u32 1.1754944e-38, %v7145_v49  ;;  %vm7144_vm2 = vcmp.eq.f32.partialorder %v7143_v53, 8.507059e+37 }
0x1336   :  { %v7152_v7 = vadd.f32 1.0, %v13793_v44  ;;  %v13789_v44 = vld [vmem:[%s17359_s9] ss:$0 sm:$0xff] }
0x1338   :  { %13796 = vrcp.f32 %v7152_v7  ;;  %vm7158_vm14 = vweird.f32 %v7152_v7  ;;  %v7164_v33 = vand.u32 2147483648, %v7152_v7  ;;  %v7162_v32 = vand.u32 2147483647, %v7152_v7 }
0x1339   :  { %v13795_v23 = vpop.eup %13794 }
0x133a   :  { %v7135_v21 = vmul.f32 %v13795_v23, %v7133_v1  ;;  %vm7140_vm13 = vweird.f32 %v13795_v23  ;;  %v7165_v46 = vor.u32 1.1754944e-38, %v7164_v33  ;;  %vm7163_vm3 = vcmp.eq.f32.partialorder %v7162_v32, 8.507059e+37 }
0x133b   :  { %vm17143_vm0 = vmor %vm7139_vm12, %vm7140_vm13 }
0x133c   :  { %v7136_v22 = vsub.f32 1.0, %v7135_v21 }
0x133e   :  { %v13797_v9 = vpop.eup %13796  ;;  %v7137_v13 = vmul.f32 %v13795_v23, %v7136_v22 }
0x133f   :  { %v7154_v51 = vmul.f32 %v13797_v9, %v7152_v7  ;;  %vm7159_vm15 = vweird.f32 %v13797_v9 }
0x1340   :  { %v7138_v2 = vadd.f32 %v13795_v23, %v7137_v13  ;;  %vm17149_vm1 = vmor %vm7158_vm14, %vm7159_vm15 }
0x1341   :  { %v7086_v52 = vpop.f32.mrf.mxu0  ;;  %v7155_v57 = vsub.f32 1.0, %v7154_v51 }
0x1342   :  { %v7087_v45 = vadd.f32 %v7086_v52, %v6692_v41  ;;  %v7142_v19 = vsel %vm17143_vm0, %v13795_v23, %v7138_v2 }
0x1343   :  { %v7099_v0 = vpop.f32.mrf.mxu1  ;;  %v7156_v8 = vmul.f32 %v13797_v9, %v7155_v57  ;;  %v7147_v27 = vsel %vm7144_vm2, %v7146_v61, %v7142_v19 }
0x1344   :  { %v7100_v4 = vadd.f32 %v7099_v0, %v7087_v45 }
0x1345   :  { %v7157_v20 = vadd.f32 %v13797_v9, %v7156_v8 }
0x1346   :  { %13798 = vtanh.f32 %v7100_v4 }
0x1347   :  { %v7161_v24 = vsel %vm17149_vm1, %v13797_v9, %v7157_v20 }
0x1348   :  { %v7112_v58 = vpop.f32.mrf.mxu2  ;;  %v7166_v28 = vsel %vm7163_vm3, %v7165_v46, %v7161_v24 }
0x1349   :  { %v7113_v14 = vadd.f32 %v7112_v58, %v6693_v6  ;;  %v7125_v55 = vpop.f32.mrf.mxu3  ;;  %v7088_v37 = vpop.f32.mrf.mxu0  ;;  %v7188_v29 = vmul.f32 %v7166_v28, %v7129_v26 }
0x134b   :  { %v7126_v11 = vadd.f32 %v7125_v55, %v7113_v14  ;;  %v7101_v54 = vpop.f32.mrf.mxu1 }
0x134c   :  { %v13799_v39 = vpop.eup %13798 }
0x134d   :  { %v11979_v63 = vmul.f32 -1.442695, %v7126_v11  ;;  %v7189_v30 = vmul.f32 %v13799_v39, %v7147_v27 }
0x134f   :  { %13800 = vpow2.f32 %v11979_v63  ;;  %v7190_v3 = vadd.f32 %v7189_v30, %v7188_v29 }
0x1350   :  { %v7114_v34 = vpop.f32.mrf.mxu2 }
0x1351   :  { %v7127_v16 = vpop.f32.mrf.mxu3  ;;  %7194 = vst [vmem:[#allocation3] sm:$0xff] %v7190_v3 }
0x1355   :  { %v13801_v31 = vpop.eup %13800 }
0x1356   :  { %v7172_v36 = vadd.f32 1.0, %v13801_v31 }
0x1358   :  { %13802 = vrcp.f32 %v7172_v36  ;;  %v7184_v40 = vand.u32 2147483648, %v7172_v36  ;;  %v7182_v42 = vand.u32 2147483647, %v7172_v36  ;;  %vm7178_vm5 = vweird.f32 %v7172_v36 }
0x1359   :  { %13804 = vtanh.f32 %v7190_v3 }
0x135a   :  { %v7185_v12 = vor.u32 1.1754944e-38, %v7184_v40  ;;  %vm7183_vm7 = vcmp.eq.f32.partialorder %v7182_v42, 8.507059e+37 }
0x135e   :  { %v13803_v62 = vpop.eup %13802 }
0x135f   :  { %v7174_v17 = vmul.f32 %v13803_v62, %v7172_v36  ;;  %vm7179_vm4 = vweird.f32 %v13803_v62  ;;  %v13805_v47 = vpop.eup %13804 }
0x1360   :  { %vm7180_vm6 = vmor %vm7178_vm5, %vm7179_vm4 }
0x1361   :  { %v7175_v10 = vsub.f32 1.0, %v7174_v17 }
0x1363   :  { %v7176_v38 = vmul.f32 %v13803_v62, %v7175_v10 }
0x1365   :  { %v7177_v25 = vadd.f32 %v13803_v62, %v7176_v38 }
0x1367   :  { %v7181_v43 = vsel %vm7180_vm6, %v13803_v62, %v7177_v25 }
0x1368   :  { %v7186_v1 = vsel %vm7183_vm7, %v7185_v12, %v7181_v43 }
0x1369   :  { %v7192_v60 = vmul.f32 %v13805_v47, %v7186_v1 }
0x136b   :  { %v7195_v18 = vpack.c.bf16 %v7192_v60, %v7192_v60 }
0x136d   :  { %7196 = vst [vmem:[#allocation4 + $0x4] sm:$0xf] %v7195_v18  ;;  %7273 = vmatmul.bf16.vlgmr.msra.gmra.mxu0 %v7195_v18 }
0x13ea   :  { %v7274_v7 = vpop.f32.mrf.mxu0 }
0x13eb   :  { %v7275_v35 = vadd.f32 %v13789_v44, %v7274_v7 }
0x13ed   :  { %12012 = vst [vmem:[%s17360_s10 + $0x20] sm:$0xff] %v7275_v35 }
0x13ee   :  { %7284 = sbr.rel (%p12014_p8) target bundleno = 5609 (0x15e9), region = 77 }
0x13f2   :  { %v7276_v23 = vpop.f32.mrf.mxu0 }
0x13f3   :  { %v7285_v21 = vlaneseq  ;;  %v13460_v51 = vld [vmem:[%s17357_s7 + $0x38] sm:$0xff]  ;;  %v13459_v52 = vld [vmem:[%s17357_s7 + $0x30] sm:$0xff]  ;;  %v13458_v53 = vld [vmem:[%s17357_s7 + $0x28] sm:$0xff]  ;;  %v13889_v61 = vmov 1.0|1.0  }
0x13f4   :  { %7375 = vmatpush.bf16.msra.mxu0 %v13460_v51  ;;  %v13457_v33 = vld [vmem:[%s17357_s7 + $0x20] sm:$0xff]  ;;  %v13456_v45 = vld [vmem:[%s17357_s7 + $0x18] sm:$0xff]  ;;  %v13455_v49 = vld [vmem:[%s17357_s7 + $0x10] sm:$0xff] }
0x13f5   :  { %v7286_v48 = vand.u32 127, %v7285_v21  ;;  %v13454_v59 = vld [vmem:[%s17357_s7 + $0x8] sm:$0xff]  ;;  %v13453_v4 = vld [vmem:[%s17357_s7] sm:$0xff] }
0x13f7   :  { %vm7287_vm8 = vcmp.lt.s32.totalorder %v7286_v48, 16 }
0x13f8   :  { %v7288_v22 = vsel %vm7287_vm8, %v7275_v35, -1e+30  ;;  %7376 = vmatpush.bf16.msra.mxu0 %v13459_v52 }
0x13f9   :  { %7289 = vmax.xlane.f32.xlu0 %v7288_v22 }
0x13fc   :  { %7377 = vmatpush.bf16.msra.mxu0 %v13458_v53 }
0x1400   :  { %7378 = vmatpush.bf16.msra.mxu0 %v13457_v33 }
0x1404   :  { %7379 = vmatpush.bf16.msra.mxu0 %v13456_v45 }
0x1408   :  { %7380 = vmatpush.bf16.msra.mxu0 %v13455_v49 }
0x140c   :  { %7381 = vmatpush.bf16.msra.mxu0 %v13454_v59 }
0x1410   :  { %7382 = vmatpush.bf16.msra.mxu0 %v13453_v4 }
0x146c   :  { %v7290_v41 = vpop.xlane.xlu0 %7289 }
0x146d   :  { %vm7291_vm9 = vcmp.ge.f32.partialorder %v7288_v22, %v7290_v41 }
0x146e   :  { %v7292_v9 = vsel %vm7291_vm9, %v7286_v48, 128 }
0x146f   :  { %v7294_v13 = vshra.s32 %v7292_v9, 16  ;;  %v7293_v57 = vand.u32 65535, %v7292_v9 }
0x1471   :  { %v7296_v15 = vcvt.s32.f32 %v7294_v13  ;;  %v7295_v2 = vcvt.s32.f32 %v7293_v57 }
0x1473   :  { %7297 = vmin.xlane.f32.xlu0 %v7296_v15 }
0x14e6   :  { %v7298_v0 = vpop.xlane.xlu0 %7297 }
0x14e7   :  { %vm7299_vm10 = vcmp.eq.f32.partialorder %v7296_v15, %v7298_v0  ;;  %v7304_v5 = vcvt.f32.s32 %v7298_v0 }
0x14e8   :  { %v7300_v32 = vsel %vm7299_vm10, %v7295_v2, inf }
0x14e9   :  { %7301 = vmin.xlane.f32.xlu1 %v7300_v32  ;;  %v7305_v8 = vshll.u32 %v7304_v5, 16 }
0x155c   :  { %v7302_v6 = vpop.xlane.xlu1 %7301 }
0x155d   :  { %v7303_v50 = vcvt.f32.s32 %v7302_v6 }
0x155f   :  { %v7306_v46 = vadd.s32 %v7305_v8, %v7303_v50 }
0x1561   :  { %vm7307_vm11 = vcmp.eq.s32.totalorder %v7286_v48, %v7306_v46 }
0x1562   :  { %vm12048_vm12 = vmpackc.low %vm7307_vm11, %vm7307_vm11 }
0x1563   :  { %12049 = vmatmul.msk.bf16.vlgmr.msra.gmra.mxu0 %vm12048_vm12, %v13889_v61 }
0x15e0   :  { %v7384_v56 = vpop.f32.mrf.mxu0 }
0x15e1   :  { %v7388_v19 = vpack.c.bf16 %v7384_v56, %v7384_v56 }
0x15e3   :  { %7389 = vst [vmem:[#allocation4] sm:$0xf] %v7388_v19 }
0x15e8   :  { %v7386_v20 = vpop.f32.mrf.mxu0 }
0x15e9 PF:  { %s12050_s1 = sld [smem:[#allocation6 + $0x5]] }
0x15ef   :  { %p12051_p9 = scmp.eq.s32.totalorder %s12050_s1, 0 }
0x15f1   :  { %7394 = sbr.rel (%p12051_p9) target bundleno = 5624 (0x15f8), region = 81 }
0x15f6   :  { %v12052_v58 = vld [vmem:[%s17352_s2 + $0x14] sm:$0xf] }
0x15f7   :  { %7397 = vst [vmem:[#allocation4] sm:$0xf] %v12052_v58 }
0x15f8 PF:  { %v12167_v14 = vld [vmem:[#allocation7 + $0xe0] sm:$0xf]  ;;  %v13491_v55 = vld [vmem:[#allocation7 + $0xec] sm:$0xf0]  ;;  %v13489_v24 = vld [vmem:[#allocation7 + $0xe4] sm:$0xf] }
0x15f9   :  { %v12168_v37 = vor.u32 %v13491_v55, %v12167_v14  ;;  %v12169_v26 = vld [vmem:[#allocation7 + $0xf0] sm:$0xf0]  ;;  %v13521_v27 = vld [vmem:[#allocation7 + $0x1e4] sm:$0xf]  ;;  %v12295_v39 = vld [vmem:[#allocation7 + $0x1e0] sm:$0xf] }
0x15fa   :  { %v12297_v28 = vld [vmem:[#allocation7 + $0x1f0] sm:$0xf0]  ;;  %v12172_v11 = vor.u32 %v13489_v24, %v12169_v26  ;;  %v13523_v63 = vld [vmem:[#allocation7 + $0x1ec] sm:$0xf0]  ;;  %v12151_v29 = vld [vmem:[#allocation7 + $0xc0] sm:$0xf] }
0x15fb   :  { %v12300_v54 = vor.u32 %v13521_v27, %v12297_v28  ;;  %7800 = vmatpush.bf16.msra.mxu0 %v12168_v37  ;;  %v12296_v30 = vor.u32 %v13523_v63, %v12295_v39  ;;  %v13487_v3 = vld [vmem:[#allocation7 + $0xcc] sm:$0xf0]  ;;  %v13485_v34 = vld [vmem:[#allocation7 + $0xc4] sm:$0xf]  ;;  %v12153_v16 = vld [vmem:[#allocation7 + $0xd0] sm:$0xf0] }
0x15fc   :  { %7826 = vmatpush.bf16.msra.mxu2 %v12172_v11  ;;  %v12152_v31 = vor.u32 %v13487_v3, %v12151_v29  ;;  %v12156_v36 = vor.u32 %v13485_v34, %v12153_v16  ;;  %v13517_v62 = vld [vmem:[#allocation7 + $0x1c4] sm:$0xf]  ;;  %v12281_v17 = vld [vmem:[#allocation7 + $0x1d0] sm:$0xf0]  ;;  %v12279_v10 = vld [vmem:[#allocation7 + $0x1c0] sm:$0xf] }
0x15fd   :  { %7839 = vmatpush.bf16.msra.mxu3 %v12300_v54  ;;  %7813 = vmatpush.bf16.msra.mxu1 %v12296_v30  ;;  %v12284_v40 = vor.u32 %v13517_v62, %v12281_v17  ;;  %v13519_v38 = vld [vmem:[#allocation7 + $0x1cc] sm:$0xf0]  ;;  %v12135_v42 = vld [vmem:[#allocation7 + $0xa0] sm:$0xf]  ;;  %v13481_v43 = vld [vmem:[#allocation7 + $0xa4] sm:$0xf] }
0x15fe   :  { %v13483_v25 = vld [vmem:[#allocation7 + $0xac] sm:$0xf0]  ;;  %v12280_v12 = vor.u32 %v13519_v38, %v12279_v10  ;;  %v12137_v47 = vld [vmem:[#allocation7 + $0xb0] sm:$0xf0]  ;;  %v13513_v1 = vld [vmem:[#allocation7 + $0x1a4] sm:$0xf] }
0x15ff   :  { %7801 = vmatpush.bf16.msra.mxu0 %v12152_v31  ;;  %v12136_v60 = vor.u32 %v13483_v25, %v12135_v42  ;;  %v12265_v18 = vld [vmem:[#allocation7 + $0x1b0] sm:$0xf0]  ;;  %v12263_v44 = vld [vmem:[#allocation7 + $0x1a0] sm:$0xf]  ;;  %v13515_v7 = vld [vmem:[#allocation7 + $0x1ac] sm:$0xf0]  ;;  %v12140_v35 = vor.u32 %v13481_v43, %v12137_v47 }
0x1600   :  { %7827 = vmatpush.bf16.msra.mxu2 %v12156_v36  ;;  %v12268_v23 = vor.u32 %v13513_v1, %v12265_v18  ;;  %v12119_v21 = vld [vmem:[#allocation7 + $0x80] sm:$0xf]  ;;  %v13479_v48 = vld [vmem:[#allocation7 + $0x8c] sm:$0xf0]  ;;  %v13477_v22 = vld [vmem:[#allocation7 + $0x84] sm:$0xf]  ;;  %v12264_v41 = vor.u32 %v13515_v7, %v12263_v44 }
0x1601   :  { %7840 = vmatpush.bf16.msra.mxu3 %v12284_v40  ;;  %7814 = vmatpush.bf16.msra.mxu1 %v12280_v12  ;;  %v12121_v9 = vld [vmem:[#allocation7 + $0x90] sm:$0xf0]  ;;  %v13509_v13 = vld [vmem:[#allocation7 + $0x184] sm:$0xf]  ;;  %v12247_v51 = vld [vmem:[#allocation7 + $0x180] sm:$0xf]  ;;  %v12120_v53 = vor.u32 %v13479_v48, %v12119_v21 }
0x1602   :  { %v12249_v15 = vld [vmem:[#allocation7 + $0x190] sm:$0xf0]  ;;  %v13511_v52 = vld [vmem:[#allocation7 + $0x18c] sm:$0xf0]  ;;  %v12124_v33 = vor.u32 %v13477_v22, %v12121_v9  ;;  %v12103_v49 = vld [vmem:[#allocation7 + $0x60] sm:$0xf] }
0x1603   :  { %7802 = vmatpush.bf16.msra.mxu0 %v12136_v60  ;;  %v12252_v45 = vor.u32 %v13509_v13, %v12249_v15  ;;  %v13475_v59 = vld [vmem:[#allocation7 + $0x6c] sm:$0xf0]  ;;  %v13473_v57 = vld [vmem:[#allocation7 + $0x64] sm:$0xf]  ;;  %v12248_v0 = vor.u32 %v13511_v52, %v12247_v51  ;;  %v12105_v2 = vld [vmem:[#allocation7 + $0x70] sm:$0xf0] }
0x1604   :  { %7828 = vmatpush.bf16.msra.mxu2 %v12140_v35  ;;  %v13505_v32 = vld [vmem:[#allocation7 + $0x164] sm:$0xf]  ;;  %v12233_v4 = vld [vmem:[#allocation7 + $0x170] sm:$0xf0]  ;;  %v12231_v5 = vld [vmem:[#allocation7 + $0x160] sm:$0xf]  ;;  %v12104_v8 = vor.u32 %v13475_v59, %v12103_v49  ;;  %v12108_v50 = vor.u32 %v13473_v57, %v12105_v2 }
0x1605   :  { %7841 = vmatpush.bf16.msra.mxu3 %v12268_v23  ;;  %7815 = vmatpush.bf16.msra.mxu1 %v12264_v41  ;;  %v13507_v6 = vld [vmem:[#allocation7 + $0x16c] sm:$0xf0]  ;;  %v12236_v46 = vor.u32 %v13505_v32, %v12233_v4  ;;  %v12087_v61 = vld [vmem:[#allocation7 + $0x40] sm:$0xf]  ;;  %v13469_v19 = vld [vmem:[#allocation7 + $0x44] sm:$0xf] }
0x1606   :  { %v13471_v56 = vld [vmem:[#allocation7 + $0x4c] sm:$0xf0]  ;;  %v12232_v20 = vor.u32 %v13507_v6, %v12231_v5  ;;  %v12089_v58 = vld [vmem:[#allocation7 + $0x50] sm:$0xf0]  ;;  %v13501_v14 = vld [vmem:[#allocation7 + $0x144] sm:$0xf] }
0x1607   :  { %7803 = vmatpush.bf16.msra.mxu0 %v12120_v53  ;;  %v12217_v55 = vld [vmem:[#allocation7 + $0x150] sm:$0xf0]  ;;  %v12215_v24 = vld [vmem:[#allocation7 + $0x140] sm:$0xf]  ;;  %v13503_v37 = vld [vmem:[#allocation7 + $0x14c] sm:$0xf0]  ;;  %v12088_v26 = vor.u32 %v13471_v56, %v12087_v61  ;;  %v12092_v27 = vor.u32 %v13469_v19, %v12089_v58 }
0x1608   :  { %7829 = vmatpush.bf16.msra.mxu2 %v12124_v33  ;;  %v12220_v28 = vor.u32 %v13501_v14, %v12217_v55  ;;  %v12071_v11 = vld [vmem:[#allocation7 + $0x20] sm:$0xf]  ;;  %v13467_v54 = vld [vmem:[#allocation7 + $0x2c] sm:$0xf0]  ;;  %v13465_v39 = vld [vmem:[#allocation7 + $0x24] sm:$0xf]  ;;  %v12216_v63 = vor.u32 %v13503_v37, %v12215_v24 }
0x1609   :  { %7842 = vmatpush.bf16.msra.mxu3 %v12252_v45  ;;  %7816 = vmatpush.bf16.msra.mxu1 %v12248_v0  ;;  %v12073_v29 = vld [vmem:[#allocation7 + $0x30] sm:$0xf0]  ;;  %v13497_v30 = vld [vmem:[#allocation7 + $0x124] sm:$0xf]  ;;  %v12199_v34 = vld [vmem:[#allocation7 + $0x120] sm:$0xf]  ;;  %v12072_v31 = vor.u32 %v13467_v54, %v12071_v11 }
0x160a   :  { %v12201_v3 = vld [vmem:[#allocation7 + $0x130] sm:$0xf0]  ;;  %v13499_v16 = vld [vmem:[#allocation7 + $0x12c] sm:$0xf0]  ;;  %v12055_v36 = vld [vmem:[#allocation7] sm:$0xf]  ;;  %v12076_v10 = vor.u32 %v13465_v39, %v12073_v29 }
0x160b   :  { %7804 = vmatpush.bf16.msra.mxu0 %v12104_v8  ;;  %v13463_v62 = vld [vmem:[#allocation7 + $0xc] sm:$0xf0]  ;;  %v13461_v17 = vld [vmem:[#allocation7 + $0x4] sm:$0xf]  ;;  %v12204_v40 = vor.u32 %v13497_v30, %v12201_v3  ;;  %v12057_v38 = vld [vmem:[#allocation7 + $0x10] sm:$0xf0]  ;;  %v12200_v12 = vor.u32 %v13499_v16, %v12199_v34 }
0x160c   :  { %7830 = vmatpush.bf16.msra.mxu2 %v12108_v50  ;;  %v13493_v42 = vld [vmem:[#allocation7 + $0x104] sm:$0xf]  ;;  %v7398_v25 = vld [vmem:[#allocation4] sm:$0xff]  ;;  %v12185_v43 = vld [vmem:[#allocation7 + $0x110] sm:$0xf0]  ;;  %v12056_v7 = vor.u32 %v13463_v62, %v12055_v36  ;;  %v12060_v22 = vor.u32 %v13461_v17, %v12057_v38  ;;  %s12345_s20 = sld [smem:[#allocation6 + $0x6]] }
0x160d   :  { %7843 = vmatpush.bf16.msra.mxu3 %v12236_v46  ;;  %7817 = vmatpush.bf16.msra.mxu1 %v12232_v20  ;;  %v12175_v47 = vld [vmem:[#allocation7 + $0xe8] sm:$0xf]  ;;  %v13492_v1 = vld [vmem:[#allocation7 + $0xf4] sm:$0xf0]  ;;  %v13490_v60 = vld [vmem:[#allocation7 + $0xec] sm:$0xf]  ;;  %v7474_v48 = vunpack.c.l.b16 %v7398_v25  ;;  %v12188_v41 = vor.u32 %v13493_v42, %v12185_v43  ;;  %v7475_v15 = vunpack.c.h.b16 %v7398_v25 }
0x160e   :  { %v12177_v18 = vld [vmem:[#allocation7 + $0xf8] sm:$0xf0]  ;;  %v13522_v44 = vld [vmem:[#allocation7 + $0x1ec] sm:$0xf]  ;;  %v12183_v23 = vld [vmem:[#allocation7 + $0x100] sm:$0xf]  ;;  %v12176_v51 = vor.u32 %v13492_v1, %v12175_v47 }
0x160f   :  { %7805 = vmatpush.bf16.msra.mxu0 %v12088_v26  ;;  %v12305_v35 = vld [vmem:[#allocation7 + $0x1f8] sm:$0xf0]  ;;  %v13495_v21 = vld [vmem:[#allocation7 + $0x10c] sm:$0xf0]  ;;  %v12303_v9 = vld [vmem:[#allocation7 + $0x1e8] sm:$0xf]  ;;  %v12180_v52 = vor.u32 %v13490_v60, %v12177_v18  ;;  %v17193_v0 = vpack.c.b16 %v7474_v48, %v7474_v48  ;;  %v17195_v5 = vpack.c.b16 %v7475_v15, %v7475_v15 }
0x1610   :  { %7831 = vmatpush.bf16.msra.mxu2 %v12092_v27  ;;  %v13524_v13 = vld [vmem:[#allocation7 + $0x1f4] sm:$0xf0]  ;;  %v12159_v53 = vld [vmem:[#allocation7 + $0xc8] sm:$0xf]  ;;  %v12308_v33 = vor.u32 %v13522_v44, %v12305_v35  ;;  %v12184_v45 = vor.u32 %v13495_v21, %v12183_v23  ;;  %v13486_v59 = vld [vmem:[#allocation7 + $0xcc] sm:$0xf] }
0x1611   :  { %7844 = vmatpush.bf16.msra.mxu3 %v12220_v28  ;;  %7818 = vmatpush.bf16.msra.mxu1 %v12216_v63  ;;  %v13488_v49 = vld [vmem:[#allocation7 + $0xd4] sm:$0xf0]  ;;  %v12161_v57 = vld [vmem:[#allocation7 + $0xd8] sm:$0xf0]  ;;  %v12304_v2 = vor.u32 %v13524_v13, %v12303_v9  ;;  %v13518_v32 = vld [vmem:[#allocation7 + $0x1cc] sm:$0xf] }
0x1612   :  { %v12289_v4 = vld [vmem:[#allocation7 + $0x1d8] sm:$0xf0]  ;;  %v12287_v6 = vld [vmem:[#allocation7 + $0x1c8] sm:$0xf]  ;;  %v13520_v8 = vld [vmem:[#allocation7 + $0x1d4] sm:$0xf0]  ;;  %v12160_v50 = vor.u32 %v13488_v49, %v12159_v53  ;;  %v12164_v46 = vor.u32 %v13486_v59, %v12161_v57 }
0x1613   :  { %7806 = vmatpush.bf16.msra.mxu0 %v12072_v31  ;;  %v12143_v61 = vld [vmem:[#allocation7 + $0xa8] sm:$0xf]  ;;  %v12292_v56 = vor.u32 %v13518_v32, %v12289_v4  ;;  %v13484_v19 = vld [vmem:[#allocation7 + $0xb4] sm:$0xf0]  ;;  %v13482_v20 = vld [vmem:[#allocation7 + $0xac] sm:$0xf]  ;;  %v12288_v14 = vor.u32 %v13520_v8, %v12287_v6 }
0x1614   :  { %7832 = vmatpush.bf16.msra.mxu2 %v12076_v10  ;;  %v12145_v58 = vld [vmem:[#allocation7 + $0xb8] sm:$0xf0]  ;;  %v13514_v55 = vld [vmem:[#allocation7 + $0x1ac] sm:$0xf]  ;;  %v12271_v37 = vld [vmem:[#allocation7 + $0x1a8] sm:$0xf]  ;;  %v12144_v27 = vor.u32 %v13484_v19, %v12143_v61 }
0x1615   :  { %7845 = vmatpush.bf16.msra.mxu3 %v12204_v40  ;;  %7819 = vmatpush.bf16.msra.mxu1 %v12200_v12  ;;  %v12273_v24 = vld [vmem:[#allocation7 + $0x1b8] sm:$0xf0]  ;;  %v13516_v26 = vld [vmem:[#allocation7 + $0x1b4] sm:$0xf0]  ;;  %v12148_v28 = vor.u32 %v13482_v20, %v12145_v58  ;;  %v12127_v11 = vld [vmem:[#allocation7 + $0x88] sm:$0xf] }
0x1616   :  { %v12276_v54 = vor.u32 %v13514_v55, %v12273_v24  ;;  %v13480_v39 = vld [vmem:[#allocation7 + $0x94] sm:$0xf0]  ;;  %v13478_v63 = vld [vmem:[#allocation7 + $0x8c] sm:$0xf]  ;;  %v12129_v29 = vld [vmem:[#allocation7 + $0x98] sm:$0xf0]  ;;  %v12272_v30 = vor.u32 %v13516_v26, %v12271_v37 }
0x1617   :  { %7807 = vmatpush.bf16.msra.mxu0 %v12056_v7  ;;  %v13510_v3 = vld [vmem:[#allocation7 + $0x18c] sm:$0xf]  ;;  %v12257_v34 = vld [vmem:[#allocation7 + $0x198] sm:$0xf0]  ;;  %v12255_v16 = vld [vmem:[#allocation7 + $0x188] sm:$0xf]  ;;  %v12128_v36 = vor.u32 %v13480_v39, %v12127_v11  ;;  %v12132_v62 = vor.u32 %v13478_v63, %v12129_v29 }
0x1618   :  { %7833 = vmatpush.bf16.msra.mxu2 %v12060_v22  ;;  %v13512_v31 = vld [vmem:[#allocation7 + $0x194] sm:$0xf0]  ;;  %v12111_v17 = vld [vmem:[#allocation7 + $0x68] sm:$0xf]  ;;  %v12260_v10 = vor.u32 %v13510_v3, %v12257_v34  ;;  %v13474_v38 = vld [vmem:[#allocation7 + $0x6c] sm:$0xf] }
0x1619   :  { %7846 = vmatpush.bf16.msra.mxu3 %v12188_v41  ;;  %7820 = vmatpush.bf16.msra.mxu1 %v12184_v45  ;;  %v13476_v40 = vld [vmem:[#allocation7 + $0x74] sm:$0xf0]  ;;  %v12113_v42 = vld [vmem:[#allocation7 + $0x78] sm:$0xf0]  ;;  %v12256_v25 = vor.u32 %v13512_v31, %v12255_v16  ;;  %v13506_v12 = vld [vmem:[#allocation7 + $0x16c] sm:$0xf] }
0x161a   :  { %7808 = vmatmul.bf16.vlgmr.msra.gmra.mxu0 %v17193_v0  ;;  %v12241_v43 = vld [vmem:[#allocation7 + $0x178] sm:$0xf0]  ;;  %v12239_v47 = vld [vmem:[#allocation7 + $0x168] sm:$0xf]  ;;  %v13508_v1 = vld [vmem:[#allocation7 + $0x174] sm:$0xf0]  ;;  %v12112_v60 = vor.u32 %v13476_v40, %v12111_v17  ;;  %v12116_v18 = vor.u32 %v13474_v38, %v12113_v42 }
0x161b   :  { %7852 = vmatpush.bf16.msrb.mxu0 %v12176_v51  ;;  %7834 = vmatmul.bf16.vlgmr.msra.gmra.mxu2 %v17193_v0  ;;  %v12095_v44 = vld [vmem:[#allocation7 + $0x48] sm:$0xf]  ;;  %v12244_v7 = vor.u32 %v13506_v12, %v12241_v43  ;;  %v13472_v35 = vld [vmem:[#allocation7 + $0x54] sm:$0xf0]  ;;  %v13470_v23 = vld [vmem:[#allocation7 + $0x4c] sm:$0xf]  ;;  %v12240_v48 = vor.u32 %v13508_v1, %v12239_v47 }
0x161c   :  { %7878 = vmatpush.bf16.msrb.mxu2 %v12180_v52  ;;  %7847 = vmatmul.bf16.vlgmr.msra.gmra.mxu3 %v17195_v5  ;;  %v12097_v21 = vld [vmem:[#allocation7 + $0x58] sm:$0xf0]  ;;  %v13502_v22 = vld [vmem:[#allocation7 + $0x14c] sm:$0xf]  ;;  %v12223_v9 = vld [vmem:[#allocation7 + $0x148] sm:$0xf]  ;;  %v12096_v15 = vor.u32 %v13472_v35, %v12095_v44 }
0x161d   :  { %7891 = vmatpush.bf16.msrb.mxu3 %v12308_v33  ;;  %7865 = vmatpush.bf16.msrb.mxu1 %v12304_v2  ;;  %v12225_v41 = vld [vmem:[#allocation7 + $0x158] sm:$0xf0]  ;;  %v13504_v13 = vld [vmem:[#allocation7 + $0x154] sm:$0xf0]  ;;  %v12100_v51 = vor.u32 %v13470_v23, %v12097_v21  ;;  %v12079_v52 = vld [vmem:[#allocation7 + $0x28] sm:$0xf] }
0x161e   :  { %7821 = vmatmul.bf16.vlgmr.msra.gmra.mxu1 %v17195_v5  ;;  %v12228_v53 = vor.u32 %v13502_v22, %v12225_v41  ;;  %v13468_v33 = vld [vmem:[#allocation7 + $0x34] sm:$0xf0]  ;;  %v13466_v45 = vld [vmem:[#allocation7 + $0x2c] sm:$0xf]  ;;  %v12081_v49 = vld [vmem:[#allocation7 + $0x38] sm:$0xf0]  ;;  %v12224_v59 = vor.u32 %v13504_v13, %v12223_v9 }
0x161f   :  { %7853 = vmatpush.bf16.msrb.mxu0 %v12160_v50  ;;  %v13498_v57 = vld [vmem:[#allocation7 + $0x12c] sm:$0xf]  ;;  %v12209_v2 = vld [vmem:[#allocation7 + $0x138] sm:$0xf0]  ;;  %v12207_v32 = vld [vmem:[#allocation7 + $0x128] sm:$0xf]  ;;  %v12080_v6 = vor.u32 %v13468_v33, %v12079_v52  ;;  %v12084_v8 = vor.u32 %v13466_v45, %v12081_v49 }
0x1620   :  { %7879 = vmatpush.bf16.msrb.mxu2 %v12164_v46  ;;  %v13500_v4 = vld [vmem:[#allocation7 + $0x134] sm:$0xf0]  ;;  %v12063_v50 = vld [vmem:[#allocation7 + $0x8] sm:$0xf]  ;;  %v12212_v46 = vor.u32 %v13498_v57, %v12209_v2  ;;  %v12065_v19 = vld [vmem:[#allocation7 + $0x18] sm:$0xf0] }
0x1621   :  { %7892 = vmatpush.bf16.msrb.mxu3 %v12292_v56  ;;  %7866 = vmatpush.bf16.msrb.mxu1 %v12288_v14  ;;  %v13464_v61 = vld [vmem:[#allocation7 + $0x14] sm:$0xf0]  ;;  %v13462_v56 = vld [vmem:[#allocation7 + $0xc] sm:$0xf]  ;;  %v12208_v20 = vor.u32 %v13500_v4, %v12207_v32  ;;  %v12193_v14 = vld [vmem:[#allocation7 + $0x118] sm:$0xf0] }
0x1622   :  { %v13494_v58 = vld [vmem:[#allocation7 + $0x10c] sm:$0xf]  ;;  %v12191_v55 = vld [vmem:[#allocation7 + $0x108] sm:$0xf]  ;;  %v13496_v24 = vld [vmem:[#allocation7 + $0x114] sm:$0xf0]  ;;  %v12064_v37 = vor.u32 %v13464_v61, %v12063_v50  ;;  %v12068_v26 = vor.u32 %v13462_v56, %v12065_v19 }
0x1623   :  { %7854 = vmatpush.bf16.msrb.mxu0 %v12144_v27  ;;  %v12196_v27 = vor.u32 %v13494_v58, %v12193_v14  ;;  %v17208_v11 = vld [vmem:[%s17356_s6] sm:$0xf]  ;;  %v13531_v40 = vld [vmem:[%s17358_s8 + $0x30] sm:$0xff]  ;;  %v13530_v43 = vld [vmem:[%s17358_s8 + $0x28] sm:$0xff]  ;;  %p12346_p10 = scmp.ne.s32.totalorder %s12345_s20, 0 }
0x1624   :  { %7880 = vmatpush.bf16.msrb.mxu2 %v12148_v28  ;;  %v12192_v28 = vor.u32 %v13496_v24, %v12191_v55  ;;  %v7466_v29 = vperm.slane %v17208_v11, 1  ;;  %v7467_v23 = vperm.slane %v17208_v11, 2  ;;  %v13527_v22 = vld [vmem:[%s17358_s8 + $0x10] sm:$0xff]  ;;  %v7468_v32 = vperm.slane %v17208_v11, 3  ;;  %v7904_v24 = vld [vmem:[#allocation3] sm:$0xff] }
0x1625   :  { %7893 = vmatpush.bf16.msrb.mxu3 %v12276_v54  ;;  %7867 = vmatpush.bf16.msrb.mxu1 %v12272_v30  ;;  %v7465_v54 = vperm.slane %v17208_v11, 0 }
0x1627   :  { %7855 = vmatpush.bf16.msrb.mxu0 %v12128_v36 }
0x1628   :  { %7881 = vmatpush.bf16.msrb.mxu2 %v12132_v62 }
0x1629   :  { %7894 = vmatpush.bf16.msrb.mxu3 %v12260_v10  ;;  %7868 = vmatpush.bf16.msrb.mxu1 %v12256_v25 }
0x162b   :  { %7856 = vmatpush.bf16.msrb.mxu0 %v12112_v60  ;;  %v13529_v60 = vld [vmem:[%s17358_s8 + $0x20] sm:$0xff] }
0x162c   :  { %7882 = vmatpush.bf16.msrb.mxu2 %v12116_v18 }
0x162d   :  { %7895 = vmatpush.bf16.msrb.mxu3 %v12244_v7  ;;  %7869 = vmatpush.bf16.msrb.mxu1 %v12240_v48  ;;  %v13528_v7 = vld [vmem:[%s17358_s8 + $0x18] sm:$0xff] }
0x162f   :  { %7857 = vmatpush.bf16.msrb.mxu0 %v12096_v15 }
0x1630   :  { %7883 = vmatpush.bf16.msrb.mxu2 %v12100_v51 }
0x1631   :  { %7896 = vmatpush.bf16.msrb.mxu3 %v12228_v53  ;;  %7870 = vmatpush.bf16.msrb.mxu1 %v12224_v59  ;;  %v13526_v53 = vld [vmem:[%s17358_s8 + $0x8] sm:$0xff] }
0x1633   :  { %7858 = vmatpush.bf16.msrb.mxu0 %v12080_v6 }
0x1634   :  { %7884 = vmatpush.bf16.msrb.mxu2 %v12084_v8 }
0x1635   :  { %7897 = vmatpush.bf16.msrb.mxu3 %v12212_v46  ;;  %7871 = vmatpush.bf16.msrb.mxu1 %v12208_v20  ;;  %v13525_v46 = vld [vmem:[%s17358_s8] sm:$0xff] }
0x1637   :  { %7859 = vmatpush.bf16.msrb.mxu0 %v12064_v37 }
0x1638   :  { %7885 = vmatpush.bf16.msrb.mxu2 %v12068_v26 }
0x1639   :  { %7898 = vmatpush.bf16.msrb.mxu3 %v12196_v27  ;;  %7872 = vmatpush.bf16.msrb.mxu1 %v12192_v28 }
0x163a   :  { %7860 = vmatmul.bf16.vlgmr.msrb.gmra.mxu0 %v17193_v0 }
0x163b   :  { %7886 = vmatmul.bf16.vlgmr.msrb.gmra.mxu2 %v17193_v0 }
0x163c   :  { %7899 = vmatmul.bf16.vlgmr.msrb.gmra.mxu3 %v17195_v5  ;;  %7873 = vmatmul.bf16.vlgmr.msrb.gmra.mxu1 %v17195_v5  ;;  %v13532_v5 = vld [vmem:[%s17358_s8 + $0x38] sm:$0xff] }
0x163d   :  { %8040 = vmatpush.bf16.msra.mxu0 %v13532_v5 }
0x1641   :  { %8041 = vmatpush.bf16.msra.mxu0 %v13531_v40 }
0x1645   :  { %8042 = vmatpush.bf16.msra.mxu0 %v13530_v43 }
0x1649   :  { %8043 = vmatpush.bf16.msra.mxu0 %v13529_v60 }
0x164d   :  { %8044 = vmatpush.bf16.msra.mxu0 %v13528_v7 }
0x1651   :  { %8045 = vmatpush.bf16.msra.mxu0 %v13527_v22 }
0x1655   :  { %8046 = vmatpush.bf16.msra.mxu0 %v13526_v53 }
0x1659   :  { %8047 = vmatpush.bf16.msra.mxu0 %v13525_v46 }
0x1697   :  { %v7809_v39 = vpop.f32.mrf.mxu0 }
0x1698   :  { %v7810_v63 = vadd.f32 %v7809_v39, %v7465_v54 }
0x169b   :  { %v7822_v30 = vpop.f32.mrf.mxu1 }
0x169c   :  { %v7823_v3 = vadd.f32 %v7822_v30, %v7810_v63 }
0x169e   :  { %v7835_v34 = vpop.f32.mrf.mxu2  ;;  %v12309_v16 = vmul.f32 -1.442695, %v7823_v3 }
0x169f   :  { %v7836_v0 = vadd.f32 %v7835_v34, %v7466_v29  ;;  %v7848_v31 = vpop.f32.mrf.mxu3  ;;  %v7811_v62 = vpop.f32.mrf.mxu0 }
0x16a0   :  { %13807 = vpow2.f32 %v12309_v16 }
0x16a1   :  { %v7849_v36 = vadd.f32 %v7848_v31, %v7836_v0 }
0x16a3   :  { %v12310_v17 = vmul.f32 -1.442695, %v7849_v36  ;;  %v7824_v10 = vpop.f32.mrf.mxu1 }
0x16a5   :  { %13809 = vpow2.f32 %v12310_v17 }
0x16a6   :  { %v13808_v38 = vpop.eup %13807  ;;  %v7837_v42 = vpop.f32.mrf.mxu2 }
0x16a7   :  { %v7908_v25 = vadd.f32 1.0, %v13808_v38  ;;  %v7850_v12 = vpop.f32.mrf.mxu3 }
0x16a9   :  { %13811 = vrcp.f32 %v7908_v25  ;;  %vm7914_vm13 = vweird.f32 %v7908_v25  ;;  %v7918_v13 = vand.u32 2147483647, %v7908_v25  ;;  %v7920_v52 = vand.u32 2147483648, %v7908_v25 }
0x16ab   :  { %v13810_v47 = vpop.eup %13809  ;;  %v7921_v50 = vor.u32 1.1754944e-38, %v7920_v52  ;;  %vm7919_vm3 = vcmp.eq.f32.partialorder %v7918_v13, 8.507059e+37 }
0x16ac   :  { %v7927_v1 = vadd.f32 1.0, %v13810_v47  ;;  %v13806_v47 = vld [vmem:[%s17359_s9] ss:$0 sm:$0xff] }
0x16ae   :  { %13813 = vrcp.f32 %v7927_v1  ;;  %vm7933_vm15 = vweird.f32 %v7927_v1  ;;  %v7939_v15 = vand.u32 2147483648, %v7927_v1  ;;  %v7937_v59 = vand.u32 2147483647, %v7927_v1 }
0x16af   :  { %v13812_v18 = vpop.eup %13811 }
0x16b0   :  { %v7910_v44 = vmul.f32 %v13812_v18, %v7908_v25  ;;  %vm7915_vm14 = vweird.f32 %v13812_v18  ;;  %v7940_v8 = vor.u32 1.1754944e-38, %v7939_v15  ;;  %vm7938_vm4 = vcmp.eq.f32.partialorder %v7937_v59, 8.507059e+37 }
0x16b1   :  { %vm17235_vm1 = vmor %vm7914_vm13, %vm7915_vm14 }
0x16b2   :  { %v7911_v35 = vsub.f32 1.0, %v7910_v44 }
0x16b4   :  { %v13814_v21 = vpop.eup %13813  ;;  %v7912_v48 = vmul.f32 %v13812_v18, %v7911_v35 }
0x16b5   :  { %v7929_v41 = vmul.f32 %v13814_v21, %v7927_v1  ;;  %vm7934_vm0 = vweird.f32 %v13814_v21 }
0x16b6   :  { %v7913_v49 = vadd.f32 %v13812_v18, %v7912_v48  ;;  %vm17241_vm2 = vmor %vm7933_vm15, %vm7934_vm0 }
0x16b7   :  { %v7861_v9 = vpop.f32.mrf.mxu0  ;;  %v7930_v33 = vsub.f32 1.0, %v7929_v41 }
0x16b8   :  { %v7862_v51 = vadd.f32 %v7861_v9, %v7467_v23  ;;  %v7917_v61 = vsel %vm17235_vm1, %v13812_v18, %v7913_v49 }
0x16b9   :  { %v7874_v45 = vpop.f32.mrf.mxu1  ;;  %v7931_v4 = vmul.f32 %v13814_v21, %v7930_v33  ;;  %v7922_v37 = vsel %vm7919_vm3, %v7921_v50, %v7917_v61 }
0x16ba   :  { %v7875_v57 = vadd.f32 %v7874_v45, %v7862_v51 }
0x16bb   :  { %v7932_v56 = vadd.f32 %v13814_v21, %v7931_v4 }
0x16bc   :  { %13815 = vtanh.f32 %v7875_v57 }
0x16bd   :  { %v7936_v14 = vsel %vm17241_vm2, %v13814_v21, %v7932_v56 }
0x16be   :  { %v7887_v19 = vpop.f32.mrf.mxu2  ;;  %v7941_v26 = vsel %vm7938_vm4, %v7940_v8, %v7936_v14 }
0x16bf   :  { %v7888_v20 = vadd.f32 %v7887_v19, %v7468_v32  ;;  %v7900_v58 = vpop.f32.mrf.mxu3  ;;  %v7863_v55 = vpop.f32.mrf.mxu0  ;;  %v7963_v39 = vmul.f32 %v7941_v26, %v7904_v24 }
0x16c1   :  { %v7901_v27 = vadd.f32 %v7900_v58, %v7888_v20  ;;  %v7876_v28 = vpop.f32.mrf.mxu1 }
0x16c2   :  { %v13816_v11 = vpop.eup %13815 }
0x16c3   :  { %v12311_v54 = vmul.f32 -1.442695, %v7901_v27  ;;  %v7964_v63 = vmul.f32 %v13816_v11, %v7922_v37 }
0x16c5   :  { %13817 = vpow2.f32 %v12311_v54  ;;  %v7965_v29 = vadd.f32 %v7964_v63, %v7963_v39 }
0x16c6   :  { %v7889_v30 = vpop.f32.mrf.mxu2 }
0x16c7   :  { %v7902_v3 = vpop.f32.mrf.mxu3  ;;  %7969 = vst [vmem:[#allocation3] sm:$0xff] %v7965_v29 }
0x16cb   :  { %v13818_v34 = vpop.eup %13817 }
0x16cc   :  { %v7947_v16 = vadd.f32 1.0, %v13818_v34 }
0x16ce   :  { %13819 = vrcp.f32 %v7947_v16  ;;  %v7959_v36 = vand.u32 2147483648, %v7947_v16  ;;  %v7957_v17 = vand.u32 2147483647, %v7947_v16  ;;  %vm7953_vm6 = vweird.f32 %v7947_v16 }
0x16cf   :  { %13821 = vtanh.f32 %v7965_v29 }
0x16d0   :  { %v7960_v40 = vor.u32 1.1754944e-38, %v7959_v36  ;;  %vm7958_vm8 = vcmp.eq.f32.partialorder %v7957_v17, 8.507059e+37 }
0x16d4   :  { %v13820_v0 = vpop.eup %13819 }
0x16d5   :  { %v7949_v31 = vmul.f32 %v13820_v0, %v7947_v16  ;;  %vm7954_vm5 = vweird.f32 %v13820_v0  ;;  %v13822_v42 = vpop.eup %13821 }
0x16d6   :  { %vm7955_vm7 = vmor %vm7953_vm6, %vm7954_vm5 }
0x16d7   :  { %v7950_v5 = vsub.f32 1.0, %v7949_v31 }
0x16d9   :  { %v7951_v62 = vmul.f32 %v13820_v0, %v7950_v5 }
0x16db   :  { %v7952_v10 = vadd.f32 %v13820_v0, %v7951_v62 }
0x16dd   :  { %v7956_v38 = vsel %vm7955_vm7, %v13820_v0, %v7952_v10 }
0x16de   :  { %v7961_v25 = vsel %vm7958_vm8, %v7960_v40, %v7956_v38 }
0x16df   :  { %v7967_v12 = vmul.f32 %v13822_v42, %v7961_v25 }
0x16e1   :  { %v7970_v43 = vpack.c.bf16 %v7967_v12, %v7967_v12 }
0x16e3   :  { %7971 = vst [vmem:[#allocation4 + $0x4] sm:$0xf] %v7970_v43  ;;  %8048 = vmatmul.bf16.vlgmr.msra.gmra.mxu0 %v7970_v43 }
0x1760   :  { %v8049_v1 = vpop.f32.mrf.mxu0 }
0x1761   :  { %v8050_v60 = vadd.f32 %v13806_v47, %v8049_v1 }
0x1763   :  { %12344 = vst [vmem:[%s17360_s10 + $0x28] sm:$0xff] %v8050_v60 }
0x1764   :  { %8059 = sbr.rel (%p12346_p10) target bundleno = 6495 (0x195f), region = 85 }
0x1768   :  { %v8051_v18 = vpop.f32.mrf.mxu0 }
0x1769   :  { %v8060_v44 = vlaneseq  ;;  %v13540_v41 = vld [vmem:[%s17357_s7 + $0x38] sm:$0xff]  ;;  %v13539_v9 = vld [vmem:[%s17357_s7 + $0x30] sm:$0xff]  ;;  %v13538_v13 = vld [vmem:[%s17357_s7 + $0x28] sm:$0xff]  ;;  %v13890_v50 = vmov 1.0|1.0  }
0x176a   :  { %8150 = vmatpush.bf16.msra.mxu0 %v13540_v41  ;;  %v13537_v15 = vld [vmem:[%s17357_s7 + $0x20] sm:$0xff]  ;;  %v13536_v51 = vld [vmem:[%s17357_s7 + $0x18] sm:$0xff]  ;;  %v13535_v52 = vld [vmem:[%s17357_s7 + $0x10] sm:$0xff] }
0x176b   :  { %v8061_v7 = vand.u32 127, %v8060_v44  ;;  %v13534_v53 = vld [vmem:[%s17357_s7 + $0x8] sm:$0xff]  ;;  %v13533_v57 = vld [vmem:[%s17357_s7] sm:$0xff] }
0x176d   :  { %vm8062_vm9 = vcmp.lt.s32.totalorder %v8061_v7, 16 }
0x176e   :  { %v8063_v35 = vsel %vm8062_vm9, %v8050_v60, -1e+30  ;;  %8151 = vmatpush.bf16.msra.mxu0 %v13539_v9 }
0x176f   :  { %8064 = vmax.xlane.f32.xlu0 %v8063_v35 }
0x1772   :  { %8152 = vmatpush.bf16.msra.mxu0 %v13538_v13 }
0x1776   :  { %8153 = vmatpush.bf16.msra.mxu0 %v13537_v15 }
0x177a   :  { %8154 = vmatpush.bf16.msra.mxu0 %v13536_v51 }
0x177e   :  { %8155 = vmatpush.bf16.msra.mxu0 %v13535_v52 }
0x1782   :  { %8156 = vmatpush.bf16.msra.mxu0 %v13534_v53 }
0x1786   :  { %8157 = vmatpush.bf16.msra.mxu0 %v13533_v57 }
0x17e2   :  { %v8065_v23 = vpop.xlane.xlu0 %8064 }
0x17e3   :  { %vm8066_vm10 = vcmp.ge.f32.partialorder %v8063_v35, %v8065_v23 }
0x17e4   :  { %v8067_v21 = vsel %vm8066_vm10, %v8061_v7, 128 }
0x17e5   :  { %v8069_v48 = vshra.s32 %v8067_v21, 16  ;;  %v8068_v33 = vand.u32 65535, %v8067_v21 }
0x17e7   :  { %v8071_v22 = vcvt.s32.f32 %v8069_v48  ;;  %v8070_v49 = vcvt.s32.f32 %v8068_v33 }
0x17e9   :  { %8072 = vmin.xlane.f32.xlu0 %v8071_v22 }
0x185c   :  { %v8073_v45 = vpop.xlane.xlu0 %8072 }
0x185d   :  { %vm8074_vm11 = vcmp.eq.f32.partialorder %v8071_v22, %v8073_v45  ;;  %v8079_v2 = vcvt.f32.s32 %v8073_v45 }
0x185e   :  { %v8075_v59 = vsel %vm8074_vm11, %v8070_v49, inf }
0x185f   :  { %8076 = vmin.xlane.f32.xlu1 %v8075_v59  ;;  %v8080_v4 = vshll.u32 %v8079_v2, 16 }
0x18d2   :  { %v8077_v32 = vpop.xlane.xlu1 %8076 }
0x18d3   :  { %v8078_v6 = vcvt.f32.s32 %v8077_v32 }
0x18d5   :  { %v8081_v8 = vadd.s32 %v8080_v4, %v8078_v6 }
0x18d7   :  { %vm8082_vm12 = vcmp.eq.s32.totalorder %v8061_v7, %v8081_v8 }
0x18d8   :  { %vm12380_vm13 = vmpackc.low %vm8082_vm12, %vm8082_vm12 }
0x18d9   :  { %12381 = vmatmul.msk.bf16.vlgmr.msra.gmra.mxu0 %vm12380_vm13, %v13890_v50 }
0x1956   :  { %v8159_v46 = vpop.f32.mrf.mxu0 }
0x1957   :  { %v8163_v61 = vpack.c.bf16 %v8159_v46, %v8159_v46 }
0x1959   :  { %8164 = vst [vmem:[#allocation4] sm:$0xf] %v8163_v61 }
0x195e   :  { %v8161_v56 = vpop.f32.mrf.mxu0 }
0x195f PF:  { %s12382_s18 = sld [smem:[#allocation6 + $0x6]] }
0x1965   :  { %p12383_p11 = scmp.eq.s32.totalorder %s12382_s18, 0 }
0x1967   :  { %8169 = sbr.rel (%p12383_p11) target bundleno = 6510 (0x196e), region = 89 }
0x196c   :  { %v12384_v19 = vld [vmem:[%s17352_s2 + $0x18] sm:$0xf] }
0x196d   :  { %8172 = vst [vmem:[#allocation4] sm:$0xf] %v12384_v19 }
0x196e PF:  { %v12499_v20 = vld [vmem:[#allocation7 + $0xe0] sm:$0xf]  ;;  %v13571_v58 = vld [vmem:[#allocation7 + $0xec] sm:$0xf0]  ;;  %v13569_v14 = vld [vmem:[#allocation7 + $0xe4] sm:$0xf] }
0x196f   :  { %v12500_v55 = vor.u32 %v13571_v58, %v12499_v20  ;;  %v12501_v24 = vld [vmem:[#allocation7 + $0xf0] sm:$0xf0]  ;;  %v13601_v37 = vld [vmem:[#allocation7 + $0x1e4] sm:$0xf]  ;;  %v12627_v11 = vld [vmem:[#allocation7 + $0x1e0] sm:$0xf] }
0x1970   :  { %v12629_v26 = vld [vmem:[#allocation7 + $0x1f0] sm:$0xf0]  ;;  %v12504_v27 = vor.u32 %v13569_v14, %v12501_v24  ;;  %v13603_v54 = vld [vmem:[#allocation7 + $0x1ec] sm:$0xf0]  ;;  %v12483_v39 = vld [vmem:[#allocation7 + $0xc0] sm:$0xf] }
0x1971   :  { %v12632_v28 = vor.u32 %v13601_v37, %v12629_v26  ;;  %8575 = vmatpush.bf16.msra.mxu0 %v12500_v55  ;;  %v12628_v63 = vor.u32 %v13603_v54, %v12627_v11  ;;  %v13567_v29 = vld [vmem:[#allocation7 + $0xcc] sm:$0xf0]  ;;  %v13565_v30 = vld [vmem:[#allocation7 + $0xc4] sm:$0xf]  ;;  %v12485_v3 = vld [vmem:[#allocation7 + $0xd0] sm:$0xf0] }
0x1972   :  { %8601 = vmatpush.bf16.msra.mxu2 %v12504_v27  ;;  %v12484_v34 = vor.u32 %v13567_v29, %v12483_v39  ;;  %v12488_v16 = vor.u32 %v13565_v30, %v12485_v3  ;;  %v13597_v0 = vld [vmem:[#allocation7 + $0x1c4] sm:$0xf]  ;;  %v12613_v31 = vld [vmem:[#allocation7 + $0x1d0] sm:$0xf0]  ;;  %v12611_v5 = vld [vmem:[#allocation7 + $0x1c0] sm:$0xf] }
0x1973   :  { %8614 = vmatpush.bf16.msra.mxu3 %v12632_v28  ;;  %8588 = vmatpush.bf16.msra.mxu1 %v12628_v63  ;;  %v12616_v36 = vor.u32 %v13597_v0, %v12613_v31  ;;  %v13599_v62 = vld [vmem:[#allocation7 + $0x1cc] sm:$0xf0]  ;;  %v12467_v17 = vld [vmem:[#allocation7 + $0xa0] sm:$0xf]  ;;  %v13561_v38 = vld [vmem:[#allocation7 + $0xa4] sm:$0xf] }
0x1974   :  { %v13563_v10 = vld [vmem:[#allocation7 + $0xac] sm:$0xf0]  ;;  %v12612_v40 = vor.u32 %v13599_v62, %v12611_v5  ;;  %v12469_v42 = vld [vmem:[#allocation7 + $0xb0] sm:$0xf0]  ;;  %v13593_v25 = vld [vmem:[#allocation7 + $0x1a4] sm:$0xf] }
0x1975   :  { %8576 = vmatpush.bf16.msra.mxu0 %v12484_v34  ;;  %v12468_v12 = vor.u32 %v13563_v10, %v12467_v17  ;;  %v12597_v43 = vld [vmem:[#allocation7 + $0x1b0] sm:$0xf0]  ;;  %v12595_v47 = vld [vmem:[#allocation7 + $0x1a0] sm:$0xf]  ;;  %v13595_v1 = vld [vmem:[#allocation7 + $0x1ac] sm:$0xf0]  ;;  %v12472_v60 = vor.u32 %v13561_v38, %v12469_v42 }
0x1976   :  { %8602 = vmatpush.bf16.msra.mxu2 %v12488_v16  ;;  %v12600_v18 = vor.u32 %v13593_v25, %v12597_v43  ;;  %v12451_v44 = vld [vmem:[#allocation7 + $0x80] sm:$0xf]  ;;  %v13559_v7 = vld [vmem:[#allocation7 + $0x8c] sm:$0xf0]  ;;  %v13557_v35 = vld [vmem:[#allocation7 + $0x84] sm:$0xf]  ;;  %v12596_v23 = vor.u32 %v13595_v1, %v12595_v47 }
0x1977   :  { %8615 = vmatpush.bf16.msra.mxu3 %v12616_v36  ;;  %8589 = vmatpush.bf16.msra.mxu1 %v12612_v40  ;;  %v12453_v21 = vld [vmem:[#allocation7 + $0x90] sm:$0xf0]  ;;  %v13589_v48 = vld [vmem:[#allocation7 + $0x184] sm:$0xf]  ;;  %v12579_v41 = vld [vmem:[#allocation7 + $0x180] sm:$0xf]  ;;  %v12452_v13 = vor.u32 %v13559_v7, %v12451_v44 }
0x1978   :  { %v12581_v22 = vld [vmem:[#allocation7 + $0x190] sm:$0xf0]  ;;  %v13591_v9 = vld [vmem:[#allocation7 + $0x18c] sm:$0xf0]  ;;  %v12456_v15 = vor.u32 %v13557_v35, %v12453_v21  ;;  %v12435_v52 = vld [vmem:[#allocation7 + $0x60] sm:$0xf] }
0x1979   :  { %8577 = vmatpush.bf16.msra.mxu0 %v12468_v12  ;;  %v12584_v51 = vor.u32 %v13589_v48, %v12581_v22  ;;  %v13555_v53 = vld [vmem:[#allocation7 + $0x6c] sm:$0xf0]  ;;  %v13553_v33 = vld [vmem:[#allocation7 + $0x64] sm:$0xf]  ;;  %v12580_v45 = vor.u32 %v13591_v9, %v12579_v41  ;;  %v12437_v49 = vld [vmem:[#allocation7 + $0x70] sm:$0xf0] }
0x197a   :  { %8603 = vmatpush.bf16.msra.mxu2 %v12472_v60  ;;  %v13585_v59 = vld [vmem:[#allocation7 + $0x164] sm:$0xf]  ;;  %v12565_v57 = vld [vmem:[#allocation7 + $0x170] sm:$0xf0]  ;;  %v12563_v2 = vld [vmem:[#allocation7 + $0x160] sm:$0xf]  ;;  %v12436_v4 = vor.u32 %v13555_v53, %v12435_v52  ;;  %v12440_v6 = vor.u32 %v13553_v33, %v12437_v49 }
0x197b   :  { %8616 = vmatpush.bf16.msra.mxu3 %v12600_v18  ;;  %8590 = vmatpush.bf16.msra.mxu1 %v12596_v23  ;;  %v13587_v32 = vld [vmem:[#allocation7 + $0x16c] sm:$0xf0]  ;;  %v12568_v8 = vor.u32 %v13585_v59, %v12565_v57  ;;  %v12419_v50 = vld [vmem:[#allocation7 + $0x40] sm:$0xf]  ;;  %v13549_v61 = vld [vmem:[#allocation7 + $0x44] sm:$0xf] }
0x197c   :  { %v13551_v46 = vld [vmem:[#allocation7 + $0x4c] sm:$0xf0]  ;;  %v12564_v56 = vor.u32 %v13587_v32, %v12563_v2  ;;  %v12421_v19 = vld [vmem:[#allocation7 + $0x50] sm:$0xf0]  ;;  %v13581_v20 = vld [vmem:[#allocation7 + $0x144] sm:$0xf] }
0x197d   :  { %8578 = vmatpush.bf16.msra.mxu0 %v12452_v13  ;;  %v12549_v58 = vld [vmem:[#allocation7 + $0x150] sm:$0xf0]  ;;  %v12547_v14 = vld [vmem:[#allocation7 + $0x140] sm:$0xf]  ;;  %v13583_v55 = vld [vmem:[#allocation7 + $0x14c] sm:$0xf0]  ;;  %v12420_v24 = vor.u32 %v13551_v46, %v12419_v50  ;;  %v12424_v37 = vor.u32 %v13549_v61, %v12421_v19 }
0x197e   :  { %8604 = vmatpush.bf16.msra.mxu2 %v12456_v15  ;;  %v12552_v26 = vor.u32 %v13581_v20, %v12549_v58  ;;  %v12403_v27 = vld [vmem:[#allocation7 + $0x20] sm:$0xf]  ;;  %v13547_v28 = vld [vmem:[#allocation7 + $0x2c] sm:$0xf0]  ;;  %v13545_v11 = vld [vmem:[#allocation7 + $0x24] sm:$0xf]  ;;  %v12548_v54 = vor.u32 %v13583_v55, %v12547_v14 }
0x197f   :  { %8617 = vmatpush.bf16.msra.mxu3 %v12584_v51  ;;  %8591 = vmatpush.bf16.msra.mxu1 %v12580_v45  ;;  %v12405_v39 = vld [vmem:[#allocation7 + $0x30] sm:$0xf0]  ;;  %v13577_v63 = vld [vmem:[#allocation7 + $0x124] sm:$0xf]  ;;  %v12531_v30 = vld [vmem:[#allocation7 + $0x120] sm:$0xf]  ;;  %v12404_v34 = vor.u32 %v13547_v28, %v12403_v27 }
0x1980   :  { %v12533_v29 = vld [vmem:[#allocation7 + $0x130] sm:$0xf0]  ;;  %v13579_v3 = vld [vmem:[#allocation7 + $0x12c] sm:$0xf0]  ;;  %v12387_v16 = vld [vmem:[#allocation7] sm:$0xf]  ;;  %v12408_v5 = vor.u32 %v13545_v11, %v12405_v39 }
0x1981   :  { %8579 = vmatpush.bf16.msra.mxu0 %v12436_v4  ;;  %v13543_v0 = vld [vmem:[#allocation7 + $0xc] sm:$0xf0]  ;;  %v13541_v31 = vld [vmem:[#allocation7 + $0x4] sm:$0xf]  ;;  %v12536_v36 = vor.u32 %v13577_v63, %v12533_v29  ;;  %v12389_v62 = vld [vmem:[#allocation7 + $0x10] sm:$0xf0]  ;;  %v12532_v40 = vor.u32 %v13579_v3, %v12531_v30 }
0x1982   :  { %8605 = vmatpush.bf16.msra.mxu2 %v12440_v6  ;;  %v13573_v17 = vld [vmem:[#allocation7 + $0x104] sm:$0xf]  ;;  %v8173_v10 = vld [vmem:[#allocation4] sm:$0xff]  ;;  %v12517_v38 = vld [vmem:[#allocation7 + $0x110] sm:$0xf0]  ;;  %v12388_v1 = vor.u32 %v13543_v0, %v12387_v16  ;;  %v12392_v35 = vor.u32 %v13541_v31, %v12389_v62 }
0x1983   :  { %8618 = vmatpush.bf16.msra.mxu3 %v12568_v8  ;;  %8592 = vmatpush.bf16.msra.mxu1 %v12564_v56  ;;  %v12507_v42 = vld [vmem:[#allocation7 + $0xe8] sm:$0xf]  ;;  %v13572_v25 = vld [vmem:[#allocation7 + $0xf4] sm:$0xf0]  ;;  %v13570_v12 = vld [vmem:[#allocation7 + $0xec] sm:$0xf]  ;;  %v8249_v7 = vunpack.c.l.b16 %v8173_v10  ;;  %v12520_v23 = vor.u32 %v13573_v17, %v12517_v38  ;;  %v8250_v22 = vunpack.c.h.b16 %v8173_v10 }
0x1984   :  { %v12509_v43 = vld [vmem:[#allocation7 + $0xf8] sm:$0xf0]  ;;  %v13602_v47 = vld [vmem:[#allocation7 + $0x1ec] sm:$0xf]  ;;  %v12515_v18 = vld [vmem:[#allocation7 + $0x100] sm:$0xf]  ;;  %v12508_v41 = vor.u32 %v13572_v25, %v12507_v42 }
0x1985   :  { %8580 = vmatpush.bf16.msra.mxu0 %v12420_v24  ;;  %v12637_v60 = vld [vmem:[#allocation7 + $0x1f8] sm:$0xf0]  ;;  %v13575_v44 = vld [vmem:[#allocation7 + $0x10c] sm:$0xf0]  ;;  %v12635_v21 = vld [vmem:[#allocation7 + $0x1e8] sm:$0xf]  ;;  %v12512_v9 = vor.u32 %v13570_v12, %v12509_v43  ;;  %v17285_v45 = vpack.c.b16 %v8249_v7, %v8249_v7  ;;  %v17287_v2 = vpack.c.b16 %v8250_v22, %v8250_v22 }
0x1986   :  { %8606 = vmatpush.bf16.msra.mxu2 %v12424_v37  ;;  %v13604_v48 = vld [vmem:[#allocation7 + $0x1f4] sm:$0xf0]  ;;  %v12491_v13 = vld [vmem:[#allocation7 + $0xc8] sm:$0xf]  ;;  %v12640_v15 = vor.u32 %v13602_v47, %v12637_v60  ;;  %v12516_v51 = vor.u32 %v13575_v44, %v12515_v18  ;;  %v13566_v53 = vld [vmem:[#allocation7 + $0xcc] sm:$0xf] }
0x1987   :  { %8619 = vmatpush.bf16.msra.mxu3 %v12552_v26  ;;  %8593 = vmatpush.bf16.msra.mxu1 %v12548_v54  ;;  %v13568_v52 = vld [vmem:[#allocation7 + $0xd4] sm:$0xf0]  ;;  %v12493_v33 = vld [vmem:[#allocation7 + $0xd8] sm:$0xf0]  ;;  %v12636_v49 = vor.u32 %v13604_v48, %v12635_v21  ;;  %v13598_v59 = vld [vmem:[#allocation7 + $0x1cc] sm:$0xf] }
0x1988   :  { %v12621_v57 = vld [vmem:[#allocation7 + $0x1d8] sm:$0xf0]  ;;  %v12619_v32 = vld [vmem:[#allocation7 + $0x1c8] sm:$0xf]  ;;  %v13600_v4 = vld [vmem:[#allocation7 + $0x1d4] sm:$0xf0]  ;;  %v12492_v6 = vor.u32 %v13568_v52, %v12491_v13  ;;  %v12496_v8 = vor.u32 %v13566_v53, %v12493_v33 }
0x1989   :  { %8581 = vmatpush.bf16.msra.mxu0 %v12404_v34  ;;  %v12475_v50 = vld [vmem:[#allocation7 + $0xa8] sm:$0xf]  ;;  %v12624_v46 = vor.u32 %v13598_v59, %v12621_v57  ;;  %v13564_v61 = vld [vmem:[#allocation7 + $0xb4] sm:$0xf0]  ;;  %v13562_v56 = vld [vmem:[#allocation7 + $0xac] sm:$0xf]  ;;  %v12620_v20 = vor.u32 %v13600_v4, %v12619_v32 }
0x198a   :  { %8607 = vmatpush.bf16.msra.mxu2 %v12408_v5  ;;  %v12477_v19 = vld [vmem:[#allocation7 + $0xb8] sm:$0xf0]  ;;  %v13594_v58 = vld [vmem:[#allocation7 + $0x1ac] sm:$0xf]  ;;  %v12603_v55 = vld [vmem:[#allocation7 + $0x1a8] sm:$0xf]  ;;  %v12476_v37 = vor.u32 %v13564_v61, %v12475_v50 }
0x198b   :  { %8620 = vmatpush.bf16.msra.mxu3 %v12536_v36  ;;  %8594 = vmatpush.bf16.msra.mxu1 %v12532_v40  ;;  %v12605_v14 = vld [vmem:[#allocation7 + $0x1b8] sm:$0xf0]  ;;  %v13596_v24 = vld [vmem:[#allocation7 + $0x1b4] sm:$0xf0]  ;;  %v12480_v26 = vor.u32 %v13562_v56, %v12477_v19  ;;  %v12459_v27 = vld [vmem:[#allocation7 + $0x88] sm:$0xf] }
0x198c   :  { %v12608_v28 = vor.u32 %v13594_v58, %v12605_v14  ;;  %v13560_v11 = vld [vmem:[#allocation7 + $0x94] sm:$0xf0]  ;;  %v13558_v54 = vld [vmem:[#allocation7 + $0x8c] sm:$0xf]  ;;  %v12461_v39 = vld [vmem:[#allocation7 + $0x98] sm:$0xf0]  ;;  %v12604_v63 = vor.u32 %v13596_v24, %v12603_v55 }
0x198d   :  { %8582 = vmatpush.bf16.msra.mxu0 %v12388_v1  ;;  %v13590_v29 = vld [vmem:[#allocation7 + $0x18c] sm:$0xf]  ;;  %v12589_v30 = vld [vmem:[#allocation7 + $0x198] sm:$0xf0]  ;;  %v12587_v3 = vld [vmem:[#allocation7 + $0x188] sm:$0xf]  ;;  %v12460_v16 = vor.u32 %v13560_v11, %v12459_v27  ;;  %v12464_v0 = vor.u32 %v13558_v54, %v12461_v39 }
0x198e   :  { %8608 = vmatpush.bf16.msra.mxu2 %v12392_v35  ;;  %v13592_v34 = vld [vmem:[#allocation7 + $0x194] sm:$0xf0]  ;;  %v12443_v31 = vld [vmem:[#allocation7 + $0x68] sm:$0xf]  ;;  %v12592_v5 = vor.u32 %v13590_v29, %v12589_v30  ;;  %v13554_v62 = vld [vmem:[#allocation7 + $0x6c] sm:$0xf] }
0x198f   :  { %8621 = vmatpush.bf16.msra.mxu3 %v12520_v23  ;;  %8595 = vmatpush.bf16.msra.mxu1 %v12516_v51  ;;  %v13556_v36 = vld [vmem:[#allocation7 + $0x74] sm:$0xf0]  ;;  %v12445_v17 = vld [vmem:[#allocation7 + $0x78] sm:$0xf0]  ;;  %v12588_v10 = vor.u32 %v13592_v34, %v12587_v3  ;;  %v13586_v40 = vld [vmem:[#allocation7 + $0x16c] sm:$0xf] }
0x1990   :  { %8583 = vmatmul.bf16.vlgmr.msra.gmra.mxu0 %v17285_v45  ;;  %v12573_v38 = vld [vmem:[#allocation7 + $0x178] sm:$0xf0]  ;;  %v12571_v42 = vld [vmem:[#allocation7 + $0x168] sm:$0xf]  ;;  %v13588_v25 = vld [vmem:[#allocation7 + $0x174] sm:$0xf0]  ;;  %v12444_v12 = vor.u32 %v13556_v36, %v12443_v31  ;;  %v12448_v43 = vor.u32 %v13554_v62, %v12445_v17 }
0x1991   :  { %8627 = vmatpush.bf16.msrb.mxu0 %v12508_v41  ;;  %8609 = vmatmul.bf16.vlgmr.msra.gmra.mxu2 %v17285_v45  ;;  %v12427_v47 = vld [vmem:[#allocation7 + $0x48] sm:$0xf]  ;;  %v12576_v1 = vor.u32 %v13586_v40, %v12573_v38  ;;  %v13552_v60 = vld [vmem:[#allocation7 + $0x54] sm:$0xf0]  ;;  %v13550_v18 = vld [vmem:[#allocation7 + $0x4c] sm:$0xf]  ;;  %v12572_v7 = vor.u32 %v13588_v25, %v12571_v42 }
0x1992   :  { %8653 = vmatpush.bf16.msrb.mxu2 %v12512_v9  ;;  %8622 = vmatmul.bf16.vlgmr.msra.gmra.mxu3 %v17287_v2  ;;  %v12429_v44 = vld [vmem:[#allocation7 + $0x58] sm:$0xf0]  ;;  %v13582_v35 = vld [vmem:[#allocation7 + $0x14c] sm:$0xf]  ;;  %v12555_v21 = vld [vmem:[#allocation7 + $0x148] sm:$0xf]  ;;  %v12428_v22 = vor.u32 %v13552_v60, %v12427_v47 }
0x1993   :  { %8666 = vmatpush.bf16.msrb.mxu3 %v12640_v15  ;;  %8640 = vmatpush.bf16.msrb.mxu1 %v12636_v49  ;;  %v12557_v23 = vld [vmem:[#allocation7 + $0x158] sm:$0xf0]  ;;  %v13584_v48 = vld [vmem:[#allocation7 + $0x154] sm:$0xf0]  ;;  %v12432_v41 = vor.u32 %v13550_v18, %v12429_v44  ;;  %v12411_v9 = vld [vmem:[#allocation7 + $0x28] sm:$0xf] }
0x1994   :  { %8596 = vmatmul.bf16.vlgmr.msra.gmra.mxu1 %v17287_v2  ;;  %v12560_v13 = vor.u32 %v13582_v35, %v12557_v23  ;;  %v13548_v15 = vld [vmem:[#allocation7 + $0x34] sm:$0xf0]  ;;  %v13546_v51 = vld [vmem:[#allocation7 + $0x2c] sm:$0xf]  ;;  %v12413_v52 = vld [vmem:[#allocation7 + $0x38] sm:$0xf0]  ;;  %v12556_v53 = vor.u32 %v13584_v48, %v12555_v21 }
0x1995   :  { %8628 = vmatpush.bf16.msrb.mxu0 %v12492_v6  ;;  %v13578_v33 = vld [vmem:[#allocation7 + $0x12c] sm:$0xf]  ;;  %v12541_v49 = vld [vmem:[#allocation7 + $0x138] sm:$0xf0]  ;;  %v12539_v59 = vld [vmem:[#allocation7 + $0x128] sm:$0xf]  ;;  %v12412_v32 = vor.u32 %v13548_v15, %v12411_v9  ;;  %v12416_v4 = vor.u32 %v13546_v51, %v12413_v52 }
0x1996   :  { %8654 = vmatpush.bf16.msrb.mxu2 %v12496_v8  ;;  %v13580_v57 = vld [vmem:[#allocation7 + $0x134] sm:$0xf0]  ;;  %v12395_v6 = vld [vmem:[#allocation7 + $0x8] sm:$0xf]  ;;  %v12544_v8 = vor.u32 %v13578_v33, %v12541_v49  ;;  %v12397_v61 = vld [vmem:[#allocation7 + $0x18] sm:$0xf0] }
0x1997   :  { %8667 = vmatpush.bf16.msrb.mxu3 %v12624_v46  ;;  %8641 = vmatpush.bf16.msrb.mxu1 %v12620_v20  ;;  %v13544_v50 = vld [vmem:[#allocation7 + $0x14] sm:$0xf0]  ;;  %v13542_v46 = vld [vmem:[#allocation7 + $0xc] sm:$0xf]  ;;  %v12540_v56 = vor.u32 %v13580_v57, %v12539_v59  ;;  %v12525_v20 = vld [vmem:[#allocation7 + $0x118] sm:$0xf0] }
0x1998   :  { %v13574_v19 = vld [vmem:[#allocation7 + $0x10c] sm:$0xf]  ;;  %v12523_v58 = vld [vmem:[#allocation7 + $0x108] sm:$0xf]  ;;  %v13576_v14 = vld [vmem:[#allocation7 + $0x114] sm:$0xf0]  ;;  %v12396_v55 = vor.u32 %v13544_v50, %v12395_v6  ;;  %v12400_v24 = vor.u32 %v13542_v46, %v12397_v61 }
0x1999   :  { %8629 = vmatpush.bf16.msrb.mxu0 %v12476_v37  ;;  %v12528_v37 = vor.u32 %v13574_v19, %v12525_v20  ;;  %v17300_v27 = vld [vmem:[%s17356_s6] sm:$0xf]  ;;  %v13611_v36 = vld [vmem:[%s17358_s8 + $0x30] sm:$0xff]  ;;  %v13610_v38 = vld [vmem:[%s17358_s8 + $0x28] sm:$0xff] }
0x199a   :  { %8655 = vmatpush.bf16.msrb.mxu2 %v12480_v26  ;;  %v12524_v26 = vor.u32 %v13576_v14, %v12523_v58  ;;  %v8241_v39 = vperm.slane %v17300_v27, 1  ;;  %v8242_v18 = vperm.slane %v17300_v27, 2  ;;  %v13607_v35 = vld [vmem:[%s17358_s8 + $0x10] sm:$0xff]  ;;  %v8243_v59 = vperm.slane %v17300_v27, 3  ;;  %v8679_v14 = vld [vmem:[#allocation3] sm:$0xff] }
0x199b   :  { %8668 = vmatpush.bf16.msrb.mxu3 %v12608_v28  ;;  %8642 = vmatpush.bf16.msrb.mxu1 %v12604_v63  ;;  %v8240_v28 = vperm.slane %v17300_v27, 0 }
0x199d   :  { %8630 = vmatpush.bf16.msrb.mxu0 %v12460_v16 }
0x199e   :  { %8656 = vmatpush.bf16.msrb.mxu2 %v12464_v0 }
0x199f   :  { %8669 = vmatpush.bf16.msrb.mxu3 %v12592_v5  ;;  %8643 = vmatpush.bf16.msrb.mxu1 %v12588_v10 }
0x19a1   :  { %8631 = vmatpush.bf16.msrb.mxu0 %v12444_v12  ;;  %v13609_v12 = vld [vmem:[%s17358_s8 + $0x20] sm:$0xff] }
0x19a2   :  { %8657 = vmatpush.bf16.msrb.mxu2 %v12448_v43 }
0x19a3   :  { %8670 = vmatpush.bf16.msrb.mxu3 %v12576_v1  ;;  %8644 = vmatpush.bf16.msrb.mxu1 %v12572_v7  ;;  %v13608_v1 = vld [vmem:[%s17358_s8 + $0x18] sm:$0xff] }
0x19a5   :  { %8632 = vmatpush.bf16.msrb.mxu0 %v12428_v22 }
0x19a6   :  { %8658 = vmatpush.bf16.msrb.mxu2 %v12432_v41 }
0x19a7   :  { %8671 = vmatpush.bf16.msrb.mxu3 %v12560_v13  ;;  %8645 = vmatpush.bf16.msrb.mxu1 %v12556_v53  ;;  %v13606_v13 = vld [vmem:[%s17358_s8 + $0x8] sm:$0xff] }
0x19a9   :  { %8633 = vmatpush.bf16.msrb.mxu0 %v12412_v32 }
0x19aa   :  { %8659 = vmatpush.bf16.msrb.mxu2 %v12416_v4 }
0x19ab   :  { %8672 = vmatpush.bf16.msrb.mxu3 %v12544_v8  ;;  %8646 = vmatpush.bf16.msrb.mxu1 %v12540_v56  ;;  %v13605_v8 = vld [vmem:[%s17358_s8] sm:$0xff] }
0x19ad   :  { %8634 = vmatpush.bf16.msrb.mxu0 %v12396_v55 }
0x19ae   :  { %8660 = vmatpush.bf16.msrb.mxu2 %v12400_v24 }
0x19af   :  { %8673 = vmatpush.bf16.msrb.mxu3 %v12528_v37  ;;  %8647 = vmatpush.bf16.msrb.mxu1 %v12524_v26 }
0x19b0   :  { %8635 = vmatmul.bf16.vlgmr.msrb.gmra.mxu0 %v17285_v45 }
0x19b1   :  { %8661 = vmatmul.bf16.vlgmr.msrb.gmra.mxu2 %v17285_v45 }
0x19b2   :  { %8674 = vmatmul.bf16.vlgmr.msrb.gmra.mxu3 %v17287_v2  ;;  %8648 = vmatmul.bf16.vlgmr.msrb.gmra.mxu1 %v17287_v2  ;;  %v13612_v2 = vld [vmem:[%s17358_s8 + $0x38] sm:$0xff] }
0x19b3   :  { %8815 = vmatpush.bf16.msra.mxu0 %v13612_v2 }
0x19b7   :  { %8816 = vmatpush.bf16.msra.mxu0 %v13611_v36 }
0x19bb   :  { %8817 = vmatpush.bf16.msra.mxu0 %v13610_v38 }
0x19bf   :  { %8818 = vmatpush.bf16.msra.mxu0 %v13609_v12 }
0x19c3   :  { %8819 = vmatpush.bf16.msra.mxu0 %v13608_v1 }
0x19c7   :  { %8820 = vmatpush.bf16.msra.mxu0 %v13607_v35 }
0x19cb   :  { %8821 = vmatpush.bf16.msra.mxu0 %v13606_v13 }
0x19cf   :  { %8822 = vmatpush.bf16.msra.mxu0 %v13605_v8 }
0x1a0d   :  { %v8584_v11 = vpop.f32.mrf.mxu0 }
0x1a0e   :  { %v8585_v54 = vadd.f32 %v8584_v11, %v8240_v28 }
0x1a11   :  { %v8597_v63 = vpop.f32.mrf.mxu1 }
0x1a12   :  { %v8598_v29 = vadd.f32 %v8597_v63, %v8585_v54 }
0x1a14   :  { %v8610_v30 = vpop.f32.mrf.mxu2  ;;  %v12641_v3 = vmul.f32 -1.442695, %v8598_v29 }
0x1a15   :  { %v8611_v45 = vadd.f32 %v8610_v30, %v8241_v39  ;;  %v8623_v34 = vpop.f32.mrf.mxu3  ;;  %v8586_v0 = vpop.f32.mrf.mxu0 }
0x1a16   :  { %13824 = vpow2.f32 %v12641_v3 }
0x1a17   :  { %v8624_v16 = vadd.f32 %v8623_v34, %v8611_v45 }
0x1a19   :  { %v12642_v31 = vmul.f32 -1.442695, %v8624_v16  ;;  %v8599_v5 = vpop.f32.mrf.mxu1 }
0x1a1b   :  { %13826 = vpow2.f32 %v12642_v31 }
0x1a1c   :  { %v13825_v62 = vpop.eup %13824  ;;  %v8612_v17 = vpop.f32.mrf.mxu2 }
0x1a1d   :  { %v8683_v10 = vadd.f32 1.0, %v13825_v62  ;;  %v8625_v40 = vpop.f32.mrf.mxu3 }
0x1a1f   :  { %13828 = vrcp.f32 %v8683_v10  ;;  %vm8689_vm14 = vweird.f32 %v8683_v10  ;;  %v8693_v48 = vand.u32 2147483647, %v8683_v10  ;;  %v8695_v9 = vand.u32 2147483648, %v8683_v10 }
0x1a21   :  { %v13827_v42 = vpop.eup %13826  ;;  %v8696_v6 = vor.u32 1.1754944e-38, %v8695_v9  ;;  %vm8694_vm4 = vcmp.eq.f32.partialorder %v8693_v48, 8.507059e+37 }
0x1a22   :  { %v8702_v25 = vadd.f32 1.0, %v13827_v42  ;;  %v13823_v42 = vld [vmem:[%s17359_s9] ss:$0 sm:$0xff] }
0x1a24   :  { %13830 = vrcp.f32 %v8702_v25  ;;  %vm8708_vm0 = vweird.f32 %v8702_v25  ;;  %v8714_v22 = vand.u32 2147483648, %v8702_v25  ;;  %v8712_v53 = vand.u32 2147483647, %v8702_v25 }
0x1a25   :  { %v13829_v43 = vpop.eup %13828 }
0x1a26   :  { %v8685_v47 = vmul.f32 %v13829_v43, %v8683_v10  ;;  %vm8690_vm15 = vweird.f32 %v13829_v43  ;;  %v8715_v4 = vor.u32 1.1754944e-38, %v8714_v22  ;;  %vm8713_vm5 = vcmp.eq.f32.partialorder %v8712_v53, 8.507059e+37 }
0x1a27   :  { %vm17327_vm2 = vmor %vm8689_vm14, %vm8690_vm15 }
0x1a28   :  { %v8686_v60 = vsub.f32 1.0, %v8685_v47 }
0x1a2a   :  { %v13831_v44 = vpop.eup %13830  ;;  %v8687_v7 = vmul.f32 %v13829_v43, %v8686_v60 }
0x1a2b   :  { %v8704_v23 = vmul.f32 %v13831_v44, %v8702_v25  ;;  %vm8709_vm1 = vweird.f32 %v13831_v44 }
0x1a2c   :  { %v8688_v52 = vadd.f32 %v13829_v43, %v8687_v7  ;;  %vm17333_vm3 = vmor %vm8708_vm0, %vm8709_vm1 }
0x1a2d   :  { %v8636_v21 = vpop.f32.mrf.mxu0  ;;  %v8705_v15 = vsub.f32 1.0, %v8704_v23 }
0x1a2e   :  { %v8637_v41 = vadd.f32 %v8636_v21, %v8242_v18  ;;  %v8692_v50 = vsel %vm17327_vm2, %v13829_v43, %v8688_v52 }
0x1a2f   :  { %v8649_v51 = vpop.f32.mrf.mxu1  ;;  %v8706_v57 = vmul.f32 %v13831_v44, %v8705_v15  ;;  %v8697_v55 = vsel %vm8694_vm4, %v8696_v6, %v8692_v50 }
0x1a30   :  { %v8650_v33 = vadd.f32 %v8649_v51, %v8637_v41 }
0x1a31   :  { %v8707_v46 = vadd.f32 %v13831_v44, %v8706_v57 }
0x1a32   :  { %13832 = vtanh.f32 %v8650_v33 }
0x1a33   :  { %v8711_v20 = vsel %vm17333_vm3, %v13831_v44, %v8707_v46 }
0x1a34   :  { %v8662_v61 = vpop.f32.mrf.mxu2  ;;  %v8716_v24 = vsel %vm8713_vm5, %v8715_v4, %v8711_v20 }
0x1a35   :  { %v8663_v56 = vadd.f32 %v8662_v61, %v8243_v59  ;;  %v8675_v19 = vpop.f32.mrf.mxu3  ;;  %v8638_v58 = vpop.f32.mrf.mxu0  ;;  %v8738_v11 = vmul.f32 %v8716_v24, %v8679_v14 }
0x1a37   :  { %v8676_v37 = vadd.f32 %v8675_v19, %v8663_v56  ;;  %v8651_v26 = vpop.f32.mrf.mxu1 }
0x1a38   :  { %v13833_v27 = vpop.eup %13832 }
0x1a39   :  { %v12643_v28 = vmul.f32 -1.442695, %v8676_v37  ;;  %v8739_v54 = vmul.f32 %v13833_v27, %v8697_v55 }
0x1a3b   :  { %13834 = vpow2.f32 %v12643_v28  ;;  %v8740_v39 = vadd.f32 %v8739_v54, %v8738_v11 }
0x1a3c   :  { %v8664_v63 = vpop.f32.mrf.mxu2 }
0x1a3d   :  { %v8677_v29 = vpop.f32.mrf.mxu3  ;;  %8744 = vst [vmem:[#allocation3] sm:$0xff] %v8740_v39 }
0x1a41   :  { %v13835_v30 = vpop.eup %13834 }
0x1a42   :  { %v8722_v3 = vadd.f32 1.0, %v13835_v30 }
0x1a44   :  { %13836 = vrcp.f32 %v8722_v3  ;;  %v8734_v16 = vand.u32 2147483648, %v8722_v3  ;;  %v8732_v31 = vand.u32 2147483647, %v8722_v3  ;;  %vm8728_vm7 = vweird.f32 %v8722_v3 }
0x1a45   :  { %13838 = vtanh.f32 %v8740_v39 }
0x1a46   :  { %v8735_v36 = vor.u32 1.1754944e-38, %v8734_v16  ;;  %vm8733_vm9 = vcmp.eq.f32.partialorder %v8732_v31, 8.507059e+37 }
0x1a4a   :  { %v13837_v45 = vpop.eup %13836 }
0x1a4b   :  { %v8724_v34 = vmul.f32 %v13837_v45, %v8722_v3  ;;  %vm8729_vm6 = vweird.f32 %v13837_v45  ;;  %v13839_v17 = vpop.eup %13838 }
0x1a4c   :  { %vm8730_vm8 = vmor %vm8728_vm7, %vm8729_vm6 }
0x1a4d   :  { %v8725_v2 = vsub.f32 1.0, %v8724_v34 }
0x1a4f   :  { %v8726_v0 = vmul.f32 %v13837_v45, %v8725_v2 }
0x1a51   :  { %v8727_v5 = vadd.f32 %v13837_v45, %v8726_v0 }
0x1a53   :  { %v8731_v62 = vsel %vm8730_vm8, %v13837_v45, %v8727_v5 }
0x1a54   :  { %v8736_v10 = vsel %vm8733_vm9, %v8735_v36, %v8731_v62 }
0x1a55   :  { %v8742_v40 = vmul.f32 %v13839_v17, %v8736_v10 }
0x1a57   :  { %v8745_v38 = vpack.c.bf16 %v8742_v40, %v8742_v40 }
0x1a59   :  { %8746 = vst [vmem:[#allocation4 + $0x4] sm:$0xf] %v8745_v38  ;;  %8823 = vmatmul.bf16.vlgmr.msra.gmra.mxu0 %v8745_v38 }
0x1ad6   :  { %v8824_v25 = vpop.f32.mrf.mxu0 }
0x1ad7   :  { %v8825_v12 = vadd.f32 %v13823_v42, %v8824_v25 }
0x1ad9   :  { %12676 = vst [vmem:[%s17360_s10 + $0x30] sm:$0xff] %v8825_v12 }
0x1ade   :  { %v8826_v43 = vpop.f32.mrf.mxu0 }
0x1adf   :  { %8834 = vsyncpa [#allocation8], 1 }

</bundles_post_ra>
